<compile_context>
chip_gen: v5e
topology: v5e:2x2
jax: 0.10.0
libtpu: 0.0.40
codegen_flags: <defaults>
</compile_context>

<pallas_src>
import jax
import jax.numpy as jnp
from jax.experimental import pallas as pl
from jax.experimental.pallas import tpu as pltpu

# ---- problem sizes (small, consistent with the module) ----
B = 2
HS = WS = 8
N = HS * WS                     # 64 spatial tokens per image (perfect square)
BN = B * N                      # 128 tokens total (batch folded)
DIM = 32                        # dim != 768 -> conv MLP branch
NUM_HEADS = 4
HEAD_DIM = DIM // NUM_HEADS
MLP_RATIO = 4.0
HIDDEN = int(DIM * MLP_RATIO)   # 128
LN_EPS = 1e-5
BN_EPS = 1e-5
SCALE = HEAD_DIM ** (-0.5)      # python float (never captured as a jnp constant)


def _erf(x):
    # Abramowitz & Stegun 7.1.26 rational approximation (max abs err ~1.5e-7).
    # Uses only abs/mul/add/div/exp/where -> guaranteed Mosaic lowering.
    p = 0.3275911
    a1, a2, a3, a4, a5 = 0.254829592, -0.284496736, 1.421413741, -1.453152027, 1.061405429
    ax = jnp.abs(x)
    t = 1.0 / (1.0 + p * ax)
    poly = ((((a5 * t + a4) * t + a3) * t + a2) * t + a1) * t
    y = 1.0 - poly * jnp.exp(-(ax * ax))
    return jnp.where(x < 0.0, -y, y)


def _gelu(x):
    # erf-based GELU, matching nn.GELU default (to ~1.5e-7 via the polynomial erf)
    return 0.5 * x * (1.0 + _erf(x * 0.7071067811865476))


def _layernorm(x, g, b):
    mu = jnp.mean(x, axis=-1, keepdims=True)
    var = jnp.mean(jnp.square(x - mu), axis=-1, keepdims=True)
    return (x - mu) * jax.lax.rsqrt(var + LN_EPS) * g + b


# ------------------------------------------------------------------
# Fused kernel: LN1 -> MHSA -> residual -> LN2 -> conv-MLP -> residual
# ------------------------------------------------------------------
def block_kernel(x_ref, wA_ref, wP_ref, vecc_ref, w1_ref, wdw_ref, dwmask_ref,
                 w2_ref, vech_ref, o_ref):
    x = x_ref[...]                                # (BN, DIM)
    vc = vecc_ref[...]                            # (6, DIM) packed small vectors
    g1, b1 = vc[0:1, :], vc[1:2, :]
    g2, b2 = vc[2:3, :], vc[3:4, :]
    bproj, bo = vc[4:5, :], vc[5:6, :]
    vh = vech_ref[...]                            # (2, HIDDEN)
    b1e, bdwe = vh[0:1, :], vh[1:2, :]

    # ---------------- LN1 + multi-head self-attention (dense, per image) ----------------
    xn = _layernorm(x, g1, b1)                    # (BN, DIM)

    per_image = []
    for b in range(B):                            # static loop: 2 images
        xb = xn[b * N:(b + 1) * N, :]             # (N, DIM), 8-sublane-aligned slice
        yb = None
        for h in range(NUM_HEADS):                # static loop: 4 heads
            # scores: xb @ (SCALE * Wq_h Wk_h^T) @ xb^T   (fold done wrapper-side)
            t = jnp.dot(xb, wA_ref[h], preferred_element_type=jnp.float32)          # (N, DIM)
            s = jax.lax.dot_general(t, xb, (((1,), (1,)), ((), ())),
                                    preferred_element_type=jnp.float32)             # (N, N)
            s = s - jnp.max(s, axis=-1, keepdims=True)
            p = jnp.exp(s)
            p = p * pl.reciprocal(jnp.sum(p, axis=-1, keepdims=True), approx=True)
            # value + output-proj folded: p @ (xb @ (Wv_h Wproj_h))
            u = jnp.dot(xb, wP_ref[h], preferred_element_type=jnp.float32)          # (N, DIM)
            c = jnp.dot(p, u, preferred_element_type=jnp.float32)                   # (N, DIM)
            yb = c if yb is None else yb + c
        per_image.append(yb)
    y = jnp.concatenate(per_image, axis=0)        # (BN, DIM)
    x1 = x + y + bproj

    # ---------------- LN2 + conv-MLP (BN folded, eval mode) ----------------
    xn2 = _layernorm(x1, g2, b2)
    hdn = _gelu(jnp.dot(xn2, w1_ref[...], preferred_element_type=jnp.float32) + b1e)  # (BN, HIDDEN)

    # 3x3 depthwise conv (padding=1) on the flattened token axis:
    # spatial shift = sublane rotation (XLU) + precomputed 0/1 boundary-mask column.
    # (valid taps never cross the image boundary, so folding B into the token axis is exact)
    wdw = wdw_ref[...]                            # (9, HIDDEN) per-tap channel weights
    dwm = dwmask_ref[...]                         # (BN, 9)     per-tap token boundary masks
    acc = hdn * wdw[4:5, :]                       # center tap (never masked)
    for ky in range(3):
        for kx in range(3):
            tap = ky * 3 + kx
            d = (ky - 1) * WS + (kx - 1)
            if d == 0:
                continue
            shifted = pltpu.roll(hdn, shift=(-d) % BN, axis=0)   # shifted[i] = hdn[(i+d) mod BN]
            acc = acc + shifted * (dwm[:, tap:tap + 1] * wdw[tap:tap + 1, :])
    h2 = _gelu(acc + bdwe)

    ymlp = jnp.dot(h2, w2_ref[...], preferred_element_type=jnp.float32) + bo          # (BN, DIM)
    o_ref[...] = x1 + ymlp


# ------------------------------------------------------------------
# Wrapper
# ------------------------------------------------------------------
def _fs(shape):
    zeros = (0,) * len(shape)
    return pl.BlockSpec(shape, lambda *_: zeros)


def block_forward(x, kp):
    xf = x.reshape(BN, DIM)
    cost = pl.CostEstimate(flops=9_500_000, transcendentals=66_000, bytes_accessed=110_000)
    out = pl.pallas_call(
        block_kernel,
        out_shape=jax.ShapeDtypeStruct((BN, DIM), jnp.float32),
        grid_spec=pltpu.PrefetchScalarGridSpec(
            num_scalar_prefetch=0,
            grid=(1,),
            in_specs=[
                _fs((BN, DIM)),                  # x (batch folded into rows)
                _fs((NUM_HEADS, DIM, DIM)),      # A_h = SCALE * Wq_h Wk_h^T
                _fs((NUM_HEADS, DIM, DIM)),      # P_h = Wv_h Wproj_h
                _fs((6, DIM)),                   # packed g1,b1,g2,b2,bproj,b2_eff
                _fs((DIM, HIDDEN)),              # fc1 (BN1 folded)
                _fs((9, HIDDEN)),                # depthwise 3x3 weights (BN2 folded)
                _fs((BN, 9)),                    # depthwise boundary masks (0/1)
                _fs((HIDDEN, DIM)),              # fc2 (BN3 folded)
                _fs((2, HIDDEN)),                # packed b1_eff, bdw_eff
            ],
            out_specs=_fs((BN, DIM)),
        ),
        compiler_params=pltpu.CompilerParams(dimension_semantics=("arbitrary",)),
        cost_estimate=cost,
    )(xf, kp["wA"], kp["wP"], kp["vec_c"], kp["w1_eff"], kp["wdw_eff"],
      kp["dw_mask"], kp["w2_eff"], kp["vec_h"])
    return out.reshape(B, N, DIM)


def _dw_boundary_masks():
    """(BN, 9) 0/1 mask: column t is 1 where tap t stays inside the 8x8 image."""
    tok = jnp.arange(BN)
    row = (tok % N) // WS
    col = tok % WS
    cols = []
    for ky in range(3):
        for kx in range(3):
            dy, dx = ky - 1, kx - 1
            valid = ((row + dy >= 0) & (row + dy < HS) &
                     (col + dx >= 0) & (col + dx < WS))
            cols.append(valid.astype(jnp.float32))
    return jnp.stack(cols, axis=1)


def prepare_kernel_params(p):
    """Wrapper-side (one-time) repacking: fold per-head q/k and v/proj weights, pack small vectors."""
    wqkv = p["wqkv"]                                                   # (DIM, 3*DIM), x @ W
    wq = wqkv[:, 0 * DIM:1 * DIM].reshape(DIM, NUM_HEADS, HEAD_DIM).transpose(1, 0, 2)  # (H, DIM, HD)
    wk = wqkv[:, 1 * DIM:2 * DIM].reshape(DIM, NUM_HEADS, HEAD_DIM).transpose(1, 0, 2)
    wv = wqkv[:, 2 * DIM:3 * DIM].reshape(DIM, NUM_HEADS, HEAD_DIM).transpose(1, 0, 2)
    wproj_h = p["wproj"].reshape(NUM_HEADS, HEAD_DIM, DIM)             # (H, HD, DIM)
    wA = (SCALE * jnp.einsum("hik,hjk->hij", wq, wk)).astype(jnp.float32)   # (H, DIM, DIM)
    wP = jnp.einsum("hik,hkj->hij", wv, wproj_h).astype(jnp.float32)        # (H, DIM, DIM)
    vec_c = jnp.concatenate([p["g1"], p["b1"], p["g2"], p["b2"],
                             p["bproj"], p["b2_eff"]], axis=0)         # (6, DIM)
    vec_h = jnp.concatenate([p["b1_eff"], p["bdw_eff"]], axis=0)       # (2, HIDDEN)
    return dict(wA=wA, wP=wP, vec_c=vec_c, vec_h=vec_h,
                w1_eff=p["w1_eff"], wdw_eff=p["wdw_eff"], w2_eff=p["w2_eff"],
                dw_mask=_dw_boundary_masks())


# ------------------------------------------------------------------
# Pure-JAX reference (same semantics) for a sanity check
# ------------------------------------------------------------------
def ref_forward(x, p):
    mu = x.mean(-1, keepdims=True)
    var = ((x - mu) ** 2).mean(-1, keepdims=True)
    xn = (x - mu) / jnp.sqrt(var + LN_EPS) * p["g1"] + p["b1"]
    qkv = xn @ p["wqkv"]
    qkv = qkv.reshape(B, N, 3, NUM_HEADS, HEAD_DIM).transpose(2, 0, 3, 1, 4)
    q, k, v = qkv[0], qkv[1], qkv[2]
    attn = jnp.einsum("bhnd,bhmd->bhnm", q, k) * SCALE
    attn = jax.nn.softmax(attn, axis=-1)
    a = jnp.einsum("bhnm,bhmd->bhnd", attn, v).transpose(0, 2, 1, 3).reshape(B, N, DIM)
    x1 = x + a @ p["wproj"] + p["bproj"]

    mu = x1.mean(-1, keepdims=True)
    var = ((x1 - mu) ** 2).mean(-1, keepdims=True)
    xn = (x1 - mu) / jnp.sqrt(var + LN_EPS) * p["g2"] + p["b2"]
    h = jax.nn.gelu(xn @ p["w1_eff"] + p["b1_eff"], approximate=False)
    hs = h.reshape(B, HS, WS, HIDDEN)
    hp = jnp.pad(hs, ((0, 0), (1, 1), (1, 1), (0, 0)))
    wdw3 = p["wdw_eff"].reshape(3, 3, HIDDEN)
    acc = jnp.zeros_like(hs)
    for ky in range(3):
        for kx in range(3):
            acc = acc + hp[:, ky:ky + HS, kx:kx + WS, :] * wdw3[ky, kx]
    h2 = jax.nn.gelu(acc.reshape(B, N, HIDDEN) + p["bdw_eff"], approximate=False)
    y = h2 @ p["w2_eff"] + p["b2_eff"]
    return x1 + y


# ------------------------------------------------------------------
# Deterministic parameter construction + BN folding (eval mode)
# ------------------------------------------------------------------
def make_params(key):
    ks = jax.random.split(key, 28)
    f32 = jnp.float32

    def nrm(k, shape, s=0.1):
        return (s * jax.random.normal(k, shape)).astype(f32)

    # LayerNorms
    g1 = (1.0 + nrm(ks[0], (1, DIM))).astype(f32)
    b1 = nrm(ks[1], (1, DIM))
    g2 = (1.0 + nrm(ks[2], (1, DIM))).astype(f32)
    b2 = nrm(ks[3], (1, DIM))
    # Attention (qkv_bias=False)
    wqkv = nrm(ks[4], (DIM, 3 * DIM))          # already transposed: x @ W
    wproj = nrm(ks[5], (DIM, DIM))
    bproj = nrm(ks[6], (1, DIM))
    # Conv-MLP raw params
    w1 = nrm(ks[7], (DIM, HIDDEN))             # 1x1 conv fc1
    b1c = nrm(ks[8], (HIDDEN,))
    wdw = nrm(ks[9], (3, 3, HIDDEN), s=0.2)    # depthwise 3x3 (per-channel)
    bdw = nrm(ks[10], (HIDDEN,))
    w2 = nrm(ks[11], (HIDDEN, DIM))            # 1x1 conv fc2
    b2c = nrm(ks[12], (DIM,))

    # BatchNorm (eval mode) params / running stats, folded into convs.
    # TODO(synk): PyTorch defaults to train-mode BN (batch stats); eval-mode running stats are used here.
    def make_bn(kg, kb, km, kv, c):
        gamma = (1.0 + nrm(kg, (c,))).astype(f32)
        beta = nrm(kb, (c,))
        mean = nrm(km, (c,))
        var = jax.random.uniform(kv, (c,), minval=0.5, maxval=1.5).astype(f32)
        s = gamma / jnp.sqrt(var + BN_EPS)
        t = beta - mean * s
        return s, t

    s1, t1 = make_bn(ks[13], ks[14], ks[15], ks[16], HIDDEN)
    s2, t2 = make_bn(ks[17], ks[18], ks[19], ks[20], HIDDEN)
    s3, t3 = make_bn(ks[21], ks[22], ks[23], ks[24], DIM)

    w1_eff = (w1 * s1[None, :]).astype(f32)
    b1_eff = (b1c * s1 + t1).reshape(1, HIDDEN).astype(f32)
    wdw_eff = (wdw * s2[None, None, :]).reshape(9, HIDDEN).astype(f32)
    bdw_eff = (bdw * s2 + t2).reshape(1, HIDDEN).astype(f32)
    w2_eff = (w2 * s3[None, :]).astype(f32)
    b2_eff = (b2c * s3 + t3).reshape(1, DIM).astype(f32)

    return dict(g1=g1, b1=b1, g2=g2, b2=b2, wqkv=wqkv, wproj=wproj, bproj=bproj,
                w1_eff=w1_eff, b1_eff=b1_eff, wdw_eff=wdw_eff, bdw_eff=bdw_eff,
                w2_eff=w2_eff, b2_eff=b2_eff)


if __name__ == "__main__":
    key = jax.random.PRNGKey(0)
    kx, kp = jax.random.split(key)
    x = jax.random.normal(kx, (B, N, DIM), dtype=jnp.float32)
    params = make_params(kp)
    kparams = prepare_kernel_params(params)

    out = jax.block_until_ready(block_forward(x, kparams))
    ref = jax.block_until_ready(ref_forward(x, params))

    assert out.shape == (B, N, DIM)
    max_err = float(jnp.max(jnp.abs(out - ref)))
    assert jnp.allclose(out, ref, atol=1e-2, rtol=1e-2), max_err

    print("KERNEL_OK")
</pallas_src>

<mosaic_0001>
module attributes {stable_mosaic.version = 11 : i64} {
  func.func @block_kernel(%arg0: i32, %arg1: memref<128x32xf32, #tpu.memory_space<vmem>>, %arg2: memref<4x32x32xf32, #tpu.memory_space<vmem>>, %arg3: memref<4x32x32xf32, #tpu.memory_space<vmem>>, %arg4: memref<6x32xf32, #tpu.memory_space<vmem>>, %arg5: memref<32x128xf32, #tpu.memory_space<vmem>>, %arg6: memref<9x128xf32, #tpu.memory_space<vmem>>, %arg7: memref<128x9xf32, #tpu.memory_space<vmem>>, %arg8: memref<128x32xf32, #tpu.memory_space<vmem>>, %arg9: memref<2x128xf32, #tpu.memory_space<vmem>>, %arg10: memref<128x32xf32, #tpu.memory_space<vmem>>) attributes {dimension_semantics = [#tpu.dimension_semantics<arbitrary>], iteration_bounds = array<i64: 1>, scalar_prefetch = 0 : i64, scratch_operands = 0 : i64, tpu.core_type = #tpu.core_type<tc>, window_params = [{pipeline_mode = #tpu.pipeline_mode<synchronous>, transform_indices = @transform_0, window_bounds = array<i64: 128, 32>}, {pipeline_mode = #tpu.pipeline_mode<synchronous>, transform_indices = @transform_1, window_bounds = array<i64: 4, 32, 32>}, {pipeline_mode = #tpu.pipeline_mode<synchronous>, transform_indices = @transform_2, window_bounds = array<i64: 4, 32, 32>}, {pipeline_mode = #tpu.pipeline_mode<synchronous>, transform_indices = @transform_3, window_bounds = array<i64: 6, 32>}, {pipeline_mode = #tpu.pipeline_mode<synchronous>, transform_indices = @transform_4, window_bounds = array<i64: 32, 128>}, {pipeline_mode = #tpu.pipeline_mode<synchronous>, transform_indices = @transform_5, window_bounds = array<i64: 9, 128>}, {pipeline_mode = #tpu.pipeline_mode<synchronous>, transform_indices = @transform_6, window_bounds = array<i64: 128, 9>}, {pipeline_mode = #tpu.pipeline_mode<synchronous>, transform_indices = @transform_7, window_bounds = array<i64: 128, 32>}, {pipeline_mode = #tpu.pipeline_mode<synchronous>, transform_indices = @transform_8, window_bounds = array<i64: 2, 128>}, {pipeline_mode = #tpu.pipeline_mode<synchronous>, transform_indices = @transform_9, window_bounds = array<i64: 128, 32>}]} {
    %c0 = arith.constant 0 : index
    %c0_0 = arith.constant 0 : index
    %0 = vector.load %arg1[%c0, %c0_0] : memref<128x32xf32, #tpu.memory_space<vmem>>, vector<128x32xf32>
    %c0_1 = arith.constant 0 : index
    %c0_2 = arith.constant 0 : index
    %1 = vector.load %arg4[%c0_1, %c0_2] : memref<6x32xf32, #tpu.memory_space<vmem>>, vector<6x32xf32>
    %2 = vector.extract_strided_slice %1 {offsets = [0, 0], sizes = [1, 32], strides = [1, 1]} : vector<6x32xf32> to vector<1x32xf32>
    %3 = vector.extract_strided_slice %1 {offsets = [1, 0], sizes = [1, 32], strides = [1, 1]} : vector<6x32xf32> to vector<1x32xf32>
    %4 = vector.extract_strided_slice %1 {offsets = [2, 0], sizes = [1, 32], strides = [1, 1]} : vector<6x32xf32> to vector<1x32xf32>
    %5 = vector.extract_strided_slice %1 {offsets = [3, 0], sizes = [1, 32], strides = [1, 1]} : vector<6x32xf32> to vector<1x32xf32>
    %6 = vector.extract_strided_slice %1 {offsets = [4, 0], sizes = [1, 32], strides = [1, 1]} : vector<6x32xf32> to vector<1x32xf32>
    %7 = vector.extract_strided_slice %1 {offsets = [5, 0], sizes = [1, 32], strides = [1, 1]} : vector<6x32xf32> to vector<1x32xf32>
    %c0_3 = arith.constant 0 : index
    %c0_4 = arith.constant 0 : index
    %8 = vector.load %arg9[%c0_3, %c0_4] : memref<2x128xf32, #tpu.memory_space<vmem>>, vector<2x128xf32>
    %9 = vector.extract_strided_slice %8 {offsets = [0, 0], sizes = [1, 128], strides = [1, 1]} : vector<2x128xf32> to vector<1x128xf32>
    %10 = vector.extract_strided_slice %8 {offsets = [1, 0], sizes = [1, 128], strides = [1, 1]} : vector<2x128xf32> to vector<1x128xf32>
    %cst = arith.constant dense<0.000000e+00> : vector<128xf32>
    %11 = vector.multi_reduction <add>, %0, %cst [1] : vector<128x32xf32> to vector<128xf32>
    %12 = vector.shape_cast %11 : vector<128xf32> to vector<128x1xf32>
    %cst_5 = arith.constant 3.200000e+01 : f32
    %13 = vector.broadcast %cst_5 : f32 to vector<128x1xf32>
    %14 = arith.divf %12, %13 : vector<128x1xf32>
    %15 = vector.broadcast %14 : vector<128x1xf32> to vector<128x32xf32>
    %16 = arith.subf %0, %15 : vector<128x32xf32>
    %17 = arith.mulf %16, %16 : vector<128x32xf32>
    %cst_6 = arith.constant dense<0.000000e+00> : vector<128xf32>
    %18 = vector.multi_reduction <add>, %17, %cst_6 [1] : vector<128x32xf32> to vector<128xf32>
    %19 = vector.shape_cast %18 : vector<128xf32> to vector<128x1xf32>
    %cst_7 = arith.constant 3.200000e+01 : f32
    %20 = vector.broadcast %cst_7 : f32 to vector<128x1xf32>
    %21 = arith.divf %19, %20 : vector<128x1xf32>
    %22 = vector.broadcast %14 : vector<128x1xf32> to vector<128x32xf32>
    %23 = arith.subf %0, %22 : vector<128x32xf32>
    %cst_8 = arith.constant 9.99999974E-6 : f32
    %24 = vector.broadcast %cst_8 : f32 to vector<128x1xf32>
    %25 = arith.addf %21, %24 : vector<128x1xf32>
    %26 = math.rsqrt %25 : vector<128x1xf32>
    %27 = vector.broadcast %26 : vector<128x1xf32> to vector<128x32xf32>
    %28 = arith.mulf %23, %27 : vector<128x32xf32>
    %29 = vector.broadcast %2 : vector<1x32xf32> to vector<128x32xf32>
    %30 = arith.mulf %28, %29 : vector<128x32xf32>
    %31 = vector.broadcast %3 : vector<1x32xf32> to vector<128x32xf32>
    %32 = arith.addf %30, %31 : vector<128x32xf32>
    %33 = vector.extract_strided_slice %32 {offsets = [0, 0], sizes = [64, 32], strides = [1, 1]} : vector<128x32xf32> to vector<64x32xf32>
    %c0_9 = arith.constant 0 : index
    %c0_10 = arith.constant 0 : index
    %c0_11 = arith.constant 0 : index
    %34 = vector.load %arg2[%c0_9, %c0_10, %c0_11] : memref<4x32x32xf32, #tpu.memory_space<vmem>>, vector<1x32x32xf32>
    %35 = vector.shape_cast %34 : vector<1x32x32xf32> to vector<32x32xf32>
    %cst_12 = arith.constant dense<0.000000e+00> : vector<64x32xf32>
    %36 = tpu.matmul %33, %35, %cst_12 {dimension_numbers = #tpu.dot_dimension_numbers<[1], [0], [0], [1], [0, 0, 1, 1], [], []>} : vector<64x32xf32>, vector<32x32xf32>, vector<64x32xf32> -> vector<64x32xf32>
    %cst_13 = arith.constant dense<0.000000e+00> : vector<64x64xf32>
    %37 = tpu.matmul %36, %33, %cst_13 {dimension_numbers = #tpu.dot_dimension_numbers<[1], [1], [0], [0], [0, 0, 1, 0], [], []>} : vector<64x32xf32>, vector<64x32xf32>, vector<64x64xf32> -> vector<64x64xf32>
    %cst_14 = arith.constant dense<0xFF800000> : vector<64xf32>
    %38 = vector.multi_reduction <maximumf>, %37, %cst_14 [1] : vector<64x64xf32> to vector<64xf32>
    %39 = vector.shape_cast %38 : vector<64xf32> to vector<64x1xf32>
    %40 = vector.broadcast %39 : vector<64x1xf32> to vector<64x64xf32>
    %41 = arith.subf %37, %40 : vector<64x64xf32>
    %42 = math.exp %41 : vector<64x64xf32>
    %cst_15 = arith.constant dense<0.000000e+00> : vector<64xf32>
    %43 = vector.multi_reduction <add>, %42, %cst_15 [1] : vector<64x64xf32> to vector<64xf32>
    %44 = vector.shape_cast %43 : vector<64xf32> to vector<64x1xf32>
    %45 = tpu.reciprocal %44 {approx = true} : vector<64x1xf32> -> vector<64x1xf32>
    %46 = vector.broadcast %45 : vector<64x1xf32> to vector<64x64xf32>
    %47 = arith.mulf %42, %46 : vector<64x64xf32>
    %c0_16 = arith.constant 0 : index
    %c0_17 = arith.constant 0 : index
    %c0_18 = arith.constant 0 : index
    %48 = vector.load %arg3[%c0_16, %c0_17, %c0_18] : memref<4x32x32xf32, #tpu.memory_space<vmem>>, vector<1x32x32xf32>
    %49 = vector.shape_cast %48 : vector<1x32x32xf32> to vector<32x32xf32>
    %cst_19 = arith.constant dense<0.000000e+00> : vector<64x32xf32>
    %50 = tpu.matmul %33, %49, %cst_19 {dimension_numbers = #tpu.dot_dimension_numbers<[1], [0], [0], [1], [0, 0, 1, 1], [], []>} : vector<64x32xf32>, vector<32x32xf32>, vector<64x32xf32> -> vector<64x32xf32>
    %cst_20 = arith.constant dense<0.000000e+00> : vector<64x32xf32>
    %51 = tpu.matmul %47, %50, %cst_20 {dimension_numbers = #tpu.dot_dimension_numbers<[1], [0], [0], [1], [0, 0, 1, 1], [], []>} : vector<64x64xf32>, vector<64x32xf32>, vector<64x32xf32> -> vector<64x32xf32>
    %c1 = arith.constant 1 : index
    %c0_21 = arith.constant 0 : index
    %c0_22 = arith.constant 0 : index
    %52 = vector.load %arg2[%c1, %c0_21, %c0_22] : memref<4x32x32xf32, #tpu.memory_space<vmem>>, vector<1x32x32xf32>
    %53 = vector.shape_cast %52 : vector<1x32x32xf32> to vector<32x32xf32>
    %cst_23 = arith.constant dense<0.000000e+00> : vector<64x32xf32>
    %54 = tpu.matmul %33, %53, %cst_23 {dimension_numbers = #tpu.dot_dimension_numbers<[1], [0], [0], [1], [0, 0, 1, 1], [], []>} : vector<64x32xf32>, vector<32x32xf32>, vector<64x32xf32> -> vector<64x32xf32>
    %cst_24 = arith.constant dense<0.000000e+00> : vector<64x64xf32>
    %55 = tpu.matmul %54, %33, %cst_24 {dimension_numbers = #tpu.dot_dimension_numbers<[1], [1], [0], [0], [0, 0, 1, 0], [], []>} : vector<64x32xf32>, vector<64x32xf32>, vector<64x64xf32> -> vector<64x64xf32>
    %cst_25 = arith.constant dense<0xFF800000> : vector<64xf32>
    %56 = vector.multi_reduction <maximumf>, %55, %cst_25 [1] : vector<64x64xf32> to vector<64xf32>
    %57 = vector.shape_cast %56 : vector<64xf32> to vector<64x1xf32>
    %58 = vector.broadcast %57 : vector<64x1xf32> to vector<64x64xf32>
    %59 = arith.subf %55, %58 : vector<64x64xf32>
    %60 = math.exp %59 : vector<64x64xf32>
    %cst_26 = arith.constant dense<0.000000e+00> : vector<64xf32>
    %61 = vector.multi_reduction <add>, %60, %cst_26 [1] : vector<64x64xf32> to vector<64xf32>
    %62 = vector.shape_cast %61 : vector<64xf32> to vector<64x1xf32>
    %63 = tpu.reciprocal %62 {approx = true} : vector<64x1xf32> -> vector<64x1xf32>
    %64 = vector.broadcast %63 : vector<64x1xf32> to vector<64x64xf32>
    %65 = arith.mulf %60, %64 : vector<64x64xf32>
    %c1_27 = arith.constant 1 : index
    %c0_28 = arith.constant 0 : index
    %c0_29 = arith.constant 0 : index
    %66 = vector.load %arg3[%c1_27, %c0_28, %c0_29] : memref<4x32x32xf32, #tpu.memory_space<vmem>>, vector<1x32x32xf32>
    %67 = vector.shape_cast %66 : vector<1x32x32xf32> to vector<32x32xf32>
    %cst_30 = arith.constant dense<0.000000e+00> : vector<64x32xf32>
    %68 = tpu.matmul %33, %67, %cst_30 {dimension_numbers = #tpu.dot_dimension_numbers<[1], [0], [0], [1], [0, 0, 1, 1], [], []>} : vector<64x32xf32>, vector<32x32xf32>, vector<64x32xf32> -> vector<64x32xf32>
    %cst_31 = arith.constant dense<0.000000e+00> : vector<64x32xf32>
    %69 = tpu.matmul %65, %68, %cst_31 {dimension_numbers = #tpu.dot_dimension_numbers<[1], [0], [0], [1], [0, 0, 1, 1], [], []>} : vector<64x64xf32>, vector<64x32xf32>, vector<64x32xf32> -> vector<64x32xf32>
    %70 = arith.addf %51, %69 : vector<64x32xf32>
    %c2 = arith.constant 2 : index
    %c0_32 = arith.constant 0 : index
    %c0_33 = arith.constant 0 : index
    %71 = vector.load %arg2[%c2, %c0_32, %c0_33] : memref<4x32x32xf32, #tpu.memory_space<vmem>>, vector<1x32x32xf32>
    %72 = vector.shape_cast %71 : vector<1x32x32xf32> to vector<32x32xf32>
    %cst_34 = arith.constant dense<0.000000e+00> : vector<64x32xf32>
    %73 = tpu.matmul %33, %72, %cst_34 {dimension_numbers = #tpu.dot_dimension_numbers<[1], [0], [0], [1], [0, 0, 1, 1], [], []>} : vector<64x32xf32>, vector<32x32xf32>, vector<64x32xf32> -> vector<64x32xf32>
    %cst_35 = arith.constant dense<0.000000e+00> : vector<64x64xf32>
    %74 = tpu.matmul %73, %33, %cst_35 {dimension_numbers = #tpu.dot_dimension_numbers<[1], [1], [0], [0], [0, 0, 1, 0], [], []>} : vector<64x32xf32>, vector<64x32xf32>, vector<64x64xf32> -> vector<64x64xf32>
    %cst_36 = arith.constant dense<0xFF800000> : vector<64xf32>
    %75 = vector.multi_reduction <maximumf>, %74, %cst_36 [1] : vector<64x64xf32> to vector<64xf32>
    %76 = vector.shape_cast %75 : vector<64xf32> to vector<64x1xf32>
    %77 = vector.broadcast %76 : vector<64x1xf32> to vector<64x64xf32>
    %78 = arith.subf %74, %77 : vector<64x64xf32>
    %79 = math.exp %78 : vector<64x64xf32>
    %cst_37 = arith.constant dense<0.000000e+00> : vector<64xf32>
    %80 = vector.multi_reduction <add>, %79, %cst_37 [1] : vector<64x64xf32> to vector<64xf32>
    %81 = vector.shape_cast %80 : vector<64xf32> to vector<64x1xf32>
    %82 = tpu.reciprocal %81 {approx = true} : vector<64x1xf32> -> vector<64x1xf32>
    %83 = vector.broadcast %82 : vector<64x1xf32> to vector<64x64xf32>
    %84 = arith.mulf %79, %83 : vector<64x64xf32>
    %c2_38 = arith.constant 2 : index
    %c0_39 = arith.constant 0 : index
    %c0_40 = arith.constant 0 : index
    %85 = vector.load %arg3[%c2_38, %c0_39, %c0_40] : memref<4x32x32xf32, #tpu.memory_space<vmem>>, vector<1x32x32xf32>
    %86 = vector.shape_cast %85 : vector<1x32x32xf32> to vector<32x32xf32>
    %cst_41 = arith.constant dense<0.000000e+00> : vector<64x32xf32>
    %87 = tpu.matmul %33, %86, %cst_41 {dimension_numbers = #tpu.dot_dimension_numbers<[1], [0], [0], [1], [0, 0, 1, 1], [], []>} : vector<64x32xf32>, vector<32x32xf32>, vector<64x32xf32> -> vector<64x32xf32>
    %cst_42 = arith.constant dense<0.000000e+00> : vector<64x32xf32>
    %88 = tpu.matmul %84, %87, %cst_42 {dimension_numbers = #tpu.dot_dimension_numbers<[1], [0], [0], [1], [0, 0, 1, 1], [], []>} : vector<64x64xf32>, vector<64x32xf32>, vector<64x32xf32> -> vector<64x32xf32>
    %89 = arith.addf %70, %88 : vector<64x32xf32>
    %c3 = arith.constant 3 : index
    %c0_43 = arith.constant 0 : index
    %c0_44 = arith.constant 0 : index
    %90 = vector.load %arg2[%c3, %c0_43, %c0_44] : memref<4x32x32xf32, #tpu.memory_space<vmem>>, vector<1x32x32xf32>
    %91 = vector.shape_cast %90 : vector<1x32x32xf32> to vector<32x32xf32>
    %cst_45 = arith.constant dense<0.000000e+00> : vector<64x32xf32>
    %92 = tpu.matmul %33, %91, %cst_45 {dimension_numbers = #tpu.dot_dimension_numbers<[1], [0], [0], [1], [0, 0, 1, 1], [], []>} : vector<64x32xf32>, vector<32x32xf32>, vector<64x32xf32> -> vector<64x32xf32>
    %cst_46 = arith.constant dense<0.000000e+00> : vector<64x64xf32>
    %93 = tpu.matmul %92, %33, %cst_46 {dimension_numbers = #tpu.dot_dimension_numbers<[1], [1], [0], [0], [0, 0, 1, 0], [], []>} : vector<64x32xf32>, vector<64x32xf32>, vector<64x64xf32> -> vector<64x64xf32>
    %cst_47 = arith.constant dense<0xFF800000> : vector<64xf32>
    %94 = vector.multi_reduction <maximumf>, %93, %cst_47 [1] : vector<64x64xf32> to vector<64xf32>
    %95 = vector.shape_cast %94 : vector<64xf32> to vector<64x1xf32>
    %96 = vector.broadcast %95 : vector<64x1xf32> to vector<64x64xf32>
    %97 = arith.subf %93, %96 : vector<64x64xf32>
    %98 = math.exp %97 : vector<64x64xf32>
    %cst_48 = arith.constant dense<0.000000e+00> : vector<64xf32>
    %99 = vector.multi_reduction <add>, %98, %cst_48 [1] : vector<64x64xf32> to vector<64xf32>
    %100 = vector.shape_cast %99 : vector<64xf32> to vector<64x1xf32>
    %101 = tpu.reciprocal %100 {approx = true} : vector<64x1xf32> -> vector<64x1xf32>
    %102 = vector.broadcast %101 : vector<64x1xf32> to vector<64x64xf32>
    %103 = arith.mulf %98, %102 : vector<64x64xf32>
    %c3_49 = arith.constant 3 : index
    %c0_50 = arith.constant 0 : index
    %c0_51 = arith.constant 0 : index
    %104 = vector.load %arg3[%c3_49, %c0_50, %c0_51] : memref<4x32x32xf32, #tpu.memory_space<vmem>>, vector<1x32x32xf32>
    %105 = vector.shape_cast %104 : vector<1x32x32xf32> to vector<32x32xf32>
    %cst_52 = arith.constant dense<0.000000e+00> : vector<64x32xf32>
    %106 = tpu.matmul %33, %105, %cst_52 {dimension_numbers = #tpu.dot_dimension_numbers<[1], [0], [0], [1], [0, 0, 1, 1], [], []>} : vector<64x32xf32>, vector<32x32xf32>, vector<64x32xf32> -> vector<64x32xf32>
    %cst_53 = arith.constant dense<0.000000e+00> : vector<64x32xf32>
    %107 = tpu.matmul %103, %106, %cst_53 {dimension_numbers = #tpu.dot_dimension_numbers<[1], [0], [0], [1], [0, 0, 1, 1], [], []>} : vector<64x64xf32>, vector<64x32xf32>, vector<64x32xf32> -> vector<64x32xf32>
    %108 = arith.addf %89, %107 : vector<64x32xf32>
    %109 = vector.extract_strided_slice %32 {offsets = [64, 0], sizes = [64, 32], strides = [1, 1]} : vector<128x32xf32> to vector<64x32xf32>
    %c0_54 = arith.constant 0 : index
    %c0_55 = arith.constant 0 : index
    %c0_56 = arith.constant 0 : index
    %110 = vector.load %arg2[%c0_54, %c0_55, %c0_56] : memref<4x32x32xf32, #tpu.memory_space<vmem>>, vector<1x32x32xf32>
    %111 = vector.shape_cast %110 : vector<1x32x32xf32> to vector<32x32xf32>
    %cst_57 = arith.constant dense<0.000000e+00> : vector<64x32xf32>
    %112 = tpu.matmul %109, %111, %cst_57 {dimension_numbers = #tpu.dot_dimension_numbers<[1], [0], [0], [1], [0, 0, 1, 1], [], []>} : vector<64x32xf32>, vector<32x32xf32>, vector<64x32xf32> -> vector<64x32xf32>
    %cst_58 = arith.constant dense<0.000000e+00> : vector<64x64xf32>
    %113 = tpu.matmul %112, %109, %cst_58 {dimension_numbers = #tpu.dot_dimension_numbers<[1], [1], [0], [0], [0, 0, 1, 0], [], []>} : vector<64x32xf32>, vector<64x32xf32>, vector<64x64xf32> -> vector<64x64xf32>
    %cst_59 = arith.constant dense<0xFF800000> : vector<64xf32>
    %114 = vector.multi_reduction <maximumf>, %113, %cst_59 [1] : vector<64x64xf32> to vector<64xf32>
    %115 = vector.shape_cast %114 : vector<64xf32> to vector<64x1xf32>
    %116 = vector.broadcast %115 : vector<64x1xf32> to vector<64x64xf32>
    %117 = arith.subf %113, %116 : vector<64x64xf32>
    %118 = math.exp %117 : vector<64x64xf32>
    %cst_60 = arith.constant dense<0.000000e+00> : vector<64xf32>
    %119 = vector.multi_reduction <add>, %118, %cst_60 [1] : vector<64x64xf32> to vector<64xf32>
    %120 = vector.shape_cast %119 : vector<64xf32> to vector<64x1xf32>
    %121 = tpu.reciprocal %120 {approx = true} : vector<64x1xf32> -> vector<64x1xf32>
    %122 = vector.broadcast %121 : vector<64x1xf32> to vector<64x64xf32>
    %123 = arith.mulf %118, %122 : vector<64x64xf32>
    %c0_61 = arith.constant 0 : index
    %c0_62 = arith.constant 0 : index
    %c0_63 = arith.constant 0 : index
    %124 = vector.load %arg3[%c0_61, %c0_62, %c0_63] : memref<4x32x32xf32, #tpu.memory_space<vmem>>, vector<1x32x32xf32>
    %125 = vector.shape_cast %124 : vector<1x32x32xf32> to vector<32x32xf32>
    %cst_64 = arith.constant dense<0.000000e+00> : vector<64x32xf32>
    %126 = tpu.matmul %109, %125, %cst_64 {dimension_numbers = #tpu.dot_dimension_numbers<[1], [0], [0], [1], [0, 0, 1, 1], [], []>} : vector<64x32xf32>, vector<32x32xf32>, vector<64x32xf32> -> vector<64x32xf32>
    %cst_65 = arith.constant dense<0.000000e+00> : vector<64x32xf32>
    %127 = tpu.matmul %123, %126, %cst_65 {dimension_numbers = #tpu.dot_dimension_numbers<[1], [0], [0], [1], [0, 0, 1, 1], [], []>} : vector<64x64xf32>, vector<64x32xf32>, vector<64x32xf32> -> vector<64x32xf32>
    %c1_66 = arith.constant 1 : index
    %c0_67 = arith.constant 0 : index
    %c0_68 = arith.constant 0 : index
    %128 = vector.load %arg2[%c1_66, %c0_67, %c0_68] : memref<4x32x32xf32, #tpu.memory_space<vmem>>, vector<1x32x32xf32>
    %129 = vector.shape_cast %128 : vector<1x32x32xf32> to vector<32x32xf32>
    %cst_69 = arith.constant dense<0.000000e+00> : vector<64x32xf32>
    %130 = tpu.matmul %109, %129, %cst_69 {dimension_numbers = #tpu.dot_dimension_numbers<[1], [0], [0], [1], [0, 0, 1, 1], [], []>} : vector<64x32xf32>, vector<32x32xf32>, vector<64x32xf32> -> vector<64x32xf32>
    %cst_70 = arith.constant dense<0.000000e+00> : vector<64x64xf32>
    %131 = tpu.matmul %130, %109, %cst_70 {dimension_numbers = #tpu.dot_dimension_numbers<[1], [1], [0], [0], [0, 0, 1, 0], [], []>} : vector<64x32xf32>, vector<64x32xf32>, vector<64x64xf32> -> vector<64x64xf32>
    %cst_71 = arith.constant dense<0xFF800000> : vector<64xf32>
    %132 = vector.multi_reduction <maximumf>, %131, %cst_71 [1] : vector<64x64xf32> to vector<64xf32>
    %133 = vector.shape_cast %132 : vector<64xf32> to vector<64x1xf32>
    %134 = vector.broadcast %133 : vector<64x1xf32> to vector<64x64xf32>
    %135 = arith.subf %131, %134 : vector<64x64xf32>
    %136 = math.exp %135 : vector<64x64xf32>
    %cst_72 = arith.constant dense<0.000000e+00> : vector<64xf32>
    %137 = vector.multi_reduction <add>, %136, %cst_72 [1] : vector<64x64xf32> to vector<64xf32>
    %138 = vector.shape_cast %137 : vector<64xf32> to vector<64x1xf32>
    %139 = tpu.reciprocal %138 {approx = true} : vector<64x1xf32> -> vector<64x1xf32>
    %140 = vector.broadcast %139 : vector<64x1xf32> to vector<64x64xf32>
    %141 = arith.mulf %136, %140 : vector<64x64xf32>
    %c1_73 = arith.constant 1 : index
    %c0_74 = arith.constant 0 : index
    %c0_75 = arith.constant 0 : index
    %142 = vector.load %arg3[%c1_73, %c0_74, %c0_75] : memref<4x32x32xf32, #tpu.memory_space<vmem>>, vector<1x32x32xf32>
    %143 = vector.shape_cast %142 : vector<1x32x32xf32> to vector<32x32xf32>
    %cst_76 = arith.constant dense<0.000000e+00> : vector<64x32xf32>
    %144 = tpu.matmul %109, %143, %cst_76 {dimension_numbers = #tpu.dot_dimension_numbers<[1], [0], [0], [1], [0, 0, 1, 1], [], []>} : vector<64x32xf32>, vector<32x32xf32>, vector<64x32xf32> -> vector<64x32xf32>
    %cst_77 = arith.constant dense<0.000000e+00> : vector<64x32xf32>
    %145 = tpu.matmul %141, %144, %cst_77 {dimension_numbers = #tpu.dot_dimension_numbers<[1], [0], [0], [1], [0, 0, 1, 1], [], []>} : vector<64x64xf32>, vector<64x32xf32>, vector<64x32xf32> -> vector<64x32xf32>
    %146 = arith.addf %127, %145 : vector<64x32xf32>
    %c2_78 = arith.constant 2 : index
    %c0_79 = arith.constant 0 : index
    %c0_80 = arith.constant 0 : index
    %147 = vector.load %arg2[%c2_78, %c0_79, %c0_80] : memref<4x32x32xf32, #tpu.memory_space<vmem>>, vector<1x32x32xf32>
    %148 = vector.shape_cast %147 : vector<1x32x32xf32> to vector<32x32xf32>
    %cst_81 = arith.constant dense<0.000000e+00> : vector<64x32xf32>
    %149 = tpu.matmul %109, %148, %cst_81 {dimension_numbers = #tpu.dot_dimension_numbers<[1], [0], [0], [1], [0, 0, 1, 1], [], []>} : vector<64x32xf32>, vector<32x32xf32>, vector<64x32xf32> -> vector<64x32xf32>
    %cst_82 = arith.constant dense<0.000000e+00> : vector<64x64xf32>
    %150 = tpu.matmul %149, %109, %cst_82 {dimension_numbers = #tpu.dot_dimension_numbers<[1], [1], [0], [0], [0, 0, 1, 0], [], []>} : vector<64x32xf32>, vector<64x32xf32>, vector<64x64xf32> -> vector<64x64xf32>
    %cst_83 = arith.constant dense<0xFF800000> : vector<64xf32>
    %151 = vector.multi_reduction <maximumf>, %150, %cst_83 [1] : vector<64x64xf32> to vector<64xf32>
    %152 = vector.shape_cast %151 : vector<64xf32> to vector<64x1xf32>
    %153 = vector.broadcast %152 : vector<64x1xf32> to vector<64x64xf32>
    %154 = arith.subf %150, %153 : vector<64x64xf32>
    %155 = math.exp %154 : vector<64x64xf32>
    %cst_84 = arith.constant dense<0.000000e+00> : vector<64xf32>
    %156 = vector.multi_reduction <add>, %155, %cst_84 [1] : vector<64x64xf32> to vector<64xf32>
    %157 = vector.shape_cast %156 : vector<64xf32> to vector<64x1xf32>
    %158 = tpu.reciprocal %157 {approx = true} : vector<64x1xf32> -> vector<64x1xf32>
    %159 = vector.broadcast %158 : vector<64x1xf32> to vector<64x64xf32>
    %160 = arith.mulf %155, %159 : vector<64x64xf32>
    %c2_85 = arith.constant 2 : index
    %c0_86 = arith.constant 0 : index
    %c0_87 = arith.constant 0 : index
    %161 = vector.load %arg3[%c2_85, %c0_86, %c0_87] : memref<4x32x32xf32, #tpu.memory_space<vmem>>, vector<1x32x32xf32>
    %162 = vector.shape_cast %161 : vector<1x32x32xf32> to vector<32x32xf32>
    %cst_88 = arith.constant dense<0.000000e+00> : vector<64x32xf32>
    %163 = tpu.matmul %109, %162, %cst_88 {dimension_numbers = #tpu.dot_dimension_numbers<[1], [0], [0], [1], [0, 0, 1, 1], [], []>} : vector<64x32xf32>, vector<32x32xf32>, vector<64x32xf32> -> vector<64x32xf32>
    %cst_89 = arith.constant dense<0.000000e+00> : vector<64x32xf32>
    %164 = tpu.matmul %160, %163, %cst_89 {dimension_numbers = #tpu.dot_dimension_numbers<[1], [0], [0], [1], [0, 0, 1, 1], [], []>} : vector<64x64xf32>, vector<64x32xf32>, vector<64x32xf32> -> vector<64x32xf32>
    %165 = arith.addf %146, %164 : vector<64x32xf32>
    %c3_90 = arith.constant 3 : index
    %c0_91 = arith.constant 0 : index
    %c0_92 = arith.constant 0 : index
    %166 = vector.load %arg2[%c3_90, %c0_91, %c0_92] : memref<4x32x32xf32, #tpu.memory_space<vmem>>, vector<1x32x32xf32>
    %167 = vector.shape_cast %166 : vector<1x32x32xf32> to vector<32x32xf32>
    %cst_93 = arith.constant dense<0.000000e+00> : vector<64x32xf32>
    %168 = tpu.matmul %109, %167, %cst_93 {dimension_numbers = #tpu.dot_dimension_numbers<[1], [0], [0], [1], [0, 0, 1, 1], [], []>} : vector<64x32xf32>, vector<32x32xf32>, vector<64x32xf32> -> vector<64x32xf32>
    %cst_94 = arith.constant dense<0.000000e+00> : vector<64x64xf32>
    %169 = tpu.matmul %168, %109, %cst_94 {dimension_numbers = #tpu.dot_dimension_numbers<[1], [1], [0], [0], [0, 0, 1, 0], [], []>} : vector<64x32xf32>, vector<64x32xf32>, vector<64x64xf32> -> vector<64x64xf32>
    %cst_95 = arith.constant dense<0xFF800000> : vector<64xf32>
    %170 = vector.multi_reduction <maximumf>, %169, %cst_95 [1] : vector<64x64xf32> to vector<64xf32>
    %171 = vector.shape_cast %170 : vector<64xf32> to vector<64x1xf32>
    %172 = vector.broadcast %171 : vector<64x1xf32> to vector<64x64xf32>
    %173 = arith.subf %169, %172 : vector<64x64xf32>
    %174 = math.exp %173 : vector<64x64xf32>
    %cst_96 = arith.constant dense<0.000000e+00> : vector<64xf32>
    %175 = vector.multi_reduction <add>, %174, %cst_96 [1] : vector<64x64xf32> to vector<64xf32>
    %176 = vector.shape_cast %175 : vector<64xf32> to vector<64x1xf32>
    %177 = tpu.reciprocal %176 {approx = true} : vector<64x1xf32> -> vector<64x1xf32>
    %178 = vector.broadcast %177 : vector<64x1xf32> to vector<64x64xf32>
    %179 = arith.mulf %174, %178 : vector<64x64xf32>
    %c3_97 = arith.constant 3 : index
    %c0_98 = arith.constant 0 : index
    %c0_99 = arith.constant 0 : index
    %180 = vector.load %arg3[%c3_97, %c0_98, %c0_99] : memref<4x32x32xf32, #tpu.memory_space<vmem>>, vector<1x32x32xf32>
    %181 = vector.shape_cast %180 : vector<1x32x32xf32> to vector<32x32xf32>
    %cst_100 = arith.constant dense<0.000000e+00> : vector<64x32xf32>
    %182 = tpu.matmul %109, %181, %cst_100 {dimension_numbers = #tpu.dot_dimension_numbers<[1], [0], [0], [1], [0, 0, 1, 1], [], []>} : vector<64x32xf32>, vector<32x32xf32>, vector<64x32xf32> -> vector<64x32xf32>
    %cst_101 = arith.constant dense<0.000000e+00> : vector<64x32xf32>
    %183 = tpu.matmul %179, %182, %cst_101 {dimension_numbers = #tpu.dot_dimension_numbers<[1], [0], [0], [1], [0, 0, 1, 1], [], []>} : vector<64x64xf32>, vector<64x32xf32>, vector<64x32xf32> -> vector<64x32xf32>
    %184 = arith.addf %165, %183 : vector<64x32xf32>
    %185 = tpu.concatenate %108, %184 in 0 : vector<64x32xf32>, vector<64x32xf32> -> vector<128x32xf32>
    %186 = arith.addf %0, %185 : vector<128x32xf32>
    %187 = vector.broadcast %6 : vector<1x32xf32> to vector<128x32xf32>
    %188 = arith.addf %186, %187 : vector<128x32xf32>
    %cst_102 = arith.constant dense<0.000000e+00> : vector<128xf32>
    %189 = vector.multi_reduction <add>, %188, %cst_102 [1] : vector<128x32xf32> to vector<128xf32>
    %190 = vector.shape_cast %189 : vector<128xf32> to vector<128x1xf32>
    %cst_103 = arith.constant 3.200000e+01 : f32
    %191 = vector.broadcast %cst_103 : f32 to vector<128x1xf32>
    %192 = arith.divf %190, %191 : vector<128x1xf32>
    %193 = vector.broadcast %192 : vector<128x1xf32> to vector<128x32xf32>
    %194 = arith.subf %188, %193 : vector<128x32xf32>
    %195 = arith.mulf %194, %194 : vector<128x32xf32>
    %cst_104 = arith.constant dense<0.000000e+00> : vector<128xf32>
    %196 = vector.multi_reduction <add>, %195, %cst_104 [1] : vector<128x32xf32> to vector<128xf32>
    %197 = vector.shape_cast %196 : vector<128xf32> to vector<128x1xf32>
    %cst_105 = arith.constant 3.200000e+01 : f32
    %198 = vector.broadcast %cst_105 : f32 to vector<128x1xf32>
    %199 = arith.divf %197, %198 : vector<128x1xf32>
    %200 = vector.broadcast %192 : vector<128x1xf32> to vector<128x32xf32>
    %201 = arith.subf %188, %200 : vector<128x32xf32>
    %cst_106 = arith.constant 9.99999974E-6 : f32
    %202 = vector.broadcast %cst_106 : f32 to vector<128x1xf32>
    %203 = arith.addf %199, %202 : vector<128x1xf32>
    %204 = math.rsqrt %203 : vector<128x1xf32>
    %205 = vector.broadcast %204 : vector<128x1xf32> to vector<128x32xf32>
    %206 = arith.mulf %201, %205 : vector<128x32xf32>
    %207 = vector.broadcast %4 : vector<1x32xf32> to vector<128x32xf32>
    %208 = arith.mulf %206, %207 : vector<128x32xf32>
    %209 = vector.broadcast %5 : vector<1x32xf32> to vector<128x32xf32>
    %210 = arith.addf %208, %209 : vector<128x32xf32>
    %c0_107 = arith.constant 0 : index
    %c0_108 = arith.constant 0 : index
    %211 = vector.load %arg5[%c0_107, %c0_108] : memref<32x128xf32, #tpu.memory_space<vmem>>, vector<32x128xf32>
    %cst_109 = arith.constant dense<0.000000e+00> : vector<128x128xf32>
    %212 = tpu.matmul %210, %211, %cst_109 {dimension_numbers = #tpu.dot_dimension_numbers<[1], [0], [0], [1], [0, 0, 1, 1], [], []>} : vector<128x32xf32>, vector<32x128xf32>, vector<128x128xf32> -> vector<128x128xf32>
    %213 = vector.broadcast %9 : vector<1x128xf32> to vector<128x128xf32>
    %214 = arith.addf %212, %213 : vector<128x128xf32>
    %cst_110 = arith.constant 5.000000e-01 : f32
    %215 = vector.broadcast %cst_110 : f32 to vector<128x128xf32>
    %216 = arith.mulf %215, %214 : vector<128x128xf32>
    %cst_111 = arith.constant 0.707106769 : f32
    %217 = vector.broadcast %cst_111 : f32 to vector<128x128xf32>
    %218 = arith.mulf %214, %217 : vector<128x128xf32>
    %219 = math.absf %218 : vector<128x128xf32>
    %cst_112 = arith.constant 0.327591091 : f32
    %220 = vector.broadcast %cst_112 : f32 to vector<128x128xf32>
    %221 = arith.mulf %220, %219 : vector<128x128xf32>
    %cst_113 = arith.constant 1.000000e+00 : f32
    %222 = vector.broadcast %cst_113 : f32 to vector<128x128xf32>
    %223 = arith.addf %222, %221 : vector<128x128xf32>
    %cst_114 = arith.constant 1.000000e+00 : f32
    %224 = vector.broadcast %cst_114 : f32 to vector<128x128xf32>
    %225 = arith.divf %224, %223 : vector<128x128xf32>
    %cst_115 = arith.constant 1.06140542 : f32
    %226 = vector.broadcast %cst_115 : f32 to vector<128x128xf32>
    %227 = arith.mulf %226, %225 : vector<128x128xf32>
    %cst_116 = arith.constant -1.45315206 : f32
    %228 = vector.broadcast %cst_116 : f32 to vector<128x128xf32>
    %229 = arith.addf %227, %228 : vector<128x128xf32>
    %230 = arith.mulf %229, %225 : vector<128x128xf32>
    %cst_117 = arith.constant 1.42141378 : f32
    %231 = vector.broadcast %cst_117 : f32 to vector<128x128xf32>
    %232 = arith.addf %230, %231 : vector<128x128xf32>
    %233 = arith.mulf %232, %225 : vector<128x128xf32>
    %cst_118 = arith.constant -0.284496725 : f32
    %234 = vector.broadcast %cst_118 : f32 to vector<128x128xf32>
    %235 = arith.addf %233, %234 : vector<128x128xf32>
    %236 = arith.mulf %235, %225 : vector<128x128xf32>
    %cst_119 = arith.constant 0.254829586 : f32
    %237 = vector.broadcast %cst_119 : f32 to vector<128x128xf32>
    %238 = arith.addf %236, %237 : vector<128x128xf32>
    %239 = arith.mulf %238, %225 : vector<128x128xf32>
    %240 = arith.mulf %219, %219 : vector<128x128xf32>
    %cst_120 = arith.constant 0.000000e+00 : f32
    %241 = vector.broadcast %cst_120 : f32 to vector<128x128xf32>
    %242 = arith.subf %241, %240 : vector<128x128xf32>
    %243 = math.exp %242 : vector<128x128xf32>
    %244 = arith.mulf %239, %243 : vector<128x128xf32>
    %cst_121 = arith.constant 1.000000e+00 : f32
    %245 = vector.broadcast %cst_121 : f32 to vector<128x128xf32>
    %246 = arith.subf %245, %244 : vector<128x128xf32>
    %cst_122 = arith.constant 0.000000e+00 : f32
    %247 = vector.broadcast %cst_122 : f32 to vector<128x128xf32>
    %248 = arith.cmpf olt, %218, %247 : vector<128x128xf32>
    %cst_123 = arith.constant 0.000000e+00 : f32
    %249 = vector.broadcast %cst_123 : f32 to vector<128x128xf32>
    %250 = arith.subf %249, %246 : vector<128x128xf32>
    %251 = arith.select %248, %250, %246 : vector<128x128xi1>, vector<128x128xf32>
    %cst_124 = arith.constant 1.000000e+00 : f32
    %252 = vector.broadcast %cst_124 : f32 to vector<128x128xf32>
    %253 = arith.addf %252, %251 : vector<128x128xf32>
    %254 = arith.mulf %216, %253 : vector<128x128xf32>
    %c0_125 = arith.constant 0 : index
    %c0_126 = arith.constant 0 : index
    %255 = vector.load %arg6[%c0_125, %c0_126] : memref<9x128xf32, #tpu.memory_space<vmem>>, vector<9x128xf32>
    %c0_127 = arith.constant 0 : index
    %c0_128 = arith.constant 0 : index
    %256 = vector.load %arg7[%c0_127, %c0_128] : memref<128x9xf32, #tpu.memory_space<vmem>>, vector<128x9xf32>
    %257 = vector.extract_strided_slice %255 {offsets = [4, 0], sizes = [1, 128], strides = [1, 1]} : vector<9x128xf32> to vector<1x128xf32>
    %258 = vector.broadcast %257 : vector<1x128xf32> to vector<128x128xf32>
    %259 = arith.mulf %254, %258 : vector<128x128xf32>
    %c9_i32 = arith.constant 9 : i32
    %260 = tpu.dynamic_rotate %254 by %c9_i32 dim 0 : vector<128x128xf32>, i32 -> vector<128x128xf32>
    %261 = vector.extract_strided_slice %256 {offsets = [0, 0], sizes = [128, 1], strides = [1, 1]} : vector<128x9xf32> to vector<128x1xf32>
    %262 = vector.extract_strided_slice %255 {offsets = [0, 0], sizes = [1, 128], strides = [1, 1]} : vector<9x128xf32> to vector<1x128xf32>
    %263 = vector.broadcast %261 : vector<128x1xf32> to vector<128x128xf32>
    %264 = vector.broadcast %262 : vector<1x128xf32> to vector<128x128xf32>
    %265 = arith.mulf %263, %264 : vector<128x128xf32>
    %266 = arith.mulf %260, %265 : vector<128x128xf32>
    %267 = arith.addf %259, %266 : vector<128x128xf32>
    %c8_i32 = arith.constant 8 : i32
    %268 = tpu.dynamic_rotate %254 by %c8_i32 dim 0 : vector<128x128xf32>, i32 -> vector<128x128xf32>
    %269 = vector.extract_strided_slice %256 {offsets = [0, 1], sizes = [128, 1], strides = [1, 1]} : vector<128x9xf32> to vector<128x1xf32>
    %270 = vector.extract_strided_slice %255 {offsets = [1, 0], sizes = [1, 128], strides = [1, 1]} : vector<9x128xf32> to vector<1x128xf32>
    %271 = vector.broadcast %269 : vector<128x1xf32> to vector<128x128xf32>
    %272 = vector.broadcast %270 : vector<1x128xf32> to vector<128x128xf32>
    %273 = arith.mulf %271, %272 : vector<128x128xf32>
    %274 = arith.mulf %268, %273 : vector<128x128xf32>
    %275 = arith.addf %267, %274 : vector<128x128xf32>
    %c7_i32 = arith.constant 7 : i32
    %276 = tpu.dynamic_rotate %254 by %c7_i32 dim 0 : vector<128x128xf32>, i32 -> vector<128x128xf32>
    %277 = vector.extract_strided_slice %256 {offsets = [0, 2], sizes = [128, 1], strides = [1, 1]} : vector<128x9xf32> to vector<128x1xf32>
    %278 = vector.extract_strided_slice %255 {offsets = [2, 0], sizes = [1, 128], strides = [1, 1]} : vector<9x128xf32> to vector<1x128xf32>
    %279 = vector.broadcast %277 : vector<128x1xf32> to vector<128x128xf32>
    %280 = vector.broadcast %278 : vector<1x128xf32> to vector<128x128xf32>
    %281 = arith.mulf %279, %280 : vector<128x128xf32>
    %282 = arith.mulf %276, %281 : vector<128x128xf32>
    %283 = arith.addf %275, %282 : vector<128x128xf32>
    %c1_i32 = arith.constant 1 : i32
    %284 = tpu.dynamic_rotate %254 by %c1_i32 dim 0 : vector<128x128xf32>, i32 -> vector<128x128xf32>
    %285 = vector.extract_strided_slice %256 {offsets = [0, 3], sizes = [128, 1], strides = [1, 1]} : vector<128x9xf32> to vector<128x1xf32>
    %286 = vector.extract_strided_slice %255 {offsets = [3, 0], sizes = [1, 128], strides = [1, 1]} : vector<9x128xf32> to vector<1x128xf32>
    %287 = vector.broadcast %285 : vector<128x1xf32> to vector<128x128xf32>
    %288 = vector.broadcast %286 : vector<1x128xf32> to vector<128x128xf32>
    %289 = arith.mulf %287, %288 : vector<128x128xf32>
    %290 = arith.mulf %284, %289 : vector<128x128xf32>
    %291 = arith.addf %283, %290 : vector<128x128xf32>
    %c127_i32 = arith.constant 127 : i32
    %292 = tpu.dynamic_rotate %254 by %c127_i32 dim 0 : vector<128x128xf32>, i32 -> vector<128x128xf32>
    %293 = vector.extract_strided_slice %256 {offsets = [0, 5], sizes = [128, 1], strides = [1, 1]} : vector<128x9xf32> to vector<128x1xf32>
    %294 = vector.extract_strided_slice %255 {offsets = [5, 0], sizes = [1, 128], strides = [1, 1]} : vector<9x128xf32> to vector<1x128xf32>
    %295 = vector.broadcast %293 : vector<128x1xf32> to vector<128x128xf32>
    %296 = vector.broadcast %294 : vector<1x128xf32> to vector<128x128xf32>
    %297 = arith.mulf %295, %296 : vector<128x128xf32>
    %298 = arith.mulf %292, %297 : vector<128x128xf32>
    %299 = arith.addf %291, %298 : vector<128x128xf32>
    %c121_i32 = arith.constant 121 : i32
    %300 = tpu.dynamic_rotate %254 by %c121_i32 dim 0 : vector<128x128xf32>, i32 -> vector<128x128xf32>
    %301 = vector.extract_strided_slice %256 {offsets = [0, 6], sizes = [128, 1], strides = [1, 1]} : vector<128x9xf32> to vector<128x1xf32>
    %302 = vector.extract_strided_slice %255 {offsets = [6, 0], sizes = [1, 128], strides = [1, 1]} : vector<9x128xf32> to vector<1x128xf32>
    %303 = vector.broadcast %301 : vector<128x1xf32> to vector<128x128xf32>
    %304 = vector.broadcast %302 : vector<1x128xf32> to vector<128x128xf32>
    %305 = arith.mulf %303, %304 : vector<128x128xf32>
    %306 = arith.mulf %300, %305 : vector<128x128xf32>
    %307 = arith.addf %299, %306 : vector<128x128xf32>
    %c120_i32 = arith.constant 120 : i32
    %308 = tpu.dynamic_rotate %254 by %c120_i32 dim 0 : vector<128x128xf32>, i32 -> vector<128x128xf32>
    %309 = vector.extract_strided_slice %256 {offsets = [0, 7], sizes = [128, 1], strides = [1, 1]} : vector<128x9xf32> to vector<128x1xf32>
    %310 = vector.extract_strided_slice %255 {offsets = [7, 0], sizes = [1, 128], strides = [1, 1]} : vector<9x128xf32> to vector<1x128xf32>
    %311 = vector.broadcast %309 : vector<128x1xf32> to vector<128x128xf32>
    %312 = vector.broadcast %310 : vector<1x128xf32> to vector<128x128xf32>
    %313 = arith.mulf %311, %312 : vector<128x128xf32>
    %314 = arith.mulf %308, %313 : vector<128x128xf32>
    %315 = arith.addf %307, %314 : vector<128x128xf32>
    %c119_i32 = arith.constant 119 : i32
    %316 = tpu.dynamic_rotate %254 by %c119_i32 dim 0 : vector<128x128xf32>, i32 -> vector<128x128xf32>
    %317 = vector.extract_strided_slice %256 {offsets = [0, 8], sizes = [128, 1], strides = [1, 1]} : vector<128x9xf32> to vector<128x1xf32>
    %318 = vector.extract_strided_slice %255 {offsets = [8, 0], sizes = [1, 128], strides = [1, 1]} : vector<9x128xf32> to vector<1x128xf32>
    %319 = vector.broadcast %317 : vector<128x1xf32> to vector<128x128xf32>
    %320 = vector.broadcast %318 : vector<1x128xf32> to vector<128x128xf32>
    %321 = arith.mulf %319, %320 : vector<128x128xf32>
    %322 = arith.mulf %316, %321 : vector<128x128xf32>
    %323 = arith.addf %315, %322 : vector<128x128xf32>
    %324 = vector.broadcast %10 : vector<1x128xf32> to vector<128x128xf32>
    %325 = arith.addf %323, %324 : vector<128x128xf32>
    %cst_129 = arith.constant 5.000000e-01 : f32
    %326 = vector.broadcast %cst_129 : f32 to vector<128x128xf32>
    %327 = arith.mulf %326, %325 : vector<128x128xf32>
    %cst_130 = arith.constant 0.707106769 : f32
    %328 = vector.broadcast %cst_130 : f32 to vector<128x128xf32>
    %329 = arith.mulf %325, %328 : vector<128x128xf32>
    %330 = math.absf %329 : vector<128x128xf32>
    %cst_131 = arith.constant 0.327591091 : f32
    %331 = vector.broadcast %cst_131 : f32 to vector<128x128xf32>
    %332 = arith.mulf %331, %330 : vector<128x128xf32>
    %cst_132 = arith.constant 1.000000e+00 : f32
    %333 = vector.broadcast %cst_132 : f32 to vector<128x128xf32>
    %334 = arith.addf %333, %332 : vector<128x128xf32>
    %cst_133 = arith.constant 1.000000e+00 : f32
    %335 = vector.broadcast %cst_133 : f32 to vector<128x128xf32>
    %336 = arith.divf %335, %334 : vector<128x128xf32>
    %cst_134 = arith.constant 1.06140542 : f32
    %337 = vector.broadcast %cst_134 : f32 to vector<128x128xf32>
    %338 = arith.mulf %337, %336 : vector<128x128xf32>
    %cst_135 = arith.constant -1.45315206 : f32
    %339 = vector.broadcast %cst_135 : f32 to vector<128x128xf32>
    %340 = arith.addf %338, %339 : vector<128x128xf32>
    %341 = arith.mulf %340, %336 : vector<128x128xf32>
    %cst_136 = arith.constant 1.42141378 : f32
    %342 = vector.broadcast %cst_136 : f32 to vector<128x128xf32>
    %343 = arith.addf %341, %342 : vector<128x128xf32>
    %344 = arith.mulf %343, %336 : vector<128x128xf32>
    %cst_137 = arith.constant -0.284496725 : f32
    %345 = vector.broadcast %cst_137 : f32 to vector<128x128xf32>
    %346 = arith.addf %344, %345 : vector<128x128xf32>
    %347 = arith.mulf %346, %336 : vector<128x128xf32>
    %cst_138 = arith.constant 0.254829586 : f32
    %348 = vector.broadcast %cst_138 : f32 to vector<128x128xf32>
    %349 = arith.addf %347, %348 : vector<128x128xf32>
    %350 = arith.mulf %349, %336 : vector<128x128xf32>
    %351 = arith.mulf %330, %330 : vector<128x128xf32>
    %cst_139 = arith.constant 0.000000e+00 : f32
    %352 = vector.broadcast %cst_139 : f32 to vector<128x128xf32>
    %353 = arith.subf %352, %351 : vector<128x128xf32>
    %354 = math.exp %353 : vector<128x128xf32>
    %355 = arith.mulf %350, %354 : vector<128x128xf32>
    %cst_140 = arith.constant 1.000000e+00 : f32
    %356 = vector.broadcast %cst_140 : f32 to vector<128x128xf32>
    %357 = arith.subf %356, %355 : vector<128x128xf32>
    %cst_141 = arith.constant 0.000000e+00 : f32
    %358 = vector.broadcast %cst_141 : f32 to vector<128x128xf32>
    %359 = arith.cmpf olt, %329, %358 : vector<128x128xf32>
    %cst_142 = arith.constant 0.000000e+00 : f32
    %360 = vector.broadcast %cst_142 : f32 to vector<128x128xf32>
    %361 = arith.subf %360, %357 : vector<128x128xf32>
    %362 = arith.select %359, %361, %357 : vector<128x128xi1>, vector<128x128xf32>
    %cst_143 = arith.constant 1.000000e+00 : f32
    %363 = vector.broadcast %cst_143 : f32 to vector<128x128xf32>
    %364 = arith.addf %363, %362 : vector<128x128xf32>
    %365 = arith.mulf %327, %364 : vector<128x128xf32>
    %c0_144 = arith.constant 0 : index
    %c0_145 = arith.constant 0 : index
    %366 = vector.load %arg8[%c0_144, %c0_145] : memref<128x32xf32, #tpu.memory_space<vmem>>, vector<128x32xf32>
    %cst_146 = arith.constant dense<0.000000e+00> : vector<128x32xf32>
    %367 = tpu.matmul %365, %366, %cst_146 {dimension_numbers = #tpu.dot_dimension_numbers<[1], [0], [0], [1], [0, 0, 1, 1], [], []>} : vector<128x128xf32>, vector<128x32xf32>, vector<128x32xf32> -> vector<128x32xf32>
    %368 = vector.broadcast %7 : vector<1x32xf32> to vector<128x32xf32>
    %369 = arith.addf %367, %368 : vector<128x32xf32>
    %370 = arith.addf %188, %369 : vector<128x32xf32>
    %c0_147 = arith.constant 0 : index
    %c0_148 = arith.constant 0 : index
    %371 = vector.load %arg10[%c0_147, %c0_148] : memref<128x32xf32, #tpu.memory_space<vmem>>, vector<128x32xf32>
    tpu.vector_store %arg10[%c0_147, %c0_148], %370 {strides = array<i32>} : memref<128x32xf32, #tpu.memory_space<vmem>>, vector<128x32xf32>,
    return
  }
  func.func @transform_0(%arg0: i32) -> (i32, i32) {
    %c0_i32 = arith.constant 0 : i32
    %c0_i32_0 = arith.constant 0 : i32
    %c0_i32_1 = arith.constant 0 : i32
    return %c0_i32, %c0_i32_0 : i32, i32
  }
  func.func @transform_1(%arg0: i32) -> (i32, i32, i32) {
    %c0_i32 = arith.constant 0 : i32
    %c0_i32_0 = arith.constant 0 : i32
    %c0_i32_1 = arith.constant 0 : i32
    %c0_i32_2 = arith.constant 0 : i32
    return %c0_i32, %c0_i32_0, %c0_i32_1 : i32, i32, i32
  }
  func.func @transform_2(%arg0: i32) -> (i32, i32, i32) {
    %c0_i32 = arith.constant 0 : i32
    %c0_i32_0 = arith.constant 0 : i32
    %c0_i32_1 = arith.constant 0 : i32
    %c0_i32_2 = arith.constant 0 : i32
    return %c0_i32, %c0_i32_0, %c0_i32_1 : i32, i32, i32
  }
  func.func @transform_3(%arg0: i32) -> (i32, i32) {
    %c0_i32 = arith.constant 0 : i32
    %c0_i32_0 = arith.constant 0 : i32
    %c0_i32_1 = arith.constant 0 : i32
    return %c0_i32, %c0_i32_0 : i32, i32
  }
  func.func @transform_4(%arg0: i32) -> (i32, i32) {
    %c0_i32 = arith.constant 0 : i32
    %c0_i32_0 = arith.constant 0 : i32
    %c0_i32_1 = arith.constant 0 : i32
    return %c0_i32, %c0_i32_0 : i32, i32
  }
  func.func @transform_5(%arg0: i32) -> (i32, i32) {
    %c0_i32 = arith.constant 0 : i32
    %c0_i32_0 = arith.constant 0 : i32
    %c0_i32_1 = arith.constant 0 : i32
    return %c0_i32, %c0_i32_0 : i32, i32
  }
  func.func @transform_6(%arg0: i32) -> (i32, i32) {
    %c0_i32 = arith.constant 0 : i32
    %c0_i32_0 = arith.constant 0 : i32
    %c0_i32_1 = arith.constant 0 : i32
    return %c0_i32, %c0_i32_0 : i32, i32
  }
  func.func @transform_7(%arg0: i32) -> (i32, i32) {
    %c0_i32 = arith.constant 0 : i32
    %c0_i32_0 = arith.constant 0 : i32
    %c0_i32_1 = arith.constant 0 : i32
    return %c0_i32, %c0_i32_0 : i32, i32
  }
  func.func @transform_8(%arg0: i32) -> (i32, i32) {
    %c0_i32 = arith.constant 0 : i32
    %c0_i32_0 = arith.constant 0 : i32
    %c0_i32_1 = arith.constant 0 : i32
    return %c0_i32, %c0_i32_0 : i32, i32
  }
  func.func @transform_9(%arg0: i32) -> (i32, i32) {
    %c0_i32 = arith.constant 0 : i32
    %c0_i32_0 = arith.constant 0 : i32
    %c0_i32_1 = arith.constant 0 : i32
    return %c0_i32, %c0_i32_0 : i32, i32
  }
}

</mosaic_0001>

<bundles_post_ra>
// kernel: tpu_custom_call.1
= control target key start
LH: loop header
LB: loop body
LE: loop exit
PB: predicated region body
PF: predicated region fallthrough
CT: control target
= control target key end

     0   :  { %vm50_vm0 = vcmask 261120   ;;  %v6919_v14 = vmov 32.0   ;;  %s11796_s0 = inlined_call_operand.vmem [shape: f32[128,32], index: 0, kind: input, shape index: {}]   ;;  %s11797_s1 = inlined_call_operand.vmem [shape: f32[4,32,32], index: 1, kind: input, shape index: {}]   ;;  %s11798_s3 = inlined_call_operand.vmem [shape: f32[6,32], index: 3, kind: input, shape index: {}]   ;;  %s11799_s2 = inlined_call_operand.vmem [shape: f32[4,32,32], index: 2, kind: input, shape index: {}]   ;;  %s11800_s6 = inlined_call_operand.vmem [shape: f32[128,9], index: 6, kind: input, shape index: {}]   ;;  %s11801_s4 = inlined_call_operand.vmem [shape: f32[32,128], index: 4, kind: input, shape index: {}]   ;;  %s11802_s5 = inlined_call_operand.vmem [shape: f32[9,128], index: 5, kind: input, shape index: {}]   ;;  %s11803_s8 = inlined_call_operand.vmem [shape: f32[2,128], index: 8, kind: input, shape index: {}]   ;;  %s11804_s7 = inlined_call_operand.vmem [shape: f32[128,32], index: 7, kind: input, shape index: {}]   ;;  %s11805_s9 = inlined_call_operand.vmem [shape: f32[128,32], index: 9, kind: output, shape index: {}]  }
   0x1   :  { %v36_v0 = vld [vmem:[%s11796_s0 + $0x20] sm:$0xff]  ;;  %v34_v1 = vld [vmem:[%s11796_s0 + $0x10] sm:$0xff]  ;;  %v37_v6 = vld [vmem:[%s11796_s0 + $0x28] sm:$0xff]  ;;  %6391 = vrcp.f32 %v6919_v14 }
   0x2   :  { %v32_v2 = vld [vmem:[%s11796_s0] sm:$0xff]  ;;  %v63_v3 = vsel %vm50_vm0, %v36_v0, 0.0  ;;  %v57_v4 = vsel %vm50_vm0, %v34_v1, 0.0  ;;  %v35_v7 = vld [vmem:[%s11796_s0 + $0x18] sm:$0xff]  ;;  %v33_v8 = vld [vmem:[%s11796_s0 + $0x8] sm:$0xff]  ;;  %v66_v9 = vsel %vm50_vm0, %v37_v6, 0.0 }
   0x3   :  { %v51_v5 = vsel %vm50_vm0, %v32_v2, 0.0  ;;  %64 = vadd.xlane.f32.xlu2 %v63_v3  ;;  %58 = vadd.xlane.f32.xlu1 %v57_v4  ;;  %v60_v10 = vsel %vm50_vm0, %v35_v7, 0.0  ;;  %v54_v11 = vsel %vm50_vm0, %v33_v8, 0.0  ;;  %v38_v12 = vld [vmem:[%s11796_s0 + $0x30] sm:$0xff]  ;;  %v39_v40 = vld [vmem:[%s11796_s0 + $0x38] sm:$0xff]  ;;  %v7075_v62 = vld [vmem:[%s11797_s1 + $0x8] sm:$0xff] }
   0x4   :  { %52 = vadd.xlane.f32.xlu0 %v51_v5  ;;  %v69_v13 = vsel %vm50_vm0, %v38_v12, 0.0  ;;  %v72_v45 = vsel %vm50_vm0, %v39_v40, 0.0  ;;  %v7057_v58 = vld [vmem:[%s11797_s1 + $0x18] sm:$0xff]  ;;  %v7066_v60 = vld [vmem:[%s11797_s1 + $0x10] sm:$0xff]  ;;  %v5971_v63 = vld [vmem:[%s11797_s1 + $0x28] sm:$0xff] }
   0x5   :  { %v5973_v59 = vld [vmem:[%s11797_s1 + $0x38] sm:$0xff]  ;;  %484 = vmatpush.msra.mxu0 %v7057_v58  ;;  %v5972_v61 = vld [vmem:[%s11797_s1 + $0x30] sm:$0xff] }
   0x6   :  { %729 = vmatpush.msra.mxu3 %v5973_v59 }
   0x7   :  { %v6392_v15 = vpop.eup %6391  ;;  %485 = vmatpush.msra.mxu0 %v7066_v60 }
   0x8   :  { %v100_v16 = vmul.f32 32.0, %v6392_v15  ;;  %vm104_vm1 = vweird.f32 %v6392_v15  ;;  %730 = vmatpush.msra.mxu3 %v5972_v61 }
   0x9   :  { %486 = vmatpush.msra.mxu0 %v7075_v62 }
   0xa   :  { %v101_v17 = vsub.f32 1.0, %v100_v16  ;;  %731 = vmatpush.msra.mxu3 %v5971_v63 }
   0xb   :  { %67 = vadd.xlane.f32.xlu2 %v66_v9  ;;  %61 = vadd.xlane.f32.xlu1 %v60_v10 }
   0xc   :  { %55 = vadd.xlane.f32.xlu0 %v54_v11  ;;  %v102_v18 = vmul.f32 %v6392_v15, %v101_v17 }
   0xe   :  { %v103_v19 = vadd.f32 %v6392_v15, %v102_v18 }
  0x10   :  { %v7006_v20 = vsel %vm104_vm1, %v6392_v15, %v103_v19 }
  0x11   :  { %11932 = vst [vmem:[#allocation2_spill] sm:$0xff] %v7006_v20 }
  0x13   :  { %70 = vadd.xlane.f32.xlu1 %v69_v13 }
  0x76   :  { %v65_v21 = vpop.xlane.xlu2 %64  ;;  %v59_v22 = vpop.xlane.xlu1 %58 }
  0x77   :  { %v108_v23 = vmul.f32 %v7006_v20, %v59_v22  ;;  %v53_v24 = vpop.xlane.xlu0 %52  ;;  %v110_v36 = vmul.f32 %v7006_v20, %v65_v21 }
  0x78   :  { %v106_v25 = vmul.f32 %v7006_v20, %v53_v24 }
  0x79   :  { %v7010_v26 = vsub.f32 %v34_v1, %v108_v23  ;;  %v7033_v43 = vsub.f32 %v36_v0, %v110_v36  ;;  %v7084_v0 = vld [vmem:[%s11797_s1] sm:$0xff] }
  0x7a   :  { %v7012_v27 = vsub.f32 %v32_v2, %v106_v25  ;;  %v5970_v1 = vld [vmem:[%s11797_s1 + $0x20] sm:$0xff]  ;;  %487 = vmatpush.msra.mxu0 %v7084_v0 }
  0x7b   :  { %v140_v28 = vmul.f32 %v7010_v26, %v7010_v26  ;;  %v142_v51 = vmul.f32 %v7033_v43, %v7033_v43  ;;  %732 = vmatpush.msra.mxu3 %v5970_v1 }
  0x7c   :  { %v138_v29 = vmul.f32 %v7012_v27, %v7012_v27 }
  0x7d   :  { %v160_v30 = vsel %vm50_vm0, %v140_v28, 0.0  ;;  %v166_v54 = vsel %vm50_vm0, %v142_v51, 0.0 }
  0x7e   :  { %v68_v31 = vpop.xlane.xlu2 %67  ;;  %161 = vadd.xlane.f32.xlu1 %v160_v30  ;;  %v154_v32 = vsel %vm50_vm0, %v138_v29, 0.0  ;;  %v62_v33 = vpop.xlane.xlu1 %61 }
  0x7f   :  { %v111_v34 = vmul.f32 %v7006_v20, %v68_v31  ;;  %155 = vadd.xlane.f32.xlu0 %v154_v32  ;;  %v56_v35 = vpop.xlane.xlu0 %55  ;;  %v109_v38 = vmul.f32 %v7006_v20, %v62_v33  ;;  %v48_v31 = vld [vmem:[%s11798_s3] sm:$0x3f] }
  0x80   :  { %v107_v37 = vmul.f32 %v7006_v20, %v56_v35 }
  0x81   :  { %v7024_v39 = vsub.f32 %v37_v6, %v111_v34  ;;  %v7035_v44 = vsub.f32 %v35_v7, %v109_v38 }
  0x82   :  { %v7029_v41 = vsub.f32 %v33_v8, %v107_v37 }
  0x83   :  { %v143_v42 = vmul.f32 %v7024_v39, %v7024_v39  ;;  %v141_v52 = vmul.f32 %v7035_v44, %v7035_v44 }
  0x84   :  { %v139_v46 = vmul.f32 %v7029_v41, %v7029_v41 }
  0x85   :  { %v169_v47 = vsel %vm50_vm0, %v143_v42, 0.0  ;;  %v163_v55 = vsel %vm50_vm0, %v141_v52, 0.0  ;;  %v7115_v42 = vperm.slane %v48_v31, 0 }
  0x86   :  { %170 = vadd.xlane.f32.xlu1 %v169_v47  ;;  %v157_v48 = vsel %vm50_vm0, %v139_v46, 0.0  ;;  %v71_v49 = vpop.xlane.xlu1 %70  ;;  %v7118_v47 = vperm.slane %v48_v31, 1 }
  0x87   :  { %73 = vadd.xlane.f32.xlu0 %v72_v45  ;;  %158 = vadd.xlane.f32.xlu2 %v157_v48  ;;  %v112_v50 = vmul.f32 %v7006_v20, %v71_v49 }
  0x89   :  { %v7047_v53 = vsub.f32 %v38_v12, %v112_v50 }
  0x8b   :  { %v144_v56 = vmul.f32 %v7047_v53, %v7047_v53 }
  0x8d   :  { %v172_v57 = vsel %vm50_vm0, %v144_v56, 0.0 }
  0x8f   :  { %167 = vadd.xlane.f32.xlu0 %v166_v54  ;;  %164 = vadd.xlane.f32.xlu2 %v163_v55 }
  0x97   :  { %173 = vadd.xlane.f32.xlu2 %v172_v57 }
  0xf1   :  { %v162_v2 = vpop.xlane.xlu1 %161 }
  0xf2   :  { %v204_v3 = vmul.f32 %v162_v2, %v7006_v20  ;;  %v156_v4 = vpop.xlane.xlu0 %155 }
  0xf3   :  { %v202_v5 = vmul.f32 %v156_v4, %v7006_v20 }
  0xf4   :  { %v7092_v6 = vadd.f32 1e-05, %v204_v3 }
  0xf5   :  { %v218_v7 = vadd.f32 1e-05, %v202_v5 }
  0xf6   :  { %6393 = vrsqrt.f32 %v7092_v6  ;;  %vm260_vm7 = vweird.f32 %v7092_v6 }
  0xf7   :  { %6395 = vrsqrt.f32 %v218_v7  ;;  %vm240_vm3 = vweird.f32 %v218_v7 }
  0xf9   :  { %v171_v21 = vpop.xlane.xlu1 %170 }
  0xfa   :  { %v159_v8 = vpop.xlane.xlu2 %158  ;;  %v74_v9 = vpop.xlane.xlu0 %73  ;;  %v207_v34 = vmul.f32 %v171_v21, %v7006_v20 }
  0xfb   :  { %v203_v10 = vmul.f32 %v159_v8, %v7006_v20  ;;  %v113_v11 = vmul.f32 %v7006_v20, %v74_v9 }
  0xfc   :  { %v7097_v12 = vpop.eup %6393  ;;  %v7121_v49 = vadd.f32 1e-05, %v207_v34 }
  0xfd   :  { %v6396_v13 = vpop.eup %6395  ;;  %v219_v14 = vadd.f32 1e-05, %v203_v10  ;;  %v7099_v15 = vsub.f32 %v39_v40, %v113_v11  ;;  %v255_v16 = vmul.f32 %v7097_v12, %v7092_v6  ;;  %vm261_vm8 = vweird.f32 %v7097_v12 }
  0xfe   :  { %v235_v17 = vmul.f32 %v6396_v13, %v218_v7  ;;  %vm241_vm2 = vweird.f32 %v6396_v13  ;;  %vm7132_vm10 = vmor %vm260_vm7, %vm261_vm8 }
  0xff   :  { %6397 = vrsqrt.f32 %v219_v14  ;;  %v145_v18 = vmul.f32 %v7099_v15, %v7099_v15  ;;  %v256_v23 = vmul.f32 %v7097_v12, %v255_v16  ;;  %vm242_vm4 = vmor %vm240_vm3, %vm241_vm2  ;;  %vm250_vm5 = vweird.f32 %v219_v14 }
 0x100   :  { %v236_v19 = vmul.f32 %v6396_v13, %v235_v17  ;;  %vm290_vm2 = vweird.f32 %v7121_v49 }
 0x101   :  { %v175_v22 = vsel %vm50_vm0, %v145_v18, 0.0  ;;  %v257_v36 = vmul.f32 0.5, %v256_v23 }
 0x102   :  { %v237_v24 = vmul.f32 0.5, %v236_v19  ;;  %v165_v25 = vpop.xlane.xlu2 %164  ;;  %176 = vadd.xlane.f32.xlu0 %v175_v22  ;;  %v168_v28 = vpop.xlane.xlu0 %167 }
 0x103   :  { %v205_v29 = vmul.f32 %v165_v25, %v7006_v20  ;;  %v206_v30 = vmul.f32 %v168_v28, %v7006_v20  ;;  %v258_v50 = vsub.f32 1.5, %v257_v36 }
 0x104   :  { %v238_v32 = vsub.f32 1.5, %v237_v24 }
 0x105   :  { %v6398_v33 = vpop.eup %6397  ;;  %v221_v35 = vadd.f32 1e-05, %v205_v29  ;;  %v7113_v40 = vadd.f32 1e-05, %v206_v30  ;;  %v259_v61 = vmul.f32 %v7097_v12, %v258_v50 }
 0x106   :  { %v239_v37 = vmul.f32 %v6396_v13, %v238_v32  ;;  %v245_v38 = vmul.f32 %v6398_v33, %v219_v14  ;;  %vm251_vm6 = vweird.f32 %v6398_v33 }
 0x107   :  { %6399 = vrsqrt.f32 %v221_v35  ;;  %vm252_vm9 = vmor %vm250_vm5, %vm251_vm6  ;;  %v263_v8 = vsel %vm7132_vm10, %v7097_v12, %v259_v61  ;;  %vm270_vm11 = vweird.f32 %v221_v35  ;;  %vm280_vm14 = vweird.f32 %v7113_v40  ;;  %v6000_v61 = vld [vmem:[%s11799_s2 + $0x30] sm:$0xff] }
 0x108   :  { %v243_v45 = vsel %vm242_vm4, %v6396_v13, %v239_v37  ;;  %v246_v46 = vmul.f32 %v6398_v33, %v245_v38  ;;  %6401 = vrsqrt.f32 %v7113_v40  ;;  %v396_v16 = vmul.f32 %v263_v8, %v7010_v26 }
 0x109   :  { %v394_v48 = vmul.f32 %v243_v45, %v7012_v27  ;;  %6403 = vrsqrt.f32 %v7121_v49 }
 0x10a   :  { %v247_v51 = vmul.f32 0.5, %v246_v46  ;;  %v174_v52 = vpop.xlane.xlu2 %173  ;;  %v413_v12 = vmul.f32 %v7115_v42, %v396_v16 }
 0x10b   :  { %v411_v54 = vmul.f32 %v7115_v42, %v394_v48  ;;  %v208_v27 = vmul.f32 %v174_v52, %v7006_v20 }
 0x10c   :  { %v248_v55 = vsub.f32 1.5, %v247_v51  ;;  %v7158_v24 = vadd.f32 %v7118_v47, %v413_v12  ;;  %v6028_v12 = vld [vmem:[%s11797_s1 + $0x50] sm:$0xff] }
 0x10d   :  { %v6400_v56 = vpop.eup %6399  ;;  %v7127_v57 = vadd.f32 %v7118_v47, %v411_v54  ;;  %v224_v7 = vadd.f32 1e-05, %v208_v27  ;;  %v7222_v27 = vld [vmem:[%s11799_s2] sm:$0xff] }
 0x10e   :  { %v6402_v59 = vpop.eup %6401  ;;  %v249_v63 = vmul.f32 %v6398_v33, %v248_v55  ;;  %v265_v1 = vmul.f32 %v6400_v56, %v221_v35  ;;  %vm271_vm12 = vweird.f32 %v6400_v56  ;;  %v7210_v55 = vld [vmem:[%s11799_s2 + $0x10] sm:$0xff] }
 0x10f   :  { %v275_v3 = vmul.f32 %v6402_v59, %v7113_v40  ;;  %5938 = vmatmul.msk.f32.vlgmr.msra.gmra.mxu0 %vm50_vm0, %v7127_v57  ;;  %5974 = vmatmul.msk.f32.vlgmr.msra.gmra.mxu3 %vm50_vm0, %v7127_v57  ;;  %v6404_v11 = vpop.eup %6403  ;;  %6405 = vrsqrt.f32 %v224_v7  ;;  %vm272_vm13 = vmor %vm270_vm11, %vm271_vm12  ;;  %vm281_vm15 = vweird.f32 %v6402_v59  ;;  %vm300_vm5 = vweird.f32 %v224_v7 }
 0x110   :  { %v253_v4 = vsel %vm252_vm9, %v6398_v33, %v249_v63  ;;  %v266_v5 = vmul.f32 %v6400_v56, %v265_v1  ;;  %vm282_vm1 = vmor %vm280_vm14, %vm281_vm15  ;;  %vm291_vm3 = vweird.f32 %v6404_v11  ;;  %v5999_v63 = vld [vmem:[%s11799_s2 + $0x28] sm:$0xff]  ;;  %v5998_v1 = vld [vmem:[%s11799_s2 + $0x20] sm:$0xff]  ;;  %vm578_vm11 = vcmask 523264  }
 0x111   :  { %v395_v6 = vmul.f32 %v253_v4, %v7029_v41  ;;  %v276_v10 = vmul.f32 %v6402_v59, %v275_v3  ;;  %v285_v41 = vmul.f32 %v6404_v11, %v7121_v49  ;;  %vm292_vm4 = vmor %vm290_vm2, %vm291_vm3 }
 0x112   :  { %v267_v9 = vmul.f32 0.5, %v266_v5 }
 0x113   :  { %v412_v13 = vmul.f32 %v7115_v42, %v395_v6  ;;  %v277_v19 = vmul.f32 0.5, %v276_v10  ;;  %v286_v21 = vmul.f32 %v6404_v11, %v285_v41 }
 0x114   :  { %v268_v14 = vsub.f32 1.5, %v267_v9 }
 0x115   :  { %v7148_v17 = vadd.f32 %v7118_v47, %v412_v13  ;;  %v278_v26 = vsub.f32 1.5, %v277_v19  ;;  %v6406_v23 = vpop.eup %6405  ;;  %v287_v28 = vmul.f32 0.5, %v286_v21  ;;  %v6029_v19 = vld [vmem:[%s11797_s1 + $0x58] sm:$0xff] }
 0x116   :  { %v269_v18 = vmul.f32 %v6400_v56, %v268_v14  ;;  %v295_v30 = vmul.f32 %v6406_v23, %v224_v7  ;;  %vm301_vm6 = vweird.f32 %v6406_v23 }
 0x117   :  { %5939 = vmatmul.msk.f32.gmra.mxu0 %vm50_vm0, %v7148_v17  ;;  %5975 = vmatmul.msk.f32.gmra.mxu3 %vm50_vm0, %v7148_v17  ;;  %v279_v29 = vmul.f32 %v6402_v59, %v278_v26  ;;  %v288_v32 = vsub.f32 1.5, %v287_v28  ;;  %vm302_vm7 = vmor %vm300_vm5, %vm301_vm6  ;;  %v6027_v26 = vld [vmem:[%s11797_s1 + $0x48] sm:$0xff] }
 0x118   :  { %v273_v22 = vsel %vm272_vm13, %v6400_v56, %v269_v18  ;;  %v296_v34 = vmul.f32 %v6406_v23, %v295_v30  ;;  %v7216_v56 = vld [vmem:[%s11799_s2 + $0x8] sm:$0xff] }
 0x119   :  { %v397_v25 = vmul.f32 %v273_v22, %v7035_v44  ;;  %v283_v33 = vsel %vm282_vm1, %v6402_v59, %v279_v29  ;;  %v289_v36 = vmul.f32 %v6404_v11, %v288_v32  ;;  %v6001_v59 = vld [vmem:[%s11799_s2 + $0x38] sm:$0xff] }
 0x11a   :  { %v398_v35 = vmul.f32 %v283_v33, %v7033_v43  ;;  %v297_v37 = vmul.f32 0.5, %v296_v34  ;;  %v6077_v33 = vld [vmem:[%s11797_s1 + $0x78] sm:$0xff]  ;;  %v6076_v34 = vld [vmem:[%s11797_s1 + $0x70] sm:$0xff] }
 0x11b   :  { %v414_v31 = vmul.f32 %v7115_v42, %v397_v25  ;;  %v293_v40 = vsel %vm292_vm4, %v6404_v11, %v289_v36  ;;  %v6074_v36 = vld [vmem:[%s11797_s1 + $0x60] sm:$0xff] }
 0x11c   :  { %v415_v38 = vmul.f32 %v7115_v42, %v398_v35  ;;  %v298_v45 = vsub.f32 1.5, %v297_v37  ;;  %v399_v46 = vmul.f32 %v293_v40, %v7024_v39  ;;  %v6075_v35 = vld [vmem:[%s11797_s1 + $0x68] sm:$0xff] }
 0x11d   :  { %v7168_v44 = vadd.f32 %v7118_v47, %v414_v31 }
 0x11e   :  { %v7178_v48 = vadd.f32 %v7118_v47, %v415_v38  ;;  %v299_v43 = vmul.f32 %v6406_v23, %v298_v45  ;;  %v416_v49 = vmul.f32 %v7115_v42, %v399_v46 }
 0x11f   :  { %5940 = vmatmul.msk.f32.gmra.mxu0 %vm50_vm0, %v7158_v24  ;;  %5976 = vmatmul.msk.f32.gmra.mxu3 %vm50_vm0, %v7158_v24 }
 0x120   :  { %v303_v50 = vsel %vm302_vm7, %v6406_v23, %v299_v43  ;;  %v7186_v51 = vadd.f32 %v7118_v47, %v416_v49  ;;  %v6026_v23 = vld [vmem:[%s11797_s1 + $0x40] sm:$0xff] }
 0x121   :  { %v400_v52 = vmul.f32 %v303_v50, %v7047_v53  ;;  %v7204_v53 = vld [vmem:[%s11799_s2 + $0x18] sm:$0xff] }
 0x122   :  { %6306 = vmatpush.msra.mxu2 %v7204_v53 }
 0x123   :  { %v417_v39 = vmul.f32 %v7115_v42, %v400_v52 }
 0x124   :  { %6307 = vmatpush.msra.mxu2 %v7210_v55 }
 0x125   :  { %v7195_v54 = vadd.f32 %v7118_v47, %v417_v39 }
 0x126   :  { %6308 = vmatpush.msra.mxu2 %v7216_v56 }
 0x127   :  { %5941 = vmatmul.msk.f32.gmra.mxu0 %vm50_vm0, %v7168_v44  ;;  %5977 = vmatmul.msk.f32.gmra.mxu3 %vm50_vm0, %v7168_v44 }
 0x128   :  { %6309 = vmatpush.msra.mxu2 %v7222_v27 }
 0x12a   :  { %928 = vmatpush.msrb.mxu2 %v6001_v59 }
 0x12c   :  { %929 = vmatpush.msrb.mxu2 %v6000_v61 }
 0x12e   :  { %930 = vmatpush.msrb.mxu2 %v5999_v63 }
 0x12f   :  { %5942 = vmatmul.msk.f32.gmra.mxu0 %vm50_vm0, %v7178_v48  ;;  %5978 = vmatmul.msk.f32.gmra.mxu3 %vm50_vm0, %v7178_v48 }
 0x130   :  { %931 = vmatpush.msrb.mxu2 %v5998_v1 }
 0x137   :  { %5943 = vmatmul.msk.f32.gmra.mxu0 %vm50_vm0, %v7186_v51  ;;  %5979 = vmatmul.msk.f32.gmra.mxu3 %vm50_vm0, %v7186_v51 }
 0x13f   :  { %5944 = vmatmul.msk.f32.gmra.mxu0 %vm50_vm0, %v7195_v54  ;;  %5980 = vmatmul.msk.f32.gmra.mxu3 %vm50_vm0, %v7195_v54 }
 0x175   :  { %v177_v2 = vpop.xlane.xlu0 %176 }
 0x176   :  { %v209_v3 = vmul.f32 %v177_v2, %v7006_v20 }
 0x178   :  { %v225_v4 = vadd.f32 1e-05, %v209_v3 }
 0x17a   :  { %6407 = vrsqrt.f32 %v225_v4  ;;  %vm310_vm9 = vweird.f32 %v225_v4 }
 0x180   :  { %v6408_v5 = vpop.eup %6407 }
 0x181   :  { %v305_v6 = vmul.f32 %v6408_v5, %v225_v4  ;;  %vm311_vm8 = vweird.f32 %v6408_v5 }
 0x182   :  { %vm312_vm10 = vmor %vm310_vm9, %vm311_vm8 }
 0x183   :  { %v306_v7 = vmul.f32 %v6408_v5, %v305_v6 }
 0x185   :  { %v307_v8 = vmul.f32 0.5, %v306_v7 }
 0x187   :  { %v308_v9 = vsub.f32 1.5, %v307_v8 }
 0x189   :  { %v309_v10 = vmul.f32 %v6408_v5, %v308_v9 }
 0x18b   :  { %v313_v11 = vsel %vm312_vm10, %v6408_v5, %v309_v10 }
 0x18c   :  { %v401_v13 = vmul.f32 %v313_v11, %v7099_v15  ;;  %v489_v15 = vpop.f32.mrf.mxu0 }
 0x18e   :  { %v418_v14 = vmul.f32 %v7115_v42, %v401_v13 }
 0x190   :  { %v7241_v16 = vadd.f32 %v7118_v47, %v418_v14 }
 0x192   :  { %5945 = vmatmul.msk.f32.gmra.mxu0 %vm50_vm0, %v7241_v16  ;;  %6298 = vmatpush.xpose.msk.msra.mxu1 %vm50_vm0, %v7241_v16  ;;  %v734_v41 = vpop.f32.mrf.mxu3 }
 0x193   :  { %5946 = vmatpush.xpose.msk.msrb.mxu0 %vm50_vm0, %v7241_v16  ;;  %5969 = vmatmul.msk.f32.vlgmr.msra.gmra.mxu2 %vm50_vm0, %v7241_v16 }
 0x194   :  { %5981 = vmatmul.msk.f32.gmra.mxu3 %vm50_vm0, %v7241_v16  ;;  %6038 = vmatpush.xpose.msk.msra.mxu2 %vm50_vm0, %v7241_v16  ;;  %v492_v18 = vpop.f32.mrf.mxu0 }
 0x195   :  { %5982 = vmatpush.xpose.msk.msrb.mxu3 %vm50_vm0, %v7241_v16 }
 0x196   :  { %6299 = vmatpush.xpose.msk.msra.mxu1 %vm50_vm0, %v7195_v54 }
 0x197   :  { %5947 = vmatpush.xpose.msk.msrb.mxu0 %vm50_vm0, %v7195_v54 }
 0x198   :  { %6039 = vmatpush.xpose.msk.msra.mxu2 %vm50_vm0, %v7195_v54 }
 0x199   :  { %5983 = vmatpush.xpose.msk.msrb.mxu3 %vm50_vm0, %v7195_v54 }
 0x19a   :  { %6300 = vmatpush.xpose.msk.msra.mxu1 %vm50_vm0, %v7186_v51  ;;  %v737_v21 = vpop.f32.mrf.mxu3 }
 0x19b   :  { %5948 = vmatpush.xpose.msk.msrb.mxu0 %vm50_vm0, %v7186_v51  ;;  %6002 = vmatmul.msk.f32.vlgmr.msrb.gmra.mxu2 %vm50_vm0, %v7127_v57 }
 0x19c   :  { %6040 = vmatpush.xpose.msk.msra.mxu2 %vm50_vm0, %v7186_v51  ;;  %v495_v22 = vpop.f32.mrf.mxu0 }
 0x19d   :  { %5984 = vmatpush.xpose.msk.msrb.mxu3 %vm50_vm0, %v7186_v51 }
 0x19e   :  { %6301 = vmatpush.xpose.msk.msra.mxu1 %vm50_vm0, %v7178_v48 }
 0x19f   :  { %5949 = vmatpush.xpose.msk.msrb.mxu0 %vm50_vm0, %v7178_v48 }
 0x1a0   :  { %6041 = vmatpush.xpose.msk.msra.mxu2 %vm50_vm0, %v7178_v48 }
 0x1a1   :  { %5985 = vmatpush.xpose.msk.msrb.mxu3 %vm50_vm0, %v7178_v48 }
 0x1a2   :  { %6302 = vmatpush.xpose.msk.msra.mxu1 %vm50_vm0, %v7168_v44  ;;  %v740_v25 = vpop.f32.mrf.mxu3 }
 0x1a3   :  { %5950 = vmatpush.xpose.msk.msrb.mxu0 %vm50_vm0, %v7168_v44  ;;  %6003 = vmatmul.msk.f32.gmra.mxu2 %vm50_vm0, %v7148_v17 }
 0x1a4   :  { %6042 = vmatpush.xpose.msk.msra.mxu2 %vm50_vm0, %v7168_v44  ;;  %v498_v28 = vpop.f32.mrf.mxu0 }
 0x1a5   :  { %5986 = vmatpush.xpose.msk.msrb.mxu3 %vm50_vm0, %v7168_v44 }
 0x1a6   :  { %6303 = vmatpush.xpose.msk.msra.mxu1 %vm50_vm0, %v7158_v24 }
 0x1a7   :  { %5951 = vmatpush.xpose.msk.msrb.mxu0 %vm50_vm0, %v7158_v24 }
 0x1a8   :  { %6043 = vmatpush.xpose.msk.msra.mxu2 %vm50_vm0, %v7158_v24 }
 0x1a9   :  { %5987 = vmatpush.xpose.msk.msrb.mxu3 %vm50_vm0, %v7158_v24 }
 0x1aa   :  { %6304 = vmatpush.xpose.msk.msra.mxu1 %vm50_vm0, %v7148_v17  ;;  %v743_v29 = vpop.f32.mrf.mxu3 }
 0x1ab   :  { %5952 = vmatpush.xpose.msk.msrb.mxu0 %vm50_vm0, %v7148_v17  ;;  %6004 = vmatmul.msk.f32.gmra.mxu2 %vm50_vm0, %v7158_v24 }
 0x1ac   :  { %6044 = vmatpush.xpose.msk.msra.mxu2 %vm50_vm0, %v7148_v17  ;;  %v501_v30 = vpop.f32.mrf.mxu0 }
 0x1ad   :  { %5988 = vmatpush.xpose.msk.msrb.mxu3 %vm50_vm0, %v7148_v17 }
 0x1ae   :  { %6305 = vmatpush.xpose.msk.msra.mxu1 %vm50_vm0, %v7127_v57 }
 0x1af   :  { %5953 = vmatpush.xpose.msk.msrb.mxu0 %vm50_vm0, %v7127_v57 }
 0x1b0   :  { %6045 = vmatpush.xpose.msk.msra.mxu2 %vm50_vm0, %v7127_v57 }
 0x1b1   :  { %5989 = vmatpush.xpose.msk.msrb.mxu3 %vm50_vm0, %v7127_v57  ;;  %5955 = vmatmul.msk.f32.vlgmr.msra.gmra.mxu1 %vm50_vm0, %v492_v18 }
 0x1b2   :  { %683 = vmatpush.msrb.mxu1 %v7204_v53  ;;  %5954 = vmatmul.msk.f32.vlgmr.msrb.gmra.mxu0 %vm50_vm0, %v489_v15  ;;  %v746_v31 = vpop.f32.mrf.mxu3 }
 0x1b3   :  { %1104 = vmatpush.msra.mxu0 %v6029_v19  ;;  %6005 = vmatmul.msk.f32.gmra.mxu2 %vm50_vm0, %v7168_v44 }
 0x1b4   :  { %6086 = vmatpush.xpose.msk.msrb.mxu2 %vm50_vm0, %v7241_v16  ;;  %5990 = vmatmul.msk.f32.vlgmr.msrb.gmra.mxu3 %vm50_vm0, %v734_v41  ;;  %v504_v32 = vpop.f32.mrf.mxu0 }
 0x1b5   :  { %1105 = vmatpush.msra.mxu0 %v6028_v12  ;;  %684 = vmatpush.msrb.mxu1 %v7210_v55 }
 0x1b7   :  { %1106 = vmatpush.msra.mxu0 %v6027_v26  ;;  %685 = vmatpush.msrb.mxu1 %v7216_v56 }
 0x1b8   :  { %6087 = vmatpush.xpose.msk.msrb.mxu2 %vm50_vm0, %v7195_v54 }
 0x1b9   :  { %1107 = vmatpush.msra.mxu0 %v6026_v23  ;;  %686 = vmatpush.msrb.mxu1 %v7222_v27 }
 0x1ba   :  { %5956 = vmatmul.msk.f32.gmra.mxu1 %vm50_vm0, %v495_v22  ;;  %6030 = vmatmul.msk.f32.vlgmr.msra.gmra.mxu0 %vm50_vm0, %v7127_v57  ;;  %v749_v37 = vpop.f32.mrf.mxu3 }
 0x1bb   :  { %6006 = vmatmul.msk.f32.gmra.mxu2 %vm50_vm0, %v7178_v48  ;;  %1422 = vmatpush.msrb.mxu0 %v6077_v33 }
 0x1bc   :  { %6088 = vmatpush.xpose.msk.msrb.mxu2 %vm50_vm0, %v7186_v51  ;;  %5991 = vmatmul.msk.f32.gmra.mxu3 %vm50_vm0, %v737_v21  ;;  %v507_v38 = vpop.f32.mrf.mxu0 }
 0x1bd   :  { %1423 = vmatpush.msrb.mxu0 %v6076_v34 }
 0x1bf   :  { %1424 = vmatpush.msrb.mxu0 %v6075_v35 }
 0x1c0   :  { %6089 = vmatpush.xpose.msk.msrb.mxu2 %vm50_vm0, %v7178_v48 }
 0x1c1   :  { %1425 = vmatpush.msrb.mxu0 %v6074_v36 }
 0x1c2   :  { %5957 = vmatmul.msk.f32.gmra.mxu1 %vm50_vm0, %v498_v28  ;;  %6031 = vmatmul.msk.f32.gmra.mxu0 %vm50_vm0, %v7148_v17  ;;  %v752_v40 = vpop.f32.mrf.mxu3 }
 0x1c3   :  { %6007 = vmatmul.msk.f32.gmra.mxu2 %vm50_vm0, %v7186_v51  ;;  %1759 = vmatpush.msra.mxu0 %v7057_v58 }
 0x1c4   :  { %6090 = vmatpush.xpose.msk.msrb.mxu2 %vm50_vm0, %v7168_v44  ;;  %5992 = vmatmul.msk.f32.gmra.mxu3 %vm50_vm0, %v740_v25 }
 0x1c5   :  { %1760 = vmatpush.msra.mxu0 %v7066_v60 }
 0x1c7   :  { %1761 = vmatpush.msra.mxu0 %v7075_v62 }
 0x1c8   :  { %6091 = vmatpush.xpose.msk.msrb.mxu2 %vm50_vm0, %v7158_v24 }
 0x1c9   :  { %1762 = vmatpush.msra.mxu0 %v7084_v0 }
 0x1ca   :  { %5958 = vmatmul.msk.f32.gmra.mxu1 %vm50_vm0, %v501_v30  ;;  %6032 = vmatmul.msk.f32.gmra.mxu0 %vm50_vm0, %v7158_v24 }
 0x1cb   :  { %6008 = vmatmul.msk.f32.gmra.mxu2 %vm50_vm0, %v7195_v54 }
 0x1cc   :  { %6092 = vmatpush.xpose.msk.msrb.mxu2 %vm50_vm0, %v7148_v17  ;;  %5993 = vmatmul.msk.f32.gmra.mxu3 %vm50_vm0, %v743_v29 }
 0x1d0   :  { %6093 = vmatpush.xpose.msk.msrb.mxu2 %vm50_vm0, %v7127_v57 }
 0x1d2   :  { %5959 = vmatmul.msk.f32.gmra.mxu1 %vm50_vm0, %v504_v32  ;;  %6033 = vmatmul.msk.f32.gmra.mxu0 %vm50_vm0, %v7168_v44 }
 0x1d3   :  { %6009 = vmatmul.msk.f32.gmra.mxu2 %vm50_vm0, %v7241_v16 }
 0x1d4   :  { %5994 = vmatmul.msk.f32.gmra.mxu3 %vm50_vm0, %v746_v31 }
 0x1da   :  { %5960 = vmatmul.msk.f32.gmra.mxu1 %vm50_vm0, %v507_v38  ;;  %6034 = vmatmul.msk.f32.gmra.mxu0 %vm50_vm0, %v7178_v48 }
 0x1dc   :  { %5995 = vmatmul.msk.f32.gmra.mxu3 %vm50_vm0, %v749_v37 }
 0x1e2   :  { %6035 = vmatmul.msk.f32.gmra.mxu0 %vm50_vm0, %v7186_v51 }
 0x1e4   :  { %5996 = vmatmul.msk.f32.gmra.mxu3 %vm50_vm0, %v752_v40 }
 0x1ea   :  { %6036 = vmatmul.msk.f32.gmra.mxu0 %vm50_vm0, %v7195_v54 }
 0x1f2   :  { %6037 = vmatmul.msk.f32.gmra.mxu0 %vm50_vm0, %v7241_v16 }
 0x1fa   :  { %6078 = vmatmul.msk.f32.vlgmr.msrb.gmra.mxu0 %vm50_vm0, %v7127_v57 }
 0x202   :  { %6079 = vmatmul.msk.f32.gmra.mxu0 %vm50_vm0, %v7148_v17 }
 0x20a   :  { %6080 = vmatmul.msk.f32.gmra.mxu0 %vm50_vm0, %v7158_v24 }
 0x20f   :  { %v510_v58 = vpop.f32.mrf.mxu0 }
 0x210   :  { %5961 = vmatmul.msk.f32.gmra.mxu1 %vm50_vm0, %v510_v58 }
 0x212   :  { %6081 = vmatmul.msk.f32.gmra.mxu0 %vm50_vm0, %v7168_v44 }
 0x216   :  { %v709_v60 = vpop.f32.mrf.mxu2 }
 0x217   :  { %v755_v62 = vpop.f32.mrf.mxu3  ;;  %1054 = vmatpush.msra.mxu1 %v709_v60 }
 0x218   :  { %5997 = vmatmul.msk.f32.gmra.mxu3 %vm50_vm0, %v755_v62  ;;  %5962 = vmatmul.msk.f32.vlgmr.msrb.gmra.mxu1 %vm50_vm0, %v7127_v57 }
 0x21a   :  { %6082 = vmatmul.msk.f32.gmra.mxu0 %vm50_vm0, %v7178_v48 }
 0x21e   :  { %v933_v0 = vpop.f32.mrf.mxu2 }
 0x220   :  { %5963 = vmatmul.msk.f32.gmra.mxu1 %vm50_vm0, %v7148_v17 }
 0x222   :  { %6083 = vmatmul.msk.f32.gmra.mxu0 %vm50_vm0, %v7186_v51 }
 0x226   :  { %v936_v45 = vpop.f32.mrf.mxu2 }
 0x228   :  { %5964 = vmatmul.msk.f32.gmra.mxu1 %vm50_vm0, %v7158_v24 }
 0x22a   :  { %6084 = vmatmul.msk.f32.gmra.mxu0 %vm50_vm0, %v7195_v54 }
 0x22e   :  { %v939_v46 = vpop.f32.mrf.mxu2  ;;  %v7461_v10 = vpop.f32.mrf.mxu1 }
 0x22f   :  { %v7429_v43 = vpop.f32.mrf.mxu0 }
 0x230   :  { %5965 = vmatmul.msk.f32.gmra.mxu1 %vm50_vm0, %v7168_v44 }
 0x232   :  { %6085 = vmatmul.msk.f32.gmra.mxu0 %vm50_vm0, %v7241_v16 }
 0x236   :  { %v942_v49 = vpop.f32.mrf.mxu2 }
 0x237   :  { %v7435_v50 = vpop.f32.mrf.mxu3  ;;  %v1109_v39 = vpop.f32.mrf.mxu0 }
 0x238   :  { %v823_v52 = vsel %vm578_vm11, %v7435_v50, -inf  ;;  %5966 = vmatmul.msk.f32.gmra.mxu1 %vm50_vm0, %v7178_v48  ;;  %6046 = vmatmul.msk.f32.vlgmr.msra.gmra.mxu2 %vm50_vm0, %v1109_v39  ;;  %v7468_v41 = vpop.f32.mrf.mxu1 }
 0x239   :  { %824 = vmax.xlane.f32.xlu1 %v823_v52 }
 0x23e   :  { %v945_v59 = vpop.f32.mrf.mxu2 }
 0x23f   :  { %v7442_v61 = vpop.f32.mrf.mxu3  ;;  %v1112_v1 = vpop.f32.mrf.mxu0 }
 0x240   :  { %v826_v63 = vsel %vm578_vm11, %v7442_v61, -inf  ;;  %5967 = vmatmul.msk.f32.gmra.mxu1 %vm50_vm0, %v7186_v51  ;;  %6047 = vmatmul.msk.f32.gmra.mxu2 %vm50_vm0, %v1112_v1  ;;  %v7475_v21 = vpop.f32.mrf.mxu1 }
 0x241   :  { %827 = vmax.xlane.f32.xlu2 %v826_v63 }
 0x246   :  { %v948_v2 = vpop.f32.mrf.mxu2 }
 0x247   :  { %v7449_v3 = vpop.f32.mrf.mxu3  ;;  %v1115_v5 = vpop.f32.mrf.mxu0 }
 0x248   :  { %v829_v4 = vsel %vm578_vm11, %v7449_v3, -inf  ;;  %5968 = vmatmul.msk.f32.gmra.mxu1 %vm50_vm0, %v7195_v54  ;;  %6048 = vmatmul.msk.f32.gmra.mxu2 %vm50_vm0, %v1115_v5  ;;  %v7482_v28 = vpop.f32.mrf.mxu1 }
 0x249   :  { %830 = vmax.xlane.f32.xlu0 %v829_v4 }
 0x24e   :  { %v951_v6 = vpop.f32.mrf.mxu2 }
 0x24f   :  { %v7456_v7 = vpop.f32.mrf.mxu3  ;;  %v1118_v9 = vpop.f32.mrf.mxu0 }
 0x250   :  { %v832_v8 = vsel %vm578_vm11, %v7456_v7, -inf  ;;  %6049 = vmatmul.msk.f32.gmra.mxu2 %vm50_vm0, %v1118_v9  ;;  %v7486_v30 = vpop.f32.mrf.mxu1 }
 0x251   :  { %833 = vmax.xlane.f32.xlu1 %v832_v8 }
 0x256   :  { %v954_v11 = vpop.f32.mrf.mxu2 }
 0x257   :  { %v7463_v13 = vpop.f32.mrf.mxu3  ;;  %989 = vmatpush.msra.mxu3 %v954_v11  ;;  %v1121_v15 = vpop.f32.mrf.mxu0 }
 0x258   :  { %v835_v14 = vsel %vm578_vm11, %v7463_v13, -inf  ;;  %6050 = vmatmul.msk.f32.gmra.mxu2 %vm50_vm0, %v1121_v15  ;;  %v7489_v32 = vpop.f32.mrf.mxu1 }
 0x259   :  { %836 = vmax.xlane.f32.xlu2 %v835_v14  ;;  %990 = vmatpush.msra.mxu3 %v951_v6 }
 0x25b   :  { %991 = vmatpush.msra.mxu3 %v948_v2 }
 0x25d   :  { %992 = vmatpush.msra.mxu3 %v945_v59 }
 0x25f   :  { %v7470_v18 = vpop.f32.mrf.mxu3  ;;  %993 = vmatpush.msra.mxu3 %v942_v49  ;;  %v1124_v12 = vpop.f32.mrf.mxu0 }
 0x260   :  { %v838_v19 = vsel %vm578_vm11, %v7470_v18, -inf  ;;  %6051 = vmatmul.msk.f32.gmra.mxu2 %vm50_vm0, %v1124_v12 }
 0x261   :  { %839 = vmax.xlane.f32.xlu0 %v838_v19  ;;  %994 = vmatpush.msra.mxu3 %v939_v46 }
 0x263   :  { %995 = vmatpush.msra.mxu3 %v936_v45 }
 0x265   :  { %996 = vmatpush.msra.mxu3 %v933_v0 }
 0x267   :  { %v7477_v22 = vpop.f32.mrf.mxu3  ;;  %v1127_v23 = vpop.f32.mrf.mxu0 }
 0x268   :  { %v841_v26 = vsel %vm578_vm11, %v7477_v22, -inf  ;;  %6052 = vmatmul.msk.f32.gmra.mxu2 %vm50_vm0, %v1127_v23 }
 0x269   :  { %842 = vmax.xlane.f32.xlu1 %v841_v26 }
 0x26f   :  { %v1130_v25 = vpop.f32.mrf.mxu0 }
 0x270   :  { %6053 = vmatmul.msk.f32.gmra.mxu2 %vm50_vm0, %v1130_v25 }
 0x277   :  { %v1427_v29 = vpop.f32.mrf.mxu0 }
 0x278   :  { %6094 = vmatmul.msk.f32.vlgmr.msrb.gmra.mxu2 %vm50_vm0, %v1427_v29 }
 0x27f   :  { %v1430_v31 = vpop.f32.mrf.mxu0 }
 0x280   :  { %6095 = vmatmul.msk.f32.gmra.mxu2 %vm50_vm0, %v1430_v31 }
 0x287   :  { %v1433_v33 = vpop.f32.mrf.mxu0 }
 0x288   :  { %6096 = vmatmul.msk.f32.gmra.mxu2 %vm50_vm0, %v1433_v33 }
 0x28d   :  { %v7492_v34 = vpop.f32.mrf.mxu1 }
 0x28f   :  { %v1436_v35 = vpop.f32.mrf.mxu0 }
 0x290   :  { %6097 = vmatmul.msk.f32.gmra.mxu2 %vm50_vm0, %v1436_v35 }
 0x295   :  { %v688_v36 = vpop.f32.mrf.mxu1 }
 0x297   :  { %v1439_v37 = vpop.f32.mrf.mxu0 }
 0x298   :  { %6098 = vmatmul.msk.f32.gmra.mxu2 %vm50_vm0, %v1439_v37 }
 0x29b   :  { %v7496_v38 = vpop.f32.mrf.mxu3 }
 0x29c   :  { %v844_v40 = vsel %vm578_vm11, %v7496_v38, -inf }
 0x29d   :  { %845 = vmax.xlane.f32.xlu0 %v844_v40  ;;  %v691_v58 = vpop.f32.mrf.mxu1 }
 0x29f   :  { %v1442_v60 = vpop.f32.mrf.mxu0 }
 0x2a0   :  { %6099 = vmatmul.msk.f32.gmra.mxu2 %vm50_vm0, %v1442_v60 }
 0x2a5   :  { %v694_v62 = vpop.f32.mrf.mxu1 }
 0x2a7   :  { %v1445_v0 = vpop.f32.mrf.mxu0 }
 0x2a8   :  { %6100 = vmatmul.msk.f32.gmra.mxu2 %vm50_vm0, %v1445_v0 }
 0x2ac   :  { %v825_v45 = vpop.xlane.xlu1 %824 }
 0x2ad   :  { %v847_v46 = vsub.f32 %v7435_v50, %v825_v45  ;;  %v697_v49 = vpop.f32.mrf.mxu1 }
 0x2af   :  { %v855_v52 = vmul.f32 1.442695, %v847_v46  ;;  %v1448_v39 = vpop.f32.mrf.mxu0  ;;  %v579_v46 = vsel %vm578_vm11, %v7429_v43, -inf }
 0x2b0   :  { %6101 = vmatmul.msk.f32.gmra.mxu2 %vm50_vm0, %v1448_v39  ;;  %v597_v39 = vsel %vm578_vm11, %v7489_v32, -inf }
 0x2b1   :  { %6409 = vpow2.f32 %v855_v52  ;;  %v591_v52 = vsel %vm578_vm11, %v7482_v28, -inf }
 0x2b4   :  { %v828_v59 = vpop.xlane.xlu2 %827 }
 0x2b5   :  { %v848_v63 = vsub.f32 %v7442_v61, %v828_v59  ;;  %v700_v1 = vpop.f32.mrf.mxu1 }
 0x2b7   :  { %v7505_v2 = vpop.eup %6409  ;;  %v857_v4 = vmul.f32 1.442695, %v848_v63 }
 0x2b8   :  { %v871_v5 = vsel %vm578_vm11, %v7505_v2, 0.0 }
 0x2b9   :  { %6411 = vpow2.f32 %v857_v4  ;;  %872 = vadd.xlane.f32.xlu2 %v871_v5 }
 0x2bc   :  { %v831_v6 = vpop.xlane.xlu0 %830 }
 0x2bd   :  { %v849_v50 = vsub.f32 %v7449_v3, %v831_v6  ;;  %v703_v8 = vpop.f32.mrf.mxu1  ;;  %v585_v6 = vsel %vm578_vm11, %v7468_v41, -inf }
 0x2bf   :  { %v7510_v9 = vpop.eup %6411  ;;  %v859_v11 = vmul.f32 1.442695, %v849_v50 }
 0x2c0   :  { %v874_v14 = vsel %vm578_vm11, %v7510_v9, 0.0 }
 0x2c1   :  { %6413 = vpow2.f32 %v859_v11  ;;  %875 = vadd.xlane.f32.xlu1 %v874_v14 }
 0x2c4   :  { %v834_v61 = vpop.xlane.xlu1 %833 }
 0x2c5   :  { %v850_v15 = vsub.f32 %v7456_v7, %v834_v61  ;;  %v706_v19 = vpop.f32.mrf.mxu1  ;;  %v600_v61 = vsel %vm578_vm11, %v7492_v34, -inf }
 0x2c6   :  { %1055 = vmatpush.msra.mxu1 %v706_v19 }
 0x2c7   :  { %v7515_v12 = vpop.eup %6413  ;;  %v861_v26 = vmul.f32 1.442695, %v850_v15 }
 0x2c8   :  { %v877_v3 = vsel %vm578_vm11, %v7515_v12, 0.0  ;;  %1056 = vmatpush.msra.mxu1 %v703_v8  ;;  %v594_v8 = vsel %vm578_vm11, %v7486_v30, -inf }
 0x2c9   :  { %6415 = vpow2.f32 %v861_v26  ;;  %878 = vadd.xlane.f32.xlu2 %v877_v3 }
 0x2ca   :  { %1057 = vmatpush.msra.mxu1 %v700_v1 }
 0x2cc   :  { %v837_v23 = vpop.xlane.xlu2 %836  ;;  %1058 = vmatpush.msra.mxu1 %v697_v49  ;;  %v588_v49 = vsel %vm578_vm11, %v7475_v21, -inf }
 0x2cd   :  { %v851_v25 = vsub.f32 %v7463_v13, %v837_v23 }
 0x2ce   :  { %1059 = vmatpush.msra.mxu1 %v694_v62 }
 0x2cf   :  { %v7520_v29 = vpop.eup %6415  ;;  %v863_v7 = vmul.f32 1.442695, %v851_v25 }
 0x2d0   :  { %v880_v31 = vsel %vm578_vm11, %v7520_v29, 0.0  ;;  %1060 = vmatpush.msra.mxu1 %v691_v58 }
 0x2d1   :  { %6417 = vpow2.f32 %v863_v7  ;;  %881 = vadd.xlane.f32.xlu0 %v880_v31 }
 0x2d2   :  { %1061 = vmatpush.msra.mxu1 %v688_v36 }
 0x2d4   :  { %v840_v33 = vpop.xlane.xlu0 %839 }
 0x2d5   :  { %v852_v35 = vsub.f32 %v7470_v18, %v840_v33  ;;  %v7567_v33 = vpop.f32.mrf.mxu2 }
 0x2d7   :  { %v7525_v37 = vpop.eup %6417  ;;  %v865_v40 = vmul.f32 1.442695, %v852_v35 }
 0x2d8   :  { %v883_v13 = vsel %vm578_vm11, %v7525_v37, 0.0 }
 0x2d9   :  { %6419 = vpow2.f32 %v865_v40  ;;  %884 = vadd.xlane.f32.xlu1 %v883_v13 }
 0x2dc   :  { %v843_v60 = vpop.xlane.xlu1 %842 }
 0x2dd   :  { %v853_v62 = vsub.f32 %v7477_v22, %v843_v60  ;;  %v582_v22 = vsel %vm578_vm11, %v7461_v10, -inf  ;;  %v7571_v13 = vpop.f32.mrf.mxu2 }
 0x2df   :  { %v7530_v0 = vpop.eup %6419  ;;  %v867_v58 = vmul.f32 1.442695, %v853_v62 }
 0x2e0   :  { %v886_v36 = vsel %vm578_vm11, %v7530_v0, 0.0 }
 0x2e1   :  { %6421 = vpow2.f32 %v867_v58  ;;  %887 = vadd.xlane.f32.xlu2 %v886_v36 }
 0x2e7   :  { %v7534_v18 = vpop.eup %6421 }
 0x2e8   :  { %v889_v45 = vsel %vm578_vm11, %v7534_v18, 0.0 }
 0x2e9   :  { %890 = vadd.xlane.f32.xlu0 %v889_v45  ;;  %580 = vmax.xlane.f32.xlu2 %v579_v46 }
 0x2f1   :  { %583 = vmax.xlane.f32.xlu0 %v582_v22  ;;  %589 = vmax.xlane.f32.xlu2 %v588_v49  ;;  %v7577_v49 = vpop.f32.mrf.mxu2 }
 0x2f9   :  { %592 = vmax.xlane.f32.xlu0 %v591_v52  ;;  %598 = vmax.xlane.f32.xlu2 %v597_v39 }
 0x310   :  { %v846_v59 = vpop.xlane.xlu0 %845 }
 0x311   :  { %v854_v63 = vsub.f32 %v7496_v38, %v846_v59 }
 0x313   :  { %v869_v1 = vmul.f32 1.442695, %v854_v63 }
 0x315   :  { %6423 = vpow2.f32 %v869_v1 }
 0x31b   :  { %v7549_v4 = vpop.eup %6423 }
 0x31c   :  { %v892_v5 = vsel %vm578_vm11, %v7549_v4, 0.0 }
 0x31d   :  { %893 = vadd.xlane.f32.xlu1 %v892_v5 }
 0x325   :  { %586 = vmax.xlane.f32.xlu1 %v585_v6 }
 0x32c   :  { %v873_v50 = vpop.xlane.xlu2 %872 }
 0x32d   :  { %6425 = vrcp.f32 %v873_v50  ;;  %595 = vmax.xlane.f32.xlu1 %v594_v8 }
 0x333   :  { %v6426_v11 = vpop.eup %6425 }
 0x334   :  { %v903_v38 = vmul.f32 %v6426_v11, %v7505_v2  ;;  %v876_v14 = vpop.xlane.xlu1 %875 }
 0x335   :  { %6427 = vrcp.f32 %v876_v14  ;;  %601 = vmax.xlane.f32.xlu1 %v600_v61  ;;  %v1201_v14 = vsel %vm578_vm11, %v7571_v13, -inf }
 0x336   :  { %6010 = vmatmul.msk.f32.vlgmr.msra.gmra.mxu3 %vm578_vm11, %v903_v38 }
 0x33b   :  { %v6428_v15 = vpop.eup %6427 }
 0x33c   :  { %v879_v19 = vpop.xlane.xlu2 %878  ;;  %v904_v26 = vmul.f32 %v6428_v15, %v7510_v9 }
 0x33d   :  { %6429 = vrcp.f32 %v879_v19  ;;  %v6057_v19 = vld [vmem:[%s11799_s2 + $0x58] sm:$0xff] }
 0x33e   :  { %6011 = vmatmul.msk.f32.gmra.mxu3 %vm578_vm11, %v904_v26 }
 0x33f   :  { %1303 = vmatpush.msrb.mxu3 %v6057_v19 }
 0x343   :  { %v6430_v3 = vpop.eup %6429 }
 0x344   :  { %v882_v23 = vpop.xlane.xlu0 %881  ;;  %v905_v25 = vmul.f32 %v6430_v3, %v7515_v12  ;;  %v6055_v3 = vld [vmem:[%s11799_s2 + $0x48] sm:$0xff] }
 0x345   :  { %6431 = vrcp.f32 %v882_v23 }
 0x346   :  { %6012 = vmatmul.msk.f32.gmra.mxu3 %vm578_vm11, %v905_v25 }
 0x34b   :  { %v6432_v2 = vpop.eup %6431 }
 0x34c   :  { %v885_v7 = vpop.xlane.xlu1 %884  ;;  %v906_v31 = vmul.f32 %v6432_v2, %v7520_v29  ;;  %v6054_v2 = vld [vmem:[%s11799_s2 + $0x40] sm:$0xff] }
 0x34d   :  { %6433 = vrcp.f32 %v885_v7 }
 0x34e   :  { %6013 = vmatmul.msk.f32.gmra.mxu3 %vm578_vm11, %v906_v31 }
 0x353   :  { %v6434_v9 = vpop.eup %6433 }
 0x354   :  { %v888_v35 = vpop.xlane.xlu2 %887  ;;  %v907_v40 = vmul.f32 %v6434_v9, %v7525_v37 }
 0x355   :  { %6435 = vrcp.f32 %v888_v35 }
 0x356   :  { %6014 = vmatmul.msk.f32.gmra.mxu3 %vm578_vm11, %v907_v40 }
 0x35b   :  { %v6436_v12 = vpop.eup %6435 }
 0x35c   :  { %v891_v60 = vpop.xlane.xlu0 %890  ;;  %v581_v62 = vpop.xlane.xlu2 %580  ;;  %v908_v58 = vmul.f32 %v6436_v12, %v7530_v0 }
 0x35d   :  { %6437 = vrcp.f32 %v891_v60  ;;  %v603_v29 = vsub.f32 %v7429_v43, %v581_v62 }
 0x35e   :  { %6015 = vmatmul.msk.f32.gmra.mxu3 %vm578_vm11, %v908_v58 }
 0x35f   :  { %v611_v36 = vmul.f32 1.442695, %v603_v29 }
 0x361   :  { %6439 = vpow2.f32 %v611_v36 }
 0x363   :  { %v6438_v45 = vpop.eup %6437 }
 0x364   :  { %v584_v46 = vpop.xlane.xlu0 %583  ;;  %v590_v37 = vpop.xlane.xlu2 %589  ;;  %v909_v22 = vmul.f32 %v6438_v45, %v7534_v18 }
 0x365   :  { %v604_v52 = vsub.f32 %v7461_v10, %v584_v46  ;;  %v606_v43 = vsub.f32 %v7475_v21, %v590_v37  ;;  %v7588_v18 = vpop.f32.mrf.mxu2  ;;  %v1198_v21 = vsel %vm578_vm11, %v7567_v33, -inf }
 0x366   :  { %6016 = vmatmul.msk.f32.gmra.mxu3 %vm578_vm11, %v909_v22  ;;  %v1207_v25 = vsel %vm578_vm11, %v7588_v18, -inf }
 0x367   :  { %v7581_v39 = vpop.eup %6439  ;;  %v613_v0 = vmul.f32 1.442695, %v604_v52  ;;  %v617_v63 = vmul.f32 1.442695, %v606_v43 }
 0x368   :  { %v627_v59 = vsel %vm578_vm11, %v7581_v39, 0.0 }
 0x369   :  { %6441 = vpow2.f32 %v613_v0  ;;  %628 = vadd.xlane.f32.xlu0 %v627_v59  ;;  %v1204_v59 = vsel %vm578_vm11, %v7577_v49, -inf }
 0x36a   :  { %6443 = vpow2.f32 %v617_v63 }
 0x36c   :  { %v593_v1 = vpop.xlane.xlu0 %592  ;;  %v599_v8 = vpop.xlane.xlu2 %598 }
 0x36d   :  { %v607_v10 = vsub.f32 %v7482_v28, %v593_v1  ;;  %v609_v38 = vsub.f32 %v7489_v32, %v599_v8  ;;  %v7602_v61 = vpop.f32.mrf.mxu2  ;;  %v6056_v32 = vld [vmem:[%s11799_s2 + $0x50] sm:$0xff] }
 0x36e   :  { %1304 = vmatpush.msrb.mxu3 %v6056_v32  ;;  %v1210_v9 = vsel %vm578_vm11, %v7602_v61, -inf  ;;  %v6104_v8 = vld [vmem:[%s11799_s2 + $0x70] sm:$0xff] }
 0x36f   :  { %v7586_v5 = vpop.eup %6441  ;;  %v619_v50 = vmul.f32 1.442695, %v607_v10  ;;  %v623_v15 = vmul.f32 1.442695, %v609_v38  ;;  %v6103_v38 = vld [vmem:[%s11799_s2 + $0x68] sm:$0xff] }
 0x370   :  { %v630_v6 = vsel %vm578_vm11, %v7586_v5, 0.0  ;;  %v7595_v11 = vpop.eup %6443  ;;  %1305 = vmatpush.msrb.mxu3 %v6055_v3 }
 0x371   :  { %631 = vadd.xlane.f32.xlu2 %v630_v6  ;;  %1199 = vmax.xlane.f32.xlu0 %v1198_v21  ;;  %6445 = vpow2.f32 %v619_v50  ;;  %v636_v28 = vsel %vm578_vm11, %v7595_v11, 0.0  ;;  %v6105_v6 = vld [vmem:[%s11799_s2 + $0x78] sm:$0xff] }
 0x372   :  { %6447 = vpow2.f32 %v623_v15  ;;  %1306 = vmatpush.msrb.mxu3 %v6054_v2 }
 0x374   :  { %1621 = vmatpush.msra.mxu3 %v6105_v6 }
 0x375   :  { %v7622_v7 = vpop.f32.mrf.mxu2 }
 0x376   :  { %v1213_v21 = vsel %vm578_vm11, %v7622_v7, -inf  ;;  %1622 = vmatpush.msra.mxu3 %v6104_v8 }
 0x377   :  { %v7607_v26 = vpop.eup %6445 }
 0x378   :  { %v639_v23 = vsel %vm578_vm11, %v7607_v26, 0.0  ;;  %v7624_v31 = vpop.eup %6447  ;;  %1623 = vmatpush.msra.mxu3 %v6103_v38 }
 0x379   :  { %1202 = vmax.xlane.f32.xlu2 %v1201_v14  ;;  %637 = vadd.xlane.f32.xlu0 %v636_v28  ;;  %v645_v35 = vsel %vm578_vm11, %v7624_v31, 0.0  ;;  %v6102_v14 = vld [vmem:[%s11799_s2 + $0x60] sm:$0xff] }
 0x37a   :  { %1624 = vmatpush.msra.mxu3 %v6102_v14 }
 0x37d   :  { %v7630_v40 = vpop.f32.mrf.mxu2 }
 0x37e   :  { %v1216_v60 = vsel %vm578_vm11, %v7630_v40, -inf }
 0x381   :  { %640 = vadd.xlane.f32.xlu2 %v639_v23  ;;  %1208 = vmax.xlane.f32.xlu0 %v1207_v25 }
 0x385   :  { %v7659_v10 = vpop.f32.mrf.mxu2 }
 0x386   :  { %v1219_v50 = vsel %vm578_vm11, %v7659_v10, -inf }
 0x389   :  { %1211 = vmax.xlane.f32.xlu2 %v1210_v9  ;;  %646 = vadd.xlane.f32.xlu0 %v645_v35 }
 0x38d   :  { %v7700_v3 = vpop.f32.mrf.mxu2 }
 0x390   :  { %v894_v12 = vpop.xlane.xlu1 %893 }
 0x391   :  { %6449 = vrcp.f32 %v894_v12  ;;  %1217 = vmax.xlane.f32.xlu0 %v1216_v60 }
 0x395   :  { %v7713_v60 = vpop.f32.mrf.mxu2 }
 0x397   :  { %v6450_v62 = vpop.eup %6449 }
 0x398   :  { %v587_v58 = vpop.xlane.xlu1 %586  ;;  %v910_v29 = vmul.f32 %v6450_v62, %v7549_v4 }
 0x399   :  { %v605_v36 = vsub.f32 %v7468_v41, %v587_v58 }
 0x39a   :  { %6017 = vmatmul.msk.f32.gmra.mxu3 %vm578_vm11, %v910_v29 }
 0x39b   :  { %v615_v45 = vmul.f32 1.442695, %v605_v36  ;;  %v1519_v36 = vsel %vm578_vm11, %v7713_v60, -inf }
 0x39d   :  { %6451 = vpow2.f32 %v615_v45  ;;  %v7727_v58 = vpop.f32.mrf.mxu2 }
 0x3a0   :  { %v596_v46 = vpop.xlane.xlu1 %595 }
 0x3a1   :  { %v608_v22 = vsub.f32 %v7486_v30, %v596_v46 }
 0x3a2   :  { %6058 = vmatmul.msk.f32.vlgmr.msrb.gmra.mxu3 %vm50_vm0, %v7127_v57 }
 0x3a3   :  { %v7639_v37 = vpop.eup %6451  ;;  %v621_v0 = vmul.f32 1.442695, %v608_v22  ;;  %1953 = vmatpush.msrb.mxu3 %v7204_v53 }
 0x3a4   :  { %v633_v52 = vsel %vm578_vm11, %v7639_v37, 0.0 }
 0x3a5   :  { %634 = vadd.xlane.f32.xlu1 %v633_v52  ;;  %6453 = vpow2.f32 %v621_v0  ;;  %1954 = vmatpush.msrb.mxu3 %v7210_v55  ;;  %v7747_v46 = vpop.f32.mrf.mxu2  ;;  %v1522_v52 = vsel %vm578_vm11, %v7727_v58, -inf }
 0x3a7   :  { %1955 = vmatpush.msrb.mxu3 %v7216_v56 }
 0x3a8   :  { %v602_v4 = vpop.xlane.xlu1 %601 }
 0x3a9   :  { %v610_v41 = vsub.f32 %v7492_v34, %v602_v4  ;;  %1956 = vmatpush.msrb.mxu3 %v7222_v27 }
 0x3aa   :  { %6059 = vmatmul.msk.f32.gmra.mxu3 %vm50_vm0, %v7148_v17 }
 0x3ab   :  { %v625_v43 = vmul.f32 1.442695, %v610_v41  ;;  %v7649_v63 = vpop.eup %6453 }
 0x3ac   :  { %v642_v34 = vsel %vm578_vm11, %v7649_v63, 0.0 }
 0x3ad   :  { %6455 = vpow2.f32 %v625_v43  ;;  %1205 = vmax.xlane.f32.xlu1 %v1204_v59  ;;  %v7764_v41 = vpop.f32.mrf.mxu2  ;;  %v1525_v43 = vsel %vm578_vm11, %v7747_v46, -inf }
 0x3b2   :  { %6060 = vmatmul.msk.f32.gmra.mxu3 %vm50_vm0, %v7158_v24 }
 0x3b3   :  { %v7653_v30 = vpop.eup %6455 }
 0x3b4   :  { %v648_v1 = vsel %vm578_vm11, %v7653_v30, 0.0 }
 0x3b5   :  { %643 = vadd.xlane.f32.xlu1 %v642_v34  ;;  %649 = vadd.xlane.f32.xlu2 %v648_v1 }
 0x3b9   :  { %v7689_v28 = vpop.f32.mrf.mxu3 }
 0x3ba   :  { %6061 = vmatmul.msk.f32.gmra.mxu3 %vm50_vm0, %v7168_v44 }
 0x3bd   :  { %1214 = vmax.xlane.f32.xlu1 %v1213_v21  ;;  %1220 = vmax.xlane.f32.xlu2 %v1219_v50  ;;  %v1528_v21 = vsel %vm578_vm11, %v7764_v41, -inf  ;;  %v7781_v50 = vpop.f32.mrf.mxu2 }
 0x3c1   :  { %v7695_v55 = vpop.f32.mrf.mxu3 }
 0x3c2   :  { %6062 = vmatmul.msk.f32.gmra.mxu3 %vm50_vm0, %v7178_v48 }
 0x3c9   :  { %v7705_v9 = vpop.f32.mrf.mxu3 }
 0x3ca   :  { %6063 = vmatmul.msk.f32.gmra.mxu3 %vm50_vm0, %v7186_v51 }
 0x3d2   :  { %6064 = vmatmul.msk.f32.gmra.mxu3 %vm50_vm0, %v7195_v54 }
 0x3da   :  { %6065 = vmatmul.msk.f32.gmra.mxu3 %vm50_vm0, %v7241_v16 }
 0x3dc   :  { %v629_v15 = vpop.xlane.xlu0 %628 }
 0x3dd   :  { %6457 = vrcp.f32 %v629_v15 }
 0x3e2   :  { %6106 = vmatmul.msk.f32.vlgmr.msra.gmra.mxu3 %vm50_vm0, %v7127_v57 }
 0x3e3   :  { %v6458_v53 = vpop.eup %6457 }
 0x3e4   :  { %v659_v56 = vmul.f32 %v6458_v53, %v7581_v39  ;;  %v1200_v19 = vpop.xlane.xlu0 %1199  ;;  %v632_v27 = vpop.xlane.xlu2 %631 }
 0x3e5   :  { %v1222_v32 = vsub.f32 %v7567_v33, %v1200_v19  ;;  %6459 = vrcp.f32 %v632_v27  ;;  %v1531_v19 = vsel %vm578_vm11, %v7781_v50, -inf }
 0x3e6   :  { %6018 = vmatmul.msk.f32.vlgmr.msra.gmra.mxu1 %vm578_vm11, %v659_v56 }
 0x3e7   :  { %v1230_v23 = vmul.f32 1.442695, %v1222_v32  ;;  %v7799_v32 = vpop.f32.mrf.mxu2 }
 0x3e9   :  { %6461 = vpow2.f32 %v1230_v23 }
 0x3ea   :  { %6107 = vmatmul.msk.f32.gmra.mxu3 %vm50_vm0, %v7148_v17 }
 0x3eb   :  { %v6460_v57 = vpop.eup %6459 }
 0x3ec   :  { %v1203_v25 = vpop.xlane.xlu2 %1202  ;;  %v660_v2 = vmul.f32 %v6460_v57, %v7586_v5  ;;  %v7719_v5 = vpop.f32.mrf.mxu3 }
 0x3ed   :  { %v1223_v39 = vsub.f32 %v7571_v13, %v1203_v25  ;;  %v1516_v13 = vsel %vm578_vm11, %v7700_v3, -inf  ;;  %v638_v34 = vpop.xlane.xlu0 %637  ;;  %v7805_v25 = vld [vmem:[%s11796_s0 + $0x68] sm:$0xff] }
 0x3ee   :  { %6019 = vmatmul.msk.f32.gmra.mxu1 %vm578_vm11, %v660_v2 }
 0x3ef   :  { %v7709_v33 = vpop.eup %6461  ;;  %v1232_v35 = vmul.f32 1.442695, %v1223_v39 }
 0x3f0   :  { %v1246_v12 = vsel %vm578_vm11, %v7709_v33, 0.0 }
 0x3f1   :  { %6463 = vpow2.f32 %v1232_v35  ;;  %1247 = vadd.xlane.f32.xlu1 %v1246_v12 }
 0x3f2   :  { %6108 = vmatmul.msk.f32.gmra.mxu3 %vm50_vm0, %v7158_v24  ;;  %v7732_v24 = vld [vmem:[%s11796_s0 + $0x40] sm:$0xff] }
 0x3f3   :  { %v75_v29 = vsel %vm50_vm0, %v7732_v24, 0.0 }
 0x3f4   :  { %v7738_v45 = vpop.f32.mrf.mxu3  ;;  %v641_v38 = vpop.xlane.xlu2 %640 }
 0x3f5   :  { %11935 = vst [vmem:[#allocation3_spill] sm:$0xff] %v7738_v45  ;;  %v1209_v53 = vpop.xlane.xlu0 %1208 }
 0x3f6   :  { %v1225_v23 = vsub.f32 %v7588_v18, %v1209_v53  ;;  %v1534_v18 = vsel %vm578_vm11, %v7799_v32, -inf }
 0x3f7   :  { %v7717_v17 = vpop.eup %6463 }
 0x3f8   :  { %v1249_v62 = vsel %vm578_vm11, %v7717_v17, 0.0 }
 0x3f9   :  { %1517 = vmax.xlane.f32.xlu1 %v1516_v13  ;;  %1250 = vadd.xlane.f32.xlu0 %v1249_v62 }
 0x3fa   :  { %6109 = vmatmul.msk.f32.gmra.mxu3 %vm50_vm0, %v7168_v44  ;;  %v7745_v44 = vld [vmem:[%s11796_s0 + $0x48] sm:$0xff] }
 0x3fb   :  { %v78_v22 = vsel %vm50_vm0, %v7745_v44, 0.0 }
 0x3fc   :  { %v7755_v0 = vpop.f32.mrf.mxu3  ;;  %v1212_v35 = vpop.xlane.xlu2 %1211 }
 0x401   :  { %76 = vadd.xlane.f32.xlu1 %v75_v29  ;;  %1520 = vmax.xlane.f32.xlu0 %v1519_v36  ;;  %v1226_v29 = vsub.f32 %v7602_v61, %v1212_v35 }
 0x402   :  { %6110 = vmatmul.msk.f32.gmra.mxu3 %vm50_vm0, %v7178_v48  ;;  %v7760_v48 = vld [vmem:[%s11796_s0 + $0x50] sm:$0xff] }
 0x403   :  { %v81_v4 = vsel %vm50_vm0, %v7760_v48, 0.0 }
 0x404   :  { %v7775_v59 = vpop.f32.mrf.mxu3 }
 0x409   :  { %79 = vadd.xlane.f32.xlu1 %v78_v22  ;;  %1523 = vmax.xlane.f32.xlu0 %v1522_v52  ;;  %v7820_v52 = vpop.f32.mrf.mxu2 }
 0x40a   :  { %6111 = vmatmul.msk.f32.gmra.mxu3 %vm50_vm0, %v7186_v51  ;;  %v7773_v51 = vld [vmem:[%s11796_s0 + $0x58] sm:$0xff] }
 0x40b   :  { %v84_v1 = vsel %vm50_vm0, %v7773_v51, 0.0 }
 0x411   :  { %82 = vadd.xlane.f32.xlu1 %v81_v4  ;;  %1526 = vmax.xlane.f32.xlu0 %v1525_v43  ;;  %v647_v43 = vpop.xlane.xlu0 %646 }
 0x412   :  { %6112 = vmatmul.msk.f32.gmra.mxu3 %vm50_vm0, %v7195_v54  ;;  %v7788_v54 = vld [vmem:[%s11796_s0 + $0x60] sm:$0xff] }
 0x413   :  { %v87_v14 = vsel %vm50_vm0, %v7788_v54, 0.0 }
 0x418   :  { %v635_v6 = vpop.xlane.xlu1 %634 }
 0x419   :  { %6465 = vrcp.f32 %v635_v6  ;;  %85 = vadd.xlane.f32.xlu1 %v84_v1  ;;  %1529 = vmax.xlane.f32.xlu0 %v1528_v21  ;;  %v1537_v1 = vsel %vm578_vm11, %v7820_v52, -inf }
 0x41a   :  { %6113 = vmatmul.msk.f32.gmra.mxu3 %vm50_vm0, %v7241_v16  ;;  %6467 = vrcp.f32 %v638_v34 }
 0x41d   :  { %v7790_v8 = vpop.f32.mrf.mxu3 }
 0x41e   :  { %11936 = vst [vmem:[#allocation4_spill] sm:$0xff] %v7790_v8 }
 0x41f   :  { %v6466_v15 = vpop.eup %6465 }
 0x420   :  { %v1206_v56 = vpop.xlane.xlu1 %1205  ;;  %v661_v16 = vmul.f32 %v6466_v15, %v7639_v37  ;;  %v6468_v2 = vpop.eup %6467  ;;  %v1236_v37 = vmul.f32 1.442695, %v1225_v23 }
 0x421   :  { %v1224_v27 = vsub.f32 %v7577_v49, %v1206_v56  ;;  %88 = vadd.xlane.f32.xlu1 %v87_v14  ;;  %1532 = vmax.xlane.f32.xlu0 %v1531_v19  ;;  %v90_v49 = vsel %vm50_vm0, %v7805_v25, 0.0  ;;  %v662_v13 = vmul.f32 %v6468_v2, %v7595_v11  ;;  %v1238_v11 = vmul.f32 1.442695, %v1226_v29  ;;  %v1218_v19 = vpop.xlane.xlu0 %1217 }
 0x422   :  { %6020 = vmatmul.msk.f32.gmra.mxu1 %vm578_vm11, %v661_v16 }
 0x423   :  { %v1234_v57 = vmul.f32 1.442695, %v1224_v27  ;;  %v1228_v27 = vsub.f32 %v7630_v40, %v1218_v19 }
 0x425   :  { %6469 = vpow2.f32 %v1234_v57  ;;  %v7807_v39 = vpop.f32.mrf.mxu3  ;;  %v1242_v2 = vmul.f32 1.442695, %v1228_v27 }
 0x426   :  { %6471 = vrcp.f32 %v641_v38 }
 0x427   :  { %6473 = vpow2.f32 %v1236_v37 }
 0x428   :  { %v644_v12 = vpop.xlane.xlu1 %643  ;;  %v650_v53 = vpop.xlane.xlu2 %649 }
 0x429   :  { %91 = vadd.xlane.f32.xlu1 %v90_v49  ;;  %1535 = vmax.xlane.f32.xlu0 %v1534_v18  ;;  %6475 = vrcp.f32 %v644_v12 }
 0x42a   :  { %6021 = vmatmul.msk.f32.gmra.mxu1 %vm578_vm11, %v662_v13  ;;  %6477 = vpow2.f32 %v1238_v11 }
 0x42b   :  { %v7815_v62 = vpop.eup %6469  ;;  %6479 = vrcp.f32 %v647_v43 }
 0x42c   :  { %v1252_v36 = vsel %vm578_vm11, %v7815_v62, 0.0  ;;  %v6472_v22 = vpop.eup %6471 }
 0x42d   :  { %v7822_v4 = vpop.f32.mrf.mxu3  ;;  %1253 = vadd.xlane.f32.xlu2 %v1252_v36  ;;  %v663_v6 = vmul.f32 %v6472_v22, %v7607_v26  ;;  %v7827_v21 = vpop.eup %6473 }
 0x42e   :  { %v1255_v38 = vsel %vm578_vm11, %v7827_v21, 0.0 }
 0x42f   :  { %v6476_v14 = vpop.eup %6475 }
 0x430   :  { %v1215_v34 = vpop.xlane.xlu1 %1214  ;;  %v664_v26 = vmul.f32 %v6476_v14, %v7649_v63  ;;  %v7834_v16 = vpop.eup %6477 }
 0x431   :  { %1538 = vmax.xlane.f32.xlu0 %v1537_v1  ;;  %v1227_v61 = vsub.f32 %v7622_v7, %v1215_v34  ;;  %v1258_v7 = vsel %vm578_vm11, %v7834_v16, 0.0  ;;  %v6480_v23 = vpop.eup %6479  ;;  %v1221_v49 = vpop.xlane.xlu2 %1220 }
 0x432   :  { %6022 = vmatmul.msk.f32.gmra.mxu1 %vm578_vm11, %v663_v6  ;;  %v665_v37 = vmul.f32 %v6480_v23, %v7624_v31  ;;  %v1229_v63 = vsub.f32 %v7659_v10, %v1221_v49  ;;  %v7885_v49 = vld [vmem:[%s11796_s0 + $0x70] sm:$0xff] }
 0x433   :  { %v1240_v56 = vmul.f32 1.442695, %v1227_v61 }
 0x434   :  { %v1244_v13 = vmul.f32 1.442695, %v1229_v63 }
 0x435   :  { %v1314_v15 = vpop.f32.mrf.mxu3  ;;  %1256 = vadd.xlane.f32.xlu2 %v1255_v38  ;;  %6481 = vpow2.f32 %v1240_v56 }
 0x436   :  { %6483 = vrcp.f32 %v650_v53 }
 0x437   :  { %6485 = vpow2.f32 %v1242_v2 }
 0x438   :  { %6487 = vpow2.f32 %v1244_v13 }
 0x43a   :  { %6023 = vmatmul.msk.f32.gmra.mxu1 %vm578_vm11, %v664_v26 }
 0x43b   :  { %v7841_v35 = vpop.eup %6481 }
 0x43c   :  { %v1261_v40 = vsel %vm578_vm11, %v7841_v35, 0.0  ;;  %v6484_v12 = vpop.eup %6483 }
 0x43d   :  { %v1317_v57 = vpop.f32.mrf.mxu3  ;;  %1259 = vadd.xlane.f32.xlu2 %v1258_v7  ;;  %v666_v29 = vmul.f32 %v6484_v12, %v7653_v30  ;;  %v7848_v36 = vpop.eup %6485 }
 0x43e   :  { %v1264_v31 = vsel %vm578_vm11, %v7848_v36, 0.0  ;;  %v7853_v10 = vpop.eup %6487 }
 0x43f   :  { %v1267_v43 = vsel %vm578_vm11, %v7853_v10, 0.0 }
 0x442   :  { %6024 = vmatmul.msk.f32.gmra.mxu1 %vm578_vm11, %v665_v37 }
 0x445   :  { %v1320_v18 = vpop.f32.mrf.mxu3  ;;  %1262 = vadd.xlane.f32.xlu2 %v1261_v40 }
 0x44a   :  { %6025 = vmatmul.msk.f32.gmra.mxu1 %vm578_vm11, %v666_v29 }
 0x44d   :  { %v1323_v22 = vpop.f32.mrf.mxu3  ;;  %1265 = vadd.xlane.f32.xlu2 %v1264_v31 }
 0x455   :  { %v1326_v11 = vpop.f32.mrf.mxu3  ;;  %1268 = vadd.xlane.f32.xlu2 %v1267_v43 }
 0x45d   :  { %v1329_v34 = vpop.f32.mrf.mxu3 }
 0x45e   :  { %1364 = vmatpush.msrb.mxu1 %v1329_v34 }
 0x460   :  { %1365 = vmatpush.msrb.mxu1 %v1326_v11  ;;  %v7906_v11 = vld [vmem:[%s11796_s0 + $0x78] sm:$0xff] }
 0x462   :  { %1366 = vmatpush.msrb.mxu1 %v1323_v22 }
 0x464   :  { %v1248_v30 = vpop.xlane.xlu1 %1247  ;;  %1367 = vmatpush.msrb.mxu1 %v1320_v18  ;;  %v93_v18 = vsel %vm50_vm0, %v7885_v49, 0.0 }
 0x465   :  { %6489 = vrcp.f32 %v1248_v30  ;;  %v7857_v1 = vpop.f32.mrf.mxu3 }
 0x466   :  { %1368 = vmatpush.msrb.mxu1 %v1317_v57 }
 0x468   :  { %1369 = vmatpush.msrb.mxu1 %v1314_v15 }
 0x46a   :  { %1370 = vmatpush.msrb.mxu1 %v7822_v4 }
 0x46b   :  { %v6490_v6 = vpop.eup %6489 }
 0x46c   :  { %v1278_v61 = vmul.f32 %v6490_v6, %v7709_v33  ;;  %v1518_v38 = vpop.xlane.xlu1 %1517  ;;  %v1251_v14 = vpop.xlane.xlu0 %1250  ;;  %1371 = vmatpush.msrb.mxu1 %v7807_v39 }
 0x46d   :  { %v1540_v53 = vsub.f32 %v7700_v3, %v1518_v38  ;;  %6491 = vrcp.f32 %v1251_v14  ;;  %v7863_v56 = vpop.f32.mrf.mxu3  ;;  %v96_v38 = vsel %vm50_vm0, %v7906_v11, 0.0 }
 0x46e   :  { %6066 = vmatmul.msk.f32.vlgmr.msrb.gmra.mxu1 %vm578_vm11, %v1278_v61 }
 0x46f   :  { %v1548_v19 = vmul.f32 1.442695, %v1540_v53 }
 0x471   :  { %6493 = vpow2.f32 %v1548_v19 }
 0x473   :  { %v6492_v26 = vpop.eup %6491 }
 0x474   :  { %v77_v15 = vpop.xlane.xlu1 %76  ;;  %v1521_v27 = vpop.xlane.xlu0 %1520  ;;  %v1279_v4 = vmul.f32 %v6492_v26, %v7717_v17 }
 0x475   :  { %v114_v33 = vmul.f32 %v7006_v20, %v77_v15  ;;  %v1541_v7 = vsub.f32 %v7713_v60, %v1521_v27  ;;  %v7869_v23 = vpop.f32.mrf.mxu3 }
 0x476   :  { %6067 = vmatmul.msk.f32.gmra.mxu1 %vm578_vm11, %v1279_v4 }
 0x477   :  { %v7872_v3 = vpop.eup %6493  ;;  %v7875_v39 = vsub.f32 %v7732_v24, %v114_v33  ;;  %v1550_v57 = vmul.f32 1.442695, %v1541_v7 }
 0x478   :  { %v1564_v2 = vsel %vm578_vm11, %v7872_v3, 0.0 }
 0x479   :  { %6495 = vpow2.f32 %v1550_v57  ;;  %1565 = vadd.xlane.f32.xlu2 %v1564_v2  ;;  %v146_v17 = vmul.f32 %v7875_v39, %v7875_v39 }
 0x47b   :  { %v178_v60 = vsel %vm50_vm0, %v146_v17, 0.0 }
 0x47c   :  { %179 = vadd.xlane.f32.xlu1 %v178_v60  ;;  %v80_v37 = vpop.xlane.xlu1 %79  ;;  %v1524_v24 = vpop.xlane.xlu0 %1523 }
 0x47d   :  { %v115_v63 = vmul.f32 %v7006_v20, %v80_v37  ;;  %v1542_v40 = vsub.f32 %v7727_v58, %v1524_v24  ;;  %v7889_v12 = vpop.f32.mrf.mxu3 }
 0x47f   :  { %v7893_v13 = vpop.eup %6495  ;;  %v7896_v29 = vsub.f32 %v7745_v44, %v115_v63  ;;  %v1552_v31 = vmul.f32 1.442695, %v1542_v40 }
 0x480   :  { %v1567_v22 = vsel %vm578_vm11, %v7893_v13, 0.0 }
 0x481   :  { %6497 = vpow2.f32 %v1552_v31  ;;  %1568 = vadd.xlane.f32.xlu0 %v1567_v22  ;;  %94 = vadd.xlane.f32.xlu2 %v93_v18  ;;  %v147_v58 = vmul.f32 %v7896_v29, %v7896_v29 }
 0x483   :  { %v181_v43 = vsel %vm50_vm0, %v147_v58, 0.0 }
 0x484   :  { %182 = vadd.xlane.f32.xlu1 %v181_v43  ;;  %v83_v44 = vpop.xlane.xlu1 %82  ;;  %v1527_v34 = vpop.xlane.xlu0 %1526 }
 0x485   :  { %v116_v30 = vmul.f32 %v7006_v20, %v83_v44  ;;  %v1543_v6 = vsub.f32 %v7747_v46, %v1527_v34  ;;  %v1638_v61 = vpop.f32.mrf.mxu3 }
 0x487   :  { %v7912_v14 = vpop.eup %6497  ;;  %v7915_v53 = vsub.f32 %v7760_v48, %v116_v30  ;;  %v1554_v19 = vmul.f32 1.442695, %v1543_v6 }
 0x488   :  { %v1570_v26 = vsel %vm578_vm11, %v7912_v14, 0.0 }
 0x489   :  { %6499 = vpow2.f32 %v1554_v19  ;;  %1571 = vadd.xlane.f32.xlu0 %v1570_v26  ;;  %97 = vadd.xlane.f32.xlu2 %v96_v38  ;;  %v148_v15 = vmul.f32 %v7915_v53, %v7915_v53 }
 0x48b   :  { %v184_v46 = vsel %vm50_vm0, %v148_v15, 0.0 }
 0x48c   :  { %185 = vadd.xlane.f32.xlu1 %v184_v46  ;;  %v86_v27 = vpop.xlane.xlu1 %85  ;;  %v1530_v4 = vpop.xlane.xlu0 %1529 }
 0x48d   :  { %v117_v33 = vmul.f32 %v7006_v20, %v86_v27  ;;  %v1544_v48 = vsub.f32 %v7764_v41, %v1530_v4  ;;  %v1641_v7 = vpop.f32.mrf.mxu3 }
 0x48f   :  { %v7924_v57 = vpop.eup %6499  ;;  %v7927_v2 = vsub.f32 %v7773_v51, %v117_v33  ;;  %v1556_v17 = vmul.f32 1.442695, %v1544_v48 }
 0x490   :  { %v1573_v60 = vsel %vm578_vm11, %v7924_v57, 0.0 }
 0x491   :  { %6501 = vpow2.f32 %v1556_v17  ;;  %1574 = vadd.xlane.f32.xlu2 %v1573_v60  ;;  %v149_v37 = vmul.f32 %v7927_v2, %v7927_v2 }
 0x493   :  { %v187_v24 = vsel %vm50_vm0, %v149_v37, 0.0 }
 0x494   :  { %v89_v63 = vpop.xlane.xlu1 %88  ;;  %188 = vadd.xlane.f32.xlu0 %v187_v24  ;;  %v1533_v41 = vpop.xlane.xlu0 %1532 }
 0x495   :  { %v118_v40 = vmul.f32 %v7006_v20, %v89_v63  ;;  %v1545_v18 = vsub.f32 %v7781_v50, %v1533_v41  ;;  %v1644_v51 = vpop.f32.mrf.mxu3  ;;  %v6843_v63 = vld [vmem:[%s11797_s1 + $0x28] sm:$0xff]  ;;  %v6844_v41 = vld [vmem:[%s11797_s1 + $0x20] sm:$0xff] }
 0x497   :  { %v7936_v31 = vpop.eup %6501  ;;  %v7939_v22 = vsub.f32 %v7788_v54, %v118_v40  ;;  %v1558_v58 = vmul.f32 1.442695, %v1545_v18 }
 0x498   :  { %v1576_v43 = vsel %vm578_vm11, %v7936_v31, 0.0 }
 0x499   :  { %6503 = vpow2.f32 %v1558_v58  ;;  %1577 = vadd.xlane.f32.xlu1 %v1576_v43  ;;  %v150_v44 = vmul.f32 %v7939_v22, %v7939_v22 }
 0x49b   :  { %v190_v34 = vsel %vm50_vm0, %v150_v44, 0.0 }
 0x49c   :  { %v92_v30 = vpop.xlane.xlu1 %91  ;;  %v1536_v6 = vpop.xlane.xlu0 %1535  ;;  %191 = vadd.xlane.f32.xlu2 %v190_v34 }
 0x49d   :  { %v119_v50 = vmul.f32 %v7006_v20, %v92_v30  ;;  %v1546_v38 = vsub.f32 %v7799_v32, %v1536_v6  ;;  %v1647_v54 = vpop.f32.mrf.mxu3 }
 0x49e   :  { %1682 = vmatpush.msra.mxu1 %v1647_v54 }
 0x49f   :  { %v7948_v19 = vpop.eup %6503  ;;  %v7951_v26 = vsub.f32 %v7805_v25, %v119_v50  ;;  %v1560_v15 = vmul.f32 1.442695, %v1546_v38  ;;  %v7995_v50 = vpop.f32.mrf.mxu1 }
 0x4a0   :  { %1683 = vmatpush.msra.mxu1 %v1644_v51  ;;  %v1579_v46 = vsel %vm578_vm11, %v7948_v19, 0.0  ;;  %v1254_v27 = vpop.xlane.xlu2 %1253 }
 0x4a1   :  { %6505 = vpow2.f32 %v1560_v15  ;;  %1580 = vadd.xlane.f32.xlu0 %v1579_v46  ;;  %v151_v4 = vmul.f32 %v7951_v26, %v7951_v26 }
 0x4a2   :  { %6507 = vrcp.f32 %v1254_v27  ;;  %1684 = vmatpush.msra.mxu1 %v1641_v7 }
 0x4a3   :  { %v193_v32 = vsel %vm50_vm0, %v151_v4, 0.0 }
 0x4a4   :  { %194 = vadd.xlane.f32.xlu1 %v193_v32  ;;  %v1539_v33 = vpop.xlane.xlu0 %1538  ;;  %1685 = vmatpush.msra.mxu1 %v1638_v61 }
 0x4a5   :  { %v1547_v25 = vsub.f32 %v7820_v52, %v1539_v33  ;;  %v6841_v52 = vld [vmem:[%s11797_s1 + $0x38] sm:$0xff] }
 0x4a6   :  { %1686 = vmatpush.msra.mxu1 %v7889_v12  ;;  %v6842_v12 = vld [vmem:[%s11797_s1 + $0x30] sm:$0xff] }
 0x4a7   :  { %v7960_v48 = vpop.eup %6505  ;;  %v1562_v17 = vmul.f32 1.442695, %v1547_v25  ;;  %v7997_v38 = vpop.f32.mrf.mxu1 }
 0x4a8   :  { %v6508_v60 = vpop.eup %6507  ;;  %1687 = vmatpush.msra.mxu1 %v7869_v23  ;;  %v1582_v37 = vsel %vm578_vm11, %v7960_v48, 0.0  ;;  %v1257_v24 = vpop.xlane.xlu2 %1256 }
 0x4a9   :  { %6509 = vpow2.f32 %v1562_v17  ;;  %1583 = vadd.xlane.f32.xlu2 %v1582_v37  ;;  %v1280_v7 = vmul.f32 %v6508_v60, %v7815_v62 }
 0x4aa   :  { %6511 = vrcp.f32 %v1257_v24  ;;  %1688 = vmatpush.msra.mxu1 %v7863_v56 }
 0x4ab   :  { %6068 = vmatmul.msk.f32.gmra.mxu1 %vm578_vm11, %v1280_v7 }
 0x4ac   :  { %1689 = vmatpush.msra.mxu1 %v7857_v1 }
 0x4ae   :  { %1994 = vmatpush.msrb.mxu1 %v6841_v52 }
 0x4af   :  { %v7972_v23 = vpop.eup %6509  ;;  %v7999_v54 = vpop.f32.mrf.mxu1 }
 0x4b0   :  { %1995 = vmatpush.msrb.mxu1 %v6842_v12  ;;  %v6512_v62 = vpop.eup %6511  ;;  %v1585_v56 = vsel %vm578_vm11, %v7972_v23, 0.0  ;;  %v1260_v61 = vpop.xlane.xlu2 %1259 }
 0x4b1   :  { %1586 = vadd.xlane.f32.xlu1 %v1585_v56  ;;  %6513 = vrcp.f32 %v1260_v61  ;;  %v1281_v1 = vmul.f32 %v6512_v62, %v7827_v21 }
 0x4b2   :  { %1996 = vmatpush.msrb.mxu1 %v6843_v63 }
 0x4b3   :  { %6069 = vmatmul.msk.f32.gmra.mxu1 %vm578_vm11, %v1281_v1 }
 0x4b4   :  { %1997 = vmatpush.msrb.mxu1 %v6844_v41 }
 0x4b7   :  { %v6514_v40 = vpop.eup %6513  ;;  %v8005_v25 = vpop.f32.mrf.mxu1 }
 0x4b8   :  { %v1263_v18 = vpop.xlane.xlu2 %1262  ;;  %v1282_v51 = vmul.f32 %v6514_v40, %v7834_v16 }
 0x4b9   :  { %6515 = vrcp.f32 %v1263_v18 }
 0x4bb   :  { %6070 = vmatmul.msk.f32.gmra.mxu1 %vm578_vm11, %v1282_v51 }
 0x4bf   :  { %v6516_v21 = vpop.eup %6515 }
 0x4c0   :  { %v1266_v58 = vpop.xlane.xlu2 %1265  ;;  %v1283_v43 = vmul.f32 %v6516_v21, %v7841_v35  ;;  %v8021_v21 = vpop.f32.mrf.mxu1 }
 0x4c1   :  { %6517 = vrcp.f32 %v1266_v58  ;;  %11937 = vst [vmem:[#allocation5_spill] sm:$0xff] %v8021_v21 }
 0x4c3   :  { %6071 = vmatmul.msk.f32.gmra.mxu1 %vm578_vm11, %v1283_v43 }
 0x4c7   :  { %v6518_v44 = vpop.eup %6517 }
 0x4c8   :  { %v1269_v34 = vpop.xlane.xlu2 %1268  ;;  %v1284_v30 = vmul.f32 %v6518_v44, %v7848_v36 }
 0x4c9   :  { %6519 = vrcp.f32 %v1269_v34 }
 0x4cb   :  { %6072 = vmatmul.msk.f32.gmra.mxu1 %vm578_vm11, %v1284_v30 }
 0x4cf   :  { %v6520_v6 = vpop.eup %6519 }
 0x4d0   :  { %v1285_v16 = vmul.f32 %v6520_v6, %v7853_v10 }
 0x4d3   :  { %6073 = vmatmul.msk.f32.gmra.mxu1 %vm578_vm11, %v1285_v16 }
 0x4ec   :  { %v1566_v35 = vpop.xlane.xlu2 %1565 }
 0x4ed   :  { %6521 = vrcp.f32 %v1566_v35 }
 0x4ef   :  { %v180_v15 = vpop.xlane.xlu1 %179 }
 0x4f0   :  { %v210_v46 = vmul.f32 %v180_v15, %v7006_v20 }
 0x4f2   :  { %v226_v36 = vadd.f32 1e-05, %v210_v46 }
 0x4f3   :  { %v6522_v27 = vpop.eup %6521 }
 0x4f4   :  { %v1596_v4 = vmul.f32 %v6522_v27, %v7872_v3  ;;  %6523 = vrsqrt.f32 %v226_v36  ;;  %v1569_v32 = vpop.xlane.xlu0 %1568  ;;  %v95_v10 = vpop.xlane.xlu2 %94  ;;  %vm320_vm12 = vweird.f32 %v226_v36 }
 0x4f5   :  { %6525 = vrcp.f32 %v1569_v32  ;;  %v120_v33 = vmul.f32 %v7006_v20, %v95_v10 }
 0x4f6   :  { %6114 = vmatmul.msk.f32.vlgmr.msra.gmra.mxu1 %vm578_vm11, %v1596_v4 }
 0x4f7   :  { %v8008_v17 = vsub.f32 %v7885_v49, %v120_v33  ;;  %v183_v60 = vpop.xlane.xlu1 %182 }
 0x4f8   :  { %v211_v37 = vmul.f32 %v183_v60, %v7006_v20 }
 0x4f9   :  { %v152_v24 = vmul.f32 %v8008_v17, %v8008_v17 }
 0x4fa   :  { %v6524_v3 = vpop.eup %6523  ;;  %v227_v7 = vadd.f32 1e-05, %v211_v37 }
 0x4fb   :  { %v6526_v52 = vpop.eup %6525  ;;  %v315_v12 = vmul.f32 %v6524_v3, %v226_v36  ;;  %v196_v62 = vsel %vm50_vm0, %v152_v24, 0.0  ;;  %vm321_vm13 = vweird.f32 %v6524_v3 }
 0x4fc   :  { %6527 = vrsqrt.f32 %v227_v7  ;;  %v1572_v56 = vpop.xlane.xlu0 %1571  ;;  %197 = vadd.xlane.f32.xlu0 %v196_v62  ;;  %v98_v61 = vpop.xlane.xlu2 %97  ;;  %v1597_v1 = vmul.f32 %v6526_v52, %v7893_v13  ;;  %vm322_vm14 = vmor %vm320_vm12, %vm321_vm13  ;;  %vm330_vm15 = vweird.f32 %v227_v7 }
 0x4fd   :  { %v316_v49 = vmul.f32 %v6524_v3, %v315_v12  ;;  %6529 = vrcp.f32 %v1572_v56  ;;  %v121_v63 = vmul.f32 %v7006_v20, %v98_v61 }
 0x4fe   :  { %6115 = vmatmul.msk.f32.gmra.mxu1 %vm578_vm11, %v1597_v1 }
 0x4ff   :  { %v317_v41 = vmul.f32 0.5, %v316_v49  ;;  %v8018_v40 = vsub.f32 %v7906_v11, %v121_v63  ;;  %v186_v18 = vpop.xlane.xlu1 %185 }
 0x500   :  { %v212_v51 = vmul.f32 %v186_v18, %v7006_v20 }
 0x501   :  { %v318_v58 = vsub.f32 1.5, %v317_v41  ;;  %v153_v13 = vmul.f32 %v8018_v40, %v8018_v40 }
 0x502   :  { %v6528_v43 = vpop.eup %6527  ;;  %v228_v44 = vadd.f32 1e-05, %v212_v51 }
 0x503   :  { %v6530_v34 = vpop.eup %6529  ;;  %v319_v30 = vmul.f32 %v6524_v3, %v318_v58  ;;  %v325_v6 = vmul.f32 %v6528_v43, %v227_v7  ;;  %v199_v16 = vsel %vm50_vm0, %v153_v13, 0.0  ;;  %vm331_vm1 = vweird.f32 %v6528_v43 }
 0x504   :  { %6531 = vrsqrt.f32 %v228_v44  ;;  %200 = vadd.xlane.f32.xlu2 %v199_v16  ;;  %v1575_v11 = vpop.xlane.xlu2 %1574  ;;  %v1598_v35 = vmul.f32 %v6530_v34, %v7912_v14  ;;  %vm332_vm2 = vmor %vm330_vm15, %vm331_vm1  ;;  %vm340_vm3 = vweird.f32 %v228_v44 }
 0x505   :  { %v323_v15 = vsel %vm322_vm14, %v6524_v3, %v319_v30  ;;  %v326_v46 = vmul.f32 %v6528_v43, %v325_v6  ;;  %6533 = vrcp.f32 %v1575_v11  ;;  %v8034_v3 = vpop.f32.mrf.mxu1 }
 0x506   :  { %v402_v36 = vmul.f32 %v323_v15, %v7875_v39  ;;  %6116 = vmatmul.msk.f32.gmra.mxu1 %vm578_vm11, %v1598_v35 }
 0x507   :  { %v327_v27 = vmul.f32 0.5, %v326_v46  ;;  %v189_v4 = vpop.xlane.xlu0 %188 }
 0x508   :  { %v419_v32 = vmul.f32 %v7115_v42, %v402_v36  ;;  %v213_v10 = vmul.f32 %v189_v4, %v7006_v20 }
 0x509   :  { %v328_v33 = vsub.f32 1.5, %v327_v27 }
 0x50a   :  { %v6532_v60 = vpop.eup %6531  ;;  %v8032_v37 = vadd.f32 %v7118_v47, %v419_v32  ;;  %v229_v14 = vadd.f32 1e-05, %v213_v10 }
 0x50b   :  { %v6534_v24 = vpop.eup %6533  ;;  %v329_v39 = vmul.f32 %v6528_v43, %v328_v33  ;;  %v335_v52 = vmul.f32 %v6532_v60, %v228_v44  ;;  %vm341_vm4 = vweird.f32 %v6532_v60 }
 0x50c   :  { %6535 = vrsqrt.f32 %v229_v14  ;;  %6122 = vmatmul.msk.f32.vlgmr.msra.gmra.mxu0 %vm50_vm0, %v8032_v37  ;;  %6146 = vmatmul.msk.f32.vlgmr.msrb.gmra.mxu3 %vm50_vm0, %v8032_v37  ;;  %v1578_v7 = vpop.xlane.xlu1 %1577  ;;  %v1599_v12 = vmul.f32 %v6534_v24, %v7924_v57  ;;  %vm342_vm5 = vmor %vm340_vm3, %vm341_vm4  ;;  %vm350_vm6 = vweird.f32 %v229_v14 }
 0x50d   :  { %v333_v62 = vsel %vm332_vm2, %v6528_v43, %v329_v39  ;;  %v336_v56 = vmul.f32 %v6532_v60, %v335_v52  ;;  %6537 = vrcp.f32 %v1578_v7  ;;  %v8053_v30 = vpop.f32.mrf.mxu1 }
 0x50e   :  { %v403_v61 = vmul.f32 %v333_v62, %v7896_v29  ;;  %6117 = vmatmul.msk.f32.gmra.mxu1 %vm578_vm11, %v1599_v12 }
 0x50f   :  { %v337_v1 = vmul.f32 0.5, %v336_v56  ;;  %v192_v49 = vpop.xlane.xlu2 %191 }
 0x510   :  { %v420_v63 = vmul.f32 %v7115_v42, %v403_v61  ;;  %v214_v41 = vmul.f32 %v192_v49, %v7006_v20 }
 0x511   :  { %v338_v18 = vsub.f32 1.5, %v337_v1 }
 0x512   :  { %v6536_v51 = vpop.eup %6535  ;;  %v8046_v58 = vadd.f32 %v7118_v47, %v420_v63  ;;  %v230_v57 = vadd.f32 1e-05, %v214_v41 }
 0x513   :  { %v6538_v13 = vpop.eup %6537  ;;  %v339_v43 = vmul.f32 %v6532_v60, %v338_v18  ;;  %v345_v29 = vmul.f32 %v6536_v51, %v229_v14  ;;  %vm351_vm7 = vweird.f32 %v6536_v51 }
 0x514   :  { %6539 = vrsqrt.f32 %v230_v57  ;;  %6123 = vmatmul.msk.f32.gmra.mxu0 %vm50_vm0, %v8046_v58  ;;  %6147 = vmatmul.msk.f32.gmra.mxu3 %vm50_vm0, %v8046_v58  ;;  %v1581_v44 = vpop.xlane.xlu0 %1580  ;;  %v1600_v34 = vmul.f32 %v6538_v13, %v7936_v31  ;;  %vm352_vm8 = vmor %vm350_vm6, %vm351_vm7  ;;  %vm360_vm9 = vweird.f32 %v230_v57 }
 0x515   :  { %v343_v6 = vsel %vm342_vm5, %v6532_v60, %v339_v43  ;;  %v346_v16 = vmul.f32 %v6536_v51, %v345_v29  ;;  %6541 = vrcp.f32 %v1581_v44  ;;  %v8069_v7 = vpop.f32.mrf.mxu1 }
 0x516   :  { %v404_v11 = vmul.f32 %v343_v6, %v7915_v53  ;;  %6118 = vmatmul.msk.f32.gmra.mxu1 %vm578_vm11, %v1600_v34  ;;  %11938 = vst [vmem:[#allocation6_spill] sm:$0xff] %v8069_v7 }
 0x517   :  { %v347_v35 = vmul.f32 0.5, %v346_v16  ;;  %v195_v15 = vpop.xlane.xlu1 %194 }
 0x518   :  { %v421_v46 = vmul.f32 %v7115_v42, %v404_v11  ;;  %v215_v36 = vmul.f32 %v195_v15, %v7006_v20 }
 0x519   :  { %v348_v27 = vsub.f32 1.5, %v347_v35 }
 0x51a   :  { %v6540_v4 = vpop.eup %6539  ;;  %v8060_v31 = vadd.f32 %v7118_v47, %v421_v46  ;;  %v231_v32 = vadd.f32 1e-05, %v215_v36 }
 0x51b   :  { %v6542_v10 = vpop.eup %6541  ;;  %v349_v33 = vmul.f32 %v6536_v51, %v348_v27  ;;  %v355_v53 = vmul.f32 %v6540_v4, %v230_v57  ;;  %vm361_vm10 = vweird.f32 %v6540_v4 }
 0x51c   :  { %6543 = vrsqrt.f32 %v231_v32  ;;  %6124 = vmatmul.msk.f32.gmra.mxu0 %vm50_vm0, %v8060_v31  ;;  %6148 = vmatmul.msk.f32.gmra.mxu3 %vm50_vm0, %v8060_v31  ;;  %v1584_v60 = vpop.xlane.xlu2 %1583  ;;  %v1601_v14 = vmul.f32 %v6542_v10, %v7948_v19  ;;  %vm362_vm12 = vmor %vm360_vm9, %vm361_vm10  ;;  %vm370_vm13 = vweird.f32 %v231_v32 }
 0x51d   :  { %v353_v24 = vsel %vm352_vm8, %v6536_v51, %v349_v33  ;;  %v356_v39 = vmul.f32 %v6540_v4, %v355_v53  ;;  %6545 = vrcp.f32 %v1584_v60  ;;  %v8082_v13 = vpop.f32.mrf.mxu1 }
 0x51e   :  { %v405_v52 = vmul.f32 %v353_v24, %v7927_v2  ;;  %6119 = vmatmul.msk.f32.gmra.mxu1 %vm578_vm11, %v1601_v14 }
 0x51f   :  { %v357_v12 = vmul.f32 0.5, %v356_v39 }
 0x520   :  { %v422_v62 = vmul.f32 %v7115_v42, %v405_v52 }
 0x521   :  { %v358_v56 = vsub.f32 1.5, %v357_v12 }
 0x522   :  { %v6544_v61 = vpop.eup %6543  ;;  %v8073_v1 = vadd.f32 %v7118_v47, %v422_v62 }
 0x523   :  { %v6546_v19 = vpop.eup %6545  ;;  %v359_v49 = vmul.f32 %v6540_v4, %v358_v56  ;;  %v365_v63 = vmul.f32 %v6544_v61, %v231_v32  ;;  %vm371_vm14 = vweird.f32 %v6544_v61 }
 0x524   :  { %v1587_v41 = vpop.xlane.xlu1 %1586  ;;  %6125 = vmatmul.msk.f32.gmra.mxu0 %vm50_vm0, %v8073_v1  ;;  %6149 = vmatmul.msk.f32.gmra.mxu3 %vm50_vm0, %v8073_v1  ;;  %v1602_v2 = vmul.f32 %v6546_v19, %v7960_v48  ;;  %vm372_vm15 = vmor %vm370_vm13, %vm371_vm14 }
 0x525   :  { %v363_v18 = vsel %vm362_vm12, %v6540_v4, %v359_v49  ;;  %v366_v51 = vmul.f32 %v6544_v61, %v365_v63  ;;  %6547 = vrcp.f32 %v1587_v41  ;;  %v8096_v15 = vpop.f32.mrf.mxu1 }
 0x526   :  { %v406_v57 = vmul.f32 %v363_v18, %v7939_v22  ;;  %6120 = vmatmul.msk.f32.gmra.mxu1 %vm578_vm11, %v1602_v2 }
 0x527   :  { %v367_v43 = vmul.f32 0.5, %v366_v51 }
 0x528   :  { %v423_v29 = vmul.f32 %v7115_v42, %v406_v57 }
 0x529   :  { %v368_v44 = vsub.f32 1.5, %v367_v43 }
 0x52a   :  { %v8086_v34 = vadd.f32 %v7118_v47, %v423_v29 }
 0x52b   :  { %v6548_v48 = vpop.eup %6547  ;;  %v369_v6 = vmul.f32 %v6544_v61, %v368_v44 }
 0x52c   :  { %6126 = vmatmul.msk.f32.gmra.mxu0 %vm50_vm0, %v8086_v34  ;;  %6150 = vmatmul.msk.f32.gmra.mxu3 %vm50_vm0, %v8086_v34  ;;  %v1603_v22 = vmul.f32 %v6548_v48, %v7972_v23 }
 0x52d   :  { %v373_v16 = vsel %vm372_vm15, %v6544_v61, %v369_v6  ;;  %v8107_v23 = vpop.f32.mrf.mxu1 }
 0x52e   :  { %v407_v11 = vmul.f32 %v373_v16, %v7951_v26  ;;  %6121 = vmatmul.msk.f32.gmra.mxu1 %vm578_vm11, %v1603_v22 }
 0x530   :  { %v424_v35 = vmul.f32 %v7115_v42, %v407_v11 }
 0x532   :  { %v8099_v46 = vadd.f32 %v7118_v47, %v424_v35 }
 0x534   :  { %6127 = vmatmul.msk.f32.gmra.mxu0 %vm50_vm0, %v8099_v46  ;;  %6151 = vmatmul.msk.f32.gmra.mxu3 %vm50_vm0, %v8099_v46 }
 0x535   :  { %v8111_v26 = vpop.f32.mrf.mxu1 }
 0x536   :  { %6154 = vmatmul.msk.f32.vlgmr.msrb.gmra.mxu1 %vm50_vm0, %v8032_v37 }
 0x53d   :  { %v8115_v36 = vpop.f32.mrf.mxu1 }
 0x53e   :  { %6155 = vmatmul.msk.f32.gmra.mxu1 %vm50_vm0, %v8046_v58  ;;  %11939 = vst [vmem:[#allocation7_spill] sm:$0xff] %v8115_v36 }
 0x545   :  { %v8121_v27 = vpop.f32.mrf.mxu1 }
 0x546   :  { %6156 = vmatmul.msk.f32.gmra.mxu1 %vm50_vm0, %v8060_v31 }
 0x54d   :  { %v8125_v4 = vpop.f32.mrf.mxu1 }
 0x54e   :  { %6157 = vmatmul.msk.f32.gmra.mxu1 %vm50_vm0, %v8073_v1 }
 0x555   :  { %v8127_v32 = vpop.f32.mrf.mxu1 }
 0x556   :  { %6158 = vmatmul.msk.f32.gmra.mxu1 %vm50_vm0, %v8086_v34  ;;  %11940 = vst [vmem:[#allocation8_spill] sm:$0xff] %v8127_v32 }
 0x55e   :  { %6159 = vmatmul.msk.f32.gmra.mxu1 %vm50_vm0, %v8099_v46 }
 0x56f   :  { %v198_v10 = vpop.xlane.xlu0 %197 }
 0x570   :  { %v216_v33 = vmul.f32 %v198_v10, %v7006_v20 }
 0x572   :  { %v232_v53 = vadd.f32 1e-05, %v216_v33 }
 0x573   :  { %v8130_v60 = vpop.f32.mrf.mxu1 }
 0x574   :  { %6549 = vrsqrt.f32 %v232_v53  ;;  %vm380_vm2 = vweird.f32 %v232_v53 }
 0x577   :  { %v201_v14 = vpop.xlane.xlu2 %200 }
 0x578   :  { %v217_v24 = vmul.f32 %v201_v14, %v7006_v20 }
 0x57a   :  { %v6550_v39 = vpop.eup %6549  ;;  %v233_v52 = vadd.f32 1e-05, %v217_v24 }
 0x57b   :  { %v375_v12 = vmul.f32 %v6550_v39, %v232_v53  ;;  %v8133_v62 = vpop.f32.mrf.mxu1  ;;  %vm381_vm1 = vweird.f32 %v6550_v39  ;;  %v6845_v53 = vld [vmem:[%s11799_s2 + $0x38] sm:$0xff] }
 0x57c   :  { %6551 = vrsqrt.f32 %v233_v52  ;;  %vm382_vm3 = vmor %vm380_vm2, %vm381_vm1  ;;  %vm390_vm5 = vweird.f32 %v233_v52 }
 0x57d   :  { %v376_v56 = vmul.f32 %v6550_v39, %v375_v12  ;;  %v6848_v12 = vld [vmem:[%s11799_s2 + $0x28] sm:$0xff] }
 0x57f   :  { %v377_v61 = vmul.f32 0.5, %v376_v56  ;;  %v6849_v56 = vld [vmem:[%s11797_s1 + $0x50] sm:$0xff] }
 0x581   :  { %v378_v19 = vsub.f32 1.5, %v377_v61  ;;  %v6850_v61 = vld [vmem:[%s11799_s2 + $0x20] sm:$0xff] }
 0x582   :  { %v6552_v49 = vpop.eup %6551 }
 0x583   :  { %v379_v63 = vmul.f32 %v6550_v39, %v378_v19  ;;  %v385_v41 = vmul.f32 %v6552_v49, %v233_v52  ;;  %v8135_v2 = vpop.f32.mrf.mxu1  ;;  %vm391_vm4 = vweird.f32 %v6552_v49  ;;  %v6847_v52 = vld [vmem:[%s11799_s2 + $0x30] sm:$0xff]  ;;  %v6851_v19 = vld [vmem:[%s11797_s1 + $0x48] sm:$0xff] }
 0x584   :  { %vm392_vm6 = vmor %vm390_vm5, %vm391_vm4 }
 0x585   :  { %v383_v18 = vsel %vm382_vm3, %v6550_v39, %v379_v63  ;;  %v386_v51 = vmul.f32 %v6552_v49, %v385_v41  ;;  %v6846_v39 = vld [vmem:[%s11797_s1 + $0x58] sm:$0xff] }
 0x586   :  { %v408_v57 = vmul.f32 %v383_v18, %v8008_v17  ;;  %v6853_v41 = vld [vmem:[%s11797_s1 + $0x78] sm:$0xff] }
 0x587   :  { %v387_v43 = vmul.f32 0.5, %v386_v51  ;;  %v6854_v51 = vld [vmem:[%s11797_s1 + $0x70] sm:$0xff] }
 0x588   :  { %v425_v29 = vmul.f32 %v7115_v42, %v408_v57  ;;  %v6855_v57 = vld [vmem:[%s11797_s1 + $0x68] sm:$0xff] }
 0x589   :  { %v388_v44 = vsub.f32 1.5, %v387_v43  ;;  %v6856_v43 = vld [vmem:[%s11797_s1 + $0x60] sm:$0xff] }
 0x58a   :  { %v8140_v48 = vadd.f32 %v7118_v47, %v425_v29 }
 0x58b   :  { %v389_v6 = vmul.f32 %v6552_v49, %v388_v44  ;;  %v8142_v22 = vpop.f32.mrf.mxu1 }
 0x58c   :  { %6128 = vmatmul.msk.f32.gmra.mxu0 %vm50_vm0, %v8140_v48  ;;  %6152 = vmatmul.msk.f32.gmra.mxu3 %vm50_vm0, %v8140_v48 }
 0x58d   :  { %v393_v17 = vsel %vm392_vm6, %v6552_v49, %v389_v6  ;;  %6160 = vmatmul.msk.f32.gmra.mxu1 %vm50_vm0, %v8140_v48  ;;  %v6852_v49 = vld [vmem:[%s11797_s1 + $0x40] sm:$0xff] }
 0x58e   :  { %v409_v16 = vmul.f32 %v393_v17, %v8018_v40  ;;  %v1764_v40 = vpop.f32.mrf.mxu0 }
 0x590   :  { %v426_v11 = vmul.f32 %v7115_v42, %v409_v16 }
 0x592   :  { %v8153_v35 = vadd.f32 %v7118_v47, %v426_v11  ;;  %v1958_v11 = vpop.f32.mrf.mxu3 }
 0x593   :  { %v8155_v10 = vpop.f32.mrf.mxu1 }
 0x594   :  { %11941 = vst [vmem:[#allocation9_spill] sm:$0xff] %v8155_v10  ;;  %6129 = vmatmul.msk.f32.gmra.mxu0 %vm50_vm0, %v8153_v35  ;;  %6130 = vmatpush.xpose.msk.msra.mxu2 %vm50_vm0, %v8153_v35 }
 0x595   :  { %6153 = vmatmul.msk.f32.gmra.mxu3 %vm50_vm0, %v8153_v35  ;;  %6161 = vmatmul.msk.f32.gmra.mxu1 %vm50_vm0, %v8153_v35 }
 0x596   :  { %6162 = vmatpush.xpose.msk.msrb.mxu0 %vm50_vm0, %v8153_v35  ;;  %v1767_v14 = vpop.f32.mrf.mxu0 }
 0x598   :  { %6131 = vmatpush.xpose.msk.msra.mxu2 %vm50_vm0, %v8140_v48 }
 0x59a   :  { %6163 = vmatpush.xpose.msk.msrb.mxu0 %vm50_vm0, %v8140_v48 }
 0x59b   :  { %v8171_v42 = vpop.f32.mrf.mxu1 }
 0x59c   :  { %6132 = vmatpush.xpose.msk.msra.mxu2 %vm50_vm0, %v8099_v46 }
 0x59e   :  { %6164 = vmatpush.xpose.msk.msrb.mxu0 %vm50_vm0, %v8099_v46  ;;  %v1770_v18 = vpop.f32.mrf.mxu0 }
 0x5a0   :  { %6133 = vmatpush.xpose.msk.msra.mxu2 %vm50_vm0, %v8086_v34 }
 0x5a2   :  { %6165 = vmatpush.xpose.msk.msrb.mxu0 %vm50_vm0, %v8086_v34 }
 0x5a3   :  { %v8181_v47 = vpop.f32.mrf.mxu1 }
 0x5a4   :  { %6134 = vmatpush.xpose.msk.msra.mxu2 %vm50_vm0, %v8073_v1 }
 0x5a6   :  { %6166 = vmatpush.xpose.msk.msrb.mxu0 %vm50_vm0, %v8073_v1  ;;  %v1773_v44 = vpop.f32.mrf.mxu0 }
 0x5a8   :  { %6135 = vmatpush.xpose.msk.msra.mxu2 %vm50_vm0, %v8060_v31 }
 0x5aa   :  { %6167 = vmatpush.xpose.msk.msrb.mxu0 %vm50_vm0, %v8060_v31 }
 0x5ab   :  { %v8191_v33 = vpop.f32.mrf.mxu1 }
 0x5ac   :  { %11942 = vst [vmem:[#allocation10_spill] sm:$0xff] %v8191_v33  ;;  %6136 = vmatpush.xpose.msk.msra.mxu2 %vm50_vm0, %v8046_v58 }
 0x5ae   :  { %6168 = vmatpush.xpose.msk.msrb.mxu0 %vm50_vm0, %v8046_v58  ;;  %v1776_v17 = vpop.f32.mrf.mxu0 }
 0x5b0   :  { %6137 = vmatpush.xpose.msk.msra.mxu2 %vm50_vm0, %v8032_v37 }
 0x5b2   :  { %6169 = vmatpush.xpose.msk.msrb.mxu0 %vm50_vm0, %v8032_v37 }
 0x5b3   :  { %6138 = vmatmul.msk.f32.vlgmr.msra.gmra.mxu2 %vm50_vm0, %v1764_v40  ;;  %v1999_v24 = vpop.f32.mrf.mxu1 }
 0x5b4   :  { %2188 = vmatpush.msrb.mxu2 %v6845_v53 }
 0x5b5   :  { %6170 = vmatmul.msk.f32.vlgmr.msrb.gmra.mxu0 %vm50_vm0, %v1999_v24 }
 0x5b6   :  { %2359 = vmatpush.msra.mxu0 %v6846_v39  ;;  %2189 = vmatpush.msrb.mxu2 %v6847_v52  ;;  %v1779_v40 = vpop.f32.mrf.mxu0 }
 0x5b8   :  { %2190 = vmatpush.msrb.mxu2 %v6848_v12  ;;  %2360 = vmatpush.msra.mxu0 %v6849_v56 }
 0x5ba   :  { %2191 = vmatpush.msrb.mxu2 %v6850_v61  ;;  %2361 = vmatpush.msra.mxu0 %v6851_v19 }
 0x5bb   :  { %6139 = vmatmul.msk.f32.gmra.mxu2 %vm50_vm0, %v1767_v14  ;;  %v2002_v63 = vpop.f32.mrf.mxu1  ;;  %v1961_v14 = vpop.f32.mrf.mxu3 }
 0x5bc   :  { %6210 = vmatpush.xpose.msk.msra.mxu2 %vm50_vm0, %v8153_v35  ;;  %2362 = vmatpush.msra.mxu0 %v6852_v49 }
 0x5bd   :  { %6171 = vmatmul.msk.f32.gmra.mxu0 %vm50_vm0, %v2002_v63 }
 0x5be   :  { %2667 = vmatpush.msrb.mxu0 %v6853_v41 }
 0x5c0   :  { %6211 = vmatpush.xpose.msk.msra.mxu2 %vm50_vm0, %v8140_v48  ;;  %2668 = vmatpush.msrb.mxu0 %v6854_v51 }
 0x5c2   :  { %2669 = vmatpush.msrb.mxu0 %v6855_v57 }
 0x5c3   :  { %6140 = vmatmul.msk.f32.gmra.mxu2 %vm50_vm0, %v1770_v18  ;;  %v2005_v29 = vpop.f32.mrf.mxu1  ;;  %v1964_v24 = vpop.f32.mrf.mxu3 }
 0x5c4   :  { %6212 = vmatpush.xpose.msk.msra.mxu2 %vm50_vm0, %v8099_v46  ;;  %2670 = vmatpush.msrb.mxu0 %v6856_v43 }
 0x5c5   :  { %6172 = vmatmul.msk.f32.gmra.mxu0 %vm50_vm0, %v2005_v29 }
 0x5c8   :  { %6213 = vmatpush.xpose.msk.msra.mxu2 %vm50_vm0, %v8086_v34 }
 0x5cb   :  { %6141 = vmatmul.msk.f32.gmra.mxu2 %vm50_vm0, %v1773_v44  ;;  %v2008_v6 = vpop.f32.mrf.mxu1  ;;  %v1967_v39 = vpop.f32.mrf.mxu3 }
 0x5cc   :  { %6214 = vmatpush.xpose.msk.msra.mxu2 %vm50_vm0, %v8073_v1 }
 0x5cd   :  { %6173 = vmatmul.msk.f32.gmra.mxu0 %vm50_vm0, %v2008_v6 }
 0x5d0   :  { %6215 = vmatpush.xpose.msk.msra.mxu2 %vm50_vm0, %v8060_v31 }
 0x5d3   :  { %6142 = vmatmul.msk.f32.gmra.mxu2 %vm50_vm0, %v1776_v17  ;;  %v2011_v16 = vpop.f32.mrf.mxu1  ;;  %v1970_v52 = vpop.f32.mrf.mxu3 }
 0x5d4   :  { %6216 = vmatpush.xpose.msk.msra.mxu2 %vm50_vm0, %v8046_v58 }
 0x5d5   :  { %6174 = vmatmul.msk.f32.gmra.mxu0 %vm50_vm0, %v2011_v16 }
 0x5d8   :  { %6217 = vmatpush.xpose.msk.msra.mxu2 %vm50_vm0, %v8032_v37 }
 0x5db   :  { %6143 = vmatmul.msk.f32.gmra.mxu2 %vm50_vm0, %v1779_v40  ;;  %v2014_v53 = vpop.f32.mrf.mxu1  ;;  %v1973_v12 = vpop.f32.mrf.mxu3 }
 0x5dd   :  { %6175 = vmatmul.msk.f32.gmra.mxu0 %vm50_vm0, %v2014_v53 }
 0x609   :  { %v1782_v56 = vpop.f32.mrf.mxu0 }
 0x60a   :  { %v2017_v61 = vpop.f32.mrf.mxu1  ;;  %6144 = vmatmul.msk.f32.gmra.mxu2 %vm50_vm0, %v1782_v56 }
 0x60b   :  { %6176 = vmatmul.msk.f32.gmra.mxu0 %vm50_vm0, %v2017_v61 }
 0x60f   :  { %v1976_v19 = vpop.f32.mrf.mxu3 }
 0x611   :  { %v1785_v49 = vpop.f32.mrf.mxu0 }
 0x612   :  { %v2020_v63 = vpop.f32.mrf.mxu1  ;;  %6145 = vmatmul.msk.f32.gmra.mxu2 %vm50_vm0, %v1785_v49 }
 0x613   :  { %6177 = vmatmul.msk.f32.gmra.mxu0 %vm50_vm0, %v2020_v63 }
 0x618   :  { %v1979_v41 = vpop.f32.mrf.mxu3 }
 0x619   :  { %2314 = vmatpush.msra.mxu1 %v1979_v41 }
 0x61a   :  { %6178 = vmatmul.msk.f32.vlgmr.msrb.gmra.mxu2 %vm50_vm0, %v8032_v37 }
 0x61b   :  { %2315 = vmatpush.msra.mxu1 %v1976_v19  ;;  %6202 = vmatmul.msk.f32.vlgmr.msra.gmra.mxu0 %vm50_vm0, %v8032_v37 }
 0x61c   :  { %6250 = vmatpush.xpose.msk.msrb.mxu2 %vm50_vm0, %v8153_v35 }
 0x61d   :  { %2316 = vmatpush.msra.mxu1 %v1973_v12 }
 0x61f   :  { %2317 = vmatpush.msra.mxu1 %v1970_v52 }
 0x620   :  { %6251 = vmatpush.xpose.msk.msrb.mxu2 %vm50_vm0, %v8140_v48 }
 0x621   :  { %2318 = vmatpush.msra.mxu1 %v1967_v39 }
 0x622   :  { %6179 = vmatmul.msk.f32.gmra.mxu2 %vm50_vm0, %v8046_v58 }
 0x623   :  { %2319 = vmatpush.msra.mxu1 %v1964_v24  ;;  %6203 = vmatmul.msk.f32.gmra.mxu0 %vm50_vm0, %v8046_v58 }
 0x624   :  { %6252 = vmatpush.xpose.msk.msrb.mxu2 %vm50_vm0, %v8099_v46 }
 0x625   :  { %2320 = vmatpush.msra.mxu1 %v1961_v14 }
 0x627   :  { %2321 = vmatpush.msra.mxu1 %v1958_v11 }
 0x628   :  { %6253 = vmatpush.xpose.msk.msrb.mxu2 %vm50_vm0, %v8086_v34 }
 0x62a   :  { %6180 = vmatmul.msk.f32.gmra.mxu2 %vm50_vm0, %v8060_v31 }
 0x62b   :  { %6204 = vmatmul.msk.f32.gmra.mxu0 %vm50_vm0, %v8060_v31 }
 0x62c   :  { %6254 = vmatpush.xpose.msk.msrb.mxu2 %vm50_vm0, %v8073_v1 }
 0x630   :  { %6255 = vmatpush.xpose.msk.msrb.mxu2 %vm50_vm0, %v8060_v31 }
 0x632   :  { %v2064_v18 = vpop.f32.mrf.mxu0  ;;  %6181 = vmatmul.msk.f32.gmra.mxu2 %vm50_vm0, %v8073_v1 }
 0x633   :  { %6205 = vmatmul.msk.f32.gmra.mxu0 %vm50_vm0, %v8073_v1  ;;  %v2088_v51 = vsel %vm578_vm11, %v2064_v18, -inf }
 0x634   :  { %6256 = vmatpush.xpose.msk.msrb.mxu2 %vm50_vm0, %v8046_v58  ;;  %2089 = vmax.xlane.f32.xlu0 %v2088_v51 }
 0x636   :  { %v8330_v11 = vpop.f32.mrf.mxu2 }
 0x638   :  { %6257 = vmatpush.xpose.msk.msrb.mxu2 %vm50_vm0, %v8032_v37 }
 0x63a   :  { %v8302_v57 = vpop.f32.mrf.mxu0  ;;  %6182 = vmatmul.msk.f32.gmra.mxu2 %vm50_vm0, %v8086_v34 }
 0x63b   :  { %6206 = vmatmul.msk.f32.gmra.mxu0 %vm50_vm0, %v8086_v34  ;;  %v2091_v43 = vsel %vm578_vm11, %v8302_v57, -inf }
 0x63c   :  { %2092 = vmax.xlane.f32.xlu1 %v2091_v43 }
 0x63e   :  { %v8342_v24 = vpop.f32.mrf.mxu2 }
 0x642   :  { %v8310_v29 = vpop.f32.mrf.mxu0  ;;  %6183 = vmatmul.msk.f32.gmra.mxu2 %vm50_vm0, %v8099_v46 }
 0x643   :  { %6207 = vmatmul.msk.f32.gmra.mxu0 %vm50_vm0, %v8099_v46  ;;  %v2094_v44 = vsel %vm578_vm11, %v8310_v29, -inf }
 0x644   :  { %2095 = vmax.xlane.f32.xlu2 %v2094_v44 }
 0x646   :  { %v8346_v39 = vpop.f32.mrf.mxu2 }
 0x64a   :  { %v8318_v6 = vpop.f32.mrf.mxu0  ;;  %6184 = vmatmul.msk.f32.gmra.mxu2 %vm50_vm0, %v8140_v48 }
 0x64b   :  { %6208 = vmatmul.msk.f32.gmra.mxu0 %vm50_vm0, %v8140_v48  ;;  %v2097_v17 = vsel %vm578_vm11, %v8318_v6, -inf }
 0x64c   :  { %2098 = vmax.xlane.f32.xlu0 %v2097_v17 }
 0x64e   :  { %v8350_v52 = vpop.f32.mrf.mxu2 }
 0x652   :  { %v8326_v16 = vpop.f32.mrf.mxu0  ;;  %6185 = vmatmul.msk.f32.gmra.mxu2 %vm50_vm0, %v8153_v35 }
 0x653   :  { %6209 = vmatmul.msk.f32.gmra.mxu0 %vm50_vm0, %v8153_v35  ;;  %v2100_v40 = vsel %vm578_vm11, %v8326_v16, -inf }
 0x654   :  { %2101 = vmax.xlane.f32.xlu1 %v2100_v40 }
 0x656   :  { %v8354_v12 = vpop.f32.mrf.mxu2 }
 0x65a   :  { %v8336_v53 = vpop.f32.mrf.mxu0 }
 0x65b   :  { %6242 = vmatmul.msk.f32.vlgmr.msrb.gmra.mxu0 %vm50_vm0, %v8032_v37  ;;  %v2103_v14 = vsel %vm578_vm11, %v8336_v53, -inf }
 0x65c   :  { %2104 = vmax.xlane.f32.xlu2 %v2103_v14 }
 0x65e   :  { %v8360_v56 = vpop.f32.mrf.mxu2 }
 0x663   :  { %6243 = vmatmul.msk.f32.gmra.mxu0 %vm50_vm0, %v8046_v58 }
 0x66b   :  { %6244 = vmatmul.msk.f32.gmra.mxu0 %vm50_vm0, %v8060_v31 }
 0x673   :  { %6245 = vmatmul.msk.f32.gmra.mxu0 %vm50_vm0, %v8073_v1 }
 0x67b   :  { %6246 = vmatmul.msk.f32.gmra.mxu0 %vm50_vm0, %v8086_v34 }
 0x683   :  { %6247 = vmatmul.msk.f32.gmra.mxu0 %vm50_vm0, %v8099_v46 }
 0x688   :  { %v8362_v61 = vpop.f32.mrf.mxu0 }
 0x689   :  { %v2106_v19 = vsel %vm578_vm11, %v8362_v61, -inf }
 0x68a   :  { %2107 = vmax.xlane.f32.xlu0 %v2106_v19 }
 0x68b   :  { %6248 = vmatmul.msk.f32.gmra.mxu0 %vm50_vm0, %v8140_v48 }
 0x68d   :  { %v8368_v49 = vpop.f32.mrf.mxu2 }
 0x690   :  { %v8370_v63 = vpop.f32.mrf.mxu0 }
 0x691   :  { %v2109_v41 = vsel %vm578_vm11, %v8370_v63, -inf }
 0x692   :  { %2110 = vmax.xlane.f32.xlu2 %v2109_v41 }
 0x693   :  { %6249 = vmatmul.msk.f32.gmra.mxu0 %vm50_vm0, %v8153_v35 }
 0x695   :  { %v8376_v51 = vpop.f32.mrf.mxu2 }
 0x698   :  { %v2364_v43 = vpop.f32.mrf.mxu0 }
 0x699   :  { %6218 = vmatmul.msk.f32.vlgmr.msra.gmra.mxu2 %vm50_vm0, %v2364_v43 }
 0x69d   :  { %v8379_v44 = vpop.f32.mrf.mxu2 }
 0x6a0   :  { %v2367_v17 = vpop.f32.mrf.mxu0 }
 0x6a1   :  { %6219 = vmatmul.msk.f32.gmra.mxu2 %vm50_vm0, %v2367_v17 }
 0x6a5   :  { %v8382_v40 = vpop.f32.mrf.mxu2 }
 0x6a7   :  { %v2090_v14 = vpop.xlane.xlu0 %2089 }
 0x6a8   :  { %v2112_v19 = vsub.f32 %v2064_v18, %v2090_v14  ;;  %v2370_v20 = vpop.f32.mrf.mxu0 }
 0x6a9   :  { %6220 = vmatmul.msk.f32.gmra.mxu2 %vm50_vm0, %v2370_v20 }
 0x6aa   :  { %v2120_v41 = vmul.f32 1.442695, %v2112_v19 }
 0x6ac   :  { %6553 = vpow2.f32 %v2120_v41 }
 0x6ad   :  { %v2199_v33 = vpop.f32.mrf.mxu2 }
 0x6af   :  { %v2093_v32 = vpop.xlane.xlu1 %2092 }
 0x6b0   :  { %v2113_v7 = vsub.f32 %v8302_v57, %v2093_v32  ;;  %v2373_v8 = vpop.f32.mrf.mxu0 }
 0x6b1   :  { %6221 = vmatmul.msk.f32.gmra.mxu2 %vm50_vm0, %v2373_v8 }
 0x6b2   :  { %v8387_v43 = vpop.eup %6553  ;;  %v2122_v10 = vmul.f32 1.442695, %v2113_v7 }
 0x6b3   :  { %v2136_v17 = vsel %vm578_vm11, %v8387_v43, 0.0 }
 0x6b4   :  { %6555 = vpow2.f32 %v2122_v10  ;;  %2137 = vadd.xlane.f32.xlu1 %v2136_v17 }
 0x6b5   :  { %v2202_v18 = vpop.f32.mrf.mxu2 }
 0x6b7   :  { %v2096_v14 = vpop.xlane.xlu2 %2095 }
 0x6b8   :  { %v2114_v20 = vsub.f32 %v8310_v29, %v2096_v14  ;;  %v2376_v19 = vpop.f32.mrf.mxu0 }
 0x6b9   :  { %6222 = vmatmul.msk.f32.gmra.mxu2 %vm50_vm0, %v2376_v19 }
 0x6ba   :  { %v8393_v41 = vpop.eup %6555  ;;  %v2124_v32 = vmul.f32 1.442695, %v2114_v20 }
 0x6bb   :  { %v2139_v8 = vsel %vm578_vm11, %v8393_v41, 0.0 }
 0x6bc   :  { %6557 = vpow2.f32 %v2124_v32  ;;  %2140 = vadd.xlane.f32.xlu0 %v2139_v8 }
 0x6bd   :  { %v2205_v7 = vpop.f32.mrf.mxu2 }
 0x6bf   :  { %v2099_v57 = vpop.xlane.xlu0 %2098 }
 0x6c0   :  { %v2115_v10 = vsub.f32 %v8318_v6, %v2099_v57  ;;  %v2379_v17 = vpop.f32.mrf.mxu0 }
 0x6c1   :  { %6223 = vmatmul.msk.f32.gmra.mxu2 %vm50_vm0, %v2379_v17 }
 0x6c2   :  { %v8399_v36 = vpop.eup %6557  ;;  %v2126_v29 = vmul.f32 1.442695, %v2115_v10 }
 0x6c3   :  { %v2142_v14 = vsel %vm578_vm11, %v8399_v36, 0.0 }
 0x6c4   :  { %6559 = vpow2.f32 %v2126_v29  ;;  %2143 = vadd.xlane.f32.xlu1 %v2142_v14 }
 0x6c5   :  { %v2208_v20 = vpop.f32.mrf.mxu2 }
 0x6c7   :  { %v2102_v19 = vpop.xlane.xlu1 %2101 }
 0x6c8   :  { %v2116_v32 = vsub.f32 %v8326_v16, %v2102_v19  ;;  %v2382_v8 = vpop.f32.mrf.mxu0 }
 0x6c9   :  { %6224 = vmatmul.msk.f32.gmra.mxu2 %vm50_vm0, %v2382_v8 }
 0x6ca   :  { %v8405_v21 = vpop.eup %6559  ;;  %v2128_v6 = vmul.f32 1.442695, %v2116_v32 }
 0x6cb   :  { %v2145_v57 = vsel %vm578_vm11, %v8405_v21, 0.0 }
 0x6cc   :  { %6561 = vpow2.f32 %v2128_v6  ;;  %2146 = vadd.xlane.f32.xlu2 %v2145_v57 }
 0x6cd   :  { %v2211_v10 = vpop.f32.mrf.mxu2 }
 0x6cf   :  { %v2105_v17 = vpop.xlane.xlu2 %2104 }
 0x6d0   :  { %v2117_v29 = vsub.f32 %v8336_v53, %v2105_v17  ;;  %v2385_v14 = vpop.f32.mrf.mxu0 }
 0x6d1   :  { %6225 = vmatmul.msk.f32.gmra.mxu2 %vm50_vm0, %v2385_v14 }
 0x6d2   :  { %v8411_v45 = vpop.eup %6561  ;;  %v2130_v16 = vmul.f32 1.442695, %v2117_v29  ;;  %v1871_v29 = vsel %vm578_vm11, %v8368_v49, -inf }
 0x6d3   :  { %v2148_v19 = vsel %vm578_vm11, %v8411_v45, 0.0 }
 0x6d4   :  { %6563 = vpow2.f32 %v2130_v16  ;;  %2149 = vadd.xlane.f32.xlu0 %v2148_v19 }
 0x6d5   :  { %v2214_v32 = vpop.f32.mrf.mxu2 }
 0x6d6   :  { %2249 = vmatpush.msra.mxu3 %v2214_v32 }
 0x6d8   :  { %v2672_v8 = vpop.f32.mrf.mxu0  ;;  %2250 = vmatpush.msra.mxu3 %v2211_v10  ;;  %v1853_v10 = vsel %vm578_vm11, %v8330_v11, -inf }
 0x6d9   :  { %6258 = vmatmul.msk.f32.vlgmr.msrb.gmra.mxu2 %vm50_vm0, %v2672_v8 }
 0x6da   :  { %v8416_v6 = vpop.eup %6563  ;;  %2251 = vmatpush.msra.mxu3 %v2208_v20  ;;  %v6857_v20 = vld [vmem:[%s11799_s2 + $0x58] sm:$0xff] }
 0x6db   :  { %v2151_v53 = vsel %vm578_vm11, %v8416_v6, 0.0 }
 0x6dc   :  { %2152 = vadd.xlane.f32.xlu1 %v2151_v53  ;;  %2252 = vmatpush.msra.mxu3 %v2205_v7  ;;  %v6860_v7 = vld [vmem:[%s11799_s2 + $0x40] sm:$0xff] }
 0x6de   :  { %2253 = vmatpush.msra.mxu3 %v2202_v18  ;;  %v6858_v18 = vld [vmem:[%s11799_s2 + $0x50] sm:$0xff] }
 0x6e0   :  { %v2675_v57 = vpop.f32.mrf.mxu0  ;;  %2254 = vmatpush.msra.mxu3 %v2199_v33 }
 0x6e1   :  { %6259 = vmatmul.msk.f32.gmra.mxu2 %vm50_vm0, %v2675_v57 }
 0x6e2   :  { %2255 = vmatpush.msra.mxu3 %v8382_v40  ;;  %v6859_v40 = vld [vmem:[%s11799_s2 + $0x48] sm:$0xff] }
 0x6e4   :  { %1854 = vmax.xlane.f32.xlu1 %v1853_v10  ;;  %2256 = vmatpush.msra.mxu3 %v8379_v44  ;;  %v1862_v44 = vsel %vm578_vm11, %v8350_v52, -inf }
 0x6e6   :  { %2553 = vmatpush.msrb.mxu3 %v6857_v20 }
 0x6e8   :  { %2554 = vmatpush.msrb.mxu3 %v6858_v18  ;;  %v2678_v33 = vpop.f32.mrf.mxu0 }
 0x6e9   :  { %6260 = vmatmul.msk.f32.gmra.mxu2 %vm50_vm0, %v2678_v33 }
 0x6ea   :  { %2555 = vmatpush.msrb.mxu3 %v6859_v40 }
 0x6ec   :  { %2556 = vmatpush.msrb.mxu3 %v6860_v7  ;;  %1863 = vmax.xlane.f32.xlu1 %v1862_v44  ;;  %v1856_v44 = vsel %vm578_vm11, %v8342_v24, -inf  ;;  %v1865_v7 = vsel %vm578_vm11, %v8354_v12, -inf }
 0x6f0   :  { %v2681_v17 = vpop.f32.mrf.mxu0 }
 0x6f1   :  { %6261 = vmatmul.msk.f32.gmra.mxu2 %vm50_vm0, %v2681_v17  ;;  %v1859_v17 = vsel %vm578_vm11, %v8346_v39, -inf }
 0x6f4   :  { %1872 = vmax.xlane.f32.xlu1 %v1871_v29  ;;  %v1868_v29 = vsel %vm578_vm11, %v8360_v56, -inf }
 0x6f8   :  { %v2684_v14 = vpop.f32.mrf.mxu0 }
 0x6f9   :  { %6262 = vmatmul.msk.f32.gmra.mxu2 %vm50_vm0, %v2684_v14 }
 0x6fd   :  { %v2108_v16 = vpop.xlane.xlu0 %2107 }
 0x6fe   :  { %v2118_v19 = vsub.f32 %v8362_v61, %v2108_v16  ;;  %v1874_v16 = vsel %vm578_vm11, %v8376_v51, -inf }
 0x700   :  { %v2132_v32 = vmul.f32 1.442695, %v2118_v19  ;;  %v2687_v8 = vpop.f32.mrf.mxu0 }
 0x701   :  { %6263 = vmatmul.msk.f32.gmra.mxu2 %vm50_vm0, %v2687_v8 }
 0x702   :  { %6565 = vpow2.f32 %v2132_v32 }
 0x705   :  { %v2111_v53 = vpop.xlane.xlu2 %2110 }
 0x706   :  { %v2119_v57 = vsub.f32 %v8370_v63, %v2111_v53 }
 0x708   :  { %v8447_v10 = vpop.eup %6565  ;;  %v2134_v20 = vmul.f32 1.442695, %v2119_v57  ;;  %v2690_v18 = vpop.f32.mrf.mxu0 }
 0x709   :  { %6264 = vmatmul.msk.f32.gmra.mxu2 %vm50_vm0, %v2690_v18  ;;  %v2154_v33 = vsel %vm578_vm11, %v8447_v10, 0.0  ;;  %v6862_v18 = vld [vmem:[%s11799_s2 + $0x70] sm:$0xff] }
 0x70a   :  { %6567 = vpow2.f32 %v2134_v20  ;;  %2155 = vadd.xlane.f32.xlu2 %v2154_v33  ;;  %v6861_v20 = vld [vmem:[%s11799_s2 + $0x78] sm:$0xff] }
 0x710   :  { %v8452_v61 = vpop.eup %6567  ;;  %v2693_v40 = vpop.f32.mrf.mxu0 }
 0x711   :  { %6265 = vmatmul.msk.f32.gmra.mxu2 %vm50_vm0, %v2693_v40  ;;  %v2157_v63 = vsel %vm578_vm11, %v8452_v61, 0.0  ;;  %v6863_v40 = vld [vmem:[%s11799_s2 + $0x68] sm:$0xff] }
 0x712   :  { %1857 = vmax.xlane.f32.xlu2 %v1856_v44  ;;  %2158 = vadd.xlane.f32.xlu0 %v2157_v63 }
 0x71a   :  { %1866 = vmax.xlane.f32.xlu2 %v1865_v7  ;;  %1860 = vmax.xlane.f32.xlu0 %v1859_v17  ;;  %v6864_v7 = vld [vmem:[%s11799_s2 + $0x60] sm:$0xff] }
 0x71c   :  { %v8467_v19 = vpop.f32.mrf.mxu2 }
 0x71d   :  { %v2453_v57 = vsel %vm578_vm11, %v8467_v19, -inf }
 0x722   :  { %1869 = vmax.xlane.f32.xlu0 %v1868_v29 }
 0x727   :  { %v2138_v14 = vpop.xlane.xlu1 %2137 }
 0x728   :  { %6569 = vrcp.f32 %v2138_v14 }
 0x72a   :  { %1875 = vmax.xlane.f32.xlu0 %v1874_v16 }
 0x72e   :  { %v6570_v32 = vpop.eup %6569 }
 0x72f   :  { %v2168_v8 = vmul.f32 %v6570_v32, %v8387_v43  ;;  %v2141_v53 = vpop.xlane.xlu0 %2140  ;;  %v8479_v43 = vpop.f32.mrf.mxu2 }
 0x730   :  { %6571 = vrcp.f32 %v2141_v53  ;;  %v2456_v17 = vsel %vm578_vm11, %v8479_v43, -inf }
 0x731   :  { %6186 = vmatmul.msk.f32.vlgmr.msra.gmra.mxu3 %vm578_vm11, %v2168_v8 }
 0x732   :  { %2454 = vmax.xlane.f32.xlu0 %v2453_v57  ;;  %2861 = vmatpush.msra.mxu3 %v6861_v20 }
 0x734   :  { %2862 = vmatpush.msra.mxu3 %v6862_v18 }
 0x736   :  { %v6572_v33 = vpop.eup %6571  ;;  %2863 = vmatpush.msra.mxu3 %v6863_v40 }
 0x737   :  { %v2144_v44 = vpop.xlane.xlu1 %2143  ;;  %v2169_v63 = vmul.f32 %v6572_v33, %v8393_v41  ;;  %v8495_v57 = vpop.f32.mrf.mxu2 }
 0x738   :  { %6573 = vrcp.f32 %v2144_v44  ;;  %2864 = vmatpush.msra.mxu3 %v6864_v7 }
 0x739   :  { %6187 = vmatmul.msk.f32.gmra.mxu3 %vm578_vm11, %v2169_v63 }
 0x73a   :  { %2457 = vmax.xlane.f32.xlu0 %v2456_v17 }
 0x73e   :  { %v6574_v29 = vpop.eup %6573 }
 0x73f   :  { %v2147_v14 = vpop.xlane.xlu2 %2146  ;;  %v2170_v16 = vmul.f32 %v6574_v29, %v8399_v36  ;;  %v8500_v44 = vpop.f32.mrf.mxu2 }
 0x740   :  { %6575 = vrcp.f32 %v2147_v14 }
 0x741   :  { %6188 = vmatmul.msk.f32.gmra.mxu3 %vm578_vm11, %v2170_v16 }
 0x746   :  { %v6576_v41 = vpop.eup %6575 }
 0x747   :  { %v2150_v32 = vpop.xlane.xlu0 %2149  ;;  %v2171_v8 = vmul.f32 %v6576_v41, %v8405_v21  ;;  %v8506_v29 = vpop.f32.mrf.mxu2 }
 0x748   :  { %6577 = vrcp.f32 %v2150_v32 }
 0x749   :  { %6189 = vmatmul.msk.f32.gmra.mxu3 %vm578_vm11, %v2171_v8 }
 0x74e   :  { %v6578_v53 = vpop.eup %6577 }
 0x74f   :  { %v2153_v20 = vpop.xlane.xlu1 %2152  ;;  %v2172_v18 = vmul.f32 %v6578_v53, %v8411_v45  ;;  %v8511_v41 = vpop.f32.mrf.mxu2  ;;  %v2465_v53 = vsel %vm578_vm11, %v8506_v29, -inf }
 0x750   :  { %6579 = vrcp.f32 %v2153_v20 }
 0x751   :  { %6190 = vmatmul.msk.f32.gmra.mxu3 %vm578_vm11, %v2172_v18 }
 0x756   :  { %v6580_v36 = vpop.eup %6579 }
 0x757   :  { %v1855_v33 = vpop.xlane.xlu1 %1854  ;;  %v2173_v40 = vmul.f32 %v6580_v36, %v8416_v6  ;;  %v8517_v8 = vpop.f32.mrf.mxu2 }
 0x758   :  { %v1877_v21 = vsub.f32 %v8330_v11, %v1855_v33 }
 0x759   :  { %6191 = vmatmul.msk.f32.gmra.mxu3 %vm578_vm11, %v2173_v40 }
 0x75a   :  { %v1885_v63 = vmul.f32 1.442695, %v1877_v21 }
 0x75c   :  { %6581 = vpow2.f32 %v1885_v63 }
 0x75f   :  { %v1864_v7 = vpop.xlane.xlu1 %1863  ;;  %v8521_v18 = vpop.f32.mrf.mxu2 }
 0x762   :  { %v8504_v17 = vpop.eup %6581 }
 0x763   :  { %v1901_v45 = vsel %vm578_vm11, %v8504_v17, 0.0 }
 0x764   :  { %1902 = vadd.xlane.f32.xlu2 %v1901_v45  ;;  %v1880_v45 = vsub.f32 %v8350_v52, %v1864_v7 }
 0x767   :  { %v1873_v14 = vpop.xlane.xlu1 %1872 }
 0x768   :  { %v1883_v6 = vsub.f32 %v8368_v49, %v1873_v14  ;;  %v2474_v49 = vsel %vm578_vm11, %v8521_v18, -inf }
 0x76a   :  { %v1897_v16 = vmul.f32 1.442695, %v1883_v6 }
 0x76c   :  { %6583 = vpow2.f32 %v1897_v16  ;;  %v1891_v16 = vmul.f32 1.442695, %v1880_v45 }
 0x772   :  { %v8513_v11 = vpop.eup %6583 }
 0x773   :  { %v1919_v32 = vsel %vm578_vm11, %v8513_v11, 0.0 }
 0x774   :  { %1920 = vadd.xlane.f32.xlu0 %v1919_v32 }
 0x77c   :  { %2466 = vmax.xlane.f32.xlu0 %v2465_v53 }
 0x77d   :  { %v2156_v20 = vpop.xlane.xlu2 %2155 }
 0x77e   :  { %6585 = vrcp.f32 %v2156_v20 }
 0x784   :  { %v6586_v36 = vpop.eup %6585  ;;  %2475 = vmax.xlane.f32.xlu0 %v2474_v49 }
 0x785   :  { %v2159_v33 = vpop.xlane.xlu0 %2158  ;;  %v1858_v40 = vpop.xlane.xlu2 %1857  ;;  %v2174_v21 = vmul.f32 %v6586_v36, %v8447_v10 }
 0x786   :  { %6587 = vrcp.f32 %v2159_v33  ;;  %v1878_v63 = vsub.f32 %v8342_v24, %v1858_v40 }
 0x787   :  { %6192 = vmatmul.msk.f32.gmra.mxu3 %vm578_vm11, %v2174_v21 }
 0x788   :  { %v1887_v14 = vmul.f32 1.442695, %v1878_v63 }
 0x78a   :  { %6589 = vpow2.f32 %v1887_v14 }
 0x78b   :  { %6591 = vpow2.f32 %v1891_v16 }
 0x78c   :  { %v6588_v6 = vpop.eup %6587 }
 0x78d   :  { %v1861_v32 = vpop.xlane.xlu0 %1860  ;;  %v1867_v53 = vpop.xlane.xlu2 %1866  ;;  %v2175_v20 = vmul.f32 %v6588_v6, %v8452_v61 }
 0x78e   :  { %v1879_v49 = vsub.f32 %v8346_v39, %v1861_v32  ;;  %v1881_v36 = vsub.f32 %v8354_v12, %v1867_v53 }
 0x78f   :  { %6193 = vmatmul.msk.f32.gmra.mxu3 %vm578_vm11, %v2175_v20 }
 0x790   :  { %v8532_v10 = vpop.eup %6589  ;;  %v1889_v24 = vmul.f32 1.442695, %v1879_v49  ;;  %v1893_v7 = vmul.f32 1.442695, %v1881_v36 }
 0x791   :  { %v1904_v52 = vsel %vm578_vm11, %v8532_v10, 0.0  ;;  %v8537_v40 = vpop.eup %6591 }
 0x792   :  { %6593 = vpow2.f32 %v1889_v24  ;;  %1905 = vadd.xlane.f32.xlu1 %v1904_v52  ;;  %v1910_v63 = vsel %vm578_vm11, %v8537_v40, 0.0  ;;  %v2459_v24 = vsel %vm578_vm11, %v8495_v57, -inf }
 0x793   :  { %6595 = vpow2.f32 %v1893_v7 }
 0x795   :  { %v1870_v33 = vpop.xlane.xlu0 %1869 }
 0x796   :  { %v1882_v61 = vsub.f32 %v8360_v56, %v1870_v33 }
 0x797   :  { %6226 = vmatmul.msk.f32.vlgmr.msrb.gmra.mxu3 %vm50_vm0, %v8032_v37 }
 0x798   :  { %v8542_v39 = vpop.eup %6593  ;;  %v1895_v21 = vmul.f32 1.442695, %v1882_v61  ;;  %v2462_v61 = vsel %vm578_vm11, %v8500_v44, -inf }
 0x799   :  { %v1907_v12 = vsel %vm578_vm11, %v8542_v39, 0.0  ;;  %v8548_v14 = vpop.eup %6595 }
 0x79a   :  { %6597 = vpow2.f32 %v1895_v21  ;;  %1908 = vadd.xlane.f32.xlu2 %v1907_v12  ;;  %1911 = vadd.xlane.f32.xlu1 %v1910_v63  ;;  %v1913_v53 = vsel %vm578_vm11, %v8548_v14, 0.0  ;;  %v8575_v21 = vpop.f32.mrf.mxu2 }
 0x79d   :  { %v1876_v45 = vpop.xlane.xlu0 %1875 }
 0x79e   :  { %v1884_v56 = vsub.f32 %v8376_v51, %v1876_v45 }
 0x79f   :  { %6227 = vmatmul.msk.f32.gmra.mxu3 %vm50_vm0, %v8046_v58 }
 0x7a0   :  { %v8553_v6 = vpop.eup %6597  ;;  %v1899_v16 = vmul.f32 1.442695, %v1884_v56 }
 0x7a1   :  { %v1916_v32 = vsel %vm578_vm11, %v8553_v6, 0.0 }
 0x7a2   :  { %6599 = vpow2.f32 %v1899_v16  ;;  %1917 = vadd.xlane.f32.xlu1 %v1916_v32  ;;  %1914 = vadd.xlane.f32.xlu2 %v1913_v53  ;;  %v8585_v56 = vpop.f32.mrf.mxu2 }
 0x7a3   :  { %v2764_v32 = vsel %vm578_vm11, %v8585_v56, -inf }
 0x7a5   :  { %v2455_v20 = vpop.xlane.xlu0 %2454 }
 0x7a6   :  { %v2477_v49 = vsub.f32 %v8467_v19, %v2455_v20  ;;  %v2468_v19 = vsel %vm578_vm11, %v8511_v41, -inf }
 0x7a7   :  { %6228 = vmatmul.msk.f32.gmra.mxu3 %vm50_vm0, %v8060_v31 }
 0x7a8   :  { %v8561_v51 = vpop.eup %6599  ;;  %v2485_v52 = vmul.f32 1.442695, %v2477_v49 }
 0x7a9   :  { %v1922_v36 = vsel %vm578_vm11, %v8561_v51, 0.0 }
 0x7aa   :  { %2460 = vmax.xlane.f32.xlu2 %v2459_v24  ;;  %1923 = vadd.xlane.f32.xlu1 %v1922_v36  ;;  %6601 = vpow2.f32 %v2485_v52  ;;  %v8595_v20 = vpop.f32.mrf.mxu2 }
 0x7ab   :  { %v2767_v49 = vsel %vm578_vm11, %v8595_v20, -inf }
 0x7ad   :  { %v2458_v7 = vpop.xlane.xlu0 %2457 }
 0x7ae   :  { %v2478_v33 = vsub.f32 %v8479_v43, %v2458_v7  ;;  %v2471_v43 = vsel %vm578_vm11, %v8517_v8, -inf }
 0x7af   :  { %6229 = vmatmul.msk.f32.gmra.mxu3 %vm50_vm0, %v8073_v1 }
 0x7b0   :  { %v2487_v12 = vmul.f32 1.442695, %v2478_v33  ;;  %v8577_v63 = vpop.eup %6601 }
 0x7b1   :  { %v2501_v45 = vsel %vm578_vm11, %v8577_v63, 0.0 }
 0x7b2   :  { %2463 = vmax.xlane.f32.xlu2 %v2462_v61  ;;  %2469 = vmax.xlane.f32.xlu1 %v2468_v19  ;;  %6603 = vpow2.f32 %v2487_v12  ;;  %v8619_v12 = vpop.f32.mrf.mxu2 }
 0x7b4   :  { %v8603_v24 = vpop.f32.mrf.mxu3 }
 0x7b7   :  { %6230 = vmatmul.msk.f32.gmra.mxu3 %vm50_vm0, %v8086_v34 }
 0x7b8   :  { %v8587_v16 = vpop.eup %6603 }
 0x7b9   :  { %v2504_v53 = vsel %vm578_vm11, %v8587_v16, 0.0 }
 0x7ba   :  { %2472 = vmax.xlane.f32.xlu2 %v2471_v43  ;;  %2502 = vadd.xlane.f32.xlu1 %v2501_v45  ;;  %v8626_v45 = vpop.f32.mrf.mxu2 }
 0x7bc   :  { %v8607_v52 = vpop.f32.mrf.mxu3 }
 0x7bf   :  { %6231 = vmatmul.msk.f32.gmra.mxu3 %vm50_vm0, %v8099_v46 }
 0x7c2   :  { %2765 = vmax.xlane.f32.xlu1 %v2764_v32  ;;  %2505 = vadd.xlane.f32.xlu2 %v2504_v53 }
 0x7c4   :  { %v8613_v61 = vpop.f32.mrf.mxu3 }
 0x7c7   :  { %6232 = vmatmul.msk.f32.gmra.mxu3 %vm50_vm0, %v8140_v48 }
 0x7ca   :  { %2768 = vmax.xlane.f32.xlu2 %v2767_v49 }
 0x7cf   :  { %6233 = vmatmul.msk.f32.gmra.mxu3 %vm50_vm0, %v8153_v35 }
 0x7d7   :  { %v1903_v36 = vpop.xlane.xlu2 %1902  ;;  %6266 = vmatmul.msk.f32.vlgmr.msra.gmra.mxu3 %vm50_vm0, %v8032_v37  ;;  %v8621_v37 = vpop.f32.mrf.mxu3 }
 0x7d8   :  { %6605 = vrcp.f32 %v1903_v36 }
 0x7de   :  { %v6606_v7 = vpop.eup %6605 }
 0x7df   :  { %v1933_v33 = vmul.f32 %v6606_v7, %v8504_v17  ;;  %6267 = vmatmul.msk.f32.gmra.mxu3 %vm50_vm0, %v8046_v58  ;;  %v8630_v32 = vpop.f32.mrf.mxu3 }
 0x7e0   :  { %11943 = vst [vmem:[#allocation11_spill] sm:$0xff] %v8630_v32 }
 0x7e1   :  { %6194 = vmatmul.msk.f32.vlgmr.msra.gmra.mxu1 %vm578_vm11, %v1933_v33 }
 0x7e7   :  { %6268 = vmatmul.msk.f32.gmra.mxu3 %vm50_vm0, %v8060_v31  ;;  %v8617_v19 = vpop.xlane.xlu0 %1920  ;;  %v8641_v7 = vpop.f32.mrf.mxu3 }
 0x7e8   :  { %11944 = vst [vmem:[#allocation12_spill] sm:$0xff] %v8641_v7 }
 0x7ef   :  { %6269 = vmatmul.msk.f32.gmra.mxu3 %vm50_vm0, %v8073_v1  ;;  %v2467_v17 = vpop.xlane.xlu0 %2466 }
 0x7f0   :  { %v2481_v43 = vsub.f32 %v8506_v29, %v2467_v17  ;;  %v8639_v29 = vpop.f32.mrf.mxu2 }
 0x7f2   :  { %v2493_v58 = vmul.f32 1.442695, %v2481_v43 }
 0x7f4   :  { %6607 = vpow2.f32 %v2493_v58 }
 0x7f7   :  { %6270 = vmatmul.msk.f32.gmra.mxu3 %vm50_vm0, %v8086_v34  ;;  %v2476_v31 = vpop.xlane.xlu0 %2475  ;;  %v2776_v34 = vsel %vm578_vm11, %v8639_v29, -inf }
 0x7f8   :  { %v2484_v49 = vsub.f32 %v8521_v18, %v2476_v31 }
 0x7fa   :  { %v8632_v53 = vpop.eup %6607  ;;  %v2499_v36 = vmul.f32 1.442695, %v2484_v49 }
 0x7fb   :  { %v2513_v1 = vsel %vm578_vm11, %v8632_v53, 0.0 }
 0x7fc   :  { %2514 = vadd.xlane.f32.xlu2 %v2513_v1  ;;  %6609 = vpow2.f32 %v2499_v36 }
 0x7ff   :  { %6271 = vmatmul.msk.f32.gmra.mxu3 %vm50_vm0, %v8099_v46 }
 0x802   :  { %v8647_v18 = vpop.eup %6609 }
 0x803   :  { %v2522_v46 = vsel %vm578_vm11, %v8647_v18, 0.0 }
 0x804   :  { %2777 = vmax.xlane.f32.xlu2 %v2776_v34 }
 0x805   :  { %v1906_v33 = vpop.xlane.xlu1 %1905 }
 0x806   :  { %6611 = vrcp.f32 %v1906_v33 }
 0x807   :  { %6272 = vmatmul.msk.f32.gmra.mxu3 %vm50_vm0, %v8140_v48 }
 0x80a   :  { %v8649_v17 = vpop.f32.mrf.mxu3 }
 0x80b   :  { %11945 = vst [vmem:[#allocation13_spill] sm:$0xff] %v8649_v17 }
 0x80c   :  { %v6612_v43 = vpop.eup %6611  ;;  %2523 = vadd.xlane.f32.xlu2 %v2522_v46 }
 0x80d   :  { %v1912_v58 = vpop.xlane.xlu1 %1911  ;;  %v1909_v31 = vpop.xlane.xlu2 %1908  ;;  %v1934_v49 = vmul.f32 %v6612_v43, %v8532_v10 }
 0x80e   :  { %6613 = vrcp.f32 %v1909_v31 }
 0x80f   :  { %6195 = vmatmul.msk.f32.gmra.mxu1 %vm578_vm11, %v1934_v49  ;;  %6273 = vmatmul.msk.f32.gmra.mxu3 %vm50_vm0, %v8153_v35  ;;  %6615 = vrcp.f32 %v1912_v58 }
 0x812   :  { %v8657_v48 = vpop.f32.mrf.mxu3 }
 0x813   :  { %11946 = vst [vmem:[#allocation14_spill] sm:$0xff] %v8657_v48 }
 0x814   :  { %v6614_v1 = vpop.eup %6613 }
 0x815   :  { %v1918_v36 = vpop.xlane.xlu1 %1917  ;;  %v1915_v34 = vpop.xlane.xlu2 %1914  ;;  %v1935_v33 = vmul.f32 %v6614_v1, %v8542_v39 }
 0x816   :  { %v6616_v17 = vpop.eup %6615  ;;  %6617 = vrcp.f32 %v1915_v34 }
 0x817   :  { %6196 = vmatmul.msk.f32.gmra.mxu1 %vm578_vm11, %v1935_v33  ;;  %v1936_v35 = vmul.f32 %v6616_v17, %v8537_v40 }
 0x81a   :  { %v8661_v46 = vpop.f32.mrf.mxu3 }
 0x81c   :  { %v6618_v48 = vpop.eup %6617 }
 0x81d   :  { %v2461_v10 = vpop.xlane.xlu2 %2460  ;;  %v1924_v43 = vpop.xlane.xlu1 %1923  ;;  %v1937_v34 = vmul.f32 %v6618_v48, %v8548_v14 }
 0x81e   :  { %v2479_v31 = vsub.f32 %v8495_v57, %v2461_v10 }
 0x81f   :  { %6197 = vmatmul.msk.f32.gmra.mxu1 %vm578_vm11, %v1936_v35 }
 0x820   :  { %v2489_v49 = vmul.f32 1.442695, %v2479_v31 }
 0x822   :  { %6619 = vpow2.f32 %v2489_v49  ;;  %v8666_v58 = vpop.f32.mrf.mxu3 }
 0x823   :  { %6621 = vrcp.f32 %v1918_v36 }
 0x825   :  { %v2464_v39 = vpop.xlane.xlu2 %2463  ;;  %v2470_v1 = vpop.xlane.xlu1 %2469 }
 0x826   :  { %v2480_v33 = vsub.f32 %v8500_v44, %v2464_v39  ;;  %v2482_v57 = vsub.f32 %v8511_v41, %v2470_v1  ;;  %v2761_v41 = vsel %vm578_vm11, %v8575_v21, -inf }
 0x827   :  { %6198 = vmatmul.msk.f32.gmra.mxu1 %vm578_vm11, %v1937_v34 }
 0x828   :  { %v8670_v7 = vpop.eup %6619  ;;  %v2491_v32 = vmul.f32 1.442695, %v2480_v33  ;;  %v2495_v10 = vmul.f32 1.442695, %v2482_v57  ;;  %v2773_v57 = vsel %vm578_vm11, %v8626_v45, -inf }
 0x829   :  { %v2507_v40 = vsel %vm578_vm11, %v8670_v7, 0.0  ;;  %v6622_v36 = vpop.eup %6621 }
 0x82a   :  { %6623 = vpow2.f32 %v2491_v32  ;;  %v8676_v17 = vpop.f32.mrf.mxu3  ;;  %2508 = vadd.xlane.f32.xlu0 %v2507_v40  ;;  %v1938_v14 = vmul.f32 %v6622_v36, %v8553_v6 }
 0x82b   :  { %6625 = vrcp.f32 %v8617_v19  ;;  %v8687_v19 = vpop.f32.mrf.mxu2 }
 0x82c   :  { %6627 = vpow2.f32 %v2495_v10 }
 0x82d   :  { %v2473_v44 = vpop.xlane.xlu2 %2472  ;;  %v2503_v31 = vpop.xlane.xlu1 %2502  ;;  %6629 = vrcp.f32 %v1924_v43 }
 0x82e   :  { %v2483_v33 = vsub.f32 %v8517_v8, %v2473_v44 }
 0x82f   :  { %6199 = vmatmul.msk.f32.gmra.mxu1 %vm578_vm11, %v1938_v14 }
 0x830   :  { %v8680_v48 = vpop.eup %6623  ;;  %v2497_v43 = vmul.f32 1.442695, %v2483_v33 }
 0x831   :  { %v2510_v32 = vsel %vm578_vm11, %v8680_v48, 0.0  ;;  %v6626_v49 = vpop.eup %6625 }
 0x832   :  { %v2567_v35 = vpop.f32.mrf.mxu3  ;;  %2762 = vmax.xlane.f32.xlu0 %v2761_v41  ;;  %2511 = vadd.xlane.f32.xlu1 %v2510_v32  ;;  %v8689_v39 = vpop.eup %6627  ;;  %v1939_v1 = vmul.f32 %v6626_v49, %v8513_v11  ;;  %6631 = vpow2.f32 %v2497_v43  ;;  %v2770_v32 = vsel %vm578_vm11, %v8619_v12, -inf }
 0x833   :  { %v2516_v34 = vsel %vm578_vm11, %v8689_v39, 0.0  ;;  %v6630_v36 = vpop.eup %6629  ;;  %v8698_v41 = vpop.f32.mrf.mxu2 }
 0x834   :  { %v1940_v11 = vmul.f32 %v6630_v36, %v8561_v51  ;;  %v2782_v49 = vsel %vm578_vm11, %v8698_v41, -inf  ;;  %v2779_v51 = vsel %vm578_vm11, %v8687_v19, -inf }
 0x835   :  { %v2506_v6 = vpop.xlane.xlu2 %2505  ;;  %v2766_v10 = vpop.xlane.xlu1 %2765 }
 0x836   :  { %v2786_v8 = vsub.f32 %v8585_v56, %v2766_v10 }
 0x837   :  { %6200 = vmatmul.msk.f32.gmra.mxu1 %vm578_vm11, %v1939_v1 }
 0x838   :  { %v2795_v33 = vmul.f32 1.442695, %v2786_v8 }
 0x83a   :  { %v2570_v40 = vpop.f32.mrf.mxu3  ;;  %2517 = vadd.xlane.f32.xlu0 %v2516_v34  ;;  %2774 = vmax.xlane.f32.xlu1 %v2773_v57  ;;  %v8708_v57 = vpop.eup %6631  ;;  %6633 = vpow2.f32 %v2795_v33 }
 0x83b   :  { %v2519_v56 = vsel %vm578_vm11, %v8708_v57, 0.0 }
 0x83d   :  { %v2769_v14 = vpop.xlane.xlu2 %2768 }
 0x83e   :  { %v2787_v44 = vsub.f32 %v8595_v20, %v2769_v14 }
 0x83f   :  { %6201 = vmatmul.msk.f32.gmra.mxu1 %vm578_vm11, %v1940_v11 }
 0x840   :  { %v2797_v34 = vmul.f32 1.442695, %v2787_v44  ;;  %v8714_v36 = vpop.eup %6633 }
 0x841   :  { %v2812_v10 = vsel %vm578_vm11, %v8714_v36, 0.0 }
 0x842   :  { %v2573_v1 = vpop.f32.mrf.mxu3  ;;  %2771 = vmax.xlane.f32.xlu0 %v2770_v32  ;;  %2783 = vmax.xlane.f32.xlu1 %v2782_v49  ;;  %6635 = vpow2.f32 %v2797_v34 }
 0x843   :  { %6637 = vrcp.f32 %v2503_v31 }
 0x844   :  { %6639 = vrcp.f32 %v2506_v6 }
 0x848   :  { %v8716_v43 = vpop.eup %6635 }
 0x849   :  { %v2815_v14 = vsel %vm578_vm11, %v8716_v43, 0.0  ;;  %v6638_v44 = vpop.eup %6637 }
 0x84a   :  { %v2576_v20 = vpop.f32.mrf.mxu3  ;;  %2780 = vmax.xlane.f32.xlu0 %v2779_v51  ;;  %2520 = vadd.xlane.f32.xlu1 %v2519_v56  ;;  %v2533_v32 = vmul.f32 %v6638_v44, %v8577_v63  ;;  %v6640_v33 = vpop.eup %6639  ;;  %v1064_v63 = vadd.f32 %v7995_v50, %v7689_v28  ;;  %v8744_v28 = vld [vmem:[%s11798_s3] sm:$0x3f]  ;;  %v6867_v44 = vld [vmem:[%s11796_s0 + $0x18] sm:$0xff] }
 0x84b   :  { %v2534_v31 = vmul.f32 %v6640_v33, %v8587_v16  ;;  %v8747_v50 = vperm.slane %v8744_v28, 4 }
 0x852   :  { %v2579_v11 = vpop.f32.mrf.mxu3  ;;  %2813 = vadd.xlane.f32.xlu0 %v2812_v10  ;;  %2816 = vadd.xlane.f32.xlu1 %v2815_v14 }
 0x853   :  { %2614 = vmatpush.msrb.mxu1 %v2579_v11  ;;  %v1082_v11 = vadd.f32 %v8053_v30, %v7775_v59  ;;  %v6868_v59 = vld [vmem:[%s11796_s0 + $0x30] sm:$0xff] }
 0x855   :  { %2615 = vmatpush.msrb.mxu1 %v2576_v20  ;;  %v1073_v20 = vadd.f32 %v8005_v25, %v7719_v5 }
 0x857   :  { %2616 = vmatpush.msrb.mxu1 %v2573_v1 }
 0x859   :  { %2617 = vmatpush.msrb.mxu1 %v2570_v40 }
 0x85a   :  { %v2866_v8 = vpop.f32.mrf.mxu3 }
 0x85b   :  { %2618 = vmatpush.msrb.mxu1 %v2567_v35 }
 0x85d   :  { %2619 = vmatpush.msrb.mxu1 %v8676_v17 }
 0x85f   :  { %2620 = vmatpush.msrb.mxu1 %v8666_v58 }
 0x861   :  { %2621 = vmatpush.msrb.mxu1 %v8661_v46  ;;  %v1397_v46 = vadd.f32 %v8082_v13, %v1064_v63 }
 0x862   :  { %6234 = vmatmul.msk.f32.vlgmr.msrb.gmra.mxu1 %vm578_vm11, %v2533_v32  ;;  %v2869_v49 = vpop.f32.mrf.mxu3 }
 0x863   :  { %v1715_v51 = vadd.f32 %v8130_v60, %v1397_v46  ;;  %v1400_v60 = vadd.f32 %v8111_v26, %v1073_v20  ;;  %v1403_v26 = vadd.f32 %v8125_v4, %v1082_v11 }
 0x865   :  { %v1718_v25 = vadd.f32 %v8142_v22, %v1400_v60  ;;  %v1721_v22 = vadd.f32 %v8181_v47, %v1403_v26 }
 0x867   :  { %v2966_v32 = vadd.f32 %v6867_v44, %v1718_v25  ;;  %v2969_v30 = vadd.f32 %v6868_v59, %v1721_v22  ;;  %v1070_v44 = vadd.f32 %v7999_v54, %v7705_v9 }
 0x86a   :  { %6235 = vmatmul.msk.f32.gmra.mxu1 %vm578_vm11, %v2534_v31  ;;  %v2872_v40 = vpop.f32.mrf.mxu3  ;;  %v8765_v31 = vadd.f32 %v8747_v50, %v2966_v32 }
 0x86c   :  { %11948 = vst [vmem:[#allocation16_spill] sm:$0xff] %v8765_v31 }
 0x86f   :  { %v2515_v35 = vpop.xlane.xlu2 %2514 }
 0x872   :  { %v2875_v1 = vpop.f32.mrf.mxu3 }
 0x877   :  { %v2778_v34 = vpop.xlane.xlu2 %2777 }
 0x878   :  { %v2790_v17 = vsub.f32 %v8639_v29, %v2778_v34  ;;  %v6865_v29 = vld [vmem:[%s11796_s0] sm:$0xff] }
 0x879   :  { %v2963_v10 = vadd.f32 %v6865_v29, %v1715_v51 }
 0x87a   :  { %v2803_v6 = vmul.f32 1.442695, %v2790_v17  ;;  %v2878_v58 = vpop.f32.mrf.mxu3  ;;  %v3005_v17 = vsel %vm50_vm0, %v8765_v31, 0.0 }
 0x87b   :  { %v8753_v5 = vadd.f32 %v8747_v50, %v2963_v10 }
 0x87c   :  { %6641 = vpow2.f32 %v2803_v6  ;;  %v8774_v6 = vadd.f32 %v8747_v50, %v2969_v30  ;;  %v1079_v30 = vadd.f32 %v8034_v3, %v7755_v0 }
 0x87d   :  { %11947 = vst [vmem:[#allocation15_spill] sm:$0xff] %v8753_v5  ;;  %v2996_v33 = vsel %vm50_vm0, %v8753_v5, 0.0 }
 0x87e   :  { %11949 = vst [vmem:[#allocation17_spill] sm:$0xff] %v8774_v6  ;;  %v3014_v4 = vsel %vm50_vm0, %v8774_v6, 0.0 }
 0x882   :  { %v8734_v56 = vpop.eup %6641  ;;  %v2881_v16 = vpop.f32.mrf.mxu3 }
 0x883   :  { %v2824_v13 = vsel %vm578_vm11, %v8734_v56, 0.0 }
 0x884   :  { %2825 = vadd.xlane.f32.xlu1 %v2824_v13 }
 0x88a   :  { %v2884_v14 = vpop.f32.mrf.mxu3 }
 0x88c   :  { %2997 = vadd.xlane.f32.xlu1 %v2996_v33 }
 0x892   :  { %v2887_v34 = vpop.f32.mrf.mxu3 }
 0x893   :  { %2922 = vmatpush.msra.mxu1 %v2887_v34 }
 0x894   :  { %3006 = vadd.xlane.f32.xlu1 %v3005_v17  ;;  %v2524_v17 = vpop.xlane.xlu2 %2523 }
 0x895   :  { %2923 = vmatpush.msra.mxu1 %v2884_v14 }
 0x897   :  { %2924 = vmatpush.msra.mxu1 %v2881_v16 }
 0x899   :  { %2925 = vmatpush.msra.mxu1 %v2878_v58 }
 0x89b   :  { %2926 = vmatpush.msra.mxu1 %v2875_v1 }
 0x89c   :  { %3015 = vadd.xlane.f32.xlu1 %v3014_v4 }
 0x89d   :  { %2927 = vmatpush.msra.mxu1 %v2872_v40  ;;  %v2509_v47 = vpop.xlane.xlu0 %2508 }
 0x89e   :  { %6643 = vrcp.f32 %v2509_v47 }
 0x89f   :  { %2928 = vmatpush.msra.mxu1 %v2869_v49 }
 0x8a1   :  { %2929 = vmatpush.msra.mxu1 %v2866_v8 }
 0x8a4   :  { %v6644_v63 = vpop.eup %6643 }
 0x8a5   :  { %v2512_v46 = vpop.xlane.xlu1 %2511  ;;  %v2535_v51 = vmul.f32 %v6644_v63, %v8670_v7  ;;  %v2763_v20 = vpop.xlane.xlu0 %2762  ;;  %v1402_v63 = vadd.f32 %v8121_v27, %v1079_v30  ;;  %v6870_v27 = vld [vmem:[%s11796_s0 + $0x28] sm:$0xff] }
 0x8a6   :  { %6645 = vrcp.f32 %v2512_v46  ;;  %v2785_v29 = vsub.f32 %v8575_v21, %v2763_v20 }
 0x8a7   :  { %6236 = vmatmul.msk.f32.gmra.mxu1 %vm578_vm11, %v2535_v51  ;;  %v1720_v51 = vadd.f32 %v8171_v42, %v1402_v63 }
 0x8a8   :  { %v2793_v1 = vmul.f32 1.442695, %v2785_v29 }
 0x8a9   :  { %v2968_v29 = vadd.f32 %v6870_v27, %v1720_v51 }
 0x8aa   :  { %6647 = vpow2.f32 %v2793_v1 }
 0x8ab   :  { %6649 = vrcp.f32 %v2515_v35 }
 0x8ac   :  { %v6646_v58 = vpop.eup %6645 }
 0x8ad   :  { %v2775_v16 = vpop.xlane.xlu1 %2774  ;;  %v2536_v40 = vmul.f32 %v6646_v58, %v8680_v48  ;;  %v2518_v8 = vpop.xlane.xlu0 %2517  ;;  %v11951_v58 = vld [vmem:[#allocation3_spill] sm:$0xff] }
 0x8ae   :  { %v2789_v49 = vsub.f32 %v8626_v45, %v2775_v16  ;;  %v11952_v16 = vld [vmem:[#allocation5_spill] sm:$0xff] }
 0x8af   :  { %6237 = vmatmul.msk.f32.gmra.mxu1 %vm578_vm11, %v2536_v40  ;;  %v1076_v42 = vadd.f32 %v11952_v16, %v11951_v58  ;;  %v8897_v16 = vpop.f32.mrf.mxu1 }
 0x8b0   :  { %v2801_v10 = vmul.f32 1.442695, %v2789_v49  ;;  %v8784_v7 = vpop.eup %6647  ;;  %v11953_v49 = vld [vmem:[#allocation7_spill] sm:$0xff] }
 0x8b1   :  { %v6650_v13 = vpop.eup %6649  ;;  %v2809_v21 = vsel %vm578_vm11, %v8784_v7, 0.0 }
 0x8b2   :  { %6651 = vpow2.f32 %v2801_v10  ;;  %2810 = vadd.xlane.f32.xlu2 %v2809_v21  ;;  %v2537_v35 = vmul.f32 %v6650_v13, %v8632_v53  ;;  %v1399_v53 = vadd.f32 %v8107_v23, %v1070_v44  ;;  %v6869_v23 = vld [vmem:[%s11796_s0 + $0x10] sm:$0xff]  ;;  %v8843_v10 = vadd.f32 %v8747_v50, %v2968_v29  ;;  %v6872_v44 = vld [vmem:[%s11796_s0 + $0x20] sm:$0xff] }
 0x8b3   :  { %6653 = vrcp.f32 %v2518_v8  ;;  %v1401_v8 = vadd.f32 %v11953_v49, %v1076_v42 }
 0x8b4   :  { %11954 = vst [vmem:[#allocation3_spill] sm:$0xff] %v8843_v10 }
 0x8b5   :  { %v2784_v60 = vpop.xlane.xlu1 %2783  ;;  %v2772_v25 = vpop.xlane.xlu0 %2771 }
 0x8b6   :  { %v2792_v48 = vsub.f32 %v8698_v41, %v2784_v60  ;;  %v2788_v45 = vsub.f32 %v8619_v12, %v2772_v25  ;;  %v1717_v12 = vadd.f32 %v8135_v2, %v1399_v53  ;;  %v11956_v60 = vld [vmem:[#allocation9_spill] sm:$0xff]  ;;  %v11957_v25 = vld [vmem:[#allocation4_spill] sm:$0xff] }
 0x8b7   :  { %6238 = vmatmul.msk.f32.gmra.mxu1 %vm578_vm11, %v2537_v35  ;;  %v1719_v35 = vadd.f32 %v11956_v60, %v1401_v8 }
 0x8b8   :  { %v8792_v14 = vpop.eup %6651  ;;  %v2807_v11 = vmul.f32 1.442695, %v2792_v48  ;;  %v2799_v32 = vmul.f32 1.442695, %v2788_v45  ;;  %v2965_v2 = vadd.f32 %v6869_v23, %v1717_v12  ;;  %v3011_v48 = vsel %vm50_vm0, %v8843_v10, 0.0  ;;  %v11958_v45 = vld [vmem:[#allocation6_spill] sm:$0xff] }
 0x8b9   :  { %v2821_v33 = vsel %vm578_vm11, %v8792_v14, 0.0  ;;  %v6654_v26 = vpop.eup %6653  ;;  %v11961_v12 = vld [vmem:[#allocation10_spill] sm:$0xff] }
 0x8ba   :  { %6655 = vpow2.f32 %v2807_v11  ;;  %2822 = vadd.xlane.f32.xlu0 %v2821_v33  ;;  %v2538_v22 = vmul.f32 %v6654_v26, %v8689_v39  ;;  %v8821_v46 = vadd.f32 %v8747_v50, %v2965_v2  ;;  %v1085_v11 = vadd.f32 %v11958_v45, %v11957_v25  ;;  %v11959_v33 = vld [vmem:[#allocation8_spill] sm:$0xff] }
 0x8bb   :  { %6657 = vpow2.f32 %v2799_v32  ;;  %v2967_v32 = vadd.f32 %v6872_v44, %v1719_v35 }
 0x8bc   :  { %11950 = vst [vmem:[#allocation18_spill] sm:$0xff] %v8821_v46  ;;  %v1404_v26 = vadd.f32 %v11959_v33, %v1085_v11 }
 0x8bd   :  { %v2521_v41 = vpop.xlane.xlu1 %2520  ;;  %v2781_v34 = vpop.xlane.xlu0 %2780  ;;  %v8862_v53 = vadd.f32 %v8747_v50, %v2967_v32 }
 0x8be   :  { %6659 = vrcp.f32 %v2521_v41  ;;  %v2791_v59 = vsub.f32 %v8687_v19, %v2781_v34  ;;  %v1067_v19 = vadd.f32 %v7997_v38, %v7695_v55  ;;  %v1722_v41 = vadd.f32 %v11961_v12, %v1404_v26 }
 0x8bf   :  { %6239 = vmatmul.msk.f32.gmra.mxu1 %vm578_vm11, %v2538_v22  ;;  %11960 = vst [vmem:[#allocation7_spill] sm:$0xff] %v8862_v53  ;;  %v6873_v22 = vld [vmem:[%s11796_s0 + $0x38] sm:$0xff] }
 0x8c0   :  { %v8803_v9 = vpop.eup %6655  ;;  %v2805_v39 = vmul.f32 1.442695, %v2791_v59  ;;  %v1398_v3 = vadd.f32 %v8096_v15, %v1067_v19  ;;  %v3002_v15 = vsel %vm50_vm0, %v8821_v46, 0.0  ;;  %v2970_v34 = vadd.f32 %v6873_v22, %v1722_v41 }
 0x8c1   :  { %v8805_v54 = vpop.eup %6657  ;;  %v2830_v4 = vsel %vm578_vm11, %v8803_v9, 0.0  ;;  %v3008_v59 = vsel %vm50_vm0, %v8862_v53, 0.0 }
 0x8c2   :  { %2831 = vadd.xlane.f32.xlu0 %v2830_v4  ;;  %v2818_v47 = vsel %vm578_vm11, %v8805_v54, 0.0  ;;  %6661 = vpow2.f32 %v2805_v39  ;;  %v1716_v55 = vadd.f32 %v8133_v62, %v1398_v3  ;;  %v6871_v62 = vld [vmem:[%s11796_s0 + $0x8] sm:$0xff]  ;;  %v8871_v30 = vadd.f32 %v8747_v50, %v2970_v34  ;;  %v11963_v4 = vld [vmem:[#allocation2_spill] sm:$0xff] }
 0x8c3   :  { %2819 = vadd.xlane.f32.xlu2 %v2818_v47  ;;  %6663 = vrcp.f32 %v2524_v17 }
 0x8c4   :  { %v6660_v0 = vpop.eup %6659  ;;  %11962 = vst [vmem:[#allocation9_spill] sm:$0xff] %v8871_v30  ;;  %v3017_v23 = vsel %vm50_vm0, %v8871_v30, 0.0 }
 0x8c5   :  { %v2539_v20 = vmul.f32 %v6660_v0, %v8708_v57  ;;  %v2964_v57 = vadd.f32 %v6871_v62, %v1716_v55  ;;  %v2817_v2 = vpop.xlane.xlu1 %2816  ;;  %v8900_v62 = vpop.f32.mrf.mxu1 }
 0x8c7   :  { %6240 = vmatmul.msk.f32.gmra.mxu1 %vm578_vm11, %v2539_v20  ;;  %v8847_v21 = vadd.f32 %v8747_v50, %v2964_v57  ;;  %v2814_v57 = vpop.xlane.xlu0 %2813 }
 0x8c8   :  { %v8827_v38 = vpop.eup %6661 }
 0x8c9   :  { %v6664_v1 = vpop.eup %6663  ;;  %v2827_v40 = vsel %vm578_vm11, %v8827_v38, 0.0  ;;  %11955 = vst [vmem:[#allocation5_spill] sm:$0xff] %v8847_v21 }
 0x8ca   :  { %3003 = vadd.xlane.f32.xlu0 %v3002_v15  ;;  %v2540_v13 = vmul.f32 %v6664_v1, %v8647_v18  ;;  %v2999_v18 = vsel %vm50_vm0, %v8847_v21, 0.0 }
 0x8cb   :  { %2828 = vadd.xlane.f32.xlu2 %v2827_v40 }
 0x8cd   :  { %v8902_v49 = vpop.f32.mrf.mxu1 }
 0x8cf   :  { %6241 = vmatmul.msk.f32.gmra.mxu1 %vm578_vm11, %v2540_v13 }
 0x8d2   :  { %3012 = vadd.xlane.f32.xlu0 %v3011_v48 }
 0x8d3   :  { %3000 = vadd.xlane.f32.xlu2 %v2999_v18 }
 0x8d5   :  { %v8906_v35 = vpop.f32.mrf.mxu1 }
 0x8db   :  { %3009 = vadd.xlane.f32.xlu2 %v3008_v59 }
 0x8dd   :  { %v8910_v32 = vpop.f32.mrf.mxu1 }
 0x8e3   :  { %3018 = vadd.xlane.f32.xlu2 %v3017_v23 }
 0x8e5   :  { %v8921_v34 = vpop.f32.mrf.mxu1 }
 0x8f7   :  { %v8875_v17 = vpop.xlane.xlu1 %2825 }
 0x8ff   :  { %v2998_v39 = vpop.xlane.xlu1 %2997 }
 0x900   :  { %v3044_v19 = vmul.f32 %v2998_v39, %v11963_v4 }
 0x902   :  { %v8879_v47 = vsub.f32 %v8753_v5, %v3044_v19 }
 0x904   :  { %v3076_v63 = vmul.f32 %v8879_v47, %v8879_v47 }
 0x906   :  { %v3092_v0 = vsel %vm50_vm0, %v3076_v63, 0.0  ;;  %v6920_v63 = vmov 0  }
 0x907   :  { %v3007_v3 = vpop.xlane.xlu1 %3006  ;;  %3093 = vadd.xlane.f32.xlu2 %v3092_v0  ;;  %6320 = vset.pattern.permute.xlu1 %v6920_v63 }
 0x908   :  { %v3047_v51 = vmul.f32 %v3007_v3, %v11963_v4  ;;  %6319 = vset.pattern.permute.xlu0 %v6920_v63  ;;  %6321 = vset.pattern.permute.xlu2 %v6920_v63  ;;  %v3383_v63 = vld [vmem:[%s11801_s4 + $0x8] sm:$0xff] }
 0x90a   :  { %v8886_v20 = vsub.f32 %v8765_v31, %v3047_v51 }
 0x90c   :  { %v3079_v55 = vmul.f32 %v8886_v20, %v8886_v20 }
 0x90e   :  { %v3101_v27 = vsel %vm50_vm0, %v3079_v55, 0.0 }
 0x90f   :  { %v3016_v29 = vpop.xlane.xlu1 %3015  ;;  %3102 = vadd.xlane.f32.xlu2 %v3101_v27 }
 0x910   :  { %v3050_v15 = vmul.f32 %v3016_v29, %v11963_v4 }
 0x912   :  { %v8893_v1 = vsub.f32 %v8774_v6, %v3050_v15 }
 0x914   :  { %v3082_v58 = vmul.f32 %v8893_v1, %v8893_v1 }
 0x916   :  { %v3110_v42 = vsel %vm50_vm0, %v3082_v58, 0.0  ;;  %v8941_v58 = vpop.f32.mrf.mxu1 }
 0x917   :  { %3111 = vadd.xlane.f32.xlu2 %v3110_v42 }
 0x925   :  { %v2811_v40 = vpop.xlane.xlu2 %2810 }
 0x926   :  { %6665 = vrcp.f32 %v2811_v40 }
 0x927   :  { %6667 = vrcp.f32 %v2814_v57 }
 0x928   :  { %6669 = vrcp.f32 %v2817_v2 }
 0x92c   :  { %v6666_v8 = vpop.eup %6665 }
 0x92d   :  { %v2823_v13 = vpop.xlane.xlu0 %2822  ;;  %v2841_v60 = vmul.f32 %v6666_v8, %v8784_v7  ;;  %v6668_v48 = vpop.eup %6667 }
 0x92e   :  { %v2842_v11 = vmul.f32 %v6668_v48, %v8714_v36  ;;  %v6670_v44 = vpop.eup %6669  ;;  %v8954_v48 = vpop.f32.mrf.mxu1 }
 0x92f   :  { %6274 = vmatmul.msk.f32.vlgmr.msra.gmra.mxu1 %vm578_vm11, %v2841_v60  ;;  %v2843_v26 = vmul.f32 %v6670_v44, %v8716_v43 }
 0x935   :  { %v2832_v25 = vpop.xlane.xlu0 %2831 }
 0x936   :  { %v2820_v45 = vpop.xlane.xlu2 %2819 }
 0x937   :  { %6275 = vmatmul.msk.f32.gmra.mxu1 %vm578_vm11, %v2842_v11  ;;  %6671 = vrcp.f32 %v2820_v45 }
 0x938   :  { %6673 = vrcp.f32 %v2823_v13 }
 0x939   :  { %6675 = vrcp.f32 %v8875_v17 }
 0x93d   :  { %v3004_v18 = vpop.xlane.xlu0 %3003  ;;  %v6672_v41 = vpop.eup %6671 }
 0x93e   :  { %v2829_v33 = vpop.xlane.xlu2 %2828  ;;  %v3046_v7 = vmul.f32 %v3004_v18, %v11963_v4  ;;  %v2844_v43 = vmul.f32 %v6672_v41, %v8805_v54  ;;  %v6674_v51 = vpop.eup %6673 }
 0x93f   :  { %6276 = vmatmul.msk.f32.gmra.mxu1 %vm578_vm11, %v2843_v26  ;;  %v2845_v15 = vmul.f32 %v6674_v51, %v8792_v14  ;;  %v6676_v40 = vpop.eup %6675  ;;  %6677 = vrcp.f32 %v2829_v33  ;;  %v4143_v26 = vld [vmem:[%s11800_s6 + $0x8] sm:$0xff]  ;;  %v4149_v51 = vld [vmem:[%s11800_s6 + $0x38] sm:$0xff] }
 0x940   :  { %v8915_v12 = vsub.f32 %v8821_v46, %v3046_v7  ;;  %v2846_v14 = vmul.f32 %v6676_v40, %v8734_v56  ;;  %6679 = vrcp.f32 %v2832_v25  ;;  %v2623_v56 = vpop.f32.mrf.mxu1 }
 0x942   :  { %v3078_v36 = vmul.f32 %v8915_v12, %v8915_v12 }
 0x944   :  { %v3098_v22 = vsel %vm50_vm0, %v3078_v36, 0.0  ;;  %v4144_v36 = vld [vmem:[%s11800_s6 + $0x10] sm:$0xff] }
 0x945   :  { %3099 = vadd.xlane.f32.xlu1 %v3098_v22  ;;  %v3013_v59 = vpop.xlane.xlu0 %3012  ;;  %v6678_v11 = vpop.eup %6677  ;;  %4222 = vperm.xlu2 %6321, %v4144_v36   ;;  %v4145_v22 = vld [vmem:[%s11800_s6 + $0x18] sm:$0xff] }
 0x946   :  { %v3001_v23 = vpop.xlane.xlu2 %3000  ;;  %v3049_v2 = vmul.f32 %v3013_v59, %v11963_v4  ;;  %v2847_v33 = vmul.f32 %v6678_v11, %v8827_v38  ;;  %v6680_v7 = vpop.eup %6679  ;;  %v4146_v38 = vld [vmem:[%s11800_s6 + $0x20] sm:$0xff] }
 0x947   :  { %v3045_v39 = vmul.f32 %v3001_v23, %v11963_v4  ;;  %6277 = vmatmul.msk.f32.gmra.mxu1 %vm578_vm11, %v2844_v43  ;;  %v2848_v25 = vmul.f32 %v6680_v7, %v8803_v9  ;;  %v4142_v59 = vld [vmem:[%s11800_s6] sm:$0xff]  ;;  %v3385_v9 = vld [vmem:[%s11801_s4 + $0x18] sm:$0xff]  ;;  %v3384_v23 = vld [vmem:[%s11801_s4 + $0x10] sm:$0xff]  ;;  %v9019_v7 = vperm.slane %v8744_v28, 3 }
 0x948   :  { %v8927_v19 = vsub.f32 %v8843_v10, %v3049_v2  ;;  %v2626_v41 = vpop.f32.mrf.mxu1  ;;  %3447 = vmatpush.msra.mxu0 %v3385_v9  ;;  %v4148_v43 = vld [vmem:[%s11800_s6 + $0x30] sm:$0xff] }
 0x949   :  { %v8931_v0 = vsub.f32 %v8847_v21, %v3045_v39  ;;  %v4147_v39 = vld [vmem:[%s11800_s6 + $0x28] sm:$0xff] }
 0x94a   :  { %v3081_v3 = vmul.f32 %v8927_v19, %v8927_v19  ;;  %3448 = vmatpush.msra.mxu0 %v3384_v23 }
 0x94b   :  { %v3077_v54 = vmul.f32 %v8931_v0, %v8931_v0 }
 0x94c   :  { %v3107_v55 = vsel %vm50_vm0, %v3081_v3, 0.0  ;;  %3449 = vmatpush.msra.mxu0 %v3383_v63  ;;  %v3382_v3 = vld [vmem:[%s11801_s4] sm:$0xff] }
 0x94d   :  { %v3095_v27 = vsel %vm50_vm0, %v3077_v54, 0.0  ;;  %3108 = vadd.xlane.f32.xlu1 %v3107_v55  ;;  %4227 = vperm.xlu2 %6321, %v4145_v22  }
 0x94e   :  { %3096 = vadd.xlane.f32.xlu0 %v3095_v27  ;;  %v3010_v29 = vpop.xlane.xlu2 %3009  ;;  %3450 = vmatpush.msra.mxu0 %v3382_v3  ;;  %v4151_v27 = vld [vmem:[%s11800_s6 + $0x48] sm:$0xff] }
 0x94f   :  { %v3048_v42 = vmul.f32 %v3010_v29, %v11963_v4  ;;  %6278 = vmatmul.msk.f32.gmra.mxu1 %vm578_vm11, %v2845_v15  ;;  %v4150_v29 = vld [vmem:[%s11800_s6 + $0x40] sm:$0xff] }
 0x950   :  { %v8987_v2 = vpop.f32.mrf.mxu1 }
 0x951   :  { %v8946_v57 = vsub.f32 %v8862_v53, %v3048_v42 }
 0x953   :  { %v3080_v17 = vmul.f32 %v8946_v57, %v8946_v57 }
 0x955   :  { %v3104_v8 = vsel %vm50_vm0, %v3080_v17, 0.0  ;;  %4237 = vperm.xlu2 %6321, %v4147_v39   ;;  %v2327_v39 = vadd.f32 %v8900_v62, %v8607_v52  ;;  %v2330_v52 = vadd.f32 %v8902_v49, %v8613_v61  ;;  %v6876_v61 = vld [vmem:[%s11796_s0 + $0x50] sm:$0xff] }
 0x956   :  { %3105 = vadd.xlane.f32.xlu0 %v3104_v8  ;;  %v3019_v13 = vpop.xlane.xlu2 %3018 }
 0x957   :  { %v3051_v60 = vmul.f32 %v3019_v13, %v11963_v4  ;;  %6279 = vmatmul.msk.f32.gmra.mxu1 %vm578_vm11, %v2846_v14  ;;  %v2648_v3 = vadd.f32 %v2626_v41, %v2327_v39 }
 0x958   :  { %v2632_v15 = vpop.f32.mrf.mxu1 }
 0x959   :  { %v8957_v45 = vsub.f32 %v8871_v30, %v3051_v60 }
 0x95b   :  { %v3083_v44 = vmul.f32 %v8957_v45, %v8957_v45 }
 0x95d   :  { %v3113_v18 = vsel %vm50_vm0, %v3083_v44, 0.0  ;;  %4252 = vperm.xlu2 %6321, %v4150_v29   ;;  %v9014_v44 = vperm.slane %v8744_v28, 2  ;;  %v6874_v28 = vld [vmem:[%s11796_s0 + $0x40] sm:$0xff] }
 0x95e   :  { %3114 = vadd.xlane.f32.xlu0 %v3113_v18 }
 0x95f   :  { %6280 = vmatmul.msk.f32.gmra.mxu1 %vm578_vm11, %v2847_v33 }
 0x960   :  { %v9011_v8 = vpop.f32.mrf.mxu1 }
 0x966   :  { %4217 = vperm.xlu1 %6320, %v4143_v26  }
 0x967   :  { %6281 = vmatmul.msk.f32.gmra.mxu1 %vm578_vm11, %v2848_v25 }
 0x968   :  { %v9016_v33 = vpop.f32.mrf.mxu1 }
 0x96e   :  { %4232 = vperm.xlu1 %6320, %v4146_v38  }
 0x970   :  { %v9025_v38 = vpop.f32.mrf.mxu1 }
 0x972   :  { %4212 = vperm.xlu0 %6319, %v4142_v59   ;;  %v2324_v59 = vadd.f32 %v8897_v16, %v8603_v24 }
 0x974   :  { %v2647_v9 = vadd.f32 %v2623_v56, %v2324_v59 }
 0x976   :  { %4242 = vperm.xlu1 %6320, %v4148_v43  }
 0x978   :  { %v9027_v22 = vpop.f32.mrf.mxu1 }
 0x97a   :  { %v3094_v54 = vpop.xlane.xlu2 %3093  ;;  %4247 = vperm.xlu0 %6319, %v4149_v51  }
 0x97b   :  { %v3140_v55 = vmul.f32 %v3094_v54, %v11963_v4  ;;  %v6875_v54 = vld [vmem:[%s11796_s0 + $0x48] sm:$0xff] }
 0x97d   :  { %v3156_v42 = vadd.f32 1e-05, %v3140_v55 }
 0x97e   :  { %4257 = vperm.xlu1 %6320, %v4151_v27  }
 0x97f   :  { %6681 = vrsqrt.f32 %v3156_v42  ;;  %vm3178_vm7 = vweird.f32 %v3156_v42 }
 0x982   :  { %v3103_v56 = vpop.xlane.xlu2 %3102 }
 0x983   :  { %v3143_v41 = vmul.f32 %v3103_v56, %v11963_v4 }
 0x985   :  { %v6682_v40 = vpop.eup %6681 }
 0x986   :  { %v3173_v17 = vmul.f32 %v6682_v40, %v3156_v42  ;;  %vm3179_vm11 = vweird.f32 %v6682_v40 }
 0x987   :  { %vm3180_vm8 = vmor %vm3178_vm7, %vm3179_vm11 }
 0x988   :  { %v3174_v13 = vmul.f32 %v6682_v40, %v3173_v17 }
 0x98a   :  { %v3175_v14 = vmul.f32 0.5, %v3174_v13 }
 0x98c   :  { %v3176_v60 = vsub.f32 1.5, %v3175_v14 }
 0x98e   :  { %v3177_v11 = vmul.f32 %v6682_v40, %v3176_v60  ;;  %v9057_v60 = vadd.f32 1e-05, %v3143_v41 }
 0x990   :  { %v3181_v18 = vsel %vm3180_vm8, %v6682_v40, %v3177_v11  ;;  %v2649_v40 = vadd.f32 %v8987_v2, %v2330_v52  ;;  %vm3208_vm2 = vweird.f32 %v9057_v60 }
 0x991   :  { %v3332_v26 = vmul.f32 %v3181_v18, %v8879_v47  ;;  %v2333_v18 = vadd.f32 %v8906_v35, %v8621_v37  ;;  %v6877_v35 = vld [vmem:[%s11796_s0 + $0x58] sm:$0xff] }
 0x993   :  { %v3349_v36 = vmul.f32 %v9014_v44, %v3332_v26 }
 0x995   :  { %v3366_v25 = vadd.f32 %v9019_v7, %v3349_v36 }
 0x997   :  { %6282 = vmatmul.msk.f32.vlgmr.msra.gmra.mxu0 %vm50_vm0, %v3366_v25  ;;  %v2650_v25 = vadd.f32 %v2632_v15, %v2333_v18  ;;  %v3112_v18 = vpop.xlane.xlu2 %3111 }
 0x9ac   :  { %v2931_v23 = vpop.f32.mrf.mxu1 }
 0x9ad   :  { %v2955_v43 = vadd.f32 %v2931_v23, %v2647_v9 }
 0x9af   :  { %v2971_v47 = vadd.f32 %v6874_v28, %v2955_v43 }
 0x9b1   :  { %v9037_v63 = vadd.f32 %v8747_v50, %v2971_v47 }
 0x9b3   :  { %11964 = vst [vmem:[#allocation4_spill] sm:$0xff] %v9037_v63  ;;  %v3020_v51 = vsel %vm50_vm0, %v9037_v63, 0.0 }
 0x9b4   :  { %3021 = vadd.xlane.f32.xlu0 %v3020_v51  ;;  %v2934_v24 = vpop.f32.mrf.mxu1 }
 0x9b5   :  { %v2956_v16 = vadd.f32 %v2934_v24, %v2648_v3 }
 0x9b7   :  { %v2972_v55 = vadd.f32 %v6875_v54, %v2956_v16  ;;  %v11968_v16 = vld [vmem:[#allocation11_spill] sm:$0xff] }
 0x9b8   :  { %v3100_v27 = vpop.xlane.xlu1 %3099  ;;  %v2336_v56 = vadd.f32 %v8910_v32, %v11968_v16 }
 0x9b9   :  { %v3142_v29 = vmul.f32 %v3100_v27, %v11963_v4  ;;  %v9048_v62 = vadd.f32 %v8747_v50, %v2972_v55 }
 0x9ba   :  { %v2651_v52 = vadd.f32 %v9011_v8, %v2336_v56 }
 0x9bb   :  { %11965 = vst [vmem:[#allocation6_spill] sm:$0xff] %v9048_v62  ;;  %v9051_v42 = vadd.f32 1e-05, %v3142_v29  ;;  %v3023_v17 = vsel %vm50_vm0, %v9048_v62, 0.0 }
 0x9bc   :  { %v2937_v13 = vpop.f32.mrf.mxu1  ;;  %3024 = vadd.xlane.f32.xlu1 %v3023_v17 }
 0x9bd   :  { %6683 = vrsqrt.f32 %v9051_v42  ;;  %v2957_v14 = vadd.f32 %v2937_v13, %v2649_v40  ;;  %vm3198_vm14 = vweird.f32 %v9051_v42 }
 0x9be   :  { %6685 = vrsqrt.f32 %v9057_v60 }
 0x9bf   :  { %v2973_v49 = vadd.f32 %v6876_v61, %v2957_v14  ;;  %v11969_v61 = vld [vmem:[#allocation12_spill] sm:$0xff] }
 0x9c0   :  { %v3109_v39 = vpop.xlane.xlu1 %3108 }
 0x9c1   :  { %v3097_v11 = vpop.xlane.xlu0 %3096  ;;  %v9065_v2 = vadd.f32 %v8747_v50, %v2973_v49  ;;  %v3145_v27 = vmul.f32 %v3109_v39, %v11963_v4  ;;  %v2339_v49 = vadd.f32 %v8921_v34, %v11969_v61 }
 0x9c2   :  { %v3141_v26 = vmul.f32 %v3097_v11, %v11963_v4 }
 0x9c3   :  { %11966 = vst [vmem:[#allocation8_spill] sm:$0xff] %v9065_v2  ;;  %v9068_v36 = vpop.eup %6683  ;;  %v3026_v9 = vsel %vm50_vm0, %v9065_v2, 0.0 }
 0x9c4   :  { %v3157_v59 = vadd.f32 1e-05, %v3141_v26  ;;  %v3193_v23 = vmul.f32 %v9068_v36, %v9051_v42  ;;  %3027 = vadd.xlane.f32.xlu2 %v3026_v9  ;;  %v2940_v43 = vpop.f32.mrf.mxu1  ;;  %v9078_v47 = vpop.eup %6685  ;;  %v9099_v26 = vadd.f32 1e-05, %v3145_v27  ;;  %v6878_v9 = vld [vmem:[%s11796_s0 + $0x60] sm:$0xff]  ;;  %vm3199_vm10 = vweird.f32 %v9068_v36 }
 0x9c5   :  { %v2958_v37 = vadd.f32 %v2940_v43, %v2650_v25  ;;  %v3203_v55 = vmul.f32 %v9078_v47, %v9057_v60  ;;  %v2652_v43 = vadd.f32 %v9016_v33, %v2339_v49  ;;  %vm3200_vm15 = vmor %vm3198_vm14, %vm3199_vm10  ;;  %vm3209_vm1 = vweird.f32 %v9078_v47 }
 0x9c6   :  { %6687 = vrsqrt.f32 %v3157_v59  ;;  %v3194_v15 = vmul.f32 %v9068_v36, %v3193_v23  ;;  %vm3188_vm12 = vweird.f32 %v3157_v59  ;;  %vm3210_vm3 = vmor %vm3208_vm2, %vm3209_vm1  ;;  %vm3228_vm7 = vweird.f32 %v9099_v26 }
 0x9c7   :  { %v2974_v28 = vadd.f32 %v6877_v35, %v2958_v37  ;;  %v3204_v11 = vmul.f32 %v9078_v47, %v3203_v55  ;;  %v3146_v37 = vmul.f32 %v3112_v18, %v11963_v4 }
 0x9c8   :  { %v3195_v41 = vmul.f32 0.5, %v3194_v15 }
 0x9c9   :  { %v3106_v3 = vpop.xlane.xlu0 %3105  ;;  %v9082_v51 = vadd.f32 %v8747_v50, %v2974_v28  ;;  %v3205_v15 = vmul.f32 0.5, %v3204_v11  ;;  %v9118_v55 = vadd.f32 1e-05, %v3146_v37 }
 0x9ca   :  { %v3144_v24 = vmul.f32 %v3106_v3, %v11963_v4  ;;  %v3196_v8 = vsub.f32 1.5, %v3195_v41 }
 0x9cb   :  { %11967 = vst [vmem:[#allocation10_spill] sm:$0xff] %v9082_v51  ;;  %v3029_v17 = vsel %vm50_vm0, %v9082_v51, 0.0  ;;  %vm3238_vm10 = vweird.f32 %v9118_v55 }
 0x9cc   :  { %v6688_v54 = vpop.eup %6687  ;;  %v9090_v29 = vadd.f32 1e-05, %v3144_v24  ;;  %v2943_v13 = vpop.f32.mrf.mxu1  ;;  %3030 = vadd.xlane.f32.xlu0 %v3029_v17  ;;  %v3197_v39 = vmul.f32 %v9068_v36, %v3196_v8 }
 0x9cd   :  { %v3183_v40 = vmul.f32 %v6688_v54, %v3157_v59  ;;  %v2959_v14 = vadd.f32 %v2943_v13, %v2651_v52  ;;  %vm3189_vm9 = vweird.f32 %v6688_v54  ;;  %v6879_v52 = vld [vmem:[%s11796_s0 + $0x68] sm:$0xff]  ;;  %v3206_v13 = vsub.f32 1.5, %v3205_v15 }
 0x9ce   :  { %6689 = vrsqrt.f32 %v9090_v29  ;;  %vm3190_vm13 = vmor %vm3188_vm12, %vm3189_vm9  ;;  %vm3218_vm5 = vweird.f32 %v9090_v29 }
 0x9cf   :  { %v3184_v32 = vmul.f32 %v6688_v54, %v3183_v40  ;;  %v2975_v23 = vadd.f32 %v6878_v9, %v2959_v14  ;;  %6691 = vrsqrt.f32 %v9099_v26  ;;  %v11971_v40 = vld [vmem:[#allocation13_spill] sm:$0xff]  ;;  %v3207_v8 = vmul.f32 %v9078_v47, %v3206_v13 }
 0x9d0   :  { %v2342_v17 = vadd.f32 %v8941_v58, %v11971_v40  ;;  %6693 = vrsqrt.f32 %v9118_v55 }
 0x9d1   :  { %v3185_v25 = vmul.f32 0.5, %v3184_v32  ;;  %v9107_v34 = vadd.f32 %v8747_v50, %v2975_v23  ;;  %v3201_v32 = vsel %vm3200_vm15, %v9068_v36, %v3197_v39  ;;  %v3115_v61 = vpop.xlane.xlu0 %3114  ;;  %v11973_v39 = vld [vmem:[#allocation14_spill] sm:$0xff] }
 0x9d2   :  { %v3334_v11 = vmul.f32 %v3201_v32, %v8915_v12  ;;  %v3147_v58 = vmul.f32 %v3115_v61, %v11963_v4 }
 0x9d3   :  { %v3186_v35 = vsub.f32 1.5, %v3185_v25  ;;  %11970 = vst [vmem:[#allocation2_spill] sm:$0xff] %v9107_v34  ;;  %v3032_v16 = vsel %vm50_vm0, %v9107_v34, 0.0 }
 0x9d4   :  { %v9109_v28 = vpop.eup %6689  ;;  %v2946_v24 = vpop.f32.mrf.mxu1  ;;  %3033 = vadd.xlane.f32.xlu1 %v3032_v16  ;;  %v9148_v12 = vadd.f32 1e-05, %v3147_v58 }
 0x9d5   :  { %v3187_v3 = vmul.f32 %v6688_v54, %v3186_v35  ;;  %v3213_v33 = vmul.f32 %v9109_v28, %v9090_v29  ;;  %v2960_v56 = vadd.f32 %v2946_v24, %v2652_v43  ;;  %v9129_v49 = vpop.eup %6691  ;;  %v6880_v43 = vld [vmem:[%s11796_s0 + $0x70] sm:$0xff]  ;;  %v3351_v35 = vmul.f32 %v9014_v44, %v3334_v11 }
 0x9d6   :  { %v3223_v25 = vmul.f32 %v9129_v49, %v9099_v26  ;;  %v6694_v15 = vpop.eup %6693  ;;  %6695 = vrsqrt.f32 %v9148_v12  ;;  %vm3219_vm4 = vweird.f32 %v9109_v28  ;;  %vm3229_vm11 = vweird.f32 %v9129_v49 }
 0x9d7   :  { %v3191_v27 = vsel %vm3190_vm13, %v6688_v54, %v3187_v3  ;;  %v2976_v41 = vadd.f32 %v6879_v52, %v2960_v56  ;;  %v3214_v14 = vmul.f32 %v9109_v28, %v3213_v33  ;;  %v2653_v54 = vadd.f32 %v9025_v38, %v2342_v17  ;;  %vm3220_vm6 = vmor %vm3218_vm5, %vm3219_vm4 }
 0x9d8   :  { %v3333_v59 = vmul.f32 %v3191_v27, %v8931_v0  ;;  %v2345_v3 = vadd.f32 %v8954_v48, %v11973_v39  ;;  %v3211_v33 = vsel %vm3210_vm3, %v9078_v47, %v3207_v8  ;;  %v3224_v24 = vmul.f32 %v9129_v49, %v3223_v25  ;;  %vm3230_vm8 = vmor %vm3228_vm7, %vm3229_vm11 }
 0x9d9   :  { %v9132_v42 = vadd.f32 %v8747_v50, %v2976_v41  ;;  %v3215_v9 = vmul.f32 0.5, %v3214_v14  ;;  %v3335_v27 = vmul.f32 %v3211_v33, %v8886_v20  ;;  %v3368_v52 = vadd.f32 %v9019_v7, %v3351_v35  ;;  %v6881_v20 = vld [vmem:[%s11796_s0 + $0x78] sm:$0xff] }
 0x9da   :  { %v3350_v0 = vmul.f32 %v9014_v44, %v3333_v59  ;;  %v2654_v56 = vadd.f32 %v9027_v22, %v2345_v3  ;;  %v3233_v48 = vmul.f32 %v6694_v15, %v9118_v55  ;;  %v3225_v47 = vmul.f32 0.5, %v3224_v24 }
 0x9db   :  { %11972 = vst [vmem:[#allocation11_spill] sm:$0xff] %v9132_v42  ;;  %v3035_v36 = vsel %vm50_vm0, %v9132_v42, 0.0  ;;  %v3216_v16 = vsub.f32 1.5, %v3215_v9  ;;  %v3352_v13 = vmul.f32 %v9014_v44, %v3335_v27  ;;  %vm3239_vm9 = vweird.f32 %v6694_v15 }
 0x9dc   :  { %v3367_v18 = vadd.f32 %v9019_v7, %v3350_v0  ;;  %3036 = vadd.xlane.f32.xlu2 %v3035_v36  ;;  %v2949_v38 = vpop.f32.mrf.mxu1  ;;  %v3234_v32 = vmul.f32 %v6694_v15, %v3233_v48  ;;  %v3226_v14 = vsub.f32 1.5, %v3225_v47  ;;  %v6696_v0 = vpop.eup %6695  ;;  %vm3240_vm12 = vmor %vm3238_vm10, %vm3239_vm9  ;;  %vm3248_vm14 = vweird.f32 %v9148_v12 }
 0x9dd   :  { %v2961_v23 = vadd.f32 %v2949_v38, %v2653_v54  ;;  %v3217_v41 = vmul.f32 %v9109_v28, %v3216_v16  ;;  %v3369_v58 = vadd.f32 %v9019_v7, %v3352_v13  ;;  %v3243_v8 = vmul.f32 %v6696_v0, %v9148_v12  ;;  %v49_v12 = vld [vmem:[%s11803_s8] sm:$0x3] }
 0x9de   :  { %6283 = vmatmul.msk.f32.gmra.mxu0 %vm50_vm0, %v3367_v18  ;;  %v3235_v36 = vmul.f32 0.5, %v3234_v32  ;;  %v3227_v18 = vmul.f32 %v9129_v49, %v3226_v14  ;;  %vm3249_vm13 = vweird.f32 %v6696_v0 }
 0x9df   :  { %v2977_v37 = vadd.f32 %v6880_v43, %v2961_v23  ;;  %v3221_v61 = vsel %vm3220_vm6, %v9109_v28, %v3217_v41  ;;  %v3244_v25 = vmul.f32 %v6696_v0, %v3243_v8  ;;  %vm3250_vm15 = vmor %vm3248_vm14, %vm3249_vm13 }
 0x9e0   :  { %v3336_v11 = vmul.f32 %v3221_v61, %v8946_v57  ;;  %v3236_v57 = vsub.f32 1.5, %v3235_v36  ;;  %v3231_v28 = vsel %vm3230_vm8, %v9129_v49, %v3227_v18 }
 0x9e1   :  { %v9159_v60 = vadd.f32 %v8747_v50, %v2977_v37  ;;  %v3337_v9 = vmul.f32 %v3231_v28, %v8927_v19  ;;  %v3245_v43 = vmul.f32 0.5, %v3244_v25 }
 0x9e2   :  { %v3237_v23 = vmul.f32 %v6694_v15, %v3236_v57 }
 0x9e3   :  { %11974 = vst [vmem:[#allocation12_spill] sm:$0xff] %v9159_v60  ;;  %v3038_v59 = vsel %vm50_vm0, %v9159_v60, 0.0  ;;  %v3354_v26 = vmul.f32 %v9014_v44, %v3337_v9  ;;  %v3246_v35 = vsub.f32 1.5, %v3245_v43 }
 0x9e4   :  { %3039 = vadd.xlane.f32.xlu0 %v3038_v59  ;;  %v2952_v40 = vpop.f32.mrf.mxu1  ;;  %v3241_v37 = vsel %vm3240_vm12, %v6694_v15, %v3237_v23  ;;  %v9205_v15 = vpop.permute.xlu1 %4217 }
 0x9e5   :  { %v2962_v17 = vadd.f32 %v2952_v40, %v2654_v56  ;;  %v3338_v39 = vmul.f32 %v3241_v37, %v8893_v1  ;;  %v3371_v49 = vadd.f32 %v9019_v7, %v3354_v26  ;;  %v3247_v3 = vmul.f32 %v6696_v0, %v3246_v35  ;;  %11976 = vst [vmem:[#allocation14_spill] sm:$0xff] %v9205_v15  ;;  %v9212_v56 = vpop.permute.xlu2 %4222 }
 0x9e6   :  { %6284 = vmatmul.msk.f32.gmra.mxu0 %vm50_vm0, %v3368_v52  ;;  %v9218_v52 = vpop.permute.xlu0 %4212 }
 0x9e7   :  { %v2978_v22 = vadd.f32 %v6881_v20, %v2962_v17  ;;  %v3355_v19 = vmul.f32 %v9014_v44, %v3338_v39  ;;  %v3251_v33 = vsel %vm3250_vm15, %v6696_v0, %v3247_v3  ;;  %11978 = vst [vmem:[#allocation20_spill] sm:$0xff] %v9218_v52 }
 0x9e8   :  { %v3339_v55 = vmul.f32 %v3251_v33, %v8957_v45  ;;  %v9216_v45 = vperm.slane %v49_v12, 0  ;;  %v9269_v12 = vld [vmem:[%s11800_s6 + $0x58] sm:$0xff] }
 0x9e9   :  { %v9178_v54 = vadd.f32 %v8747_v50, %v2978_v22  ;;  %v3353_v50 = vmul.f32 %v9014_v44, %v3336_v11  ;;  %v3372_v24 = vadd.f32 %v9019_v7, %v3355_v19 }
 0x9ea   :  { %v3356_v1 = vmul.f32 %v9014_v44, %v3339_v55  ;;  %11977 = vst [vmem:[#allocation19_spill] sm:$0xff] %v9216_v45 }
 0x9eb   :  { %11975 = vst [vmem:[#allocation13_spill] sm:$0xff] %v9178_v54  ;;  %v3041_v29 = vsel %vm50_vm0, %v9178_v54, 0.0  ;;  %v3370_v38 = vadd.f32 %v9019_v7, %v3353_v50 }
 0x9ec   :  { %3042 = vadd.xlane.f32.xlu1 %v3041_v29  ;;  %v3373_v16 = vadd.f32 %v9019_v7, %v3356_v1  ;;  %v9214_v27 = vpop.permute.xlu1 %4232 }
 0x9ed   :  { %v9226_v41 = vpop.permute.xlu2 %4227 }
 0x9ee   :  { %6285 = vmatmul.msk.f32.gmra.mxu0 %vm50_vm0, %v3369_v58  ;;  %v9231_v20 = vpop.permute.xlu0 %4247 }
 0x9f4   :  { %v9228_v40 = vpop.permute.xlu1 %4242 }
 0x9f5   :  { %v9233_v13 = vpop.permute.xlu2 %4237 }
 0x9f6   :  { %6286 = vmatmul.msk.f32.gmra.mxu0 %vm50_vm0, %v3370_v38 }
 0x9fc   :  { %v9235_v32 = vpop.permute.xlu1 %4257 }
 0x9fd   :  { %11979 = vst [vmem:[#allocation21_spill] sm:$0xff] %v9235_v32  ;;  %v9244_v36 = vpop.permute.xlu2 %4252 }
 0x9fe   :  { %6287 = vmatmul.msk.f32.gmra.mxu0 %vm50_vm0, %v3371_v49  ;;  %11980 = vst [vmem:[#allocation22_spill] sm:$0xff] %v9244_v36 }
 0xa06   :  { %6288 = vmatmul.msk.f32.gmra.mxu0 %vm50_vm0, %v3372_v24  ;;  %v9263_v24 = vld [vmem:[%s11800_s6 + $0x60] sm:$0xff] }
 0xa0e   :  { %6289 = vmatmul.msk.f32.gmra.mxu0 %vm50_vm0, %v3373_v16 }
 0xa14   :  { %v3452_v59 = vpop.f32.mrf.mxu0 }
 0xa15   :  { %v9221_v48 = vadd.f32 %v3452_v59, %v9216_v45 }
 0xa17   :  { %v9224_v47 = vmul.f32 0.70710677, %v9221_v48 }
 0xa19   :  { %v3532_v17 = vand.u32 2147483647, %v9224_v47  ;;  %vm4060_vm8 = vcmp.lt.f32.partialorder %v9224_v47, 0.0 }
 0xa1b   :  { %v3548_v22 = vmul.f32 0.3275911, %v3532_v17 }
 0xa1d   :  { %v3564_v14 = vadd.f32 1.0, %v3548_v22  ;;  %v9275_v22 = vld [vmem:[%s11800_s6 + $0x50] sm:$0xff] }
 0xa1f   :  { %6697 = vrcp.f32 %v3564_v14  ;;  %v3591_v3 = vand.u32 2147483648, %v3564_v14  ;;  %vm3585_vm2 = vweird.f32 %v3564_v14  ;;  %v3589_v19 = vand.u32 2147483647, %v3564_v14 }
 0xa21   :  { %v3592_v55 = vor.u32 1.1754944e-38, %v3591_v3  ;;  %vm3590_vm4 = vcmp.eq.f32.partialorder %v3589_v19, 8.507059e+37 }
 0xa25   :  { %v6698_v50 = vpop.eup %6697 }
 0xa26   :  { %v3581_v28 = vmul.f32 %v6698_v50, %v3564_v14  ;;  %vm3586_vm1 = vweird.f32 %v6698_v50 }
 0xa27   :  { %v3022_v61 = vpop.xlane.xlu0 %3021  ;;  %vm3587_vm3 = vmor %vm3585_vm2, %vm3586_vm1 }
 0xa28   :  { %v3052_v0 = vmul.f32 %v3022_v61, %v11963_v4  ;;  %v3582_v23 = vsub.f32 1.0, %v3581_v28 }
 0xa2a   :  { %v9239_v11 = vsub.f32 %v9037_v63, %v3052_v0  ;;  %v3583_v37 = vmul.f32 %v6698_v50, %v3582_v23 }
 0xa2c   :  { %v3084_v29 = vmul.f32 %v9239_v11, %v9239_v11  ;;  %v3584_v49 = vadd.f32 %v6698_v50, %v3583_v37 }
 0xa2e   :  { %v3116_v58 = vsel %vm50_vm0, %v3084_v29, 0.0  ;;  %v3588_v33 = vsel %vm3587_vm3, %v6698_v50, %v3584_v49 }
 0xa2f   :  { %v3025_v18 = vpop.xlane.xlu1 %3024  ;;  %3117 = vadd.xlane.f32.xlu1 %v3116_v58  ;;  %v3593_v1 = vsel %vm3590_vm4, %v3592_v55, %v3588_v33  ;;  %v3964_v58 = vmul.f32 %v3532_v17, %v3532_v17 }
 0xa30   :  { %v3053_v8 = vmul.f32 %v3025_v18, %v11963_v4  ;;  %v3820_v16 = vmul.f32 1.0614054, %v3593_v1 }
 0xa31   :  { %v3980_v28 = vsub.f32 0.0, %v3964_v58 }
 0xa32   :  { %v9248_v57 = vsub.f32 %v9048_v62, %v3053_v8  ;;  %v3836_v59 = vadd.f32 -1.4531521, %v3820_v16 }
 0xa33   :  { %v3996_v37 = vmul.f32 1.442695, %v3980_v28 }
 0xa34   :  { %v3085_v25 = vmul.f32 %v9248_v57, %v9248_v57  ;;  %v3852_v14 = vmul.f32 %v3836_v59, %v3593_v1 }
 0xa36   :  { %v3119_v9 = vsel %vm50_vm0, %v3085_v25, 0.0  ;;  %v3868_v61 = vadd.f32 1.4214138, %v3852_v14 }
 0xa37   :  { %v3028_v38 = vpop.xlane.xlu2 %3027  ;;  %3120 = vadd.xlane.f32.xlu2 %v3119_v9 }
 0xa38   :  { %v3054_v43 = vmul.f32 %v3028_v38, %v11963_v4  ;;  %v3884_v0 = vmul.f32 %v3868_v61, %v3593_v1 }
 0xa3a   :  { %v9255_v26 = vsub.f32 %v9065_v2, %v3054_v43  ;;  %v3900_v50 = vadd.f32 -0.28449672, %v3884_v0 }
 0xa3c   :  { %v3086_v35 = vmul.f32 %v9255_v26, %v9255_v26  ;;  %v3916_v38 = vmul.f32 %v3900_v50, %v3593_v1 }
 0xa3e   :  { %v3122_v39 = vsel %vm50_vm0, %v3086_v35, 0.0  ;;  %v3932_v49 = vadd.f32 0.2548296, %v3916_v38 }
 0xa3f   :  { %3123 = vadd.xlane.f32.xlu0 %v3122_v39  ;;  %v3031_v23 = vpop.xlane.xlu0 %3030 }
 0xa40   :  { %v3055_v17 = vmul.f32 %v3031_v23, %v11963_v4  ;;  %v3948_v16 = vmul.f32 %v3932_v49, %v3593_v1 }
 0xa42   :  { %v9296_v55 = vsub.f32 %v9082_v51, %v3055_v17 }
 0xa44   :  { %11981 = vst [vmem:[#allocation23_spill] sm:$0xff] %v9296_v55  ;;  %v3087_v1 = vmul.f32 %v9296_v55, %v9296_v55 }
 0xa46   :  { %v3125_v2 = vsel %vm50_vm0, %v3087_v1, 0.0  ;;  %v9333_v1 = vld [vmem:[%s11802_s5] sm:$0xff] }
 0xa47   :  { %v3034_v19 = vpop.xlane.xlu1 %3033  ;;  %11984 = vst [vmem:[#allocation26_spill] sm:$0xff] %v9333_v1 }
 0xa48   :  { %4272 = vperm.xlu1 %6320, %v9263_v24   ;;  %v3056_v0 = vmul.f32 %v3034_v19, %v11963_v4 }
 0xa4a   :  { %v9313_v17 = vsub.f32 %v9107_v34, %v3056_v0 }
 0xa4c   :  { %11982 = vst [vmem:[#allocation24_spill] sm:$0xff] %v9313_v17  ;;  %v3088_v62 = vmul.f32 %v9313_v17, %v9313_v17 }
 0xa4f   :  { %4267 = vperm.xlu2 %6321, %v9269_v12  }
 0xa53   :  { %4262 = vperm.xlu0 %6319, %v9275_v22  }
 0xa5b   :  { %v3455_v29 = vpop.f32.mrf.mxu0 }
 0xa5c   :  { %v9279_v18 = vadd.f32 %v3455_v29, %v9216_v45  ;;  %v3037_v29 = vpop.xlane.xlu2 %3036 }
 0xa5e   :  { %v9282_v8 = vmul.f32 0.70710677, %v9279_v18 }
 0xa60   :  { %v3533_v25 = vand.u32 2147483647, %v9282_v8  ;;  %vm4061_vm4 = vcmp.lt.f32.partialorder %v9282_v8, 0.0 }
 0xa62   :  { %v3549_v9 = vmul.f32 0.3275911, %v3533_v25 }
 0xa63   :  { %v3458_v43 = vpop.f32.mrf.mxu0 }
 0xa64   :  { %v3565_v35 = vadd.f32 1.0, %v3549_v9  ;;  %v9286_v39 = vadd.f32 %v3458_v43, %v9216_v45  ;;  %v3057_v43 = vmul.f32 %v3037_v29, %v11963_v4 }
 0xa66   :  { %6699 = vrcp.f32 %v3565_v35  ;;  %v9290_v3 = vmul.f32 0.70710677, %v9286_v39  ;;  %v3606_v49 = vand.u32 2147483648, %v3565_v35  ;;  %v9321_v29 = vsub.f32 %v9132_v42, %v3057_v43 }
 0xa67   :  { %6701 = vpow2.f32 %v3996_v37  ;;  %vm3600_vm6 = vweird.f32 %v3565_v35 }
 0xa68   :  { %v9293_v33 = vand.u32 2147483647, %v9290_v3  ;;  %11983 = vst [vmem:[#allocation25_spill] sm:$0xff] %v9321_v29  ;;  %v3607_v0 = vor.u32 1.1754944e-38, %v3606_v49 }
 0xa6a   :  { %v3550_v59 = vmul.f32 0.3275911, %v9293_v33 }
 0xa6b   :  { %v3461_v14 = vpop.f32.mrf.mxu0 }
 0xa6c   :  { %v6700_v61 = vpop.eup %6699  ;;  %v9301_v58 = vadd.f32 %v3461_v14, %v9216_v45  ;;  %v9303_v28 = vadd.f32 1.0, %v3550_v59  ;;  %v3604_v14 = vand.u32 2147483647, %v3565_v35 }
 0xa6d   :  { %v3596_v50 = vmul.f32 %v6700_v61, %v3565_v35  ;;  %v6702_v9 = vpop.eup %6701  ;;  %vm3601_vm5 = vweird.f32 %v6700_v61  ;;  %v3965_v35 = vmul.f32 %v3533_v25, %v3533_v25  ;;  %v3128_v25 = vsel %vm50_vm0, %v3088_v62, 0.0 }
 0xa6e   :  { %v9306_v38 = vmul.f32 0.70710677, %v9301_v58  ;;  %v4028_v23 = vmul.f32 %v6702_v9, %v3948_v16  ;;  %6703 = vrcp.f32 %v9303_v28  ;;  %vm3602_vm11 = vmor %vm3600_vm6, %vm3601_vm5  ;;  %vm3605_vm7 = vcmp.eq.f32.partialorder %v3604_v14, 8.507059e+37 }
 0xa6f   :  { %v3597_v37 = vsub.f32 1.0, %v3596_v50  ;;  %v3619_v30 = vand.u32 2147483647, %v9303_v28  ;;  %vm3615_vm10 = vweird.f32 %v9303_v28 }
 0xa70   :  { %v9316_v19 = vand.u32 2147483647, %v9306_v38  ;;  %v4044_v16 = vsub.f32 1.0, %v4028_v23 }
 0xa71   :  { %v3598_v59 = vmul.f32 %v6700_v61, %v3597_v37  ;;  %vm3620_vm13 = vcmp.eq.f32.partialorder %v3619_v30, 8.507059e+37 }
 0xa72   :  { %v3551_v51 = vmul.f32 0.3275911, %v9316_v19  ;;  %3126 = vadd.xlane.f32.xlu1 %v3125_v2  ;;  %v4076_v43 = vsub.f32 0.0, %v4044_v16 }
 0xa73   :  { %v3599_v50 = vadd.f32 %v6700_v61, %v3598_v59  ;;  %v3464_v9 = vpop.f32.mrf.mxu0  ;;  %v3089_v59 = vmul.f32 %v9321_v29, %v9321_v29 }
 0xa74   :  { %v9323_v34 = vadd.f32 1.0, %v3551_v51  ;;  %v9326_v37 = vadd.f32 %v3464_v9, %v9216_v45  ;;  %v6704_v63 = vpop.eup %6703  ;;  %v9343_v9 = vperm.slane %v9333_v1, 0 }
 0xa75   :  { %v3603_v23 = vsel %vm3602_vm11, %v6700_v61, %v3599_v50  ;;  %v3611_v51 = vmul.f32 %v6704_v63, %v9303_v28  ;;  %v3981_v50 = vsub.f32 0.0, %v3965_v35  ;;  %vm3616_vm9 = vweird.f32 %v6704_v63 }
 0xa76   :  { %v9335_v2 = vsel %vm3605_vm7, %v3607_v0, %v3603_v23  ;;  %6705 = vrcp.f32 %v9323_v34  ;;  %v9346_v61 = vmul.f32 0.70710677, %v9326_v37  ;;  %v3621_v0 = vand.u32 2147483648, %v9303_v28  ;;  %vm3617_vm12 = vmor %vm3615_vm10, %vm3616_vm9 }
 0xa77   :  { %v3821_v49 = vmul.f32 1.0614054, %v9335_v2  ;;  %v3612_v42 = vsub.f32 1.0, %v3611_v51  ;;  %v4092_v51 = vsel %vm4060_vm8, %v4076_v43, %v4044_v16  ;;  %v9357_v10 = vmul.f32 %v9343_v9, %v9212_v56 }
 0xa78   :  { %3129 = vadd.xlane.f32.xlu2 %v3128_v25  ;;  %v9353_v6 = vand.u32 2147483647, %v9346_v61  ;;  %v3131_v35 = vsel %vm50_vm0, %v3089_v59, 0.0  ;;  %v3998_v16 = vmul.f32 1.442695, %v3981_v50  ;;  %v3622_v56 = vor.u32 1.1754944e-38, %v3621_v0 }
 0xa79   :  { %v3837_v14 = vadd.f32 -1.4531521, %v3821_v49  ;;  %v3613_v23 = vmul.f32 %v6704_v63, %v3612_v42  ;;  %v3966_v59 = vmul.f32 %v9293_v33, %v9293_v33  ;;  %vm3630_vm15 = vweird.f32 %v9323_v34 }
 0xa7a   :  { %v3552_v42 = vmul.f32 0.3275911, %v9353_v6  ;;  %vm4062_vm11 = vcmp.lt.f32.partialorder %v9290_v3, 0.0  ;;  %v11987_v3 = vlaneseq }
 0xa7b   :  { %v3853_v62 = vmul.f32 %v3837_v14, %v9335_v2  ;;  %v3467_v47 = vpop.f32.mrf.mxu0  ;;  %v3614_v53 = vadd.f32 %v6704_v63, %v3613_v23 }
 0xa7c   :  { %v6706_v49 = vpop.eup %6705  ;;  %v9364_v25 = vadd.f32 %v3467_v47, %v9216_v45  ;;  %v9370_v23 = vadd.f32 1.0, %v3552_v42 }
 0xa7d   :  { %v3869_v31 = vadd.f32 1.4214138, %v3853_v62  ;;  %v3626_v43 = vmul.f32 %v6706_v49, %v9323_v34  ;;  %v3618_v14 = vsel %vm3617_vm12, %v6704_v63, %v3614_v53  ;;  %3132 = vadd.xlane.f32.xlu0 %v3131_v35  ;;  %v3636_v62 = vand.u32 2147483648, %v9323_v34 }
 0xa7e   :  { %v9373_v46 = vsel %vm3620_vm13, %v3622_v56, %v3618_v14  ;;  %v9376_v50 = vmul.f32 0.70710677, %v9364_v25  ;;  %v3967_v53 = vmul.f32 %v9316_v19, %v9316_v19  ;;  %6707 = vrcp.f32 %v9370_v23 }
 0xa7f   :  { %v3885_v28 = vmul.f32 %v3869_v31, %v9335_v2  ;;  %v3627_v47 = vsub.f32 1.0, %v3626_v43  ;;  %v3822_v0 = vmul.f32 1.0614054, %v9373_v46  ;;  %vm3631_vm14 = vweird.f32 %v6706_v49 }
 0xa80   :  { %v3634_v31 = vand.u32 2147483647, %v9323_v34  ;;  %6709 = vpow2.f32 %v3998_v16  ;;  %v3982_v35 = vsub.f32 0.0, %v3966_v59  ;;  %v9385_v42 = vand.u32 2147483647, %v9376_v50  ;;  %vm3632_vm1 = vmor %vm3630_vm15, %vm3631_vm14 }
 0xa81   :  { %v3901_v30 = vadd.f32 -0.28449672, %v3885_v28  ;;  %v3628_v63 = vmul.f32 %v6706_v49, %v3627_v47  ;;  %v3838_v33 = vadd.f32 -1.4531521, %v3822_v0  ;;  %v9389_v56 = vmul.f32 %v9343_v9, %v9226_v41 }
 0xa82   :  { %v3637_v28 = vor.u32 1.1754944e-38, %v3636_v62  ;;  %v3983_v47 = vsub.f32 0.0, %v3967_v53  ;;  %v3553_v16 = vmul.f32 0.3275911, %v9385_v42  ;;  %v4108_v59 = vadd.f32 1.0, %v4092_v51 }
 0xa83   :  { %v3917_v43 = vmul.f32 %v3901_v30, %v9335_v2  ;;  %v3629_v19 = vadd.f32 %v6706_v49, %v3628_v63  ;;  %v3854_v14 = vmul.f32 %v3838_v33, %v9373_v46  ;;  %vm3635_vm2 = vcmp.eq.f32.partialorder %v3634_v31, 8.507059e+37  ;;  %v3470_v5 = vpop.f32.mrf.mxu0 }
 0xa84   :  { %v6708_v52 = vpop.eup %6707  ;;  %v4000_v15 = vmul.f32 1.442695, %v3982_v35  ;;  %v9397_v30 = vadd.f32 1.0, %v3553_v16  ;;  %v3500_v34 = vmul.f32 0.5, %v9221_v48  ;;  %v4002_v31 = vmul.f32 1.442695, %v3983_v47 }
 0xa85   :  { %v3933_v0 = vadd.f32 0.2548296, %v3917_v43  ;;  %v3633_v21 = vsel %vm3632_vm1, %v6706_v49, %v3629_v19  ;;  %v3870_v41 = vadd.f32 1.4214138, %v3854_v14  ;;  %v3641_v53 = vmul.f32 %v6708_v52, %v9370_v23  ;;  %v9416_v43 = vld [vmem:[%s11800_s6 + $0x78] sm:$0xff] }
 0xa86   :  { %v9395_v32 = vsel %vm3635_vm2, %v3637_v28, %v3633_v21  ;;  %v6710_v51 = vpop.eup %6709  ;;  %6711 = vrcp.f32 %v9397_v30  ;;  %v9406_v33 = vadd.f32 %v3470_v5, %v9216_v45  ;;  %v9411_v35 = vperm.slane %v9333_v1, 4 }
 0xa87   :  { %v3949_v63 = vmul.f32 %v3933_v0, %v9335_v2  ;;  %v3823_v62 = vmul.f32 1.0614054, %v9395_v32  ;;  %v3886_v49 = vmul.f32 %v3870_v41, %v9373_v46  ;;  %v3642_v2 = vsub.f32 1.0, %v3641_v53 }
 0xa88   :  { %v9418_v19 = vmul.f32 %v4108_v59, %v3500_v34  ;;  %6713 = vpow2.f32 %v4000_v15  ;;  %v3651_v28 = vand.u32 2147483648, %v9370_v23  ;;  %vm3646_vm3 = vweird.f32 %v6708_v52 }
 0xa89   :  { %v9408_v21 = vmul.f32 %v6710_v51, %v3949_v63  ;;  %v3839_v48 = vadd.f32 -1.4531521, %v3823_v62  ;;  %v3902_v14 = vadd.f32 -0.28449672, %v3886_v49  ;;  %v3643_v47 = vmul.f32 %v6708_v52, %v3642_v2 }
 0xa8a   :  { %11985 = vst [vmem:[#allocation27_spill] sm:$0xff] %v9418_v19  ;;  %v3649_v16 = vand.u32 2147483647, %v9370_v23  ;;  %6715 = vpow2.f32 %v4002_v31  ;;  %v9426_v41 = vmul.f32 0.70710677, %v9406_v33  ;;  %vm3645_vm5 = vweird.f32 %v9370_v23 }
 0xa8b   :  { %v3855_v5 = vmul.f32 %v3839_v48, %v9395_v32  ;;  %v3918_v0 = vmul.f32 %v3902_v14, %v9373_v46  ;;  %4287 = vperm.xlu1 %6320, %v9416_v43   ;;  %v4045_v15 = vsub.f32 1.0, %v9408_v21  ;;  %v3644_v63 = vadd.f32 %v6708_v52, %v3643_v47  ;;  %vm3647_vm6 = vmor %vm3645_vm5, %vm3646_vm3  ;;  %v9439_v48 = vld [vmem:[%s11800_s6 + $0x70] sm:$0xff] }
 0xa8c   :  { %v6712_v62 = vpop.eup %6711  ;;  %v3652_v51 = vor.u32 1.1754944e-38, %v3651_v28  ;;  %v3968_v49 = vmul.f32 %v9353_v6, %v9353_v6  ;;  %v9434_v31 = vand.u32 2147483647, %v9426_v41  ;;  %vm3650_vm7 = vcmp.eq.f32.partialorder %v3649_v16, 8.507059e+37  ;;  %v9447_v6 = vld [vmem:[%s11800_s6 + $0x68] sm:$0xff] }
 0xa8d   :  { %v3871_v34 = vadd.f32 1.4214138, %v3855_v5  ;;  %v3934_v53 = vadd.f32 0.2548296, %v3918_v0  ;;  %v3648_v23 = vsel %vm3647_vm6, %v6708_v52, %v3644_v63  ;;  %v3656_v2 = vmul.f32 %v6712_v62, %v9397_v30  ;;  %11986 = vst [vmem:[#allocation28_spill] sm:$0xff] %v9447_v6 }
 0xa8e   :  { %v6714_v14 = vpop.eup %6713  ;;  %v9450_v5 = vsel %vm3650_vm7, %v3652_v51, %v3648_v23  ;;  %v3969_v47 = vmul.f32 %v9385_v42, %v9385_v42  ;;  %v4077_v0 = vsub.f32 0.0, %v4045_v15  ;;  %v3664_v36 = vand.u32 2147483647, %v9397_v30 }
 0xa8f   :  { %v3887_v21 = vmul.f32 %v3871_v34, %v9395_v32  ;;  %v3950_v28 = vmul.f32 %v3934_v53, %v9373_v46  ;;  %v3824_v52 = vmul.f32 1.0614054, %v9450_v5  ;;  %v3657_v16 = vsub.f32 1.0, %v3656_v2 }
 0xa90   :  { %4282 = vperm.xlu2 %6321, %v9439_v48   ;;  %v6716_v34 = vpop.eup %6715  ;;  %v3666_v29 = vand.u32 2147483648, %v9397_v30  ;;  %v3554_v46 = vmul.f32 0.3275911, %v9434_v31  ;;  %vm3661_vm8 = vweird.f32 %v6712_v62  ;;  %v3984_v23 = vsub.f32 0.0, %v3968_v49 }
 0xa91   :  { %v3903_v59 = vadd.f32 -0.28449672, %v3887_v21  ;;  %v4030_v63 = vmul.f32 %v6714_v14, %v3950_v28  ;;  %4277 = vperm.xlu0 %6319, %v9447_v6   ;;  %v3840_v42 = vadd.f32 -1.4531521, %v3824_v52  ;;  %v3658_v51 = vmul.f32 %v6712_v62, %v3657_v16 }
 0xa92   :  { %vm3660_vm9 = vweird.f32 %v9397_v30  ;;  %v9462_v2 = vadd.f32 1.0, %v3554_v46  ;;  %v6921_v14 = vmov 1   ;;  %v4093_v28 = vsel %vm4061_vm4, %v4077_v0, %v4045_v15 }
 0xa93   :  { %v3919_v53 = vmul.f32 %v3903_v59, %v9395_v32  ;;  %v4046_v21 = vsub.f32 1.0, %v4030_v63  ;;  %6324 = vset.pattern.permute.xlu1 %v6921_v14  ;;  %v3856_v17 = vmul.f32 %v3840_v42, %v9450_v5  ;;  %v3659_v55 = vadd.f32 %v6712_v62, %v3658_v51  ;;  %v9470_v59 = vld [vmem:[%s11800_s6 + $0x10] sm:$0xff]  ;;  %vm3662_vm10 = vmor %vm3660_vm9, %vm3661_vm8 }
 0xa94   :  { %4348 = vperm.xlu1 %6324, %v9470_v59   ;;  %v3667_v30 = vor.u32 1.1754944e-38, %v3666_v29  ;;  %v3985_v52 = vsub.f32 0.0, %v3969_v47  ;;  %6717 = vrcp.f32 %v9462_v2  ;;  %vm3665_vm12 = vcmp.eq.f32.partialorder %v3664_v36, 8.507059e+37  ;;  %v9486_v36 = vld [vmem:[%s11800_s6 + $0x8] sm:$0xff] }
 0xa95   :  { %v3935_v1 = vadd.f32 0.2548296, %v3919_v53  ;;  %v4078_v49 = vsub.f32 0.0, %v4046_v21  ;;  %v3872_v15 = vadd.f32 1.4214138, %v3856_v17  ;;  %v3663_v0 = vsel %vm3662_vm10, %v6712_v62, %v3659_v55 }
 0xa96   :  { %v4109_v16 = vadd.f32 1.0, %v4093_v28  ;;  %v4004_v46 = vmul.f32 1.442695, %v3984_v23  ;;  %v9477_v53 = vsel %vm3665_vm12, %v3667_v30, %v3663_v0  ;;  %v3501_v47 = vmul.f32 0.5, %v9279_v18  ;;  %v9497_v18 = vld [vmem:[%s11800_s6] sm:$0xff] }
 0xa97   :  { %v3951_v8 = vmul.f32 %v3935_v1, %v9395_v32  ;;  %v4094_v63 = vsel %vm4062_vm11, %v4078_v49, %v4046_v21  ;;  %v3888_v6 = vmul.f32 %v3872_v15, %v9450_v5  ;;  %v3825_v29 = vmul.f32 1.0614054, %v9477_v53  ;;  %v9492_v1 = vpop.xlane.xlu1 %3042  ;;  %v9512_v15 = vld [vmem:[%s11800_s6 + $0x20] sm:$0xff] }
 0xa98   :  { %v4110_v42 = vadd.f32 1.0, %v4094_v63  ;;  %6323 = vset.pattern.permute.xlu2 %v6921_v14  ;;  %v3502_v32 = vmul.f32 0.5, %v9286_v39  ;;  %v4006_v55 = vmul.f32 1.442695, %v3985_v52  ;;  %v9490_v17 = vshrl.u32 %v11987_v3, 7 }
 0xa99   :  { %v4031_v51 = vmul.f32 %v6716_v34, %v3951_v8  ;;  %6322 = vset.pattern.permute.xlu0 %v6921_v14  ;;  %4344 = vperm.xlu2 %6323, %v9486_v36   ;;  %v3904_v34 = vadd.f32 -0.28449672, %v3888_v6  ;;  %v3841_v21 = vadd.f32 -1.4531521, %v3825_v29  ;;  %v11828_v39 = vrot.slane %v9418_v19, 7 }
 0xa9a   :  { %4340 = vperm.xlu0 %6322, %v9497_v18   ;;  %v6718_v23 = vpop.eup %6717  ;;  %v9501_v14 = vmul.f32 %v4109_v16, %v3501_v47  ;;  %v9503_v28 = vmul.f32 %v4110_v42, %v3502_v32  ;;  %v3503_v49 = vmul.f32 0.5, %v9301_v58  ;;  %6719 = vpow2.f32 %v4004_v46 }
 0xa9b   :  { %v4047_v62 = vsub.f32 1.0, %v4031_v51  ;;  %v3920_v6 = vmul.f32 %v3904_v34, %v9450_v5  ;;  %v3857_v52 = vmul.f32 %v3841_v21, %v9477_v53  ;;  %v3671_v8 = vmul.f32 %v6718_v23, %v9462_v2 }
 0xa9c   :  { %11988 = vst [vmem:[#allocation29_spill] sm:$0xff] %v9501_v14  ;;  %4356 = vperm.xlu1 %6324, %v9512_v15   ;;  %vm4063_vm13 = vcmp.lt.f32.partialorder %v9306_v38, 0.0  ;;  %6721 = vpow2.f32 %v4006_v55  ;;  %v3679_v58 = vand.u32 2147483647, %v9462_v2  ;;  %vm4193_vm14 = vcmp.lt.s32.totalorder %v9490_v17, 1 }
 0xa9d   :  { %11989 = vst [vmem:[#allocation30_spill] sm:$0xff] %v9503_v28  ;;  %v4079_v30 = vsub.f32 0.0, %v4047_v62  ;;  %v3936_v16 = vadd.f32 0.2548296, %v3920_v6  ;;  %v3873_v63 = vadd.f32 1.4214138, %v3857_v52  ;;  %vm3676_vm15 = vweird.f32 %v6718_v23 }
 0xa9e   :  { %v3672_v46 = vsub.f32 1.0, %v3671_v8  ;;  %v3681_v51 = vand.u32 2147483648, %v9462_v2  ;;  %v4176_v29 = vrot.slane %v9501_v14, 7  ;;  %v4177_v55 = vrot.slane %v9503_v28, 7 }
 0xa9f   :  { %v4095_v0 = vsel %vm4063_vm13, %v4079_v30, %v4047_v62  ;;  %v3952_v47 = vmul.f32 %v3936_v16, %v9450_v5  ;;  %v3889_v32 = vmul.f32 %v3873_v63, %v9477_v53  ;;  %vm3675_vm1 = vweird.f32 %v9462_v2  ;;  %v9535_v5 = vld [vmem:[%s11800_s6 + $0x18] sm:$0xff]  ;;  %v9541_v2 = vld [vmem:[%s11800_s6 + $0x28] sm:$0xff] }
 0xaa0   :  { %v4111_v42 = vadd.f32 1.0, %v4095_v0  ;;  %v3673_v38 = vmul.f32 %v6718_v23, %v3672_v46  ;;  %v6720_v3 = vpop.eup %6719  ;;  %vm9526_vm2 = vcmp.eq.f32.partialorder %v3679_v58, 8.507059e+37  ;;  %v3970_v21 = vmul.f32 %v9434_v31, %v9434_v31  ;;  %vm3677_vm3 = vmor %vm3675_vm1, %vm3676_vm15 }
 0xaa1   :  { %4352 = vperm.xlu2 %6323, %v9535_v5   ;;  %v4032_v30 = vmul.f32 %v6720_v3, %v3952_v47  ;;  %v3905_v6 = vadd.f32 -0.28449672, %v3889_v32  ;;  %v9546_v31 = vsel %vm4193_vm14, %v4176_v29, %v4177_v55  ;;  %v3682_v58 = vor.u32 1.1754944e-38, %v3681_v51 }
 0xaa2   :  { %v9523_v34 = vmul.f32 %v4111_v42, %v3503_v49  ;;  %v3674_v49 = vadd.f32 %v6718_v23, %v3673_v38  ;;  %4360 = vperm.xlu0 %6322, %v9541_v2   ;;  %v3118_v52 = vpop.xlane.xlu1 %3117  ;;  %11993 = vst [vmem:[#allocation32_spill] sm:$0xff] %v9546_v31  ;;  %v6722_v8 = vpop.eup %6721  ;;  %v4310_v63 = vmul.f32 %v9389_v56, %v9546_v31  ;;  %vm4064_vm4 = vcmp.lt.f32.partialorder %v9346_v61, 0.0 }
 0xaa3   :  { %v3148_v0 = vmul.f32 %v3118_v52, %v11963_v4  ;;  %v4048_v46 = vsub.f32 1.0, %v4032_v30  ;;  %v3921_v42 = vmul.f32 %v3905_v6, %v9477_v53  ;;  %v9559_v32 = vsel %vm4193_vm14, %v11828_v39, %v4176_v29 }
 0xaa4   :  { %11990 = vst [vmem:[#allocation31_spill] sm:$0xff] %v9523_v34  ;;  %v4162_v16 = vmul.f32 %v9411_v35, %v9523_v34  ;;  %v3678_v47 = vsel %vm3677_vm3, %v6718_v23, %v3674_v49  ;;  %v4161_v56 = vmul.f32 %v9411_v35, %v9503_v28  ;;  %v3986_v49 = vsub.f32 0.0, %v3970_v21  ;;  %v9582_v21 = vld [vmem:[%s11800_s6 + $0x30] sm:$0xff] }
 0xaa5   :  { %11994 = vst [vmem:[#allocation33_spill] sm:$0xff] %v9559_v32  ;;  %v9563_v51 = vsel %vm9526_vm2, %v3682_v58, %v3678_v47  ;;  %v9565_v38 = vadd.f32 1e-05, %v3148_v0  ;;  %v4080_v30 = vsub.f32 0.0, %v4048_v46  ;;  %v3937_v6 = vadd.f32 0.2548296, %v3921_v42 }
 0xaa6   :  { %v9567_v3 = vadd.f32 %v4310_v63, %v4162_v16  ;;  %v3826_v23 = vmul.f32 1.0614054, %v9563_v51  ;;  %v4309_v29 = vmul.f32 %v9357_v10, %v9559_v32  ;;  %v4178_v62 = vrot.slane %v9523_v34, 7 }
 0xaa7   :  { %6723 = vrsqrt.f32 %v9565_v38  ;;  %v4096_v52 = vsel %vm4064_vm4, %v4080_v30, %v4048_v46  ;;  %v3953_v58 = vmul.f32 %v3937_v6, %v9477_v53  ;;  %v3504_v16 = vmul.f32 0.5, %v9326_v37  ;;  %v3040_v46 = vpop.xlane.xlu0 %3039  ;;  %v9597_v30 = vld [vmem:[%s11800_s6 + $0x40] sm:$0xff] }
 0xaa8   :  { %v3842_v0 = vadd.f32 -1.4531521, %v3826_v23  ;;  %v4112_v63 = vadd.f32 1.0, %v4096_v52  ;;  %v9585_v61 = vadd.f32 %v4309_v29, %v4161_v56  ;;  %v9589_v10 = vsel %vm4193_vm14, %v4177_v55, %v4178_v62 }
 0xaa9   :  { %4364 = vperm.xlu2 %6323, %v9582_v21   ;;  %11995 = vst [vmem:[#allocation34_spill] sm:$0xff] %v9589_v10  ;;  %v4295_v53 = vmul.f32 %v9343_v9, %v9214_v27  ;;  %v4033_v42 = vmul.f32 %v6722_v8, %v3953_v58  ;;  %v4008_v47 = vmul.f32 1.442695, %v3986_v49  ;;  %v3505_v23 = vmul.f32 0.5, %v9364_v25 }
 0xaaa   :  { %v3858_v37 = vmul.f32 %v3842_v0, %v9563_v51  ;;  %4372 = vperm.xlu0 %6322, %v9597_v30   ;;  %v3121_v56 = vpop.xlane.xlu2 %3120  ;;  %v9600_v6 = vmul.f32 %v4112_v63, %v3504_v16  ;;  %v4454_v39 = vrot.slane %v9503_v28, 1  ;;  %vm4065_vm5 = vcmp.lt.f32.partialorder %v9376_v50, 0.0 }
 0xaab   :  { %v3149_v55 = vmul.f32 %v3121_v56, %v11963_v4  ;;  %v4049_v27 = vsub.f32 1.0, %v4033_v42  ;;  %v4311_v8 = vmul.f32 %v4295_v53, %v9589_v10  ;;  %6725 = vpow2.f32 %v4008_v47 }
 0xaac   :  { %11996 = vst [vmem:[#allocation35_spill] sm:$0xff] %v9600_v6  ;;  %v3874_v29 = vadd.f32 1.4214138, %v3858_v37  ;;  %v4179_v58 = vrot.slane %v9600_v6, 7  ;;  %v4163_v0 = vmul.f32 %v9411_v35, %v9600_v6  ;;  %v11831_v42 = vrot.slane %v9501_v14, 1 }
 0xaad   :  { %v6724_v52 = vpop.eup %6723  ;;  %v9605_v49 = vadd.f32 1e-05, %v3149_v55  ;;  %v4081_v16 = vsub.f32 0.0, %v4049_v27  ;;  %vm4468_vm6 = vcmp.lt.s32.totalorder %v9490_v17, 7  ;;  %v4455_v47 = vrot.slane %v9523_v34, 1 }
 0xaae   :  { %v3890_v63 = vmul.f32 %v3874_v29, %v9563_v51  ;;  %v3253_v25 = vmul.f32 %v6724_v52, %v9565_v38  ;;  %v9615_v53 = vadd.f32 %v4311_v8, %v4163_v0  ;;  %v9621_v29 = vsel %vm4193_vm14, %v4178_v62, %v4179_v58 }
 0xaaf   :  { %6727 = vrsqrt.f32 %v9605_v49  ;;  %v4097_v37 = vsel %vm4065_vm5, %v4081_v16, %v4049_v27  ;;  %11997 = vst [vmem:[#allocation36_spill] sm:$0xff] %v9621_v29  ;;  %v9627_v50 = vsel %vm4468_vm6, %v11831_v42, %v4454_v39  ;;  %v4296_v16 = vmul.f32 %v9343_v9, %v9233_v13 }
 0xab0   :  { %v3906_v56 = vadd.f32 -0.28449672, %v3890_v63  ;;  %v3254_v55 = vmul.f32 %v6724_v52, %v3253_v25  ;;  %v4113_v19 = vadd.f32 1.0, %v4097_v37  ;;  %11998 = vst [vmem:[#allocation37_spill] sm:$0xff] %v9627_v50  ;;  %vm3258_vm11 = vweird.f32 %v9565_v38 }
 0xab1   :  { %v6726_v25 = vpop.eup %6725  ;;  %vm3259_vm7 = vweird.f32 %v6724_v52  ;;  %v3058_v10 = vmul.f32 %v3040_v46, %v11963_v4  ;;  %vm4066_vm10 = vcmp.lt.f32.partialorder %v9426_v41, 0.0  ;;  %vm3268_vm12 = vweird.f32 %v9605_v49 }
 0xab2   :  { %v3922_v8 = vmul.f32 %v3906_v56, %v9563_v51  ;;  %v3255_v27 = vmul.f32 0.5, %v3254_v55  ;;  %4384 = vperm.xlu0 %6322, %v9269_v12   ;;  %v3124_v0 = vpop.xlane.xlu0 %3123  ;;  %v9634_v63 = vmul.f32 %v4113_v19, %v3505_v23  ;;  %v9640_v56 = vsel %vm4468_vm6, %v4454_v39, %v4455_v47  ;;  %vm3260_vm8 = vmor %vm3258_vm11, %vm3259_vm7 }
 0xab3   :  { %v3150_v62 = vmul.f32 %v3124_v0, %v11963_v4  ;;  %12000 = vst [vmem:[#allocation39_spill] sm:$0xff] %v9640_v56  ;;  %v4456_v19 = vrot.slane %v9600_v6, 1 }
 0xab4   :  { %11999 = vst [vmem:[#allocation38_spill] sm:$0xff] %v9634_v63  ;;  %v3938_v37 = vadd.f32 0.2548296, %v3922_v8  ;;  %v3256_v42 = vsub.f32 1.5, %v3255_v27  ;;  %v4180_v32 = vrot.slane %v9634_v63, 7  ;;  %v4164_v13 = vmul.f32 %v9411_v35, %v9634_v63 }
 0xab5   :  { %v6728_v55 = vpop.eup %6727  ;;  %v9642_v12 = vadd.f32 1e-05, %v3150_v62  ;;  %v4457_v27 = vrot.slane %v9634_v63, 1  ;;  %v4312_v62 = vmul.f32 %v4296_v16, %v9621_v29  ;;  %v9665_v38 = vsel %vm4468_vm6, %v4455_v47, %v4456_v19 }
 0xab6   :  { %v3954_v23 = vmul.f32 %v3938_v37, %v9563_v51  ;;  %v3257_v0 = vmul.f32 %v6724_v52, %v3256_v42  ;;  %v3263_v8 = vmul.f32 %v6728_v55, %v9605_v49  ;;  %v9656_v39 = vsel %vm4193_vm14, %v4179_v58, %v4180_v32 }
 0xab7   :  { %6729 = vrsqrt.f32 %v9642_v12  ;;  %12001 = vst [vmem:[#allocation40_spill] sm:$0xff] %v9656_v39  ;;  %v9661_v31 = vadd.f32 %v4312_v62, %v4164_v13  ;;  %v9670_v58 = vsel %vm4468_vm6, %v4456_v19, %v4457_v27  ;;  %vm3269_vm9 = vweird.f32 %v6728_v55 }
 0xab8   :  { %v4034_v56 = vmul.f32 %v6726_v25, %v3954_v23  ;;  %v3261_v51 = vsel %vm3260_vm8, %v6724_v52, %v3257_v0  ;;  %v3264_v42 = vmul.f32 %v6728_v55, %v3263_v8  ;;  %12002 = vst [vmem:[#allocation41_spill] sm:$0xff] %v9670_v58  ;;  %v9674_v52 = vsub.f32 %v9159_v60, %v3058_v10  ;;  %vm3270_vm13 = vmor %vm3268_vm12, %vm3269_vm9 }
 0xab9   :  { %v3340_v37 = vmul.f32 %v3261_v51, %v9239_v11  ;;  %v3506_v23 = vmul.f32 0.5, %v9406_v33  ;;  %v4297_v10 = vmul.f32 %v9343_v9, %v9228_v40  ;;  %v4298_v62 = vmul.f32 %v9343_v9, %v9231_v20 }
 0xaba   :  { %v4050_v50 = vsub.f32 1.0, %v4034_v56  ;;  %v3265_v6 = vmul.f32 0.5, %v3264_v42  ;;  %4396 = vperm.xlu0 %6322, %v9439_v48   ;;  %v3090_v41 = vmul.f32 %v9674_v52, %v9674_v52  ;;  %v11846_v51 = vmov 2  }
 0xabb   :  { %v3357_v46 = vmul.f32 %v9014_v44, %v3340_v37  ;;  %v4313_v42 = vmul.f32 %v4297_v10, %v9656_v39  ;;  %v3059_v20 = vmul.f32 %v9492_v1, %v11963_v4  ;;  %vm3278_vm1 = vweird.f32 %v9642_v12 }
 0xabc   :  { %v4082_v11 = vsub.f32 0.0, %v4050_v50  ;;  %v3266_v16 = vsub.f32 1.5, %v3265_v6 }
 0xabd   :  { %v6730_v25 = vpop.eup %6729  ;;  %v3374_v47 = vadd.f32 %v9019_v7, %v3357_v46 }
 0xabe   :  { %v4098_v56 = vsel %vm4066_vm10, %v4082_v11, %v4050_v50  ;;  %v3267_v13 = vmul.f32 %v6728_v55, %v3266_v16  ;;  %v3273_v19 = vmul.f32 %v6730_v25, %v9642_v12  ;;  %vm3279_vm15 = vweird.f32 %v6730_v25 }
 0xabf   :  { %v4114_v0 = vadd.f32 1.0, %v4098_v56  ;;  %6290 = vmatmul.msk.f32.gmra.mxu0 %vm50_vm0, %v3374_v47  ;;  %v3134_v11 = vsel %vm50_vm0, %v3090_v41, 0.0  ;;  %vm3280_vm2 = vmor %vm3278_vm1, %vm3279_vm15  ;;  %v9745_v41 = vld [vmem:[%s11800_s6 + $0x38] sm:$0xff] }
 0xac0   :  { %v3271_v6 = vsel %vm3270_vm13, %v6728_v55, %v3267_v13  ;;  %v3274_v8 = vmul.f32 %v6730_v25, %v3273_v19 }
 0xac1   :  { %v9686_v50 = vmul.f32 %v4114_v0, %v3506_v23  ;;  %v3341_v49 = vmul.f32 %v3271_v6, %v9248_v57 }
 0xac2   :  { %v3275_v33 = vmul.f32 0.5, %v3274_v8  ;;  %6326 = vset.pattern.permute.xlu0 %v11846_v51  ;;  %v3473_v8 = vpop.f32.mrf.mxu0 }
 0xac3   :  { %12003 = vst [vmem:[#allocation42_spill] sm:$0xff] %v9686_v50  ;;  %4490 = vperm.xlu0 %6326, %v9486_v36   ;;  %v3358_v40 = vmul.f32 %v9014_v44, %v3341_v49  ;;  %v4165_v55 = vmul.f32 %v9411_v35, %v9686_v50  ;;  %v11842_v37 = vrot.slane %v9686_v50, 1  ;;  %v11843_v57 = vrot.slane %v9686_v50, 7 }
 0xac4   :  { %v3276_v46 = vsub.f32 1.5, %v3275_v33  ;;  %v9749_v49 = vadd.f32 %v3473_v8, %v9216_v45 }
 0xac5   :  { %v3375_v16 = vadd.f32 %v9019_v7, %v3358_v40  ;;  %v9703_v47 = vadd.f32 %v4313_v42, %v4165_v55  ;;  %v9709_v56 = vsel %vm4468_vm6, %v4457_v27, %v11842_v37  ;;  %v9715_v13 = vsel %vm4193_vm14, %v4180_v32, %v11843_v57  ;;  %v9759_v55 = vpop.permute.xlu0 %4262 }
 0xac6   :  { %12004 = vst [vmem:[#allocation43_spill] sm:$0xff] %v9709_v56  ;;  %v3277_v1 = vmul.f32 %v6730_v25, %v3276_v46  ;;  %3135 = vadd.xlane.f32.xlu1 %v3134_v11  ;;  %v9719_v19 = vmul.f32 %v4298_v62, %v9715_v13  ;;  %v9723_v27 = vsub.f32 %v9178_v54, %v3059_v20  ;;  %v9751_v62 = vpop.permute.xlu2 %4267  ;;  %v9755_v42 = vmul.f32 0.70710677, %v9749_v49 }
 0xac7   :  { %12005 = vst [vmem:[#allocation44_spill] sm:$0xff] %v9715_v13  ;;  %6291 = vmatmul.msk.f32.gmra.mxu0 %vm50_vm0, %v3375_v16  ;;  %v11844_v11 = vmov 3   ;;  %v12010_v54 = vmov 2  }
 0xac8   :  { %v3281_v23 = vsel %vm3280_vm2, %v6730_v25, %v3277_v1  ;;  %v3091_v12 = vmul.f32 %v9723_v27, %v9723_v27  ;;  %v9736_v25 = vld [vmem:[%s11800_s6 + $0x48] sm:$0xff]  ;;  %12007 = vst [vmem:[#allocation46_spill] sm:$0xff] %v9751_v62  ;;  %v9762_v46 = vand.u32 2147483647, %v9755_v42 }
 0xac9   :  { %v3342_v0 = vmul.f32 %v3281_v23, %v9255_v26  ;;  %v9740_v26 = vpop.permute.xlu1 %4272 }
 0xaca   :  { %v3137_v6 = vsel %vm50_vm0, %v3091_v12, 0.0  ;;  %12006 = vst [vmem:[#allocation45_spill] sm:$0xff] %v9740_v26  ;;  %v3555_v23 = vmul.f32 0.3275911, %v9762_v46 }
 0xacb   :  { %4510 = vperm.xlu0 %6326, %v9582_v21   ;;  %v3359_v32 = vmul.f32 %v9014_v44, %v3342_v0 }
 0xacd   :  { %v3376_v10 = vadd.f32 %v9019_v7, %v3359_v32  ;;  %v12008_v32 = vld [vmem:[#allocation28_spill] sm:$0xff] }
 0xacf   :  { %6292 = vmatmul.msk.f32.gmra.mxu0 %vm50_vm0, %v3376_v10 }
 0xad2   :  { %3138 = vadd.xlane.f32.xlu2 %v3137_v6 }
 0xad3   :  { %4522 = vperm.xlu0 %6326, %v9736_v25  }
 0xadb   :  { %4534 = vperm.xlu0 %6326, %v9263_v24  }
 0xadf   :  { %4368 = vperm.xlu1 %6324, %v9745_v41  }
 0xae3   :  { %4546 = vperm.xlu0 %6326, %v9416_v43  }
 0xae5   :  { %v3127_v33 = vpop.xlane.xlu1 %3126 }
 0xae6   :  { %v3151_v40 = vmul.f32 %v3127_v33, %v11963_v4  ;;  %v9771_v33 = vadd.f32 1.0, %v3555_v23 }
 0xae7   :  { %4380 = vperm.xlu1 %6324, %v9275_v22  }
 0xae8   :  { %v3167_v20 = vadd.f32 1e-05, %v3151_v40  ;;  %vm3690_vm15 = vweird.f32 %v9771_v33 }
 0xaea   :  { %6731 = vrsqrt.f32 %v3167_v20  ;;  %4376 = vperm.xlu2 %6323, %v9736_v25   ;;  %vm3288_vm4 = vweird.f32 %v3167_v20 }
 0xaeb   :  { %6330 = vset.pattern.permute.xlu0 %v11844_v11  ;;  %v3130_v16 = vpop.xlane.xlu2 %3129 }
 0xaec   :  { %v3152_v1 = vmul.f32 %v3130_v16, %v11963_v4  ;;  %4607 = vperm.xlu0 %6330, %v9470_v59  }
 0xaee   :  { %v3168_v0 = vadd.f32 1e-05, %v3152_v1 }
 0xaef   :  { %4392 = vperm.xlu1 %6324, %v12008_v32  }
 0xaf0   :  { %v6732_v10 = vpop.eup %6731  ;;  %6733 = vrsqrt.f32 %v3168_v0  ;;  %v3133_v12 = vpop.xlane.xlu0 %3132  ;;  %vm3298_vm7 = vweird.f32 %v3168_v0 }
 0xaf1   :  { %v3283_v6 = vmul.f32 %v6732_v10, %v3167_v20  ;;  %v3153_v8 = vmul.f32 %v3133_v12, %v11963_v4  ;;  %vm3289_vm3 = vweird.f32 %v6732_v10 }
 0xaf2   :  { %4388 = vperm.xlu2 %6323, %v9263_v24   ;;  %vm3290_vm5 = vmor %vm3288_vm4, %vm3289_vm3  ;;  %vm4067_vm3 = vcmp.lt.f32.partialorder %v9755_v42, 0.0  ;;  %v12025_v42 = vmov 8  }
 0xaf3   :  { %v3284_v40 = vmul.f32 %v6732_v10, %v3283_v6  ;;  %v3169_v37 = vadd.f32 1e-05, %v3153_v8  ;;  %v9774_v16 = vpop.permute.xlu2 %4282 }
 0xaf4   :  { %12009 = vst [vmem:[#allocation28_spill] sm:$0xff] %v9774_v16  ;;  %4627 = vperm.xlu0 %6330, %v9745_v41  }
 0xaf5   :  { %v3285_v57 = vmul.f32 0.5, %v3284_v40  ;;  %6735 = vrsqrt.f32 %v3169_v37  ;;  %vm3308_vm10 = vweird.f32 %v3169_v37 }
 0xaf6   :  { %v6734_v1 = vpop.eup %6733  ;;  %6737 = vrcp.f32 %v9771_v33 }
 0xaf7   :  { %v3286_v11 = vsub.f32 1.5, %v3285_v57  ;;  %v3293_v51 = vmul.f32 %v6734_v1, %v3168_v0  ;;  %6325 = vset.pattern.permute.xlu1 %v12010_v54  ;;  %v12012_v57 = vld [vmem:[#allocation23_spill] sm:$0xff]  ;;  %vm3299_vm11 = vweird.f32 %v6734_v1 }
 0xaf8   :  { %4486 = vperm.xlu1 %6325, %v9497_v18   ;;  %vm3300_vm8 = vmor %vm3298_vm7, %vm3299_vm11 }
 0xaf9   :  { %v3287_v23 = vmul.f32 %v6732_v10, %v3286_v11  ;;  %v3294_v24 = vmul.f32 %v6734_v1, %v3293_v51 }
 0xafa   :  { %4400 = vperm.xlu2 %6323, %v9416_v43  }
 0xafb   :  { %v6736_v12 = vpop.eup %6735  ;;  %v3291_v6 = vsel %vm3290_vm5, %v6732_v10, %v3287_v23  ;;  %v3295_v8 = vmul.f32 0.5, %v3294_v24  ;;  %v9781_v40 = vpop.permute.xlu2 %4344 }
 0xafc   :  { %12011 = vst [vmem:[#allocation47_spill] sm:$0xff] %v9781_v40  ;;  %v9783_v60 = vpop.eup %6737  ;;  %v3343_v16 = vmul.f32 %v3291_v6, %v12012_v57  ;;  %v3303_v26 = vmul.f32 %v6736_v12, %v3169_v37  ;;  %4639 = vperm.xlu0 %6330, %v9275_v22   ;;  %v12014_v22 = vld [vmem:[#allocation24_spill] sm:$0xff]  ;;  %vm3309_vm9 = vweird.f32 %v6736_v12 }
 0xafd   :  { %v3296_v13 = vsub.f32 1.5, %v3295_v8  ;;  %v9787_v11 = vpop.permute.xlu1 %4287  ;;  %v3686_v43 = vmul.f32 %v9783_v60, %v9771_v33  ;;  %vm3310_vm12 = vmor %vm3308_vm10, %vm3309_vm9  ;;  %vm3691_vm13 = vweird.f32 %v9783_v60 }
 0xafe   :  { %12013 = vst [vmem:[#allocation23_spill] sm:$0xff] %v9787_v11  ;;  %v3304_v51 = vmul.f32 %v6736_v12, %v3303_v26  ;;  %v3360_v20 = vmul.f32 %v9014_v44, %v3343_v16  ;;  %v12015_v11 = vld [vmem:[#allocation26_spill] sm:$0xff]  ;;  %vm3692_vm1 = vmor %vm3690_vm15, %vm3691_vm13 }
 0xaff   :  { %v3297_v10 = vmul.f32 %v6734_v1, %v3296_v13  ;;  %v9796_v26 = vperm.slane %v12015_v11, 1  ;;  %v3687_v13 = vsub.f32 1.0, %v3686_v43 }
 0xb00   :  { %v3305_v23 = vmul.f32 0.5, %v3304_v51  ;;  %4498 = vperm.xlu1 %6325, %v9535_v5   ;;  %v3377_v24 = vadd.f32 %v9019_v7, %v3360_v20 }
 0xb01   :  { %v3301_v6 = vsel %vm3300_vm8, %v6734_v1, %v3297_v10 }
 0xb02   :  { %v3344_v8 = vmul.f32 %v3301_v6, %v12014_v22  ;;  %v3306_v57 = vsub.f32 1.5, %v3305_v23  ;;  %6327 = vset.pattern.permute.xlu2 %v12010_v54  ;;  %6293 = vmatmul.msk.f32.gmra.mxu0 %vm50_vm0, %v3377_v24  ;;  %v3688_v23 = vmul.f32 %v9783_v60, %v3687_v13  ;;  %v12017_v24 = vld [vmem:[#allocation25_spill] sm:$0xff] }
 0xb03   :  { %v4353_v0 = vpop.permute.xlu2 %4352  ;;  %4494 = vperm.xlu2 %6327, %v9470_v59   ;;  %v9801_v16 = vpop.permute.xlu0 %4277 }
 0xb04   :  { %12016 = vst [vmem:[#allocation24_spill] sm:$0xff] %v9801_v16  ;;  %v3307_v51 = vmul.f32 %v6736_v12, %v3306_v57  ;;  %v4407_v1 = vmul.f32 %v9796_v26, %v4353_v0  ;;  %4651 = vperm.xlu0 %6330, %v12008_v32   ;;  %v3361_v20 = vmul.f32 %v9014_v44, %v3344_v8  ;;  %v11854_v0 = vmov 7  }
 0xb05   :  { %v3689_v13 = vadd.f32 %v9783_v60, %v3688_v23 }
 0xb06   :  { %v3311_v11 = vsel %vm3310_vm12, %v6736_v12, %v3307_v51  ;;  %v4423_v54 = vmul.f32 %v4407_v1, %v9503_v28  ;;  %v4349_v10 = vpop.permute.xlu1 %4348  ;;  %v3378_v37 = vadd.f32 %v9019_v7, %v3361_v20  ;;  %v3696_v20 = vand.u32 2147483648, %v9771_v33 }
 0xb07   :  { %v4406_v43 = vmul.f32 %v9796_v26, %v4349_v10  ;;  %v3345_v6 = vmul.f32 %v3311_v11, %v12017_v24 }
 0xb08   :  { %v9811_v22 = vadd.f32 %v4423_v54, %v9567_v3  ;;  %4506 = vperm.xlu1 %6325, %v9541_v2  }
 0xb09   :  { %v4422_v8 = vmul.f32 %v4406_v43, %v9501_v14  ;;  %v3362_v1 = vmul.f32 %v9014_v44, %v3345_v6  ;;  %v3693_v43 = vsel %vm3692_vm1, %v9783_v60, %v3689_v13  ;;  %v3697_v6 = vor.u32 1.1754944e-38, %v3696_v20  ;;  %v9853_v20 = vld [vmem:[%s11800_s6 + $0x58] sm:$0xff] }
 0xb0a   :  { %6294 = vmatmul.msk.f32.gmra.mxu0 %vm50_vm0, %v3378_v37 }
 0xb0b   :  { %v9818_v12 = vadd.f32 %v4422_v8, %v9585_v61  ;;  %v4365_v57 = vpop.permute.xlu2 %4364  ;;  %4502 = vperm.xlu2 %6327, %v9512_v15   ;;  %v3694_v61 = vand.u32 2147483647, %v9771_v33  ;;  %v3379_v24 = vadd.f32 %v9019_v7, %v3362_v1 }
 0xb0c   :  { %v4410_v3 = vmul.f32 %v9796_v26, %v4365_v57  ;;  %6334 = vset.pattern.permute.xlu0 %v11854_v0  ;;  %v9825_v51 = vpop.permute.xlu0 %4340  ;;  %v11858_v57 = vmov 8  }
 0xb0d   :  { %12018 = vst [vmem:[#allocation26_spill] sm:$0xff] %v9825_v51  ;;  %4938 = vperm.xlu0 %6334, %v9497_v18   ;;  %vm3695_vm2 = vcmp.eq.f32.partialorder %v3694_v61, 8.507059e+37 }
 0xb0e   :  { %v4426_v11 = vmul.f32 %v4410_v3, %v9634_v63  ;;  %v4357_v54 = vpop.permute.xlu1 %4356  ;;  %v3698_v33 = vsel %vm3695_vm2, %v3697_v6, %v3693_v43  ;;  %v12019_v3 = vld [vmem:[#allocation35_spill] sm:$0xff]  ;;  %v11856_v43 = vmov 5  }
 0xb0f   :  { %v4408_v10 = vmul.f32 %v9796_v26, %v4357_v54  ;;  %v3827_v13 = vmul.f32 1.0614054, %v3698_v33 }
 0xb10   :  { %v9836_v23 = vadd.f32 %v4426_v11, %v9703_v47  ;;  %4518 = vperm.xlu1 %6325, %v9597_v30   ;;  %v9862_v11 = vld [vmem:[%s11800_s6 + $0x50] sm:$0xff] }
 0xb11   :  { %v4424_v37 = vmul.f32 %v4408_v10, %v9523_v34  ;;  %v3843_v61 = vadd.f32 -1.4531521, %v3827_v13  ;;  %v12028_v34 = vmov 5  }
 0xb12   :  { %6295 = vmatmul.msk.f32.gmra.mxu0 %vm50_vm0, %v3379_v24 }
 0xb13   :  { %v9843_v8 = vadd.f32 %v4424_v37, %v9615_v53  ;;  %4514 = vperm.xlu2 %6327, %v9745_v41   ;;  %v3859_v10 = vmul.f32 %v3843_v61, %v3698_v33  ;;  %v3971_v37 = vmul.f32 %v9762_v46, %v9762_v46  ;;  %v11852_v61 = vmov 6  }
 0xb14   :  { %v4361_v60 = vpop.permute.xlu0 %4360 }
 0xb15   :  { %v4409_v47 = vmul.f32 %v9796_v26, %v4361_v60  ;;  %6340 = vset.pattern.permute.xlu0 %v11858_v57  ;;  %v12021_v60 = vmov 3   ;;  %v3987_v13 = vsub.f32 0.0, %v3971_v37 }
 0xb16   :  { %5063 = vperm.xlu0 %6340, %v9535_v5  }
 0xb17   :  { %v4425_v1 = vmul.f32 %v4409_v47, %v12019_v3 }
 0xb18   :  { %4530 = vperm.xlu1 %6325, %v9853_v20  }
 0xb19   :  { %v9857_v53 = vadd.f32 %v4425_v1, %v9661_v31  ;;  %v3875_v31 = vadd.f32 1.4214138, %v3859_v10  ;;  %v4010_v1 = vmul.f32 1.442695, %v3987_v13 }
 0xb1b   :  { %4526 = vperm.xlu2 %6327, %v9862_v11   ;;  %v3891_v6 = vmul.f32 %v3875_v31, %v3698_v33  ;;  %6739 = vpow2.f32 %v4010_v1 }
 0xb1c   :  { %v9865_v54 = vpop.permute.xlu0 %4372 }
 0xb1d   :  { %v3907_v47 = vadd.f32 -0.28449672, %v3891_v6 }
 0xb1e   :  { %6341 = vset.pattern.permute.xlu0 %v11856_v43 }
 0xb1f   :  { %4712 = vperm.xlu0 %6341, %v9497_v18  }
 0xb20   :  { %4542 = vperm.xlu1 %6325, %v9439_v48  }
 0xb23   :  { %4538 = vperm.xlu2 %6327, %v12008_v32   ;;  %v3923_v32 = vmul.f32 %v3907_v47, %v3698_v33 }
 0xb24   :  { %v9871_v24 = vpop.permute.xlu0 %4384 }
 0xb25   :  { %12020 = vst [vmem:[#allocation25_spill] sm:$0xff] %v9871_v24  ;;  %v3939_v46 = vadd.f32 0.2548296, %v3923_v32 }
 0xb27   :  { %4732 = vperm.xlu0 %6341, %v9541_v2   ;;  %v3955_v31 = vmul.f32 %v3939_v46, %v3698_v33 }
 0xb28   :  { %6329 = vset.pattern.permute.xlu1 %v12021_v60 }
 0xb29   :  { %4603 = vperm.xlu1 %6329, %v9486_v36  }
 0xb2b   :  { %6328 = vset.pattern.permute.xlu2 %v12021_v60 }
 0xb2c   :  { %4599 = vperm.xlu2 %6328, %v9497_v18   ;;  %v9880_v48 = vpop.permute.xlu0 %4396  ;;  %v6740_v18 = vpop.eup %6739 }
 0xb2d   :  { %12022 = vst [vmem:[#allocation48_spill] sm:$0xff] %v9880_v48  ;;  %v4035_v37 = vmul.f32 %v6740_v18, %v3955_v31 }
 0xb2f   :  { %6346 = vset.pattern.permute.xlu0 %v11852_v61  ;;  %v4051_v1 = vsub.f32 1.0, %v4035_v37 }
 0xb30   :  { %4833 = vperm.xlu0 %6346, %v9470_v59  }
 0xb31   :  { %4615 = vperm.xlu1 %6329, %v9512_v15   ;;  %v9894_v15 = vld [vmem:[%s11802_s5] sm:$0xff] }
 0xb32   :  { %v9897_v47 = vperm.slane %v9894_v15, 2 }
 0xb34   :  { %4611 = vperm.xlu2 %6328, %v9535_v5  }
 0xb35   :  { %v9886_v10 = vpop.permute.xlu0 %4490 }
 0xb36   :  { %12023 = vst [vmem:[#allocation49_spill] sm:$0xff] %v9886_v10 }
 0xb38   :  { %4849 = vperm.xlu0 %6346, %v9582_v21  }
 0xb39   :  { %4623 = vperm.xlu1 %6329, %v9582_v21   ;;  %v3136_v6 = vpop.xlane.xlu1 %3135 }
 0xb3a   :  { %v3154_v60 = vmul.f32 %v3136_v6, %v11963_v4 }
 0xb3c   :  { %v3170_v13 = vadd.f32 1e-05, %v3154_v60  ;;  %4619 = vperm.xlu2 %6328, %v9541_v2   ;;  %v3476_v33 = vpop.f32.mrf.mxu0  ;;  %v4083_v2 = vsub.f32 0.0, %v4051_v1 }
 0xb3d   :  { %v9901_v32 = vadd.f32 %v3476_v33, %v9216_v45  ;;  %v4511_v21 = vpop.permute.xlu0 %4510 }
 0xb3e   :  { %6741 = vrsqrt.f32 %v3170_v13  ;;  %v4556_v46 = vmul.f32 %v9897_v47, %v4511_v21  ;;  %v4099_v57 = vsel %vm4067_vm3, %v4083_v2, %v4051_v1  ;;  %v9932_v1 = vld [vmem:[%s11800_s6 + $0x60] sm:$0xff]  ;;  %vm3318_vm5 = vweird.f32 %v3170_v13 }
 0xb3f   :  { %v9905_v31 = vmul.f32 0.70710677, %v9901_v32  ;;  %v4115_v28 = vadd.f32 1.0, %v4099_v57 }
 0xb40   :  { %v4572_v18 = vmul.f32 %v4556_v46, %v9709_v56  ;;  %6355 = vset.pattern.permute.xlu0 %v11854_v0 }
 0xb41   :  { %v3540_v6 = vand.u32 2147483647, %v9905_v31  ;;  %4966 = vperm.xlu0 %6355, %v9745_v41   ;;  %4635 = vperm.xlu1 %6329, %v9736_v25  }
 0xb42   :  { %v9913_v60 = vadd.f32 %v4572_v18, %v9836_v23 }
 0xb43   :  { %v3556_v37 = vmul.f32 0.3275911, %v3540_v6 }
 0xb44   :  { %12024 = vst [vmem:[#allocation50_spill] sm:$0xff] %v9913_v60  ;;  %v6742_v33 = vpop.eup %6741  ;;  %4631 = vperm.xlu2 %6328, %v9597_v30   ;;  %v3479_v21 = vpop.f32.mrf.mxu0 }
 0xb45   :  { %v3313_v46 = vmul.f32 %v6742_v33, %v3170_v13  ;;  %v3572_v61 = vadd.f32 1.0, %v3556_v37  ;;  %v3139_v0 = vpop.xlane.xlu2 %3138  ;;  %v9917_v43 = vpop.permute.xlu0 %4522  ;;  %v9920_v41 = vadd.f32 %v3479_v21, %v9216_v45  ;;  %vm3319_vm4 = vweird.f32 %v6742_v33 }
 0xb46   :  { %v3155_v25 = vmul.f32 %v3139_v0, %v11963_v4  ;;  %v3507_v0 = vmul.f32 0.5, %v9749_v49  ;;  %vm3320_vm11 = vmor %vm3318_vm5, %vm3319_vm4 }
 0xb47   :  { %v3314_v23 = vmul.f32 %v6742_v33, %v3313_v46  ;;  %6743 = vrcp.f32 %v3572_v61  ;;  %v9924_v18 = vmul.f32 0.70710677, %v9920_v41  ;;  %v3709_v13 = vand.u32 2147483647, %v3572_v61 }
 0xb48   :  { %v9926_v48 = vadd.f32 1e-05, %v3155_v25  ;;  %v9943_v46 = vmul.f32 %v4115_v28, %v3507_v0  ;;  %v3711_v0 = vand.u32 2147483648, %v3572_v61  ;;  %vm3705_vm8 = vweird.f32 %v3572_v61 }
 0xb49   :  { %v3315_v63 = vmul.f32 0.5, %v3314_v23  ;;  %6360 = vset.pattern.permute.xlu0 %v12025_v42  ;;  %4647 = vperm.xlu1 %6329, %v9932_v1   ;;  %v9936_v4 = vand.u32 2147483647, %v9924_v18  ;;  %vm3710_vm10 = vcmp.eq.f32.partialorder %v3709_v13, 8.507059e+37 }
 0xb4a   :  { %5083 = vperm.xlu0 %6360, %v9597_v30   ;;  %6745 = vrsqrt.f32 %v9926_v48  ;;  %12026 = vst [vmem:[#allocation51_spill] sm:$0xff] %v9943_v46  ;;  %vm3328_vm13 = vweird.f32 %v9926_v48 }
 0xb4b   :  { %v3316_v57 = vsub.f32 1.5, %v3315_v63  ;;  %v3557_v2 = vmul.f32 0.3275911, %v9936_v4 }
 0xb4c   :  { %4643 = vperm.xlu2 %6328, %v9853_v20   ;;  %v3482_v37 = vpop.f32.mrf.mxu0 }
 0xb4d   :  { %v6744_v21 = vpop.eup %6743  ;;  %v3317_v25 = vmul.f32 %v6742_v33, %v3316_v57  ;;  %v9946_v23 = vadd.f32 %v3482_v37, %v9216_v45  ;;  %v9948_v30 = vpop.permute.xlu2 %4376  ;;  %v9952_v51 = vadd.f32 1.0, %v3557_v2  ;;  %v9963_v57 = vld [vmem:[%s11800_s6 + $0x78] sm:$0xff] }
 0xb4e   :  { %v9950_v49 = vpop.permute.xlu0 %4534  ;;  %v3701_v63 = vmul.f32 %v6744_v21, %v3572_v61  ;;  %vm3706_vm7 = vweird.f32 %v6744_v21 }
 0xb4f   :  { %12027 = vst [vmem:[#allocation52_spill] sm:$0xff] %v9950_v49  ;;  %v3321_v3 = vsel %vm3320_vm11, %v6742_v33, %v3317_v25  ;;  %v9955_v10 = vmul.f32 0.70710677, %v9946_v23  ;;  %6747 = vrcp.f32 %v9952_v51  ;;  %v4166_v33 = vmul.f32 %v9411_v35, %v9943_v46  ;;  %vm3707_vm9 = vmor %vm3705_vm8, %vm3706_vm7 }
 0xb50   :  { %v3702_v40 = vsub.f32 1.0, %v3701_v63  ;;  %v9958_v28 = vpop.eup %6745  ;;  %v3346_v37 = vmul.f32 %v3321_v3, %v9674_v52  ;;  %v3972_v49 = vmul.f32 %v3540_v6, %v3540_v6  ;;  %v3712_v3 = vor.u32 1.1754944e-38, %v3711_v0 }
 0xb51   :  { %4659 = vperm.xlu1 %6329, %v9963_v57   ;;  %v4369_v2 = vpop.permute.xlu1 %4368  ;;  %v3323_v63 = vmul.f32 %v9958_v28, %v9926_v48  ;;  %v9972_v14 = vand.u32 2147483647, %v9955_v10  ;;  %v4330_v6 = vadd.f32 %v9719_v19, %v4166_v33  ;;  %vm3329_vm12 = vweird.f32 %v9958_v28 }
 0xb52   :  { %v3703_v25 = vmul.f32 %v6744_v21, %v3702_v40  ;;  %6365 = vset.pattern.permute.xlu0 %v12028_v34  ;;  %v4411_v16 = vmul.f32 %v9796_v26, %v4369_v2  ;;  %v6897_v40 = vld [vmem:[%s11800_s6 + $0x70] sm:$0xff]  ;;  %v3363_v62 = vmul.f32 %v9014_v44, %v3346_v37  ;;  %v3988_v24 = vsub.f32 0.0, %v3972_v49  ;;  %vm3330_vm1 = vmor %vm3328_vm13, %vm3329_vm12 }
 0xb53   :  { %4752 = vperm.xlu0 %6365, %v9862_v11   ;;  %v3324_v29 = vmul.f32 %v9958_v28, %v3323_v63  ;;  %v3558_v52 = vmul.f32 0.3275911, %v9972_v14  ;;  %v3726_v49 = vand.u32 2147483648, %v9952_v51  ;;  %vm3720_vm2 = vweird.f32 %v9952_v51 }
 0xb54   :  { %v3704_v60 = vadd.f32 %v6744_v21, %v3703_v25  ;;  %4655 = vperm.xlu2 %6328, %v6897_v40   ;;  %v4427_v2 = vmul.f32 %v4411_v16, %v9686_v50  ;;  %v3380_v37 = vadd.f32 %v9019_v7, %v3363_v62  ;;  %vm4070_vm12 = vcmp.lt.f32.partialorder %v9955_v10, 0.0 }
 0xb55   :  { %v9985_v11 = vpop.permute.xlu2 %4388  ;;  %v6748_v25 = vpop.eup %6747  ;;  %v3325_v56 = vmul.f32 0.5, %v3324_v29  ;;  %v9989_v39 = vadd.f32 1.0, %v3558_v52  ;;  %v3724_v52 = vand.u32 2147483647, %v9952_v51 }
 0xb56   :  { %v9987_v61 = vpop.permute.xlu0 %4546  ;;  %v3708_v63 = vsel %vm3707_vm9, %v6744_v21, %v3704_v60  ;;  %v3716_v13 = vmul.f32 %v6748_v25, %v9952_v51  ;;  %v9995_v0 = vadd.f32 %v4427_v2, %v4330_v6  ;;  %vm3721_vm15 = vweird.f32 %v6748_v25  ;;  %6296 = vmatmul.msk.f32.gmra.mxu0 %vm50_vm0, %v3380_v37 }
 0xb57   :  { %12029 = vst [vmem:[#allocation53_spill] sm:$0xff] %v9987_v61  ;;  %v9992_v40 = vsel %vm3710_vm10, %v3712_v3, %v3708_v63  ;;  %v3326_v16 = vsub.f32 1.5, %v3325_v56  ;;  %6749 = vrcp.f32 %v9989_v39  ;;  %v12030_v3 = vmov 6   ;;  %vm3722_vm3 = vmor %vm3720_vm2, %vm3721_vm15 }
 0xb58   :  { %v3828_v19 = vmul.f32 1.0614054, %v9992_v40  ;;  %v3717_v60 = vsub.f32 1.0, %v3716_v13  ;;  %v4012_v6 = vmul.f32 1.442695, %v3988_v24  ;;  %vm3725_vm4 = vcmp.eq.f32.partialorder %v3724_v52, 8.507059e+37 }
 0xb59   :  { %6332 = vset.pattern.permute.xlu1 %v12028_v34  ;;  %v10002_v29 = vpop.permute.xlu1 %4380  ;;  %v3327_v33 = vmul.f32 %v9958_v28, %v3326_v16  ;;  %v10034_v52 = vperm.slane %v9894_v15, 3  ;;  %vm3735_vm11 = vweird.f32 %v9989_v39  ;;  %vm4068_vm9 = vcmp.lt.f32.partialorder %v9905_v31, 0.0 }
 0xb5a   :  { %v3844_v21 = vadd.f32 -1.4531521, %v3828_v19  ;;  %4720 = vperm.xlu1 %6332, %v9470_v59   ;;  %v3718_v56 = vmul.f32 %v6748_v25, %v3717_v60  ;;  %v3973_v59 = vmul.f32 %v9936_v4, %v9936_v4  ;;  %6751 = vpow2.f32 %v4012_v6  ;;  %v6898_v6 = vld [vmem:[%s11800_s6] sm:$0xff] }
 0xb5b   :  { %6370 = vset.pattern.permute.xlu0 %v12030_v3  ;;  %v3331_v2 = vsel %vm3330_vm1, %v9958_v28, %v3327_v33  ;;  %v3727_v28 = vor.u32 1.1754944e-38, %v3726_v49  ;;  %v11872_v31 = vrot.slane %v9943_v46, 1  ;;  %vm4069_vm10 = vcmp.lt.f32.partialorder %v9924_v18, 0.0 }
 0xb5c   :  { %v3860_v48 = vmul.f32 %v3844_v21, %v9992_v40  ;;  %4869 = vperm.xlu0 %6370, %v9853_v20   ;;  %v3719_v63 = vadd.f32 %v6748_v25, %v3718_v56  ;;  %v3347_v62 = vmul.f32 %v3331_v2, %v9723_v27  ;;  %6331 = vset.pattern.permute.xlu2 %v12028_v34  ;;  %v11871_v27 = vrot.slane %v9943_v46, 7 }
 0xb5d   :  { %v10019_v13 = vpop.permute.xlu2 %4400  ;;  %v6750_v19 = vpop.eup %6749  ;;  %4716 = vperm.xlu2 %6331, %v9486_v36   ;;  %v3989_v37 = vsub.f32 0.0, %v3973_v59  ;;  %v12044_v18 = vrot.slane %v9943_v46, 7 }
 0xb5e   :  { %12031 = vst [vmem:[#allocation54_spill] sm:$0xff] %v10019_v13  ;;  %v3876_v24 = vadd.f32 1.4214138, %v3860_v48  ;;  %v4608_v20 = vpop.permute.xlu0 %4607  ;;  %v3723_v16 = vsel %vm3722_vm3, %v6748_v25, %v3719_v63  ;;  %v3731_v51 = vmul.f32 %v6750_v19, %v9989_v39  ;;  %v3364_v21 = vmul.f32 %v9014_v44, %v3347_v62 }
 0xb5f   :  { %v10025_v60 = vsel %vm3725_vm4, %v3727_v28, %v3723_v16  ;;  %v3741_v25 = vand.u32 2147483648, %v9989_v39  ;;  %vm3736_vm5 = vweird.f32 %v6750_v19  ;;  %v3739_v44 = vand.u32 2147483647, %v9989_v39 }
 0xb60   :  { %v3892_v4 = vmul.f32 %v3876_v24, %v9992_v40  ;;  %v3829_v33 = vmul.f32 1.0614054, %v10025_v60  ;;  %v3732_v49 = vsub.f32 1.0, %v3731_v51  ;;  %v3381_v48 = vadd.f32 %v9019_v7, %v3364_v21  ;;  %vm3737_vm7 = vmor %vm3735_vm11, %vm3736_vm5 }
 0xb61   :  { %v10030_v56 = vpop.permute.xlu1 %4392  ;;  %v12032_v62 = vmov 7   ;;  %v12033_v7 = vrot.slane %v9686_v50, 7  ;;  %v4014_v16 = vmul.f32 1.442695, %v3989_v37  ;;  %vm3740_vm8 = vcmp.eq.f32.partialorder %v3739_v44, 8.507059e+37  ;;  %v12036_v44 = vld [vmem:[#allocation32_spill] sm:$0xff] }
 0xb62   :  { %v3908_v36 = vadd.f32 -0.28449672, %v3892_v4  ;;  %6333 = vset.pattern.permute.xlu1 %v12030_v3  ;;  %v3845_v2 = vadd.f32 -1.4531521, %v3829_v33  ;;  %v3733_v63 = vmul.f32 %v6750_v19, %v3732_v49  ;;  %6297 = vmatmul.msk.f32.gmra.mxu0 %vm50_vm0, %v3381_v48  ;;  %v3742_v33 = vor.u32 1.1754944e-38, %v3741_v25 }
 0xb63   :  { %4825 = vperm.xlu1 %6333, %v6898_v6   ;;  %v10051_v24 = vsel %vm4193_vm14, %v12033_v7, %v11871_v27  ;;  %v4665_v49 = vmul.f32 %v10034_v52, %v4608_v20  ;;  %v6752_v7 = vpop.eup %6751  ;;  %v3974_v25 = vmul.f32 %v9972_v14, %v9972_v14  ;;  %v6899_v14 = vld [vmem:[%s11800_s6 + $0x8] sm:$0xff]  ;;  %6753 = vpow2.f32 %v4014_v16 }
 0xb64   :  { %v3924_v59 = vmul.f32 %v3908_v36, %v9992_v40  ;;  %6375 = vset.pattern.permute.xlu0 %v12032_v62  ;;  %12034 = vst [vmem:[#allocation55_spill] sm:$0xff] %v10051_v24  ;;  %v3861_v28 = vmul.f32 %v3845_v2, %v10025_v60  ;;  %v3734_v51 = vadd.f32 %v6750_v19, %v3733_v63  ;;  %v6900_v16 = vld [vmem:[%s11800_s6 + $0x68] sm:$0xff] }
 0xb65   :  { %4986 = vperm.xlu0 %6375, %v9932_v1   ;;  %v4495_v4 = vpop.permute.xlu2 %4494  ;;  %4724 = vperm.xlu2 %6331, %v9535_v5  }
 0xb66   :  { %v3940_v21 = vadd.f32 0.2548296, %v3924_v59  ;;  %v4552_v36 = vmul.f32 %v9897_v47, %v4495_v4  ;;  %v4628_v48 = vpop.permute.xlu0 %4627  ;;  %v3877_v2 = vadd.f32 1.4214138, %v3861_v28  ;;  %v3738_v37 = vsel %vm3737_vm7, %v6750_v19, %v3734_v51  ;;  %v12035_v59 = vld [vmem:[#allocation37_spill] sm:$0xff] }
 0xb67   :  { %v4670_v39 = vmul.f32 %v10034_v52, %v4628_v48  ;;  %v10062_v63 = vsel %vm3740_vm8, %v3742_v33, %v3738_v37  ;;  %v4681_v28 = vmul.f32 %v4665_v49, %v12036_v44  ;;  %v3990_v48 = vsub.f32 0.0, %v3974_v25 }
 0xb68   :  { %v3956_v1 = vmul.f32 %v3940_v21, %v9992_v40  ;;  %v4568_v20 = vmul.f32 %v4552_v36, %v12035_v59  ;;  %v3893_v5 = vmul.f32 %v3877_v2, %v10025_v60  ;;  %v3830_v4 = vmul.f32 1.0614054, %v10062_v63 }
 0xb69   :  { %v10070_v27 = vmul.f32 %v4670_v39, %v10051_v24 }
 0xb6a   :  { %v4036_v19 = vmul.f32 %v6752_v7, %v3956_v1  ;;  %v4584_v51 = vadd.f32 %v4568_v20, %v9818_v12  ;;  %v10074_v40 = vpop.permute.xlu1 %4486  ;;  %v3909_v21 = vadd.f32 -0.28449672, %v3893_v5  ;;  %v3846_v33 = vadd.f32 -1.4531521, %v3830_v4 }
 0xb6b   :  { %12037 = vst [vmem:[#allocation56_spill] sm:$0xff] %v10074_v40  ;;  %4829 = vperm.xlu1 %6333, %v6899_v14   ;;  %v4016_v4 = vmul.f32 1.442695, %v3990_v48 }
 0xb6c   :  { %v4052_v36 = vsub.f32 1.0, %v4036_v19  ;;  %v10079_v2 = vadd.f32 %v4681_v28, %v4584_v51  ;;  %v3925_v7 = vmul.f32 %v3909_v21, %v10025_v60  ;;  %v3862_v49 = vmul.f32 %v3846_v33, %v10062_v63 }
 0xb6d   :  { %v4503_v37 = vpop.permute.xlu2 %4502  ;;  %6380 = vset.pattern.permute.xlu0 %v12025_v42  ;;  %6335 = vset.pattern.permute.xlu2 %v12025_v42  ;;  %v3508_v28 = vmul.f32 0.5, %v9901_v32  ;;  %6755 = vpow2.f32 %v4016_v4  ;;  %v4413_v32 = vmul.f32 %v9796_v26, %v9948_v30 }
 0xb6e   :  { %12038 = vst [vmem:[#allocation57_spill] sm:$0xff] %v10079_v2  ;;  %v4084_v12 = vsub.f32 0.0, %v4052_v36  ;;  %v4554_v39 = vmul.f32 %v9897_v47, %v4503_v37  ;;  %v10086_v1 = vpop.permute.xlu0 %4639  ;;  %5103 = vperm.xlu0 %6380, %v6900_v16   ;;  %v3941_v25 = vadd.f32 0.2548296, %v3925_v7  ;;  %v3878_v20 = vadd.f32 1.4214138, %v3862_v49  ;;  %5051 = vperm.xlu2 %6335, %v6898_v6   ;;  %v6754_v37 = vpop.eup %6753 }
 0xb6f   :  { %v4412_v49 = vmul.f32 %v9796_v26, %v9865_v54  ;;  %v12070_v2 = vld [vmem:[#allocation36_spill] sm:$0xff] }
 0xb70   :  { %v4100_v5 = vsel %vm4068_vm9, %v4084_v12, %v4052_v36  ;;  %v4570_v19 = vmul.f32 %v4554_v39, %v9665_v38  ;;  %v3957_v21 = vmul.f32 %v3941_v25, %v10025_v60  ;;  %v3894_v33 = vmul.f32 %v3878_v20, %v10062_v63  ;;  %v12040_v60 = vld [vmem:[#allocation22_spill] sm:$0xff] }
 0xb71   :  { %v4116_v51 = vadd.f32 1.0, %v4100_v5 }
 0xb72   :  { %v10097_v44 = vadd.f32 %v4570_v19, %v9843_v8  ;;  %v4499_v16 = vpop.permute.xlu1 %4498  ;;  %v4037_v6 = vmul.f32 %v6754_v37, %v3957_v21  ;;  %v3910_v36 = vadd.f32 -0.28449672, %v3894_v33  ;;  %v4299_v8 = vmul.f32 %v9343_v9, %v12040_v60  ;;  %v12041_v19 = vld [vmem:[#allocation39_spill] sm:$0xff] }
 0xb73   :  { %v10100_v7 = vmul.f32 %v4116_v51, %v3508_v28  ;;  %v4553_v48 = vmul.f32 %v9897_v47, %v4499_v16  ;;  %6337 = vset.pattern.permute.xlu1 %v12025_v42  ;;  %v12042_v33 = vrot.slane %v9686_v50, 1 }
 0xb74   :  { %5055 = vperm.xlu1 %6337, %v6899_v14   ;;  %v4053_v12 = vsub.f32 1.0, %v4037_v6  ;;  %v3926_v39 = vmul.f32 %v3910_v36, %v10062_v63  ;;  %v4315_v54 = vmul.f32 %v4299_v8, %v10051_v24 }
 0xb75   :  { %12039 = vst [vmem:[#allocation58_spill] sm:$0xff] %v10100_v7  ;;  %v4515_v25 = vpop.permute.xlu2 %4514  ;;  %v4183_v20 = vrot.slane %v10100_v7, 7  ;;  %v4429_v5 = vmul.f32 %v4413_v32, %v10100_v7  ;;  %v4569_v4 = vmul.f32 %v4553_v48, %v12041_v19  ;;  %v10125_v37 = vsel %vm4468_vm6, %v12042_v33, %v11872_v31 }
 0xb76   :  { %v4557_v28 = vmul.f32 %v9897_v47, %v4515_v25  ;;  %v10115_v30 = vpop.permute.xlu0 %4651  ;;  %6385 = vset.pattern.permute.xlu0 %v12028_v34  ;;  %v4085_v51 = vsub.f32 0.0, %v4053_v12  ;;  %v3942_v21 = vadd.f32 0.2548296, %v3926_v39  ;;  %12043 = vst [vmem:[#allocation22_spill] sm:$0xff] %v10125_v37  ;;  %6336 = vset.pattern.permute.xlu2 %v12032_v62  ;;  %v4167_v36 = vmul.f32 %v9411_v35, %v10100_v7  ;;  %v6756_v39 = vpop.eup %6755 }
 0xb77   :  { %4772 = vperm.xlu0 %6385, %v9963_v57   ;;  %v10131_v16 = vadd.f32 %v4569_v4, %v9811_v22  ;;  %4942 = vperm.xlu2 %6336, %v6899_v14   ;;  %v4428_v48 = vmul.f32 %v4412_v49, %v9943_v46  ;;  %v3509_v32 = vmul.f32 0.5, %v9920_v41  ;;  %v10143_v22 = vsel %vm4193_vm14, %v12044_v18, %v4183_v20 }
 0xb78   :  { %v4573_v6 = vmul.f32 %v4557_v28, %v10125_v37  ;;  %v4101_v60 = vsel %vm4069_vm10, %v4085_v51, %v4053_v12  ;;  %v3958_v8 = vmul.f32 %v3942_v21, %v10062_v63  ;;  %12045 = vst [vmem:[#allocation59_spill] sm:$0xff] %v10143_v22  ;;  %v4331_v4 = vadd.f32 %v4315_v54, %v4167_v36  ;;  %v12046_v28 = vld [vmem:[#allocation21_spill] sm:$0xff] }
 0xb79   :  { %v4117_v57 = vadd.f32 1.0, %v4101_v60  ;;  %v4300_v49 = vmul.f32 %v9343_v9, %v12046_v28  ;;  %v4414_v41 = vmul.f32 %v9796_v26, %v10002_v29  ;;  %v4559_v51 = vmul.f32 %v9897_v47, %v9917_v43 }
 0xb7a   :  { %v4589_v14 = vadd.f32 %v4573_v6, %v9995_v0  ;;  %v4507_v25 = vpop.permute.xlu1 %4506  ;;  %v4038_v33 = vmul.f32 %v6756_v39, %v3958_v8  ;;  %v6901_v0 = vld [vmem:[%s11800_s6 + $0x10] sm:$0xff]  ;;  %v4444_v21 = vadd.f32 %v4428_v48, %v4331_v4  ;;  %v4460_v6 = vrot.slane %v10100_v7, 1 }
 0xb7b   :  { %v4555_v63 = vmul.f32 %v9897_v47, %v4507_v25  ;;  %v10151_v12 = vmul.f32 %v4117_v57, %v3509_v32  ;;  %v4316_v29 = vmul.f32 %v4300_v49, %v10143_v22 }
 0xb7c   :  { %5059 = vperm.xlu1 %6337, %v6901_v0   ;;  %v10159_v54 = vadd.f32 %v10070_v27, %v4589_v14  ;;  %v4054_v36 = vsub.f32 1.0, %v4038_v33  ;;  %v4301_v27 = vmul.f32 %v9343_v9, %v9759_v55 }
 0xb7d   :  { %12047 = vst [vmem:[#allocation21_spill] sm:$0xff] %v10151_v12  ;;  %v4571_v32 = vmul.f32 %v4555_v63, %v9670_v58  ;;  %v4527_v60 = vpop.permute.xlu2 %4526  ;;  %v4461_v8 = vrot.slane %v10151_v12, 1  ;;  %v4168_v43 = vmul.f32 %v9411_v35, %v10151_v12  ;;  %v4184_v39 = vrot.slane %v10151_v12, 7 }
 0xb7e   :  { %12048 = vst [vmem:[#allocation60_spill] sm:$0xff] %v10159_v54  ;;  %v4430_v48 = vmul.f32 %v4414_v41, %v10151_v12  ;;  %v4086_v57 = vsub.f32 0.0, %v4054_v36  ;;  %v3510_v41 = vmul.f32 0.5, %v9946_v23 }
 0xb7f   :  { %v10173_v18 = vadd.f32 %v4571_v32, %v9857_v53  ;;  %v3485_v14 = vpop.f32.mrf.mxu0  ;;  %v10175_v25 = vpop.permute.xlu0 %4938  ;;  %6389 = vset.pattern.permute.xlu0 %v12025_v42  ;;  %v10180_v4 = vsel %vm4468_vm6, %v4460_v6, %v4461_v8  ;;  %v4332_v28 = vadd.f32 %v4316_v29, %v4168_v43  ;;  %v10184_v49 = vsel %vm4193_vm14, %v4183_v20, %v4184_v39  ;;  %v12052_v43 = vld [vmem:[#allocation25_spill] sm:$0xff] }
 0xb80   :  { %12049 = vst [vmem:[#allocation61_spill] sm:$0xff] %v10175_v25  ;;  %4946 = vperm.xlu2 %6336, %v6901_v0   ;;  %v10187_v55 = vadd.f32 %v3485_v14, %v9216_v45  ;;  %v4575_v53 = vmul.f32 %v4559_v51, %v10180_v4  ;;  %v4102_v10 = vsel %vm4070_vm12, %v4086_v57, %v4054_v36  ;;  %v12054_v36 = vrot.slane %v9943_v46, 1 }
 0xb81   :  { %12050 = vst [vmem:[#allocation62_spill] sm:$0xff] %v10180_v4  ;;  %v4317_v33 = vmul.f32 %v4301_v27, %v10184_v49  ;;  %v4118_v63 = vadd.f32 1.0, %v4102_v10  ;;  %v4445_v32 = vadd.f32 %v4429_v5, %v4332_v28  ;;  %v4415_v20 = vmul.f32 %v9796_v26, %v12052_v43  ;;  %v6902_v10 = vld [vmem:[%s11800_s6 + $0x18] sm:$0xff] }
 0xb82   :  { %12051 = vst [vmem:[#allocation63_spill] sm:$0xff] %v10184_v49  ;;  %v10193_v31 = vmul.f32 0.70710677, %v10187_v55  ;;  %v4519_v29 = vpop.permute.xlu1 %4518  ;;  %v10207_v23 = vsel %vm4468_vm6, %v12054_v36, %v4460_v6  ;;  %v4673_v27 = vmul.f32 %v10034_v52, %v10086_v1 }
 0xb83   :  { %v4558_v0 = vmul.f32 %v9897_v47, %v4519_v29  ;;  %v10198_v14 = vmul.f32 %v4118_v63, %v3510_v41  ;;  %12055 = vst [vmem:[#allocation64_spill] sm:$0xff] %v10207_v23  ;;  %v10210_v5 = vadd.f32 %v4575_v53, %v4445_v32  ;;  %v12056_v32 = vld [vmem:[#allocation46_spill] sm:$0xff]  ;;  %v4560_v29 = vmul.f32 %v9897_v47, %v4527_v60 }
 0xb84   :  { %v10201_v51 = vand.u32 2147483647, %v10193_v31  ;;  %6339 = vset.pattern.permute.xlu1 %v12032_v62  ;;  %v4302_v1 = vmul.f32 %v9343_v9, %v12056_v32  ;;  %vm4071_vm12 = vcmp.lt.f32.partialorder %v10193_v31, 0.0 }
 0xb85   :  { %12053 = vst [vmem:[#allocation25_spill] sm:$0xff] %v10198_v14  ;;  %v4574_v57 = vmul.f32 %v4558_v0, %v10207_v23  ;;  %v10215_v28 = vpop.permute.xlu2 %4538  ;;  %4950 = vperm.xlu1 %6339, %v6902_v10   ;;  %v4169_v6 = vmul.f32 %v9411_v35, %v10198_v14  ;;  %v11876_v41 = vrot.slane %v10198_v14, 7  ;;  %v11877_v53 = vrot.slane %v10198_v14, 1 }
 0xb86   :  { %v3559_v63 = vmul.f32 0.3275911, %v10201_v51  ;;  %v10231_v36 = vmul.f32 %v4415_v20, %v10198_v14 }
 0xb87   :  { %v10228_v43 = vadd.f32 %v4574_v57, %v4444_v21  ;;  %v3488_v0 = vpop.f32.mrf.mxu0  ;;  %v4333_v12 = vadd.f32 %v4317_v33, %v4169_v6  ;;  %v10237_v4 = vsel %vm4193_vm14, %v4184_v39, %v11876_v41  ;;  %v10243_v32 = vsel %vm4468_vm6, %v4461_v8, %v11877_v53 }
 0xb88   :  { %12057 = vst [vmem:[#allocation46_spill] sm:$0xff] %v10237_v4  ;;  %v3575_v60 = vadd.f32 1.0, %v3559_v63  ;;  %6338 = vset.pattern.permute.xlu2 %v12030_v3  ;;  %v10246_v21 = vpop.permute.xlu0 %5063  ;;  %v10249_v20 = vmul.f32 %v4302_v1, %v10237_v4  ;;  %v4689_v33 = vmul.f32 %v4673_v27, %v10237_v4  ;;  %v4576_v57 = vmul.f32 %v4560_v29, %v10243_v32  ;;  %v6903_v27 = vld [vmem:[%s11800_s6 + $0x20] sm:$0xff] }
 0xb89   :  { %12058 = vst [vmem:[#allocation65_spill] sm:$0xff] %v10243_v32  ;;  %4837 = vperm.xlu2 %6338, %v6902_v10   ;;  %v4446_v39 = vadd.f32 %v4430_v48, %v4333_v12  ;;  %v10256_v8 = vadd.f32 %v3488_v0, %v9216_v45 }
 0xb8a   :  { %12059 = vst [vmem:[#allocation66_spill] sm:$0xff] %v10246_v21  ;;  %6757 = vrcp.f32 %v3575_v60  ;;  %v10253_v6 = vpop.permute.xlu1 %4530  ;;  %v3756_v54 = vand.u32 2147483648, %v3575_v60  ;;  %v3754_v32 = vand.u32 2147483647, %v3575_v60  ;;  %vm3750_vm15 = vweird.f32 %v3575_v60 }
 0xb8b   :  { %v4592_v63 = vadd.f32 %v4576_v57, %v4446_v39  ;;  %v10259_v41 = vmul.f32 0.70710677, %v10256_v8 }
 0xb8c   :  { %vm3755_vm2 = vcmp.eq.f32.partialorder %v3754_v32, 8.507059e+37  ;;  %v10304_v32 = vperm.slane %v9894_v15, 5 }
 0xb8d   :  { %v10261_v53 = vpop.permute.xlu2 %4599  ;;  %6343 = vset.pattern.permute.xlu1 %v12030_v3  ;;  %v10267_v12 = vadd.f32 %v4689_v33, %v4592_v63  ;;  %v10270_v48 = vand.u32 2147483647, %v10259_v41 }
 0xb8e   :  { %12060 = vst [vmem:[#allocation67_spill] sm:$0xff] %v10261_v53  ;;  %4841 = vperm.xlu1 %6343, %v6903_v27   ;;  %v12063_v53 = vld [vmem:[#allocation34_spill] sm:$0xff] }
 0xb8f   :  { %v3491_v10 = vpop.f32.mrf.mxu0  ;;  %v3560_v57 = vmul.f32 0.3275911, %v10270_v48 }
 0xb90   :  { %v6758_v1 = vpop.eup %6757  ;;  %v10273_v29 = vadd.f32 %v3491_v10, %v9216_v45 }
 0xb91   :  { %v3746_v0 = vmul.f32 %v6758_v1, %v3575_v60  ;;  %6342 = vset.pattern.permute.xlu2 %v12028_v34  ;;  %v10277_v39 = vpop.permute.xlu0 %4712  ;;  %v3576_v46 = vadd.f32 1.0, %v3560_v57  ;;  %vm3751_vm13 = vweird.f32 %v6758_v1  ;;  %v3975_v57 = vmul.f32 %v10201_v51, %v10201_v51 }
 0xb92   :  { %12061 = vst [vmem:[#allocation68_spill] sm:$0xff] %v10277_v39  ;;  %v10280_v4 = vmul.f32 0.70710677, %v10273_v29  ;;  %4728 = vperm.xlu2 %6342, %v6903_v27   ;;  %v10282_v33 = vpop.permute.xlu1 %4542  ;;  %vm3752_vm1 = vmor %vm3750_vm15, %vm3751_vm13  ;;  %vm4072_vm13 = vcmp.lt.f32.partialorder %v10259_v41, 0.0 }
 0xb93   :  { %12062 = vst [vmem:[#allocation69_spill] sm:$0xff] %v10282_v33  ;;  %v3747_v63 = vsub.f32 1.0, %v3746_v0  ;;  %6759 = vrcp.f32 %v3576_v46  ;;  %v3757_v0 = vor.u32 1.1754944e-38, %v3756_v54  ;;  %v3991_v51 = vsub.f32 0.0, %v3975_v57 }
 0xb94   :  { %v10285_v23 = vand.u32 2147483647, %v10280_v4  ;;  %vm3765_vm4 = vweird.f32 %v3576_v46  ;;  %vm4073_vm15 = vcmp.lt.f32.partialorder %v10280_v4, 0.0 }
 0xb95   :  { %v3748_v10 = vmul.f32 %v6758_v1, %v3747_v63  ;;  %v4612_v37 = vpop.permute.xlu2 %4611  ;;  %v4018_v57 = vmul.f32 1.442695, %v3991_v51  ;;  %v12069_v51 = vld [vmem:[#allocation43_spill] sm:$0xff] }
 0xb96   :  { %v3561_v50 = vmul.f32 0.3275911, %v10285_v23  ;;  %6345 = vset.pattern.permute.xlu1 %v12025_v42  ;;  %v4666_v24 = vmul.f32 %v10034_v52, %v4612_v37 }
 0xb97   :  { %v3749_v7 = vadd.f32 %v6758_v1, %v3748_v10  ;;  %5067 = vperm.xlu1 %6345, %v6903_v27  }
 0xb98   :  { %v10292_v33 = vadd.f32 1.0, %v3561_v50  ;;  %v4682_v39 = vmul.f32 %v4666_v24, %v12063_v53 }
 0xb99   :  { %v3753_v63 = vsel %vm3752_vm1, %v6758_v1, %v3749_v7  ;;  %v4733_v40 = vpop.permute.xlu0 %4732  ;;  %v6760_v37 = vpop.eup %6759 }
 0xb9a   :  { %v10295_v61 = vsel %vm3755_vm2, %v3757_v0, %v3753_v63  ;;  %6761 = vrcp.f32 %v10292_v33  ;;  %6344 = vset.pattern.permute.xlu2 %v12032_v62  ;;  %v10301_v54 = vadd.f32 %v4682_v39, %v10131_v16  ;;  %v3761_v7 = vmul.f32 %v6760_v37, %v3576_v46 }
 0xb9b   :  { %v3831_v60 = vmul.f32 1.0614054, %v10295_v61  ;;  %4954 = vperm.xlu2 %6344, %v6903_v27   ;;  %v4604_v50 = vpop.permute.xlu1 %4603  ;;  %v3769_v63 = vand.u32 2147483647, %v3576_v46  ;;  %v4781_v25 = vmul.f32 %v10304_v32, %v4733_v40  ;;  %v3771_v39 = vand.u32 2147483648, %v3576_v46  ;;  %v12064_v27 = vld [vmem:[#allocation33_spill] sm:$0xff] }
 0xb9c   :  { %v4664_v1 = vmul.f32 %v10034_v52, %v4604_v50  ;;  %v3762_v0 = vsub.f32 1.0, %v3761_v7  ;;  %vm3766_vm3 = vweird.f32 %v6760_v37  ;;  %v12066_v50 = vld [vmem:[#allocation40_spill] sm:$0xff]  ;;  %v6904_v40 = vld [vmem:[%s11800_s6 + $0x28] sm:$0xff]  ;;  %v3786_v45 = vand.u32 2147483648, %v10292_v33 }
 0xb9d   :  { %v3847_v24 = vadd.f32 -1.4531521, %v3831_v60  ;;  %v4620_v10 = vpop.permute.xlu2 %4619  ;;  %vm10321_vm5 = vcmp.eq.f32.partialorder %v3769_v63, 8.507059e+37  ;;  %vm3767_vm11 = vmor %vm3765_vm4, %vm3766_vm3  ;;  %v3772_v46 = vor.u32 1.1754944e-38, %v3771_v39  ;;  %6763 = vpow2.f32 %v4018_v57 }
 0xb9e   :  { %v4668_v13 = vmul.f32 %v10034_v52, %v4620_v10  ;;  %v10311_v21 = vmul.f32 %v4664_v1, %v12064_v27  ;;  %v3763_v60 = vmul.f32 %v6760_v37, %v3762_v0  ;;  %v4797_v0 = vmul.f32 %v4781_v25, %v12069_v51 }
 0xb9f   :  { %v3863_v16 = vmul.f32 %v3847_v24, %v10295_v61  ;;  %6348 = vset.pattern.permute.xlu1 %v12032_v62  ;;  %v3976_v24 = vmul.f32 %v10270_v48, %v10270_v48  ;;  %v3784_v48 = vand.u32 2147483647, %v10292_v33  ;;  %vm3780_vm8 = vweird.f32 %v10292_v33 }
 0xba0   :  { %12065 = vst [vmem:[#allocation70_spill] sm:$0xff] %v10311_v21  ;;  %v6762_v15 = vpop.eup %6761  ;;  %v4684_v58 = vmul.f32 %v4668_v13, %v12066_v50  ;;  %4958 = vperm.xlu1 %6348, %v6904_v40   ;;  %v3764_v10 = vadd.f32 %v6760_v37, %v3763_v60  ;;  %v3787_v27 = vor.u32 1.1754944e-38, %v3786_v45  ;;  %v3977_v45 = vmul.f32 %v10285_v23, %v10285_v23 }
 0xba1   :  { %v3879_v7 = vadd.f32 1.4214138, %v3863_v16  ;;  %v3776_v1 = vmul.f32 %v6762_v15, %v10292_v33  ;;  %vm3781_vm7 = vweird.f32 %v6762_v15  ;;  %vm3785_vm10 = vcmp.eq.f32.partialorder %v3784_v48, 8.507059e+37 }
 0xba2   :  { %v4700_v13 = vadd.f32 %v4684_v58, %v10173_v18  ;;  %v10327_v21 = vpop.permute.xlu0 %4833  ;;  %v3768_v63 = vsel %vm3767_vm11, %v6760_v37, %v3764_v10  ;;  %vm3782_vm9 = vmor %vm3780_vm8, %vm3781_vm7 }
 0xba3   :  { %v3895_v50 = vmul.f32 %v3879_v7, %v10295_v61  ;;  %v3777_v16 = vsub.f32 1.0, %v3776_v1  ;;  %6347 = vset.pattern.permute.xlu2 %v12030_v3  ;;  %v4616_v60 = vpop.permute.xlu1 %4615  ;;  %v10338_v18 = vsel %vm10321_vm5, %v3772_v46, %v3768_v63  ;;  %v3992_v46 = vsub.f32 0.0, %v3976_v24  ;;  %v6905_v63 = vld [vmem:[%s11800_s6 + $0x30] sm:$0xff]  ;;  %v6764_v48 = vpop.eup %6763 }
 0xba4   :  { %4845 = vperm.xlu2 %6347, %v6904_v40   ;;  %v4667_v25 = vmul.f32 %v10034_v52, %v4616_v60  ;;  %v10334_v51 = vadd.f32 %v4797_v0, %v4700_v13  ;;  %v3832_v1 = vmul.f32 1.0614054, %v10338_v18 }
 0xba5   :  { %v3911_v58 = vadd.f32 -0.28449672, %v3895_v50  ;;  %v3778_v39 = vmul.f32 %v6762_v15, %v3777_v16  ;;  %v4632_v7 = vpop.permute.xlu2 %4631 }
 0xba6   :  { %v4683_v37 = vmul.f32 %v4667_v25, %v12070_v2  ;;  %v4671_v10 = vmul.f32 %v10034_v52, %v4632_v7  ;;  %v3848_v50 = vadd.f32 -1.4531521, %v3832_v1 }
 0xba7   :  { %v3927_v53 = vmul.f32 %v3911_v58, %v10295_v61  ;;  %v3779_v60 = vadd.f32 %v6762_v15, %v3778_v39 }
 0xba8   :  { %v10346_v0 = vadd.f32 %v4683_v37, %v10097_v44  ;;  %v4687_v13 = vmul.f32 %v4671_v10, %v10143_v22  ;;  %6350 = vset.pattern.permute.xlu1 %v12028_v34  ;;  %v3864_v33 = vmul.f32 %v3848_v50, %v10338_v18  ;;  %v4020_v37 = vmul.f32 1.442695, %v3992_v46  ;;  %v12072_v50 = vld [vmem:[#allocation44_spill] sm:$0xff] }
 0xba9   :  { %v3943_v57 = vadd.f32 0.2548296, %v3927_v53  ;;  %v3783_v16 = vsel %vm3782_vm9, %v6762_v15, %v3779_v60  ;;  %4736 = vperm.xlu1 %6350, %v6905_v63   ;;  %v3993_v60 = vsub.f32 0.0, %v3977_v45 }
 0xbaa   :  { %v10354_v25 = vsel %vm3785_vm10, %v3787_v27, %v3783_v16  ;;  %v10359_v44 = vadd.f32 %v4687_v13, %v10228_v43  ;;  %v10361_v58 = vpop.permute.xlu0 %4849  ;;  %v3880_v39 = vadd.f32 1.4214138, %v3864_v33  ;;  %v12073_v16 = vld [vmem:[#allocation50_spill] sm:$0xff]  ;;  %6765 = vpow2.f32 %v4020_v37 }
 0xbab   :  { %v3959_v53 = vmul.f32 %v3943_v57, %v10295_v61  ;;  %v3833_v15 = vmul.f32 1.0614054, %v10354_v25  ;;  %v4624_v24 = vpop.permute.xlu1 %4623  ;;  %v4022_v46 = vmul.f32 1.442695, %v3993_v60 }
 0xbac   :  { %12071 = vst [vmem:[#allocation36_spill] sm:$0xff] %v10359_v44  ;;  %6349 = vset.pattern.permute.xlu2 %v12025_v42  ;;  %v4669_v7 = vmul.f32 %v10034_v52, %v4624_v24  ;;  %v3896_v43 = vmul.f32 %v3880_v39, %v10338_v18  ;;  %v3511_v39 = vmul.f32 0.5, %v10187_v55 }
 0xbad   :  { %v4039_v1 = vmul.f32 %v6764_v48, %v3959_v53  ;;  %v3849_v10 = vadd.f32 -1.4531521, %v3833_v15  ;;  %5071 = vperm.xlu2 %6349, %v6904_v40   ;;  %v4644_v23 = vpop.permute.xlu2 %4643  ;;  %6767 = vpow2.f32 %v4022_v46 }
 0xbae   :  { %v4685_v27 = vmul.f32 %v4669_v7, %v12072_v50  ;;  %v3912_v57 = vadd.f32 -0.28449672, %v3896_v43 }
 0xbaf   :  { %v4055_v61 = vsub.f32 1.0, %v4039_v1  ;;  %v3865_v13 = vmul.f32 %v3849_v10, %v10354_v25 }
 0xbb0   :  { %v10371_v33 = vadd.f32 %v4685_v27, %v12073_v16  ;;  %v3928_v40 = vmul.f32 %v3912_v57, %v10338_v18  ;;  %v6766_v27 = vpop.eup %6765  ;;  %v4561_v57 = vmul.f32 %v9897_v47, %v10253_v6 }
 0xbb1   :  { %v4087_v44 = vsub.f32 0.0, %v4055_v61  ;;  %v3881_v24 = vadd.f32 1.4214138, %v3865_v13  ;;  %6352 = vset.pattern.permute.xlu1 %v12025_v42  ;;  %v4416_v13 = vmul.f32 %v9796_v26, %v9985_v11 }
 0xbb2   :  { %12074 = vst [vmem:[#allocation44_spill] sm:$0xff] %v10371_v33  ;;  %5075 = vperm.xlu1 %6352, %v6905_v63   ;;  %v3944_v1 = vadd.f32 0.2548296, %v3928_v40 }
 0xbb3   :  { %v4103_v45 = vsel %vm4071_vm12, %v4087_v44, %v4055_v61  ;;  %v3897_v53 = vmul.f32 %v3881_v24, %v10354_v25  ;;  %v4636_v15 = vpop.permute.xlu1 %4635  ;;  %v10377_v48 = vpop.permute.xlu0 %4966  ;;  %v12076_v61 = vld [vmem:[#allocation45_spill] sm:$0xff] }
 0xbb4   :  { %v4119_v7 = vadd.f32 1.0, %v4103_v45  ;;  %v4672_v37 = vmul.f32 %v10034_v52, %v4636_v15  ;;  %v3960_v44 = vmul.f32 %v3944_v1, %v10338_v18  ;;  %v4303_v55 = vmul.f32 %v9343_v9, %v12076_v61 }
 0xbb5   :  { %v3913_v10 = vadd.f32 -0.28449672, %v3897_v53  ;;  %6351 = vset.pattern.permute.xlu2 %v12032_v62  ;;  %v10382_v31 = vpop.permute.xlu2 %4655  ;;  %v4674_v45 = vmul.f32 %v10034_v52, %v4644_v23  ;;  %v12080_v1 = vrot.slane %v10198_v14, 7 }
 0xbb6   :  { %v10384_v43 = vmul.f32 %v4119_v7, %v3511_v39  ;;  %v4688_v60 = vmul.f32 %v4672_v37, %v10184_v49  ;;  %4962 = vperm.xlu2 %6351, %v6905_v63   ;;  %v4040_v24 = vmul.f32 %v6766_v27, %v3960_v44  ;;  %v12078_v39 = vrot.slane %v10198_v14, 1  ;;  %v6906_v44 = vld [vmem:[%s11800_s6 + $0x38] sm:$0xff]  ;;  %v6768_v27 = vpop.eup %6767 }
 0xbb7   :  { %v3929_v16 = vmul.f32 %v3913_v10, %v10354_v25 }
 0xbb8   :  { %12075 = vst [vmem:[#allocation50_spill] sm:$0xff] %v10384_v43  ;;  %v4170_v18 = vmul.f32 %v9411_v35, %v10384_v43  ;;  %v4463_v40 = vrot.slane %v10384_v43, 1  ;;  %v4186_v63 = vrot.slane %v10384_v43, 7  ;;  %v10401_v53 = vadd.f32 %v4688_v60, %v10210_v5 }
 0xbb9   :  { %v3945_v46 = vadd.f32 0.2548296, %v3929_v16  ;;  %v4432_v11 = vmul.f32 %v4416_v13, %v10384_v43  ;;  %v4056_v15 = vsub.f32 1.0, %v4040_v24  ;;  %v12101_v43 = vld [vmem:[#allocation41_spill] sm:$0xff] }
 0xbba   :  { %12077 = vst [vmem:[#allocation45_spill] sm:$0xff] %v10401_v53  ;;  %v4334_v6 = vadd.f32 %v10249_v20, %v4170_v18  ;;  %v10409_v7 = vsel %vm4468_vm6, %v12078_v39, %v4463_v40  ;;  %v10415_v37 = vsel %vm4193_vm14, %v12080_v1, %v4186_v63  ;;  %6354 = vset.pattern.permute.xlu1 %v12030_v3 }
 0xbbb   :  { %12079 = vst [vmem:[#allocation71_spill] sm:$0xff] %v10409_v7  ;;  %v4577_v5 = vmul.f32 %v4561_v57, %v10409_v7  ;;  %v3961_v23 = vmul.f32 %v3945_v46, %v10354_v25  ;;  %v4319_v20 = vmul.f32 %v4303_v55, %v10415_v37  ;;  %v4690_v10 = vmul.f32 %v4674_v45, %v10415_v37  ;;  %v4648_v60 = vpop.permute.xlu1 %4647 }
 0xbbc   :  { %12081 = vst [vmem:[#allocation72_spill] sm:$0xff] %v10415_v37  ;;  %4853 = vperm.xlu1 %6354, %v6906_v44   ;;  %v4088_v61 = vsub.f32 0.0, %v4056_v15  ;;  %v4447_v13 = vadd.f32 %v10231_v36, %v4334_v6  ;;  %v10426_v16 = vpop.permute.xlu0 %5083  ;;  %v3512_v46 = vmul.f32 0.5, %v10256_v8  ;;  %v4417_v8 = vmul.f32 %v9796_v26, %v10030_v56  ;;  %v6907_v56 = vld [vmem:[%s11800_s6 + $0x40] sm:$0xff] }
 0xbbd   :  { %v4041_v57 = vmul.f32 %v6768_v27, %v3961_v23  ;;  %v4717_v25 = vpop.permute.xlu2 %4716  ;;  %v12085_v23 = vld [vmem:[#allocation24_spill] sm:$0xff] }
 0xbbe   :  { %v4104_v24 = vsel %vm4072_vm13, %v4088_v61, %v4056_v15  ;;  %v4593_v55 = vadd.f32 %v4577_v5, %v4447_v13  ;;  %6353 = vset.pattern.permute.xlu2 %v12028_v34  ;;  %v4777_v18 = vmul.f32 %v10304_v32, %v4717_v25  ;;  %v4304_v15 = vmul.f32 %v9343_v9, %v12085_v23  ;;  %v12086_v5 = vld [vmem:[#allocation52_spill] sm:$0xff] }
 0xbbf   :  { %v4120_v45 = vadd.f32 1.0, %v4104_v24  ;;  %v4057_v39 = vsub.f32 1.0, %v4041_v57  ;;  %4740 = vperm.xlu2 %6353, %v6906_v44   ;;  %v4562_v27 = vmul.f32 %v9897_v47, %v12086_v5  ;;  %v3513_v24 = vmul.f32 0.5, %v10273_v29 }
 0xbc0   :  { %v10432_v1 = vadd.f32 %v4690_v10, %v4593_v55  ;;  %v10435_v36 = vmul.f32 %v4777_v18, %v12035_v59  ;;  %v4675_v18 = vmul.f32 %v10034_v52, %v4648_v60 }
 0xbc1   :  { %v10437_v6 = vmul.f32 %v4120_v45, %v3512_v46  ;;  %v4089_v41 = vsub.f32 0.0, %v4057_v39 }
 0xbc2   :  { %12082 = vst [vmem:[#allocation73_spill] sm:$0xff] %v10432_v1 }
 0xbc3   :  { %12083 = vst [vmem:[#allocation74_spill] sm:$0xff] %v10435_v36  ;;  %v4105_v61 = vsel %vm4073_vm15, %v4089_v41, %v4057_v39  ;;  %v4171_v10 = vmul.f32 %v9411_v35, %v10437_v6  ;;  %v4187_v13 = vrot.slane %v10437_v6, 7  ;;  %v4464_v57 = vrot.slane %v10437_v6, 1  ;;  %v10451_v25 = vpop.permute.xlu1 %4659 }
 0xbc4   :  { %12084 = vst [vmem:[#allocation75_spill] sm:$0xff] %v10437_v6  ;;  %6357 = vset.pattern.permute.xlu1 %v12028_v34  ;;  %v4121_v55 = vadd.f32 1.0, %v4105_v61  ;;  %v4433_v4 = vmul.f32 %v4417_v8, %v10437_v6 }
 0xbc5   :  { %4744 = vperm.xlu1 %6357, %v6907_v56   ;;  %v4335_v46 = vadd.f32 %v4319_v20, %v4171_v10  ;;  %v10461_v45 = vsel %vm4193_vm14, %v4186_v63, %v4187_v13  ;;  %v10465_v39 = vsel %vm4468_vm6, %v4463_v40, %v4464_v57  ;;  %v4725_v29 = vpop.permute.xlu2 %4724  ;;  %v4753_v41 = vpop.permute.xlu0 %4752  ;;  %v4676_v20 = vmul.f32 %v10034_v52, %v10115_v30  ;;  %v6908_v30 = vld [vmem:[%s11802_s5] sm:$0xff] }
 0xbc6   :  { %12087 = vst [vmem:[#allocation24_spill] sm:$0xff] %v10461_v45  ;;  %v10467_v23 = vmul.f32 %v4121_v55, %v3513_v24  ;;  %v4320_v60 = vmul.f32 %v4304_v15, %v10461_v45  ;;  %v4578_v5 = vmul.f32 %v4562_v27, %v10465_v39  ;;  %v4691_v61 = vmul.f32 %v4675_v18, %v10461_v45  ;;  %v12103_v45 = vld [vmem:[#allocation14_spill] sm:$0xff] }
 0xbc7   :  { %12088 = vst [vmem:[#allocation52_spill] sm:$0xff] %v10465_v39  ;;  %v4448_v8 = vadd.f32 %v4432_v11, %v4335_v46  ;;  %v4779_v63 = vmul.f32 %v10304_v32, %v4725_v29  ;;  %v4786_v10 = vmul.f32 %v10304_v32, %v4753_v41  ;;  %6356 = vset.pattern.permute.xlu2 %v12025_v42  ;;  %v10486_v11 = vperm.slane %v6908_v30, 6 }
 0xbc8   :  { %12089 = vst [vmem:[#allocation76_spill] sm:$0xff] %v10467_v23  ;;  %v4563_v40 = vmul.f32 %v9897_v47, %v10215_v28  ;;  %v11895_v24 = vrot.slane %v10467_v23, 7  ;;  %v4172_v15 = vmul.f32 %v9411_v35, %v10467_v23  ;;  %5079 = vperm.xlu2 %6356, %v6906_v44   ;;  %v11894_v27 = vrot.slane %v10467_v23, 1  ;;  %v12090_v28 = vld [vmem:[#allocation28_spill] sm:$0xff] }
 0xbc9   :  { %v4594_v55 = vadd.f32 %v4578_v5, %v4448_v8  ;;  %v4795_v18 = vmul.f32 %v4779_v63, %v9665_v38  ;;  %v4802_v46 = vmul.f32 %v4786_v10, %v10409_v7  ;;  %v4305_v29 = vmul.f32 %v9343_v9, %v12090_v28 }
 0xbca   :  { %v4336_v41 = vadd.f32 %v4320_v60, %v4172_v15  ;;  %v10496_v44 = vsel %vm4468_vm6, %v4464_v57, %v11894_v27  ;;  %v10502_v6 = vsel %vm4193_vm14, %v4187_v13, %v11895_v24  ;;  %v4891_v13 = vmul.f32 %v10486_v11, %v10327_v21 }
 0xbcb   :  { %12091 = vst [vmem:[#allocation28_spill] sm:$0xff] %v10496_v44  ;;  %v10504_v5 = vadd.f32 %v4691_v61, %v4594_v55  ;;  %v4811_v8 = vadd.f32 %v4795_v18, %v10301_v54  ;;  %v10508_v63 = vadd.f32 %v4802_v46, %v10267_v12  ;;  %v4579_v60 = vmul.f32 %v4563_v40, %v10496_v44  ;;  %v12096_v18 = vld [vmem:[#allocation34_spill] sm:$0xff] }
 0xbcc   :  { %12092 = vst [vmem:[#allocation77_spill] sm:$0xff] %v10502_v6  ;;  %v4721_v10 = vpop.permute.xlu1 %4720  ;;  %v10513_v57 = vmul.f32 %v4305_v29, %v10502_v6  ;;  %v4692_v15 = vmul.f32 %v4676_v20, %v10502_v6  ;;  %v4449_v28 = vadd.f32 %v4433_v4, %v4336_v41  ;;  %v4907_v46 = vmul.f32 %v4891_v13, %v12096_v18  ;;  %v12097_v29 = vld [vmem:[#allocation57_spill] sm:$0xff] }
 0xbcd   :  { %12093 = vst [vmem:[#allocation78_spill] sm:$0xff] %v10504_v5  ;;  %6359 = vset.pattern.permute.xlu1 %v12032_v62  ;;  %v4778_v61 = vmul.f32 %v10304_v32, %v4721_v10  ;;  %v10519_v54 = vpop.permute.xlu2 %5051 }
 0xbce   :  { %12094 = vst [vmem:[#allocation79_spill] sm:$0xff] %v10508_v63  ;;  %4970 = vperm.xlu1 %6359, %v6907_v56   ;;  %v4595_v12 = vadd.f32 %v4579_v60, %v4449_v28  ;;  %v6909_v60 = vld [vmem:[%s11800_s6 + $0x48] sm:$0xff] }
 0xbcf   :  { %v4794_v40 = vmul.f32 %v4778_v61, %v12041_v19 }
 0xbd0   :  { %6358 = vset.pattern.permute.xlu2 %v12030_v3  ;;  %v10523_v55 = vadd.f32 %v4692_v15, %v4595_v12  ;;  %v12098_v15 = vld [vmem:[#allocation19_spill] sm:$0xff] }
 0xbd1   :  { %v4810_v20 = vadd.f32 %v4794_v40, %v12097_v29  ;;  %4857 = vperm.xlu2 %6358, %v6907_v56   ;;  %v10539_v56 = vperm.slane %v6908_v30, 7  ;;  %v12099_v29 = vld [vmem:[#allocation31_spill] sm:$0xff] }
 0xbd2   :  { %12095 = vst [vmem:[#allocation80_spill] sm:$0xff] %v10523_v55 }
 0xbd3   :  { %v4923_v4 = vadd.f32 %v4907_v46, %v4810_v20  ;;  %v3494_v10 = vpop.f32.mrf.mxu0 }
 0xbd4   :  { %v10537_v28 = vadd.f32 %v3494_v10, %v12098_v15 }
 0xbd5   :  { %v10527_v41 = vpop.permute.xlu2 %4942  ;;  %v10530_v21 = vpop.permute.xlu1 %4825 }
 0xbd6   :  { %6362 = vset.pattern.permute.xlu1 %v12030_v3  ;;  %v10542_v13 = vmul.f32 0.70710677, %v10537_v28 }
 0xbd7   :  { %4861 = vperm.xlu1 %6362, %v6909_v60  }
 0xbd8   :  { %v3546_v40 = vand.u32 2147483647, %v10542_v13  ;;  %vm4074_vm10 = vcmp.lt.f32.partialorder %v10542_v13, 0.0  ;;  %v12137_v13 = vld [vmem:[#allocation55_spill] sm:$0xff] }
 0xbd9   :  { %6361 = vset.pattern.permute.xlu2 %v12028_v34 }
 0xbda   :  { %4748 = vperm.xlu2 %6361, %v6909_v60   ;;  %v3562_v46 = vmul.f32 0.3275911, %v3546_v40 }
 0xbdc   :  { %v3578_v27 = vadd.f32 1.0, %v3562_v46 }
 0xbdd   :  { %v4947_v61 = vpop.permute.xlu2 %4946  ;;  %v10544_v12 = vpop.permute.xlu1 %4829 }
 0xbde   :  { %v5004_v18 = vmul.f32 %v10539_v56, %v4947_v61  ;;  %6769 = vrcp.f32 %v3578_v27  ;;  %v3801_v5 = vand.u32 2147483648, %v3578_v27  ;;  %vm3795_vm2 = vweird.f32 %v3578_v27 }
 0xbdf   :  { %6364 = vset.pattern.permute.xlu1 %v12025_v42  ;;  %v3497_v10 = vpop.f32.mrf.mxu0 }
 0xbe0   :  { %5087 = vperm.xlu1 %6364, %v6909_v60   ;;  %v5020_v20 = vmul.f32 %v5004_v18, %v12099_v29  ;;  %v10551_v24 = vadd.f32 %v3497_v10, %v12098_v15 }
 0xbe2   :  { %v5036_v30 = vadd.f32 %v5020_v20, %v4923_v4  ;;  %6363 = vset.pattern.permute.xlu2 %v12032_v62  ;;  %v10555_v55 = vmul.f32 0.70710677, %v10551_v24 }
 0xbe3   :  { %4974 = vperm.xlu2 %6363, %v6909_v60   ;;  %v6910_v60 = vld [vmem:[%s11800_s6 + $0x50] sm:$0xff] }
 0xbe4   :  { %v10561_v18 = vand.u32 2147483647, %v10555_v55  ;;  %v6770_v46 = vpop.eup %6769 }
 0xbe5   :  { %v4838_v61 = vpop.permute.xlu2 %4837  ;;  %v3791_v20 = vmul.f32 %v6770_v46, %v3578_v27  ;;  %vm3796_vm1 = vweird.f32 %v6770_v46 }
 0xbe6   :  { %v4892_v6 = vmul.f32 %v10486_v11, %v4838_v61  ;;  %v10558_v1 = vpop.permute.xlu1 %5055  ;;  %v3563_v15 = vmul.f32 0.3275911, %v10561_v18  ;;  %vm3797_vm3 = vmor %vm3795_vm2, %vm3796_vm1  ;;  %vm4075_vm1 = vcmp.lt.f32.partialorder %v10555_v55, 0.0 }
 0xbe7   :  { %12100 = vst [vmem:[#allocation34_spill] sm:$0xff] %v10558_v1 }
 0xbe8   :  { %6367 = vset.pattern.permute.xlu1 %v12032_v62  ;;  %v4908_v4 = vmul.f32 %v4892_v6, %v12070_v2  ;;  %v10571_v10 = vadd.f32 1.0, %v3563_v15  ;;  %v10577_v2 = vld [vmem:[%s11802_s5 + $0x8] ss:$0 sm:$0xff]  ;;  %v3792_v6 = vsub.f32 1.0, %v3791_v20  ;;  %v3799_v15 = vand.u32 2147483647, %v3578_v27 }
 0xbe9   :  { %4978 = vperm.xlu1 %6367, %v6910_v60   ;;  %v6911_v20 = vld [vmem:[%s11803_s8] sm:$0x3]  ;;  %v10598_v27 = vmul.f32 %v9343_v9, %v12103_v45 }
 0xbea   :  { %v10569_v29 = vadd.f32 %v4908_v4, %v4811_v8  ;;  %6771 = vrcp.f32 %v10571_v10  ;;  %v3793_v4 = vmul.f32 %v6770_v46, %v3792_v6  ;;  %v10587_v14 = vperm.slane %v6911_v20, 1  ;;  %v6912_v6 = vld [vmem:[%s11800_s6 + $0x58] sm:$0xff] }
 0xbeb   :  { %6366 = vset.pattern.permute.xlu2 %v12030_v3  ;;  %vm3800_vm4 = vcmp.eq.f32.partialorder %v3799_v15, 8.507059e+37  ;;  %12104 = vst [vmem:[#allocation19_spill] sm:$0xff] %v10598_v27  ;;  %v3816_v59 = vand.u32 2147483648, %v10571_v10  ;;  %v3814_v33 = vand.u32 2147483647, %v10571_v10  ;;  %vm3810_vm11 = vweird.f32 %v10571_v10 }
 0xbec   :  { %4865 = vperm.xlu2 %6366, %v6910_v60   ;;  %12102 = vst [vmem:[#allocation57_spill] sm:$0xff] %v10587_v14  ;;  %v3794_v63 = vadd.f32 %v6770_v46, %v3793_v4 }
 0xbed   :  { %v4729_v61 = vpop.permute.xlu2 %4728  ;;  %vm3815_vm8 = vcmp.eq.f32.partialorder %v3814_v33, 8.507059e+37  ;;  %v12121_v33 = vld [vmem:[#allocation26_spill] sm:$0xff] }
 0xbee   :  { %v4780_v44 = vmul.f32 %v10304_v32, %v4729_v61  ;;  %v5060_v8 = vpop.permute.xlu1 %5059  ;;  %v3798_v53 = vsel %vm3797_vm3, %v6770_v46, %v3794_v63 }
 0xbef   :  { %v5117_v39 = vmul.f32 %v10577_v2, %v5060_v8  ;;  %v3802_v8 = vor.u32 1.1754944e-38, %v3801_v5  ;;  %v12106_v5 = vld [vmem:[#allocation20_spill] sm:$0xff] }
 0xbf0   :  { %v4796_v7 = vmul.f32 %v4780_v44, %v12101_v43  ;;  %v3978_v44 = vmul.f32 %v3546_v40, %v3546_v40  ;;  %v6772_v49 = vpop.eup %6771 }
 0xbf1   :  { %6369 = vset.pattern.permute.xlu1 %v12028_v34  ;;  %v5133_v61 = vmul.f32 %v5117_v39, %v9665_v38  ;;  %v12105_v38 = vld [vmem:[#allocation27_spill] sm:$0xff]  ;;  %v10601_v4 = vsel %vm3800_vm4, %v3802_v8, %v3798_v53  ;;  %v3806_v22 = vmul.f32 %v6772_v49, %v10571_v10  ;;  %v12110_v53 = vld [vmem:[#allocation29_spill] sm:$0xff]  ;;  %vm3811_vm5 = vweird.f32 %v6772_v49 }
 0xbf2   :  { %4756 = vperm.xlu1 %6369, %v6912_v6   ;;  %v10594_v37 = vadd.f32 %v4796_v7, %v10346_v0  ;;  %v11910_v39 = vrot.slane %v12105_v38, 1  ;;  %v10607_v0 = vmul.f32 %v9343_v9, %v12106_v5  ;;  %v3834_v7 = vmul.f32 1.0614054, %v10601_v4  ;;  %vm3812_vm7 = vmor %vm3810_vm11, %vm3811_vm5 }
 0xbf3   :  { %v5149_v20 = vadd.f32 %v5133_v61, %v5036_v30  ;;  %v10615_v40 = vmul.f32 %v9411_v35, %v12105_v38  ;;  %v10619_v30 = vmul.f32 %v9411_v35, %v12110_v53  ;;  %v12112_v46 = vrot.slane %v12110_v53, 1 }
 0xbf4   :  { %6368 = vset.pattern.permute.xlu2 %v12025_v42  ;;  %12107 = vst [vmem:[#allocation31_spill] sm:$0xff] %v10607_v0  ;;  %v3994_v61 = vsub.f32 0.0, %v3978_v44  ;;  %v3807_v8 = vsub.f32 1.0, %v3806_v22  ;;  %v3850_v5 = vadd.f32 -1.4531521, %v3834_v7  ;;  %v12117_v22 = vld [vmem:[#allocation49_spill] sm:$0xff] }
 0xbf5   :  { %v10611_v63 = vadd.f32 %v10587_v14, %v5149_v20  ;;  %5091 = vperm.xlu2 %6368, %v6910_v60   ;;  %v4955_v45 = vpop.permute.xlu2 %4954  ;;  %12109 = vst [vmem:[#allocation14_spill] sm:$0xff] %v10615_v40  ;;  %v10627_v15 = vsel %vm4468_vm6, %v11910_v39, %v12112_v46  ;;  %v12114_v60 = vld [vmem:[#allocation66_spill] sm:$0xff]  ;;  %v12116_v46 = vld [vmem:[#allocation47_spill] sm:$0xff]  ;;  %v4551_v39 = vmul.f32 %v9897_v47, %v12117_v22  ;;  %v3817_v22 = vor.u32 1.1754944e-38, %v3816_v59 }
 0xbf6   :  { %12111 = vst [vmem:[#allocation20_spill] sm:$0xff] %v10619_v30  ;;  %v5118_v20 = vmul.f32 %v10577_v2, %v12114_v60  ;;  %v3808_v1 = vmul.f32 %v6772_v49, %v3807_v8  ;;  %v4405_v44 = vmul.f32 %v9796_v26, %v12116_v46  ;;  %v3866_v7 = vmul.f32 %v3850_v5, %v10601_v4  ;;  %v12119_v30 = vld [vmem:[#allocation35_spill] sm:$0xff] }
 0xbf7   :  { %12108 = vst [vmem:[#allocation41_spill] sm:$0xff] %v10611_v63  ;;  %v10633_v19 = vmul.f32 0.70710677, %v10611_v63  ;;  %v4951_v36 = vpop.permute.xlu1 %4950  ;;  %v4024_v63 = vmul.f32 1.442695, %v3994_v61  ;;  %v12120_v59 = vld [vmem:[#allocation23_spill] sm:$0xff] }
 0xbf8   :  { %12113 = vst [vmem:[#allocation29_spill] sm:$0xff] %v10627_v15  ;;  %v5005_v40 = vmul.f32 %v10539_v56, %v4951_v36  ;;  %v3809_v8 = vadd.f32 %v6772_v49, %v3808_v1  ;;  %v5134_v36 = vmul.f32 %v5118_v20, %v12101_v43  ;;  %v3882_v46 = vadd.f32 1.4214138, %v3866_v7  ;;  %v12122_v20 = vld [vmem:[#allocation48_spill] sm:$0xff] }
 0xbf9   :  { %12115 = vst [vmem:[#allocation66_spill] sm:$0xff] %v10633_v19  ;;  %v10643_v60 = vand.u32 2147483647, %v10633_v19  ;;  %v3979_v19 = vmul.f32 %v10561_v18, %v10561_v18  ;;  %v10655_v10 = vmul.f32 %v4405_v44, %v12105_v38  ;;  %v10669_v18 = vmul.f32 %v9796_v26, %v12121_v33  ;;  %v12125_v33 = vld [vmem:[#allocation61_spill] sm:$0xff] }
 0xbfa   :  { %6372 = vset.pattern.permute.xlu1 %v12025_v42  ;;  %v5021_v0 = vmul.f32 %v5005_v40, %v12119_v30  ;;  %v3813_v27 = vsel %vm3812_vm7, %v6772_v49, %v3809_v8  ;;  %v3898_v40 = vmul.f32 %v3882_v46, %v10601_v4  ;;  %v10665_v49 = vmul.f32 %v9343_v9, %v12120_v59 }
 0xbfb   :  { %12118 = vst [vmem:[#allocation47_spill] sm:$0xff] %v10643_v60  ;;  %5095 = vperm.xlu1 %6372, %v6912_v6   ;;  %v5230_v5 = vmul.f32 0.3275911, %v10643_v60  ;;  %v10658_v30 = vsel %vm3815_vm8, %v3817_v22, %v3813_v27  ;;  %v10674_v27 = vmul.f32 %v9796_v26, %v12122_v20  ;;  %v10679_v9 = vmul.f32 %v4551_v39, %v10627_v15 }
 0xbfc   :  { %v5037_v1 = vadd.f32 %v5021_v0, %v10569_v29  ;;  %v3835_v29 = vmul.f32 1.0614054, %v10658_v30  ;;  %v3914_v44 = vadd.f32 -0.28449672, %v3898_v40  ;;  %v3995_v46 = vsub.f32 0.0, %v3979_v19  ;;  %v12124_v40 = vld [vmem:[#allocation54_spill] sm:$0xff] }
 0xbfd   :  { %v10660_v43 = vadd.f32 1.0, %v5230_v5  ;;  %6371 = vset.pattern.permute.xlu2 %v12032_v62  ;;  %12123 = vst [vmem:[#allocation49_spill] sm:$0xff] %v10679_v9  ;;  %v10687_v59 = vmul.f32 %v9796_v26, %v12124_v40  ;;  %v5002_v39 = vmul.f32 %v10539_v56, %v12125_v33  ;;  %v12128_v26 = vld [vmem:[#allocation40_spill] sm:$0xff]  ;;  %v12132_v33 = vld [vmem:[#allocation38_spill] sm:$0xff]  ;;  %v12134_v9 = vld [vmem:[#allocation67_spill] sm:$0xff] }
 0xbfe   :  { %v5150_v0 = vadd.f32 %v5134_v36, %v5037_v1  ;;  %4982 = vperm.xlu2 %6371, %v6912_v6   ;;  %v4846_v61 = vpop.permute.xlu2 %4845  ;;  %v3851_v8 = vadd.f32 -1.4531521, %v3835_v29  ;;  %v3930_v36 = vmul.f32 %v3914_v44, %v10601_v4  ;;  %v5006_v6 = vmul.f32 %v10539_v56, %v4955_v45  ;;  %v12127_v29 = vld [vmem:[#allocation53_spill] sm:$0xff]  ;;  %v10707_v44 = vld [vmem:[%s11800_s6 + $0x60] sm:$0xff] }
 0xbff   :  { %6773 = vrcp.f32 %v10660_v43  ;;  %v4894_v7 = vmul.f32 %v10486_v11, %v4846_v61  ;;  %v10698_v45 = vmul.f32 %v9897_v47, %v12127_v29  ;;  %v4026_v40 = vmul.f32 1.442695, %v3995_v46 }
 0xc00   :  { %6775 = vpow2.f32 %v4024_v63  ;;  %v4842_v22 = vpop.permute.xlu1 %4841  ;;  %v3867_v63 = vmul.f32 %v3851_v8, %v10658_v30  ;;  %v10694_v19 = vadd.f32 %v10587_v14, %v5150_v0  ;;  %v12130_v8 = vld [vmem:[#allocation68_spill] sm:$0xff]  ;;  %v5022_v29 = vmul.f32 %v5006_v6, %v12132_v33 }
 0xc01   :  { %v4910_v5 = vmul.f32 %v4894_v7, %v12072_v50  ;;  %v4893_v1 = vmul.f32 %v10486_v11, %v4842_v22  ;;  %v3946_v50 = vadd.f32 0.2548296, %v3930_v36  ;;  %v12129_v7 = vld [vmem:[#allocation56_spill] sm:$0xff]  ;;  %v4776_v22 = vmul.f32 %v10304_v32, %v12130_v8 }
 0xc02   :  { %12126 = vst [vmem:[#allocation35_spill] sm:$0xff] %v10694_v19  ;;  %v10712_v0 = vmul.f32 %v9897_v47, %v12129_v7  ;;  %v3883_v36 = vadd.f32 1.4214138, %v3867_v63  ;;  %v10725_v7 = vmul.f32 %v5002_v39, %v12110_v53  ;;  %v10729_v8 = vmul.f32 %v10034_v52, %v12134_v9 }
 0xc03   :  { %6374 = vset.pattern.permute.xlu1 %v12030_v3  ;;  %v10701_v61 = vadd.f32 %v4910_v5, %v10334_v51  ;;  %v4909_v20 = vmul.f32 %v4893_v1, %v12128_v26  ;;  %v10717_v51 = vmul.f32 0.70710677, %v10694_v19  ;;  %v3962_v1 = vmul.f32 %v3946_v50, %v10601_v4  ;;  %v12135_v4 = vld [vmem:[#allocation69_spill] sm:$0xff] }
 0xc04   :  { %4873 = vperm.xlu1 %6374, %v10707_v44   ;;  %12133 = vst [vmem:[#allocation26_spill] sm:$0xff] %v10725_v7  ;;  %v3899_v63 = vmul.f32 %v3883_v36, %v10658_v30  ;;  %v10737_v46 = vmul.f32 %v9897_v47, %v12135_v4  ;;  %v10744_v9 = vmul.f32 %v4776_v22, %v10627_v15  ;;  %6777 = vpow2.f32 %v4026_v40 }
 0xc05   :  { %12131 = vst [vmem:[#allocation23_spill] sm:$0xff] %v10717_v51  ;;  %v10719_v5 = vpop.eup %6773  ;;  %v4925_v26 = vadd.f32 %v4909_v20, %v10594_v37  ;;  %v10741_v39 = vand.u32 2147483647, %v10717_v51  ;;  %v4895_v50 = vmul.f32 %v10486_v11, %v10361_v58  ;;  %v5009_v47 = vmul.f32 %v10539_v56, %v10377_v48 }
 0xc06   :  { %v6776_v60 = vpop.eup %6775  ;;  %v5291_v19 = vmul.f32 %v10719_v5, %v10660_v43  ;;  %6373 = vset.pattern.permute.xlu2 %v12028_v34  ;;  %v3915_v20 = vadd.f32 -0.28449672, %v3899_v63  ;;  %vm5296_vm9 = vweird.f32 %v10719_v5  ;;  %v5299_v48 = vand.u32 2147483647, %v10660_v43  ;;  %v12136_v63 = vld [vmem:[#allocation43_spill] sm:$0xff] }
 0xc07   :  { %v4042_v37 = vmul.f32 %v6776_v60, %v3962_v1  ;;  %4760 = vperm.xlu2 %6373, %v10707_v44   ;;  %v5072_v53 = vpop.permute.xlu2 %5071  ;;  %v5038_v6 = vadd.f32 %v5022_v29, %v4925_v26  ;;  %v5301_v1 = vand.u32 2147483648, %v10660_v43  ;;  %vm5295_vm12 = vweird.f32 %v10660_v43 }
 0xc08   :  { %v5292_v36 = vsub.f32 1.0, %v5291_v19  ;;  %v3931_v29 = vmul.f32 %v3915_v20, %v10658_v30  ;;  %v5231_v19 = vmul.f32 0.3275911, %v10741_v39  ;;  %vm10774_vm13 = vmor %vm5295_vm12, %vm5296_vm9  ;;  %vm5300_vm15 = vcmp.eq.f32.partialorder %v5299_v48, 8.507059e+37 }
 0xc09   :  { %v4058_v33 = vsub.f32 1.0, %v4042_v37  ;;  %v5068_v60 = vpop.permute.xlu1 %5067  ;;  %v10763_v37 = vld [vmem:[%s11800_s6 + $0x68] sm:$0xff] }
 0xc0a   :  { %v5293_v26 = vmul.f32 %v10719_v5, %v5292_v36  ;;  %v5119_v22 = vmul.f32 %v10577_v2, %v5068_v60  ;;  %v3947_v40 = vadd.f32 0.2548296, %v3931_v29  ;;  %v10769_v36 = vmul.f32 %v4895_v50, %v12137_v13  ;;  %v6778_v50 = vpop.eup %6777 }
 0xc0b   :  { %v4090_v58 = vsub.f32 0.0, %v4058_v33  ;;  %v3514_v60 = vmul.f32 0.5, %v10537_v28  ;;  %v4677_v28 = vmul.f32 %v10034_v52, %v10382_v31  ;;  %v5123_v31 = vmul.f32 %v10577_v2, %v10426_v16 }
 0xc0c   :  { %6377 = vset.pattern.permute.xlu1 %v12028_v34  ;;  %v5135_v4 = vmul.f32 %v5119_v22, %v12136_v63  ;;  %v5294_v20 = vadd.f32 %v10719_v5, %v5293_v26  ;;  %v5302_v22 = vor.u32 1.1754944e-38, %v5301_v1  ;;  %v3963_v51 = vmul.f32 %v3947_v40, %v10658_v30  ;;  %v12140_v26 = vld [vmem:[#allocation58_spill] sm:$0xff] }
 0xc0d   :  { %4764 = vperm.xlu1 %6377, %v10763_v37   ;;  %v4106_v15 = vsel %vm4074_vm10, %v4090_v58, %v4058_v33  ;;  %v10783_v13 = vmul.f32 %v5009_v47, %v12140_v26  ;;  %v10788_v33 = vadd.f32 1.0, %v5231_v19  ;;  %v5120_v1 = vmul.f32 %v10577_v2, %v5072_v53 }
 0xc0e   :  { %v4122_v63 = vadd.f32 1.0, %v4106_v15  ;;  %v5151_v7 = vadd.f32 %v5135_v4, %v5038_v6  ;;  %v5298_v43 = vsel %vm10774_vm13, %v10719_v5, %v5294_v20  ;;  %v4043_v30 = vmul.f32 %v6778_v50, %v3963_v51 }
 0xc0f   :  { %12141 = vst [vmem:[#allocation48_spill] sm:$0xff] %v10783_v13  ;;  %6376 = vset.pattern.permute.xlu2 %v12025_v42  ;;  %v10798_v47 = vsel %vm5300_vm15, %v5302_v22, %v5298_v43  ;;  %v4434_v58 = vmul.f32 %v10674_v27, %v10467_v23  ;;  %6779 = vrcp.f32 %v10788_v33  ;;  %v12145_v20 = vrot.slane %v10467_v23, 7 }
 0xc10   :  { %v10790_v15 = vmul.f32 %v4122_v63, %v3514_v60  ;;  %v10793_v6 = vadd.f32 %v10587_v14, %v5151_v7  ;;  %5099 = vperm.xlu2 %6376, %v10707_v44   ;;  %v10796_v5 = vpop.permute.xlu2 %4962  ;;  %v4059_v51 = vsub.f32 1.0, %v4043_v30  ;;  %v5502_v4 = vmul.f32 1.0614054, %v10798_v47  ;;  %v12148_v63 = vld [vmem:[#allocation42_spill] sm:$0xff]  ;;  %v12150_v14 = vld [vmem:[#allocation65_spill] sm:$0xff] }
 0xc11   :  { %v12147_v29 = vrot.slane %v10467_v23, 1 }
 0xc12   :  { %12142 = vst [vmem:[#allocation54_spill] sm:$0xff] %v10790_v15  ;;  %v10807_v7 = vmul.f32 0.70710677, %v10793_v6  ;;  %v4466_v44 = vrot.slane %v10790_v15, 1  ;;  %v4959_v48 = vpop.permute.xlu1 %4958  ;;  %v4189_v19 = vrot.slane %v10790_v15, 7  ;;  %v4173_v16 = vmul.f32 %v9411_v35, %v10790_v15 }
 0xc13   :  { %12143 = vst [vmem:[#allocation61_spill] sm:$0xff] %v10793_v6  ;;  %v5007_v40 = vmul.f32 %v10539_v56, %v4959_v48  ;;  %v4091_v53 = vsub.f32 0.0, %v4059_v51  ;;  %v4870_v48 = vpop.permute.xlu0 %4869  ;;  %v5518_v55 = vadd.f32 -1.4531521, %v5502_v4 }
 0xc14   :  { %12144 = vst [vmem:[#allocation53_spill] sm:$0xff] %v10807_v7  ;;  %v10817_v27 = vand.u32 2147483647, %v10807_v7  ;;  %v10824_v60 = vsel %vm4193_vm14, %v12145_v20, %v4189_v19  ;;  %v10830_v22 = vsel %vm4468_vm6, %v12147_v29, %v4466_v44  ;;  %v4337_v30 = vadd.f32 %v10513_v57, %v4173_v16  ;;  %v12149_v29 = vld [vmem:[#allocation22_spill] sm:$0xff]  ;;  %v12151_v16 = vld [vmem:[#allocation64_spill] sm:$0xff] }
 0xc15   :  { %6379 = vset.pattern.permute.xlu1 %v12032_v62  ;;  %12146 = vst [vmem:[#allocation40_spill] sm:$0xff] %v10824_v60  ;;  %v5023_v43 = vmul.f32 %v5007_v40, %v12148_v63  ;;  %v4322_v50 = vmul.f32 %v10665_v49, %v10824_v60  ;;  %v4580_v26 = vmul.f32 %v10737_v46, %v10830_v22  ;;  %v3515_v20 = vmul.f32 0.5, %v10551_v24 }
 0xc16   :  { %4990 = vperm.xlu1 %6379, %v10763_v37   ;;  %v4107_v7 = vsel %vm4075_vm1, %v4091_v53, %v4059_v51  ;;  %v5136_v6 = vmul.f32 %v5120_v1, %v12149_v29  ;;  %v5232_v40 = vmul.f32 0.3275911, %v10817_v27  ;;  %v4450_v13 = vadd.f32 %v4434_v58, %v4337_v30  ;;  %v10856_v1 = vpop.eup %6779 }
 0xc17   :  { %v4123_v63 = vadd.f32 1.0, %v4107_v7  ;;  %v5039_v23 = vadd.f32 %v5023_v43, %v10701_v61  ;;  %v4693_v49 = vmul.f32 %v4677_v28, %v10824_v60  ;;  %v10847_v46 = vmul.f32 %v5123_v31, %v12150_v14 }
 0xc18   :  { %v4678_v57 = vmul.f32 %v10034_v52, %v10451_v25  ;;  %v10853_v24 = vmul.f32 %v10577_v2, %v10519_v54  ;;  %6378 = vset.pattern.permute.xlu2 %v12030_v3  ;;  %v10859_v61 = vmul.f32 %v10486_v11, %v4870_v48  ;;  %v4596_v52 = vadd.f32 %v4580_v26, %v4450_v13 }
 0xc19   :  { %v10861_v58 = vmul.f32 %v4123_v63, %v3515_v20  ;;  %v10863_v28 = vadd.f32 %v5136_v6, %v5039_v23  ;;  %4877 = vperm.xlu2 %6378, %v10763_v37   ;;  %v4741_v31 = vpop.permute.xlu2 %4740  ;;  %v10868_v25 = vmul.f32 %v10539_v56, %v10527_v41  ;;  %v10872_v54 = vmul.f32 %v10486_v11, %v10530_v21  ;;  %v12155_v63 = vld [vmem:[#allocation60_spill] sm:$0xff] }
 0xc1a   :  { %v4890_v51 = vmul.f32 %v10486_v11, %v10544_v12  ;;  %v4783_v7 = vmul.f32 %v10304_v32, %v4741_v31  ;;  %v10878_v6 = vadd.f32 1.0, %v5232_v40  ;;  %v4435_v21 = vmul.f32 %v10687_v59, %v10790_v15  ;;  %v12154_v59 = vld [vmem:[#allocation19_spill] sm:$0xff]  ;;  %v12161_v15 = vld [vmem:[#allocation14_spill] sm:$0xff] }
 0xc1b   :  { %v4190_v23 = vrot.slane %v10861_v58, 7  ;;  %v4467_v37 = vrot.slane %v10861_v58, 1  ;;  %v4174_v13 = vmul.f32 %v9411_v35, %v10861_v58  ;;  %v4737_v41 = vpop.permute.xlu1 %4736  ;;  %v5534_v12 = vmul.f32 %v5518_v55, %v10798_v47 }
 0xc1c   :  { %v4799_v4 = vmul.f32 %v4783_v7, %v12151_v16  ;;  %v4782_v53 = vmul.f32 %v10304_v32, %v4737_v41  ;;  %v12152_v43 = vrot.slane %v12105_v38, 7  ;;  %6781 = vrcp.f32 %v10878_v6  ;;  %v12157_v7 = vld [vmem:[#allocation31_spill] sm:$0xff] }
 0xc1d   :  { %v10896_v30 = vsel %vm4468_vm6, %v4466_v44, %v4467_v37  ;;  %v10900_v35 = vsel %vm4193_vm14, %v4189_v19, %v4190_v23  ;;  %v4338_v48 = vadd.f32 %v4322_v50, %v4174_v13  ;;  %v10913_v44 = vld [vmem:[%s11800_s6 + $0x70] sm:$0xff]  ;;  %v5306_v19 = vmul.f32 %v10856_v1, %v10788_v33 }
 0xc1e   :  { %v10892_v26 = vsel %vm4193_vm14, %v4190_v23, %v12152_v43  ;;  %6382 = vset.pattern.permute.xlu1 %v12030_v3  ;;  %v4581_v40 = vmul.f32 %v10698_v45, %v10896_v30  ;;  %v10908_v55 = vadd.f32 %v4799_v4, %v12155_v63  ;;  %v12156_v50 = vld [vmem:[#allocation32_spill] sm:$0xff]  ;;  %v4307_v45 = vmul.f32 %v12157_v7, %v10900_v35 }
 0xc1f   :  { %12153 = vst [vmem:[#allocation56_spill] sm:$0xff] %v10892_v26  ;;  %v4308_v20 = vmul.f32 %v12154_v59, %v10892_v26  ;;  %4881 = vperm.xlu1 %6382, %v10913_v44   ;;  %v4906_v31 = vmul.f32 %v4890_v51, %v12156_v50  ;;  %v4451_v23 = vadd.f32 %v4435_v21, %v4338_v48  ;;  %v12158_v13 = vld [vmem:[#allocation20_spill] sm:$0xff]  ;;  %v12159_v43 = vrot.slane %v12105_v38, 1 }
 0xc20   :  { %v4420_v4 = vmul.f32 %v10669_v18, %v10861_v58  ;;  %v5550_v63 = vadd.f32 1.4214138, %v5534_v12  ;;  %v4323_v51 = vadd.f32 %v4307_v45, %v12161_v15  ;;  %v4694_v60 = vmul.f32 %v4678_v57, %v10900_v35 }
 0xc21   :  { %v4324_v41 = vadd.f32 %v4308_v20, %v12158_v13  ;;  %v10929_v59 = vsel %vm4468_vm6, %v4467_v37, %v12159_v43  ;;  %v4597_v50 = vadd.f32 %v4581_v40, %v4451_v23  ;;  %v4798_v7 = vmul.f32 %v4782_v53, %v12149_v29  ;;  %6381 = vset.pattern.permute.xlu2 %v12028_v34  ;;  %v12163_v29 = vld [vmem:[#allocation44_spill] sm:$0xff]  ;;  %v12164_v53 = vld [vmem:[#allocation49_spill] sm:$0xff]  ;;  %v12165_v20 = vld [vmem:[#allocation34_spill] sm:$0xff] }
 0xc22   :  { %12160 = vst [vmem:[#allocation68_spill] sm:$0xff] %v10929_v59  ;;  %v5008_v18 = vmul.f32 %v10539_v56, %v10796_v5  ;;  %4768 = vperm.xlu2 %6381, %v10913_v44   ;;  %v10939_v17 = vpop.permute.xlu2 %5079  ;;  %v10941_v37 = vadd.f32 %v4693_v49, %v4596_v52  ;;  %v5307_v12 = vsub.f32 1.0, %v5306_v19  ;;  %v4436_v15 = vadd.f32 %v4420_v4, %v4323_v51  ;;  %v12166_v40 = vld [vmem:[#allocation47_spill] sm:$0xff]  ;;  %v10954_v52 = vpop.eup %6781 }
 0xc23   :  { %v4437_v21 = vadd.f32 %v10655_v10, %v4324_v41  ;;  %v4566_v57 = vmul.f32 %v10712_v0, %v10929_v59  ;;  %v10945_v48 = vadd.f32 %v4694_v60, %v4597_v50  ;;  %v4814_v34 = vadd.f32 %v4798_v7, %v12163_v29  ;;  %v12167_v41 = vld [vmem:[#allocation70_spill] sm:$0xff]  ;;  %v12168_v43 = vld [vmem:[#allocation51_spill] sm:$0xff] }
 0xc24   :  { %v5116_v5 = vmul.f32 %v10577_v2, %v12165_v20  ;;  %v5646_v45 = vmul.f32 %v12166_v40, %v12166_v40  ;;  %v5076_v23 = vpop.permute.xlu1 %5075  ;;  %v5308_v49 = vmul.f32 %v10856_v1, %v5307_v12  ;;  %v4679_v0 = vmul.f32 %v10729_v8, %v10892_v26  ;;  %v5829_v26 = vld [vmem:[%s11804_s7 + $0x48] sm:$0xff] }
 0xc25   :  { %12162 = vst [vmem:[#allocation38_spill] sm:$0xff] %v10945_v48  ;;  %v4583_v10 = vadd.f32 %v12164_v53, %v4437_v21  ;;  %v4582_v19 = vadd.f32 %v4566_v57, %v4436_v15  ;;  %v4927_v60 = vadd.f32 %v10769_v36, %v4814_v34  ;;  %v5566_v13 = vmul.f32 %v5550_v63, %v10798_v47  ;;  %v12169_v36 = vld [vmem:[#allocation74_spill] sm:$0xff]  ;;  %v12171_v34 = vld [vmem:[#allocation33_spill] sm:$0xff] }
 0xc26   :  { %v5024_v51 = vmul.f32 %v5008_v18, %v12168_v43  ;;  %v5121_v50 = vmul.f32 %v10577_v2, %v5076_v23  ;;  %vm5311_vm14 = vweird.f32 %v10856_v1  ;;  %v5309_v21 = vadd.f32 %v10856_v1, %v5308_v49  ;;  %v12170_v57 = vld [vmem:[#allocation30_spill] sm:$0xff] }
 0xc27   :  { %v4696_v4 = vadd.f32 %v12167_v41, %v4583_v10  ;;  %6384 = vset.pattern.permute.xlu1 %v12025_v42  ;;  %v4695_v7 = vadd.f32 %v4679_v0, %v4582_v19  ;;  %vm5310_vm6 = vweird.f32 %v10788_v33  ;;  %v5316_v8 = vand.u32 2147483648, %v10788_v33  ;;  %v5834_v19 = vld [vmem:[%s11804_s7 + $0x70] sm:$0xff]  ;;  %v12175_v41 = vld [vmem:[#allocation57_spill] sm:$0xff] }
 0xc28   :  { %5107 = vperm.xlu1 %6384, %v10913_v44   ;;  %v5040_v12 = vadd.f32 %v5024_v51, %v4927_v60  ;;  %v5137_v18 = vmul.f32 %v5121_v50, %v12151_v16  ;;  %v5314_v15 = vand.u32 2147483647, %v10788_v33  ;;  %v5019_v29 = vmul.f32 %v10868_v25, %v12170_v57  ;;  %vm10979_vm2 = vmor %vm5310_vm6, %vm5311_vm14  ;;  %v12177_v51 = vld [vmem:[#allocation26_spill] sm:$0xff] }
 0xc29   :  { %v4809_v63 = vadd.f32 %v12169_v36, %v4696_v4  ;;  %v4905_v53 = vmul.f32 %v10872_v54, %v12171_v34  ;;  %v4808_v10 = vadd.f32 %v10744_v9, %v4695_v7  ;;  %v5582_v20 = vadd.f32 -0.28449672, %v5566_v13  ;;  %v5832_v57 = vld [vmem:[%s11804_s7 + $0x60] sm:$0xff] }
 0xc2a   :  { %v5321_v16 = vmul.f32 %v10954_v52, %v10878_v6  ;;  %v5153_v33 = vadd.f32 %v5137_v18, %v5040_v12  ;;  %6383 = vset.pattern.permute.xlu2 %v12032_v62  ;;  %v5313_v25 = vsel %vm10979_vm2, %v10856_v1, %v5309_v21  ;;  %v5662_v54 = vsub.f32 0.0, %v5646_v45  ;;  %v12174_v1 = vld [vmem:[#allocation39_spill] sm:$0xff] }
 0xc2b   :  { %v4922_v23 = vadd.f32 %v4906_v31, %v4809_v63  ;;  %v4921_v9 = vadd.f32 %v4905_v53, %v4808_v10  ;;  %4994 = vperm.xlu2 %6383, %v10913_v44   ;;  %v10990_v49 = vpop.permute.xlu2 %4857  ;;  %v5835_v31 = vld [vmem:[%s11804_s7 + $0x78] sm:$0xff]  ;;  %v5317_v0 = vor.u32 1.1754944e-38, %v5316_v8  ;;  %v5647_v60 = vmul.f32 %v10741_v39, %v10741_v39  ;;  %v5833_v21 = vld [vmem:[%s11804_s7 + $0x68] sm:$0xff] }
 0xc2c   :  { %v5132_v45 = vmul.f32 %v5116_v5, %v12174_v1  ;;  %v11002_v4 = vadd.f32 %v12175_v41, %v5153_v33  ;;  %5837 = vmatpush.msra.mxu2 %v5835_v31  ;;  %vm5315_vm3 = vcmp.eq.f32.partialorder %v5314_v15, 8.507059e+37  ;;  %v12176_v44 = vld [vmem:[#allocation37_spill] sm:$0xff]  ;;  %v5598_v39 = vmul.f32 %v5582_v20, %v10798_v47  ;;  %v12178_v20 = vld [vmem:[#allocation59_spill] sm:$0xff] }
 0xc2d   :  { %v5035_v13 = vadd.f32 %v5019_v29, %v4922_v23  ;;  %v5131_v43 = vmul.f32 %v10853_v24, %v12176_v44  ;;  %v5034_v50 = vadd.f32 %v12177_v51, %v4921_v9  ;;  %v11011_v8 = vsel %vm5315_vm3, %v5317_v0, %v5313_v25  ;;  %v4987_v24 = vpop.permute.xlu0 %4986  ;;  %v12179_v23 = vld [vmem:[#allocation24_spill] sm:$0xff]  ;;  %v5831_v25 = vld [vmem:[%s11804_s7 + $0x58] sm:$0xff] }
 0xc2e   :  { %v4854_v7 = vpop.permute.xlu1 %4853  ;;  %v5322_v36 = vsub.f32 1.0, %v5321_v16  ;;  %v11014_v63 = vmul.f32 0.70710677, %v11002_v4  ;;  %5838 = vmatpush.msra.mxu2 %v5834_v19  ;;  %v5680_v18 = vmul.f32 1.442695, %v5662_v54  ;;  %v11019_v15 = vmul.f32 %v10817_v27, %v10817_v27  ;;  %v11035_v27 = vld [vmem:[%s11800_s6 + $0x78] sm:$0xff] }
 0xc2f   :  { %v5148_v5 = vadd.f32 %v5132_v45, %v5035_v13  ;;  %v4896_v12 = vmul.f32 %v10486_v11, %v4854_v7  ;;  %v5147_v29 = vadd.f32 %v5131_v43, %v5034_v50  ;;  %v5663_v34 = vsub.f32 0.0, %v5647_v60  ;;  %v5830_v60 = vld [vmem:[%s11804_s7 + $0x50] sm:$0xff] }
 0xc30   :  { %6387 = vset.pattern.permute.xlu1 %v12032_v62  ;;  %v11029_v10 = vand.u32 2147483647, %v11014_v63  ;;  %5839 = vmatpush.msra.mxu2 %v5833_v21  ;;  %v5503_v62 = vmul.f32 1.0614054, %v11011_v8  ;;  %v11041_v16 = vmul.f32 %v10859_v61, %v12179_v23  ;;  %v5122_v33 = vmul.f32 %v10577_v2, %v10939_v17  ;;  %v12180_v43 = vld [vmem:[#allocation48_spill] sm:$0xff] }
 0xc31   :  { %v11026_v53 = vadd.f32 %v12175_v41, %v5148_v5  ;;  %v4912_v40 = vmul.f32 %v4896_v12, %v12178_v20  ;;  %4998 = vperm.xlu1 %6387, %v11035_v27   ;;  %v11049_v54 = vadd.f32 %v12175_v41, %v5147_v29  ;;  %v5614_v9 = vadd.f32 0.2548296, %v5598_v39 }
 0xc32   :  { %v5014_v31 = vmul.f32 %v10539_v56, %v4987_v24  ;;  %v5323_v0 = vmul.f32 %v10954_v52, %v5322_v36  ;;  %5840 = vmatpush.msra.mxu2 %v5832_v57  ;;  %6783 = vpow2.f32 %v5680_v18  ;;  %v5664_v17 = vsub.f32 0.0, %v11019_v15 }
 0xc33   :  { %v11053_v19 = vmul.f32 0.70710677, %v11026_v53  ;;  %v4928_v61 = vadd.f32 %v4912_v40, %v10908_v55  ;;  %6386 = vset.pattern.permute.xlu2 %v12030_v3  ;;  %v11063_v13 = vmul.f32 0.70710677, %v11049_v54  ;;  %v5682_v1 = vmul.f32 1.442695, %v5663_v34 }
 0xc34   :  { %v5234_v44 = vmul.f32 0.3275911, %v11029_v10  ;;  %4885 = vperm.xlu2 %6386, %v11035_v27   ;;  %v4749_v51 = vpop.permute.xlu2 %4748  ;;  %5841 = vmatpush.msra.mxu2 %v5831_v25  ;;  %v5519_v50 = vadd.f32 -1.4531521, %v5503_v62  ;;  %v12181_v3 = vld [vmem:[#allocation62_spill] sm:$0xff]  ;;  %v5630_v5 = vmul.f32 %v5614_v9, %v10798_v47  ;;  %v4897_v12 = vmul.f32 %v10486_v11, %v10990_v49  ;;  %v12182_v62 = vld [vmem:[#allocation45_spill] sm:$0xff] }
 0xc35   :  { %v5213_v45 = vand.u32 2147483647, %v11053_v19  ;;  %v5041_v55 = vadd.f32 %v12180_v43, %v4928_v61  ;;  %v5138_v7 = vmul.f32 %v5122_v33, %v12181_v3  ;;  %v4785_v21 = vmul.f32 %v10304_v32, %v4749_v51  ;;  %v12183_v9 = vld [vmem:[#allocation63_spill] sm:$0xff]  ;;  %v12184_v43 = vld [vmem:[#allocation36_spill] sm:$0xff] }
 0xc36   :  { %v5212_v39 = vand.u32 2147483647, %v11063_v13  ;;  %5842 = vmatpush.msra.mxu2 %v5830_v60  ;;  %v5324_v18 = vadd.f32 %v10954_v52, %v5323_v0  ;;  %vm5325_vm4 = vweird.f32 %v10878_v6  ;;  %v11083_v47 = vadd.f32 1.0, %v5234_v44 }
 0xc37   :  { %v5229_v36 = vmul.f32 0.3275911, %v5213_v45  ;;  %v4745_v24 = vpop.permute.xlu1 %4744  ;;  %v11077_v15 = vadd.f32 %v5138_v7, %v5041_v55  ;;  %v4801_v57 = vmul.f32 %v4785_v21, %v12150_v14  ;;  %v5535_v40 = vmul.f32 %v5519_v50, %v11011_v8 }
 0xc38   :  { %v4784_v29 = vmul.f32 %v10304_v32, %v4745_v24  ;;  %v5228_v34 = vmul.f32 0.3275911, %v5212_v39  ;;  %vm5326_vm5 = vweird.f32 %v10954_v52  ;;  %v6784_v49 = vpop.eup %6783  ;;  %v5331_v14 = vand.u32 2147483648, %v10878_v6  ;;  %5843 = vmatpush.msra.mxu2 %v5829_v26  ;;  %v12193_v26 = vld [vmem:[#allocation46_spill] sm:$0xff] }
 0xc39   :  { %v11081_v20 = vadd.f32 1.0, %v5229_v36  ;;  %v11088_v23 = vadd.f32 %v4801_v57, %v12182_v62  ;;  %v4913_v0 = vmul.f32 %v4897_v12, %v12183_v9  ;;  %v11096_v61 = vmul.f32 %v6784_v49, %v5630_v5  ;;  %vm11107_vm11 = vmor %vm5325_vm4, %vm5326_vm5  ;;  %v12188_v5 = vld [vmem:[#allocation41_spill] sm:$0xff]  ;;  %v12189_v12 = vld [vmem:[#allocation35_spill] sm:$0xff] }
 0xc3a   :  { %v4800_v33 = vmul.f32 %v4784_v29, %v12181_v3  ;;  %v11091_v25 = vadd.f32 1.0, %v5228_v34  ;;  %v5329_v60 = vand.u32 2147483647, %v10878_v6  ;;  %v11099_v44 = vmul.f32 %v5213_v45, %v5213_v45  ;;  %v12187_v3 = vld [vmem:[#allocation76_spill] sm:$0xff] }
 0xc3b   :  { %6785 = vrcp.f32 %v11081_v20  ;;  %v11103_v51 = vmul.f32 %v5212_v39, %v5212_v39  ;;  %v11112_v7 = vmul.f32 %v5014_v31, %v12187_v3  ;;  %v5551_v45 = vadd.f32 1.4214138, %v5535_v40 }
 0xc3c   :  { %v4816_v55 = vadd.f32 %v4800_v33, %v12184_v43  ;;  %6787 = vrcp.f32 %v11091_v25  ;;  %6388 = vset.pattern.permute.xlu2 %v12025_v42  ;;  %v5328_v21 = vsel %vm11107_vm11, %v10954_v52, %v5324_v18  ;;  %v11121_v36 = vmul.f32 0.5, %v12188_v5 }
 0xc3d   :  { %6789 = vrcp.f32 %v11083_v47  ;;  %5111 = vperm.xlu2 %6388, %v11035_v27   ;;  %v4975_v39 = vpop.permute.xlu2 %4974  ;;  %v11124_v24 = vmul.f32 0.5, %v12189_v12  ;;  %v5332_v31 = vor.u32 1.1754944e-38, %v5331_v14  ;;  %v11126_v57 = vmul.f32 1.442695, %v5664_v17 }
 0xc3e   :  { %v4929_v6 = vadd.f32 %v4913_v0, %v4816_v55  ;;  %6791 = vpow2.f32 %v5682_v1  ;;  %vm5330_vm7 = vcmp.eq.f32.partialorder %v5329_v60, 8.507059e+37  ;;  %v11132_v52 = vmul.f32 %v11029_v10, %v11029_v10  ;;  %v5104_v0 = vpop.permute.xlu0 %5103  ;;  %v12190_v60 = vld [vmem:[#allocation21_spill] sm:$0xff] }
 0xc3f   :  { %v11135_v34 = vsel %vm5330_vm7, %v5332_v31, %v5328_v21  ;;  %v5567_v17 = vmul.f32 %v5551_v45, %v11011_v8  ;;  %v11142_v1 = vadd.f32 %v12175_v41, %v10863_v28  ;;  %vm5265_vm8 = vweird.f32 %v11091_v25 }
 0xc40   :  { %v4971_v27 = vpop.permute.xlu1 %4970  ;;  %v5504_v62 = vmul.f32 1.0614054, %v11135_v34  ;;  %v5269_v14 = vand.u32 2147483647, %v11091_v25  ;;  %vm5280_vm9 = vweird.f32 %v11081_v20  ;;  %v5271_v50 = vand.u32 2147483648, %v11091_v25 }
 0xc41   :  { %v6786_v40 = vpop.eup %6785  ;;  %v5010_v49 = vmul.f32 %v10539_v56, %v4971_v27  ;;  %v5284_v45 = vand.u32 2147483647, %v11081_v20  ;;  %v5286_v21 = vand.u32 2147483648, %v11081_v20  ;;  %v11156_v5 = vmul.f32 0.70710677, %v11142_v1 }
 0xc42   :  { %v6788_v33 = vpop.eup %6787  ;;  %v5276_v10 = vmul.f32 %v6786_v40, %v11081_v20  ;;  %v5520_v28 = vadd.f32 -1.4531521, %v5504_v62  ;;  %v5583_v42 = vadd.f32 -0.28449672, %v5567_v17  ;;  %vm5281_vm10 = vweird.f32 %v6786_v40  ;;  %v5828_v20 = vld [vmem:[%s11804_s7 + $0x40] sm:$0xff] }
 0xc43   :  { %v11148_v9 = vpop.eup %6789  ;;  %v5026_v43 = vmul.f32 %v5010_v49, %v12190_v60  ;;  %v5261_v55 = vmul.f32 %v6788_v33, %v11091_v25  ;;  %v11166_v62 = vand.u32 2147483647, %v11156_v5  ;;  %vm5266_vm12 = vweird.f32 %v6788_v33  ;;  %vm5282_vm13 = vmor %vm5280_vm9, %vm5281_vm10  ;;  %5844 = vmatpush.msra.mxu2 %v5828_v20 }
 0xc44   :  { %v5277_v3 = vsub.f32 1.0, %v5276_v10  ;;  %v11158_v12 = vpop.eup %6791  ;;  %v5536_v49 = vmul.f32 %v5520_v28, %v11135_v34  ;;  %v11163_v18 = vmul.f32 %v11148_v9, %v11083_v47  ;;  %v5011_v10 = vmul.f32 %v10539_v56, %v4975_v39  ;;  %vm5267_vm15 = vmor %vm5265_vm8, %vm5266_vm12 }
 0xc45   :  { %v5042_v31 = vadd.f32 %v5026_v43, %v4929_v6  ;;  %v5262_v27 = vsub.f32 1.0, %v5261_v55  ;;  %v5272_v43 = vor.u32 1.1754944e-38, %v5271_v50  ;;  %v5233_v28 = vmul.f32 0.3275911, %v11166_v62 }
 0xc46   :  { %v5278_v60 = vmul.f32 %v6786_v40, %v5277_v3  ;;  %v4866_v38 = vpop.permute.xlu2 %4865  ;;  %v5599_v39 = vmul.f32 %v5583_v42, %v11011_v8  ;;  %vm5285_vm1 = vcmp.eq.f32.partialorder %v5284_v45, 8.507059e+37  ;;  %vm5270_vm14 = vcmp.eq.f32.partialorder %v5269_v14, 8.507059e+37  ;;  %v4773_v45 = vpop.permute.xlu0 %4772 }
 0xc47   :  { %v11170_v29 = vadd.f32 %v10847_v46, %v5042_v31  ;;  %v5263_v6 = vmul.f32 %v6788_v33, %v5262_v27  ;;  %v4899_v17 = vmul.f32 %v10486_v11, %v4866_v38  ;;  %v5287_v46 = vor.u32 1.1754944e-38, %v5286_v21  ;;  %v12191_v27 = vld [vmem:[#allocation72_spill] sm:$0xff] }
 0xc48   :  { %v5279_v55 = vadd.f32 %v6786_v40, %v5278_v60  ;;  %v5552_v31 = vadd.f32 1.4214138, %v5536_v49  ;;  %v11190_v42 = vadd.f32 1.0, %v5233_v28  ;;  %v12192_v49 = vld [vmem:[#allocation79_spill] sm:$0xff]  ;;  %v5615_v14 = vadd.f32 0.2548296, %v5599_v39 }
 0xc49   :  { %v4862_v3 = vpop.permute.xlu1 %4861  ;;  %v5264_v48 = vadd.f32 %v6788_v33, %v5263_v6  ;;  %v4915_v59 = vmul.f32 %v4899_v17, %v12191_v27  ;;  %v5826_v27 = vld [vmem:[%s11804_s7 + $0x30] sm:$0xff]  ;;  %v5352_v39 = vsub.f32 1.0, %v11163_v18  ;;  %v5824_v18 = vld [vmem:[%s11804_s7 + $0x20] sm:$0xff]  ;;  %vm5355_vm6 = vweird.f32 %v11083_v47 }
 0xc4a   :  { %v4898_v38 = vmul.f32 %v10486_v11, %v4862_v3  ;;  %v5283_v50 = vsel %vm5282_vm13, %v6786_v40, %v5279_v55  ;;  %v5568_v55 = vmul.f32 %v5552_v31, %v11135_v34  ;;  %6793 = vrcp.f32 %v11190_v42  ;;  %v12195_v3 = vld [vmem:[#allocation25_spill] sm:$0xff] }
 0xc4b   :  { %v5268_v60 = vsel %vm5267_vm15, %v6788_v33, %v5264_v48  ;;  %v11188_v21 = vsel %vm5285_vm1, %v5287_v46, %v5283_v50  ;;  %v11193_v6 = vadd.f32 %v4915_v59, %v12192_v49  ;;  %v5827_v48 = vld [vmem:[%s11804_s7 + $0x38] sm:$0xff]  ;;  %v12194_v59 = vsub.f32 0.0, %v11099_v44  ;;  %v5825_v44 = vld [vmem:[%s11804_s7 + $0x28] sm:$0xff] }
 0xc4c   :  { %v4914_v17 = vmul.f32 %v4898_v38, %v12193_v26  ;;  %v11196_v25 = vsel %vm5270_vm14, %v5272_v43, %v5268_v60  ;;  %v5501_v40 = vmul.f32 1.0614054, %v11188_v21  ;;  %v5027_v43 = vmul.f32 %v5011_v10, %v12195_v3  ;;  %5845 = vmatpush.msra.mxu2 %v5827_v48 }
 0xc4d   :  { %v5500_v33 = vmul.f32 1.0614054, %v11196_v25  ;;  %v5678_v28 = vmul.f32 1.442695, %v12194_v59  ;;  %v11213_v50 = vmul.f32 %v10577_v2, %v5104_v0  ;;  %v12196_v10 = vsub.f32 0.0, %v11103_v51 }
 0xc4e   :  { %v4930_v46 = vadd.f32 %v4914_v17, %v11088_v23  ;;  %v5517_v38 = vadd.f32 -1.4531521, %v5501_v40  ;;  %6795 = vpow2.f32 %v11126_v57  ;;  %v11223_v23 = vmul.f32 %v10304_v32, %v4773_v45  ;;  %5846 = vmatpush.msra.mxu2 %v5826_v27  ;;  %v5823_v27 = vld [vmem:[%s11804_s7 + $0x18] sm:$0xff] }
 0xc4f   :  { %v5516_v31 = vadd.f32 -1.4531521, %v5500_v33  ;;  %v5676_v20 = vmul.f32 1.442695, %v12196_v10  ;;  %v5092_v60 = vpop.permute.xlu2 %5091  ;;  %v12198_v17 = vsub.f32 1.0, %v11096_v61  ;;  %v5631_v57 = vmul.f32 %v5615_v14, %v11011_v8 }
 0xc50   :  { %12197 = vst [vmem:[#allocation67_spill] sm:$0xff] %v11223_v23  ;;  %v5043_v49 = vadd.f32 %v5027_v43, %v4930_v46  ;;  %v5533_v0 = vmul.f32 %v5517_v38, %v11188_v21  ;;  %v5584_v40 = vadd.f32 -0.28449672, %v5568_v55  ;;  %6797 = vpow2.f32 %v5678_v28  ;;  %5847 = vmatpush.msra.mxu2 %v5825_v44  ;;  %v6794_v3 = vpop.eup %6793  ;;  %v12199_v28 = vld [vmem:[#allocation71_spill] sm:$0xff] }
 0xc51   :  { %v5532_v26 = vmul.f32 %v5516_v31, %v11196_v25  ;;  %v11232_v51 = vsub.f32 0.0, %v12198_v17  ;;  %v11237_v33 = vmul.f32 0.5, %v11049_v54  ;;  %v5353_v43 = vmul.f32 %v11148_v9, %v5352_v39  ;;  %v5821_v17 = vld [vmem:[%s11804_s7 + $0x8] sm:$0xff] }
 0xc52   :  { %v5088_v48 = vpop.permute.xlu1 %5087  ;;  %v5549_v59 = vadd.f32 1.4214138, %v5533_v0  ;;  %6799 = vpow2.f32 %v5676_v20  ;;  %5848 = vmatpush.msra.mxu2 %v5824_v18  ;;  %v5336_v55 = vmul.f32 %v6794_v3, %v11190_v42  ;;  %v5359_v54 = vand.u32 2147483647, %v11083_v47 }
 0xc53   :  { %v5124_v46 = vmul.f32 %v10577_v2, %v5088_v48  ;;  %v5548_v8 = vadd.f32 1.4214138, %v5532_v26  ;;  %v5822_v2 = vld [vmem:[%s11804_s7 + $0x10] sm:$0xff]  ;;  %v11254_v44 = vmul.f32 %v11158_v12, %v5631_v57  ;;  %v5600_v31 = vmul.f32 %v5584_v40, %v11135_v34 }
 0xc54   :  { %v5565_v14 = vmul.f32 %v5549_v59, %v11188_v21  ;;  %v11257_v10 = vpop.eup %6795  ;;  %5849 = vmatpush.msra.mxu2 %v5823_v27  ;;  %v5337_v0 = vsub.f32 1.0, %v5336_v55  ;;  %v5346_v18 = vand.u32 2147483648, %v11190_v42  ;;  %vm5356_vm2 = vweird.f32 %v11148_v9 }
 0xc55   :  { %v5140_v38 = vmul.f32 %v5124_v46, %v12199_v28  ;;  %v5564_v39 = vmul.f32 %v5548_v8, %v11196_v25  ;;  %v5344_v12 = vand.u32 2147483647, %v11190_v42  ;;  %v5354_v57 = vadd.f32 %v11148_v9, %v5353_v43  ;;  %vm11288_vm5 = vmor %vm5355_vm6, %vm5356_vm2 }
 0xc56   :  { %v5581_v20 = vadd.f32 -0.28449672, %v5565_v14  ;;  %v6798_v40 = vpop.eup %6797  ;;  %5850 = vmatpush.msra.mxu2 %v5822_v2  ;;  %v5338_v46 = vmul.f32 %v6794_v3, %v5337_v0  ;;  %vm5340_vm3 = vweird.f32 %v11190_v42  ;;  %vm5341_vm4 = vweird.f32 %v6794_v3  ;;  %v5820_v14 = vld [vmem:[%s11804_s7] sm:$0xff] }
 0xc57   :  { %v5156_v26 = vadd.f32 %v5140_v38, %v5043_v49  ;;  %v5580_v48 = vadd.f32 -0.28449672, %v5564_v39  ;;  %v5616_v55 = vadd.f32 0.2548296, %v5600_v31  ;;  %v5361_v28 = vand.u32 2147483648, %v11083_v47  ;;  %vm5342_vm11 = vmor %vm5340_vm3, %vm5341_vm4 }
 0xc58   :  { %v5597_v59 = vmul.f32 %v5581_v20, %v11188_v21  ;;  %v6800_v27 = vpop.eup %6799  ;;  %v11271_v8 = vpop.permute.xlu2 %4982  ;;  %v11281_v38 = vld [vmem:[%s11802_s5 + $0x8] ss:$0 sm:$0xff]  ;;  %5851 = vmatpush.msra.mxu2 %v5821_v17  ;;  %v5339_v20 = vadd.f32 %v6794_v3, %v5338_v46  ;;  %v5347_v0 = vor.u32 1.1754944e-38, %v5346_v18  ;;  %vm5345_vm7 = vcmp.eq.f32.partialorder %v5344_v12, 8.507059e+37  ;;  %v12204_v12 = vld [vmem:[#allocation50_spill] sm:$0xff] }
 0xc59   :  { %v11269_v49 = vadd.f32 %v12175_v41, %v5156_v26  ;;  %v5596_v43 = vmul.f32 %v5580_v48, %v11196_v25  ;;  %v5125_v2 = vmul.f32 %v11281_v38, %v5092_v60  ;;  %v5358_v60 = vsel %vm11288_vm5, %v11148_v9, %v5354_v57 }
 0xc5a   :  { %v5613_v39 = vadd.f32 0.2548296, %v5597_v59  ;;  %5852 = vmatpush.msra.mxu2 %v5820_v14  ;;  %vm5740_vm8 = vcmp.lt.f32.partialorder %v11063_v13, 0.0  ;;  %v5343_v17 = vsel %vm5342_vm11, %v6794_v3, %v5339_v20  ;;  %v5362_v59 = vor.u32 1.1754944e-38, %v5361_v28 }
 0xc5b   :  { %12200 = vst [vmem:[#allocation69_spill] sm:$0xff] %v11269_v49  ;;  %v11293_v31 = vmul.f32 0.70710677, %v11269_v49  ;;  %v4979_v48 = vpop.permute.xlu1 %4978  ;;  %v5612_v45 = vadd.f32 0.2548296, %v5596_v43  ;;  %v11305_v43 = vsel %vm5345_vm7, %v5347_v0, %v5343_v17  ;;  %vm5360_vm9 = vcmp.eq.f32.partialorder %v5359_v54, 8.507059e+37 }
 0xc5c   :  { %v5012_v47 = vmul.f32 %v10539_v56, %v4979_v48  ;;  %v5629_v18 = vmul.f32 %v5613_v39, %v11188_v21  ;;  %v11309_v42 = vadd.f32 %v12175_v41, %v11077_v15  ;;  %v5505_v14 = vmul.f32 1.0614054, %v11305_v43  ;;  %v12206_v0 = vld [vmem:[#allocation66_spill] sm:$0xff] }
 0xc5d   :  { %12203 = vst [vmem:[#allocation43_spill] sm:$0xff] %v11293_v31  ;;  %v5628_v46 = vmul.f32 %v5612_v45, %v11196_v25  ;;  %v11313_v26 = vsel %vm5360_vm9, %v5362_v59, %v5358_v60  ;;  %v5727_v21 = vsub.f32 1.0, %v11254_v44  ;;  %v5632_v3 = vmul.f32 %v5616_v55, %v11135_v34  ;;  %v12205_v45 = vld [vmem:[#allocation52_spill] sm:$0xff]  ;;  %v12209_v49 = vld [vmem:[#allocation78_spill] sm:$0xff] }
 0xc5e   :  { %v5028_v9 = vmul.f32 %v5012_v47, %v12204_v12  ;;  %v5709_v57 = vmul.f32 %v6798_v40, %v5629_v18  ;;  %v5506_v25 = vmul.f32 1.0614054, %v11313_v26  ;;  %v5141_v54 = vmul.f32 %v5125_v2, %v12205_v45  ;;  %v12207_v18 = vld [vmem:[#allocation23_spill] sm:$0xff] }
 0xc5f   :  { %v5708_v48 = vmul.f32 %v6800_v27, %v5628_v46  ;;  %v11320_v28 = vand.u32 2147483647, %v11293_v31  ;;  %v5521_v39 = vadd.f32 -1.4531521, %v5505_v14  ;;  %vm5741_vm10 = vcmp.lt.f32.partialorder %v11053_v19, 0.0 }
 0xc60   :  { %v5044_v15 = vadd.f32 %v5028_v9, %v11193_v6  ;;  %v5725_v20 = vsub.f32 1.0, %v5709_v57  ;;  %vm5742_vm12 = vcmp.lt.f32.partialorder %v12206_v0, 0.0  ;;  %v5522_v27 = vadd.f32 -1.4531521, %v5506_v25 }
 0xc61   :  { %v5724_v40 = vsub.f32 1.0, %v5708_v48  ;;  %v4761_v34 = vpop.permute.xlu2 %4760  ;;  %v5537_v55 = vmul.f32 %v5521_v39, %v11305_v43  ;;  %v5649_v2 = vmul.f32 %v11166_v62, %v11166_v62  ;;  %v11331_v60 = vmul.f32 0.70710677, %v11309_v42  ;;  %v12208_v62 = vld [vmem:[#allocation28_spill] sm:$0xff] }
 0xc62   :  { %v11325_v44 = vadd.f32 %v5141_v54, %v5044_v15  ;;  %v4788_v6 = vmul.f32 %v10304_v32, %v4761_v34  ;;  %vm5743_vm13 = vcmp.lt.f32.partialorder %v12207_v18, 0.0  ;;  %v5759_v17 = vsub.f32 0.0, %v5727_v21 }
 0xc63   :  { %v5756_v47 = vsub.f32 0.0, %v5724_v40  ;;  %v5712_v59 = vmul.f32 %v11257_v10, %v5632_v3  ;;  %v5237_v46 = vmul.f32 0.3275911, %v11320_v28  ;;  %v5553_v9 = vadd.f32 1.4214138, %v5537_v55 }
 0xc64   :  { %v4757_v12 = vpop.permute.xlu1 %4756  ;;  %v5538_v57 = vmul.f32 %v5522_v27, %v11313_v26  ;;  %v5219_v14 = vand.u32 2147483647, %v11331_v60  ;;  %v4804_v48 = vmul.f32 %v4788_v6, %v12208_v62  ;;  %v5757_v15 = vsub.f32 0.0, %v5725_v20 }
 0xc65   :  { %v4787_v25 = vmul.f32 %v10304_v32, %v4757_v12  ;;  %v5772_v54 = vsel %vm5740_vm8, %v5756_v47, %v5724_v40  ;;  %v5569_v34 = vmul.f32 %v5553_v9, %v11305_v43  ;;  %v5665_v10 = vsub.f32 0.0, %v5649_v2  ;;  %v12210_v12 = vld [vmem:[#allocation73_spill] sm:$0xff] }
 0xc66   :  { %v5788_v39 = vadd.f32 1.0, %v5772_v54  ;;  %v5554_v3 = vadd.f32 1.4214138, %v5538_v57  ;;  %v5013_v55 = vmul.f32 %v10539_v56, %v11271_v8  ;;  %v11347_v27 = vadd.f32 %v4804_v48, %v12209_v49  ;;  %v12212_v48 = vld [vmem:[#allocation75_spill] sm:$0xff] }
 0xc67   :  { %v4803_v31 = vmul.f32 %v4787_v25, %v12205_v45  ;;  %v5235_v6 = vmul.f32 0.3275911, %v5219_v14  ;;  %v11350_v23 = vadd.f32 1.0, %v5237_v46  ;;  %v5585_v40 = vadd.f32 -0.28449672, %v5569_v34 }
 0xc68   :  { %v5804_v13 = vmul.f32 %v5788_v39, %v11237_v33  ;;  %v5570_v47 = vmul.f32 %v5554_v3, %v11313_v26  ;;  %v5773_v2 = vsel %vm5741_vm10, %v5757_v15, %v5725_v20  ;;  %v5728_v57 = vsub.f32 1.0, %v5712_v59 }
 0xc69   :  { %v4819_v9 = vadd.f32 %v4803_v31, %v12210_v12  ;;  %v11357_v8 = vadd.f32 1.0, %v5235_v6  ;;  %v11361_v49 = vmul.f32 %v11213_v50, %v10896_v30  ;;  %v12211_v45 = vsub.f32 1.0, %v11096_v61 }
 0xc6a   :  { %5853 = vmatmul.f32.vlgmr.msra.gmra.mxu2 %v5804_v13  ;;  %v5601_v46 = vmul.f32 %v5585_v40, %v11305_v43  ;;  %v5686_v31 = vmul.f32 1.442695, %v5665_v10  ;;  %v5029_v19 = vmul.f32 %v5013_v55, %v12212_v48  ;;  %v11371_v59 = vpop.permute.xlu2 %5099  ;;  %v5586_v25 = vadd.f32 -0.28449672, %v5570_v47  ;;  %v12214_v55 = vld [vmem:[#allocation61_spill] sm:$0xff] }
 0xc6b   :  { %v5774_v33 = vsel %vm5742_vm12, %v11232_v51, %v12211_v45  ;;  %v4932_v20 = vadd.f32 %v11041_v16, %v4819_v9  ;;  %6801 = vrcp.f32 %v11357_v8  ;;  %v5789_v50 = vadd.f32 1.0, %v5773_v2 }
 0xc6c   :  { %6803 = vrcp.f32 %v11350_v23  ;;  %v5775_v61 = vsel %vm5743_vm13, %v5759_v17, %v5727_v21  ;;  %v11379_v51 = vadd.f32 %v12175_v41, %v11170_v29  ;;  %v12213_v0 = vsub.f32 0.0, %v11132_v52  ;;  %v12215_v17 = vld [vmem:[#allocation53_spill] sm:$0xff] }
 0xc6d   :  { %v5096_v15 = vpop.permute.xlu1 %5095  ;;  %v5045_v16 = vadd.f32 %v5029_v19, %v4932_v20  ;;  %v5790_v39 = vadd.f32 1.0, %v5774_v33  ;;  %v5760_v34 = vsub.f32 0.0, %v5728_v57  ;;  %v5181_v3 = vmul.f32 0.5, %v11026_v53 }
 0xc6e   :  { %v5688_v54 = vmul.f32 1.442695, %v12213_v0  ;;  %v5126_v10 = vmul.f32 %v11281_v38, %v5096_v15  ;;  %v11386_v6 = vmul.f32 0.5, %v12214_v55  ;;  %v5617_v18 = vadd.f32 0.2548296, %v5601_v46 }
 0xc6f   :  { %v5791_v21 = vadd.f32 1.0, %v5775_v61  ;;  %vm5744_vm15 = vcmp.lt.f32.partialorder %v12215_v17, 0.0  ;;  %6805 = vpow2.f32 %v5686_v31  ;;  %v5602_v29 = vmul.f32 %v5586_v25, %v11313_v26 }
 0xc70   :  { %v5142_v52 = vmul.f32 %v5126_v10, %v12208_v62  ;;  %v5805_v13 = vmul.f32 %v5789_v50, %v5181_v3  ;;  %v5651_v40 = vmul.f32 %v5219_v14, %v5219_v14  ;;  %v11392_v47 = vmul.f32 0.70710677, %v11379_v51 }
 0xc71   :  { %v6802_v12 = vpop.eup %6801  ;;  %6807 = vpow2.f32 %v5688_v54  ;;  %v5806_v53 = vmul.f32 %v5790_v39, %v11121_v36  ;;  %v5776_v9 = vsel %vm5744_vm15, %v5760_v34, %v5728_v57  ;;  %v11396_v2 = vmul.f32 0.5, %v11142_v1 }
 0xc72   :  { %v11398_v45 = vpop.eup %6803  ;;  %v5158_v33 = vadd.f32 %v5142_v52, %v5045_v16  ;;  %5856 = vmatmul.f32.gmra.mxu2 %v5805_v13  ;;  %v5633_v46 = vmul.f32 %v5617_v18, %v11305_v43  ;;  %v11402_v62 = vmul.f32 0.5, %v11002_v4  ;;  %v5366_v14 = vmul.f32 %v6802_v12, %v11357_v8  ;;  %v12216_v52 = vld [vmem:[#allocation77_spill] sm:$0xff] }
 0xc73   :  { %v5653_v31 = vmul.f32 %v11320_v28, %v11320_v28  ;;  %v11408_v36 = vmul.f32 %v5791_v21, %v11124_v24  ;;  %v5618_v57 = vadd.f32 0.2548296, %v5602_v29  ;;  %v5220_v1 = vand.u32 2147483647, %v11392_v47  ;;  %v4878_v19 = vpop.permute.xlu2 %4877 }
 0xc74   :  { %v11412_v48 = vadd.f32 %v12175_v41, %v5158_v33  ;;  %v5792_v20 = vadd.f32 1.0, %v5776_v9  ;;  %v5367_v43 = vsub.f32 1.0, %v5366_v14  ;;  %v5667_v25 = vsub.f32 0.0, %v5651_v40 }
 0xc75   :  { %v6806_v4 = vpop.eup %6805  ;;  %v5396_v50 = vmul.f32 %v11398_v45, %v11350_v23  ;;  %v5374_v61 = vand.u32 2147483647, %v11357_v8  ;;  %v5376_v28 = vand.u32 2147483648, %v11357_v8  ;;  %v5236_v24 = vmul.f32 0.3275911, %v5220_v1 }
 0xc76   :  { %v11419_v0 = vmul.f32 0.70710677, %v11412_v48  ;;  %v4874_v54 = vpop.permute.xlu1 %4873  ;;  %v11421_v15 = vmul.f32 %v6806_v4, %v5633_v46  ;;  %v5368_v16 = vmul.f32 %v6802_v12, %v5367_v43  ;;  %vm5371_vm1 = vweird.f32 %v6802_v12 }
 0xc77   :  { %v6808_v39 = vpop.eup %6807  ;;  %v5669_v34 = vsub.f32 0.0, %v5653_v31  ;;  %v4901_v10 = vmul.f32 %v10486_v11, %v4874_v54  ;;  %v5634_v3 = vmul.f32 %v5618_v57, %v11313_v26  ;;  %v11426_v55 = vmul.f32 0.5, %v11309_v42 }
 0xc78   :  { %v11429_v18 = vand.u32 2147483647, %v11419_v0  ;;  %v5369_v21 = vadd.f32 %v6802_v12, %v5368_v16  ;;  %vm5370_vm14 = vweird.f32 %v11357_v8  ;;  %v11432_v17 = vadd.f32 1.0, %v5236_v24 }
 0xc79   :  { %v5397_v29 = vsub.f32 1.0, %v5396_v50  ;;  %v4917_v13 = vmul.f32 %v4901_v10, %v12216_v52  ;;  %vm5372_vm6 = vmor %vm5370_vm14, %vm5371_vm1  ;;  %v5377_v40 = vor.u32 1.1754944e-38, %v5376_v28  ;;  %v5690_v9 = vmul.f32 1.442695, %v5667_v25  ;;  %v12219_v52 = vld [vmem:[#allocation40_spill] sm:$0xff] }
 0xc7a   :  { %v5239_v33 = vmul.f32 0.3275911, %v11429_v18  ;;  %5859 = vmatmul.f32.gmra.mxu2 %v5806_v53  ;;  %v5729_v42 = vsub.f32 1.0, %v11421_v15  ;;  %v5373_v26 = vsel %vm5372_vm6, %v6802_v12, %v5369_v21  ;;  %vm5375_vm2 = vcmp.eq.f32.partialorder %v5374_v61, 8.507059e+37 }
 0xc7b   :  { %v11438_v46 = vadd.f32 %v4917_v13, %v11347_v27  ;;  %v5714_v14 = vmul.f32 %v6808_v39, %v5634_v3  ;;  %v11440_v8 = vsel %vm5375_vm2, %v5377_v40, %v5373_v26  ;;  %6809 = vrcp.f32 %v11432_v17 }
 0xc7c   :  { %v11443_v31 = vmul.f32 1.442695, %v5669_v34  ;;  %v11446_v57 = vmul.f32 %v5792_v20, %v11386_v6  ;;  %v5507_v43 = vmul.f32 1.0614054, %v11440_v8  ;;  %v5404_v53 = vand.u32 2147483647, %v11350_v23  ;;  %v4769_v4 = vpop.permute.xlu2 %4768 }
 0xc7d   :  { %v5398_v12 = vmul.f32 %v11398_v45, %v5397_v29  ;;  %v11453_v27 = vmul.f32 %v11281_v38, %v11371_v59  ;;  %v11455_v25 = vadd.f32 1.0, %v5239_v33  ;;  %6811 = vpow2.f32 %v5690_v9  ;;  %v12220_v9 = vld [vmem:[#allocation80_spill] sm:$0xff] }
 0xc7e   :  { %v4790_v50 = vmul.f32 %v10304_v32, %v4769_v4  ;;  %vm5745_vm3 = vcmp.lt.f32.partialorder %v11156_v5, 0.0  ;;  %v5761_v6 = vsub.f32 0.0, %v5729_v42  ;;  %vm5746_vm4 = vcmp.lt.f32.partialorder %v11014_v63, 0.0 }
 0xc7f   :  { %v5523_v20 = vadd.f32 -1.4531521, %v5507_v43  ;;  %vm5400_vm5 = vweird.f32 %v11350_v23  ;;  %v4902_v61 = vmul.f32 %v10486_v11, %v4878_v19  ;;  %v4765_v28 = vpop.permute.xlu1 %4764  ;;  %v5730_v24 = vsub.f32 1.0, %v5714_v14 }
 0xc80   :  { %v11462_v59 = vmul.f32 %v5220_v1, %v5220_v1  ;;  %vm5401_vm11 = vweird.f32 %v11398_v45  ;;  %v4806_v54 = vmul.f32 %v4790_v50, %v10896_v30  ;;  %v4789_v15 = vmul.f32 %v10304_v32, %v4765_v28 }
 0xc81   :  { %v5539_v16 = vmul.f32 %v5523_v20, %v11440_v8  ;;  %vm11468_vm7 = vcmp.eq.f32.partialorder %v5404_v53, 8.507059e+37  ;;  %v6810_v34 = vpop.eup %6809  ;;  %6813 = vrcp.f32 %v11455_v25  ;;  %v5399_v19 = vadd.f32 %v11398_v45, %v5398_v12  ;;  %vm5402_vm8 = vmor %vm5400_vm5, %vm5401_vm11 }
 0xc82   :  { %v5406_v1 = vand.u32 2147483648, %v11350_v23  ;;  %v11477_v10 = vadd.f32 %v12175_v41, %v11325_v44  ;;  %v11480_v30 = vadd.f32 %v4806_v54, %v10941_v37  ;;  %5862 = vmatmul.f32.gmra.mxu2 %v11408_v36  ;;  %v4805_v32 = vmul.f32 %v4789_v15, %v10830_v22 }
 0xc83   :  { %v5555_v3 = vadd.f32 1.4214138, %v5539_v16  ;;  %v5381_v21 = vmul.f32 %v6810_v34, %v11432_v17  ;;  %v6812_v29 = vpop.eup %6811  ;;  %v4918_v13 = vmul.f32 %v4902_v61, %v12219_v52  ;;  %v5762_v44 = vsub.f32 0.0, %v5730_v24 }
 0xc84   :  { %v5403_v40 = vsel %vm5402_vm8, %v11398_v45, %v5399_v19  ;;  %v5407_v37 = vor.u32 1.1754944e-38, %v5406_v1  ;;  %v4821_v33 = vadd.f32 %v4805_v32, %v12220_v9  ;;  %v11494_v14 = vmul.f32 0.70710677, %v11477_v10 }
 0xc85   :  { %v5571_v36 = vmul.f32 %v5555_v3, %v11440_v8  ;;  %v5382_v26 = vsub.f32 1.0, %v5381_v21  ;;  %vm5386_vm9 = vweird.f32 %v6810_v34  ;;  %v5389_v43 = vand.u32 2147483647, %v11432_v17  ;;  %v12221_v3 = vld [vmem:[#allocation54_spill] sm:$0xff] }
 0xc86   :  { %v5391_v23 = vand.u32 2147483648, %v11432_v17  ;;  %v11500_v53 = vsel %vm11468_vm7, %v5407_v37, %v5403_v40  ;;  %v4934_v12 = vadd.f32 %v4918_v13, %v4821_v33  ;;  %v5777_v61 = vsel %vm5745_vm3, %v5761_v6, %v5729_v42 }
 0xc87   :  { %v5587_v45 = vadd.f32 -0.28449672, %v5571_v36  ;;  %v5383_v4 = vmul.f32 %v6810_v34, %v5382_v26  ;;  %v5509_v50 = vmul.f32 1.0614054, %v11500_v53  ;;  %v11503_v20 = vpop.eup %6813  ;;  %v5778_v28 = vsel %vm5746_vm4, %v5762_v44, %v5730_v24 }
 0xc88   :  { %v5668_v54 = vsub.f32 0.0, %v11462_v59  ;;  %v5222_v15 = vand.u32 2147483647, %v11494_v14  ;;  %v4991_v16 = vpop.permute.xlu1 %4990  ;;  %vm5385_vm10 = vweird.f32 %v11432_v17  ;;  %v5046_v32 = vadd.f32 %v11112_v7, %v11438_v46  ;;  %v4995_v46 = vpop.permute.xlu2 %4994 }
 0xc89   :  { %v5603_v39 = vmul.f32 %v5587_v45, %v11440_v8  ;;  %v5384_v19 = vadd.f32 %v6810_v34, %v5383_v4  ;;  %v5525_v1 = vadd.f32 -1.4531521, %v5509_v50  ;;  %v5015_v5 = vmul.f32 %v10539_v56, %v4991_v16  ;;  %vm5387_vm12 = vmor %vm5385_vm10, %vm5386_vm9 }
 0xc8a   :  { %v5392_v63 = vor.u32 1.1754944e-38, %v5391_v23  ;;  %v5238_v42 = vmul.f32 0.3275911, %v5222_v15  ;;  %5865 = vmatmul.f32.gmra.mxu2 %v11446_v57  ;;  %vm5390_vm13 = vcmp.eq.f32.partialorder %v5389_v43, 8.507059e+37  ;;  %v5426_v17 = vmul.f32 %v11503_v20, %v11455_v25 }
 0xc8b   :  { %v5619_v6 = vadd.f32 0.2548296, %v5603_v39  ;;  %v5388_v24 = vsel %vm5387_vm12, %v6810_v34, %v5384_v19  ;;  %v5541_v59 = vmul.f32 %v5525_v1, %v11500_v53  ;;  %v5031_v21 = vmul.f32 %v5015_v5, %v12221_v3 }
 0xc8c   :  { %v11522_v52 = vsel %vm5390_vm13, %v5392_v63, %v5388_v24  ;;  %v11524_v7 = vadd.f32 1.0, %v5238_v42  ;;  %v5793_v13 = vadd.f32 1.0, %v5777_v61  ;;  %v5143_v34 = vmul.f32 %v11453_v27, %v10830_v22 }
 0xc8d   :  { %v5635_v44 = vmul.f32 %v5619_v6, %v11440_v8  ;;  %v5508_v57 = vmul.f32 1.0614054, %v11522_v52  ;;  %v5557_v40 = vadd.f32 1.4214138, %v5541_v59  ;;  %v5047_v37 = vadd.f32 %v5031_v21, %v4934_v12 }
 0xc8e   :  { %v5794_v9 = vadd.f32 1.0, %v5778_v28  ;;  %6815 = vrcp.f32 %v11524_v7  ;;  %v5692_v26 = vmul.f32 1.442695, %v5668_v54  ;;  %v5427_v23 = vsub.f32 1.0, %v5426_v17 }
 0xc8f   :  { %v5715_v33 = vmul.f32 %v6812_v29, %v5635_v44  ;;  %v5524_v36 = vadd.f32 -1.4531521, %v5508_v57  ;;  %v5573_v43 = vmul.f32 %v5557_v40, %v11500_v53  ;;  %v5159_v45 = vadd.f32 %v5143_v34, %v5046_v32 }
 0xc90   :  { %v5016_v4 = vmul.f32 %v10539_v56, %v4995_v46  ;;  %v11534_v8 = vadd.f32 %v11361_v49, %v5047_v37  ;;  %v5809_v50 = vmul.f32 %v5793_v13, %v11396_v2  ;;  %6817 = vpow2.f32 %v11443_v31  ;;  %v4886_v24 = vpop.permute.xlu2 %4885 }
 0xc91   :  { %v5731_v61 = vsub.f32 1.0, %v5715_v33  ;;  %v5540_v22 = vmul.f32 %v5524_v36, %v11522_v52  ;;  %v5589_v27 = vadd.f32 -0.28449672, %v5573_v43  ;;  %v11541_v29 = vmul.f32 %v11429_v18, %v11429_v18  ;;  %v4882_v12 = vpop.permute.xlu1 %4881 }
 0xc92   :  { %v5810_v28 = vmul.f32 %v5794_v9, %v11402_v62  ;;  %vm5747_vm15 = vcmp.lt.f32.partialorder %v11331_v60, 0.0  ;;  %5868 = vmatmul.f32.gmra.mxu2 %v5809_v50  ;;  %v4903_v49 = vmul.f32 %v10486_v11, %v4882_v12  ;;  %6819 = vpow2.f32 %v5692_v26 }
 0xc93   :  { %v5556_v54 = vadd.f32 1.4214138, %v5540_v22  ;;  %v5419_v2 = vand.u32 2147483647, %v11524_v7  ;;  %v5428_v39 = vmul.f32 %v11503_v20, %v5427_v23  ;;  %v5032_v31 = vmul.f32 %v5016_v4, %v10861_v58 }
 0xc94   :  { %v6816_v16 = vpop.eup %6815  ;;  %v5605_v18 = vmul.f32 %v5589_v27, %v11500_v53  ;;  %v11551_v19 = vadd.f32 %v12175_v41, %v5159_v45  ;;  %v4919_v62 = vmul.f32 %v4903_v49, %v10900_v35  ;;  %v5763_v1 = vsub.f32 0.0, %v5731_v61 }
 0xc95   :  { %v5572_v32 = vmul.f32 %v5556_v54, %v11522_v52  ;;  %v11555_v5 = vmul.f32 %v5222_v15, %v5222_v15  ;;  %v5411_v42 = vmul.f32 %v6816_v16, %v11524_v7  ;;  %vm5415_vm1 = vweird.f32 %v11524_v7 }
 0xc96   :  { %v5621_v63 = vadd.f32 0.2548296, %v5605_v18  ;;  %v5421_v6 = vand.u32 2147483648, %v11524_v7  ;;  %vm11560_vm14 = vcmp.eq.f32.partialorder %v5419_v2, 8.507059e+37  ;;  %vm5430_vm6 = vweird.f32 %v11455_v25  ;;  %v6818_v59 = vpop.eup %6817 }
 0xc97   :  { %v5588_v58 = vadd.f32 -0.28449672, %v5572_v32  ;;  %v5434_v35 = vand.u32 2147483647, %v11455_v25  ;;  %v5412_v17 = vsub.f32 1.0, %v5411_v42  ;;  %v5436_v3 = vand.u32 2147483648, %v11455_v25 }
 0xc98   :  { %v5637_v15 = vmul.f32 %v5621_v63, %v11500_v53  ;;  %v11569_v21 = vmul.f32 0.70710677, %v11551_v19  ;;  %v6820_v46 = vpop.eup %6819  ;;  %v4935_v13 = vadd.f32 %v4919_v62, %v11480_v30  ;;  %v5779_v44 = vsel %vm5747_vm15, %v5763_v1, %v5731_v61  ;;  %v12224_v61 = vld [vmem:[#allocation68_spill] sm:$0xff] }
 0xc99   :  { %v5604_v57 = vmul.f32 %v5588_v58, %v11522_v52  ;;  %vm5431_vm2 = vweird.f32 %v11503_v20  ;;  %v5413_v34 = vmul.f32 %v6816_v16, %v5412_v17  ;;  %vm5416_vm3 = vweird.f32 %v6816_v16 }
 0xc9a   :  { %v5717_v40 = vmul.f32 %v6818_v59, %v5637_v15  ;;  %v11577_v53 = vand.u32 2147483647, %v11569_v21  ;;  %5871 = vmatmul.f32.gmra.mxu2 %v5810_v28  ;;  %v5108_v37 = vpop.permute.xlu1 %5107  ;;  %v5422_v33 = vor.u32 1.1754944e-38, %v5421_v6  ;;  %v5429_v36 = vadd.f32 %v11503_v20, %v5428_v39  ;;  %vm5432_vm5 = vmor %vm5430_vm6, %vm5431_vm2 }
 0xc9b   :  { %v5620_v9 = vadd.f32 0.2548296, %v5604_v57  ;;  %vm5435_vm4 = vcmp.eq.f32.partialorder %v5434_v35, 8.507059e+37  ;;  %v5129_v60 = vmul.f32 %v11281_v38, %v5108_v37  ;;  %v5795_v30 = vadd.f32 1.0, %v5779_v44  ;;  %vm5417_vm11 = vmor %vm5415_vm1, %vm5416_vm3  ;;  %v12227_v37 = vld [vmem:[#allocation38_spill] sm:$0xff] }
 0xc9c   :  { %v5414_v26 = vadd.f32 %v6816_v16, %v5413_v34  ;;  %v5437_v43 = vor.u32 1.1754944e-38, %v5436_v3  ;;  %v5048_v23 = vadd.f32 %v5032_v31, %v4935_v13  ;;  %v5433_v4 = vsel %vm5432_vm5, %v11503_v20, %v5429_v36 }
 0xc9d   :  { %v5636_v45 = vmul.f32 %v5620_v9, %v11522_v52  ;;  %v5240_v50 = vmul.f32 0.3275911, %v11577_v53  ;;  %v5145_v22 = vmul.f32 %v5129_v60, %v12224_v61  ;;  %v5733_v27 = vsub.f32 1.0, %v5717_v40 }
 0xc9e   :  { %v5418_v12 = vsel %vm5417_vm11, %v6816_v16, %v5414_v26  ;;  %v11590_v28 = vsel %vm5435_vm4, %v5437_v43, %v5433_v4  ;;  %v5671_v7 = vsub.f32 0.0, %v11541_v29  ;;  %v5670_v39 = vsub.f32 0.0, %v11555_v5  ;;  %v12225_v5 = vld [vmem:[#allocation67_spill] sm:$0xff] }
 0xc9f   :  { %v5716_v25 = vmul.f32 %v6820_v46, %v5636_v45  ;;  %v11594_v49 = vsel %vm11560_vm14, %v5422_v33, %v5418_v12  ;;  %v5511_v52 = vmul.f32 1.0614054, %v11590_v28  ;;  %v11597_v54 = vadd.f32 1.0, %v5240_v50  ;;  %v12226_v46 = vld [vmem:[#allocation43_spill] sm:$0xff] }
 0xca0   :  { %v5161_v20 = vadd.f32 %v5145_v22, %v5048_v23  ;;  %v5510_v2 = vmul.f32 1.0614054, %v11594_v49  ;;  %v5811_v16 = vmul.f32 %v5795_v30, %v11426_v55  ;;  %v5765_v63 = vsub.f32 0.0, %v5733_v27 }
 0xca1   :  { %v5732_v31 = vsub.f32 1.0, %v5716_v25  ;;  %v5527_v18 = vadd.f32 -1.4531521, %v5511_v52  ;;  %6821 = vrcp.f32 %v11597_v54  ;;  %v5698_v42 = vmul.f32 1.442695, %v5671_v7 }
 0xca2   :  { %v11605_v62 = vadd.f32 %v12175_v41, %v5161_v20  ;;  %v5526_v1 = vadd.f32 -1.4531521, %v5510_v2  ;;  %5874 = vmatmul.f32.gmra.mxu2 %v5811_v16  ;;  %vm5748_vm7 = vcmp.lt.f32.partialorder %v11392_v47, 0.0  ;;  %v4807_v58 = vmul.f32 %v12225_v5, %v12224_v61  ;;  %v12228_v2 = vld [vmem:[#allocation56_spill] sm:$0xff]  ;;  %v12229_v16 = vld [vmem:[#allocation69_spill] sm:$0xff] }
 0xca3   :  { %v5764_v32 = vsub.f32 0.0, %v5732_v31  ;;  %v5543_v29 = vmul.f32 %v5527_v18, %v11590_v28  ;;  %v5696_v59 = vmul.f32 1.442695, %v5670_v39  ;;  %vm5749_vm8 = vcmp.lt.f32.partialorder %v12226_v46, 0.0  ;;  %v4999_v30 = vpop.permute.xlu1 %4998 }
 0xca4   :  { %v11609_v6 = vmul.f32 0.70710677, %v11605_v62  ;;  %v5542_v55 = vmul.f32 %v5526_v1, %v11594_v49  ;;  %v5188_v57 = vmul.f32 0.5, %v11379_v51  ;;  %v5781_v47 = vsel %vm5749_vm8, %v5765_v63, %v5733_v27 }
 0xca5   :  { %v5780_v35 = vsel %vm5748_vm7, %v5764_v32, %v5732_v31  ;;  %v5559_v15 = vadd.f32 1.4214138, %v5543_v29  ;;  %v11623_v34 = vadd.f32 %v12175_v41, %v11534_v8  ;;  %v4823_v9 = vadd.f32 %v4807_v58, %v12227_v37 }
 0xca6   :  { %v11616_v17 = vand.u32 2147483647, %v11609_v6  ;;  %v5796_v3 = vadd.f32 1.0, %v5780_v35  ;;  %v5558_v13 = vadd.f32 1.4214138, %v5542_v55  ;;  %6823 = vpow2.f32 %v5698_v42  ;;  %v12230_v55 = vld [vmem:[#allocation27_spill] sm:$0xff] }
 0xca7   :  { %v6822_v44 = vpop.eup %6821  ;;  %v5575_v40 = vmul.f32 %v5559_v15, %v11590_v28  ;;  %v4904_v60 = vmul.f32 %v10486_v11, %v4886_v24  ;;  %v5797_v45 = vadd.f32 1.0, %v5781_v47  ;;  %6825 = vpow2.f32 %v5696_v59 }
 0xca8   :  { %v5242_v33 = vmul.f32 0.3275911, %v11616_v17  ;;  %v5574_v36 = vmul.f32 %v5558_v13, %v11594_v49  ;;  %v5812_v26 = vmul.f32 %v5796_v3, %v5188_v57  ;;  %v5441_v51 = vmul.f32 %v6822_v44, %v11597_v54 }
 0xca9   :  { %v5591_v43 = vadd.f32 -0.28449672, %v5575_v40  ;;  %v5449_v61 = vand.u32 2147483647, %v11597_v54  ;;  %v11635_v22 = vmul.f32 0.70710677, %v11623_v34  ;;  %v5017_v11 = vmul.f32 %v10539_v56, %v4999_v30  ;;  %v5112_v56 = vpop.permute.xlu2 %5111 }
 0xcaa   :  { %v11630_v23 = vadd.f32 1.0, %v5242_v33  ;;  %v5590_v4 = vadd.f32 -0.28449672, %v5574_v36  ;;  %5877 = vmatmul.f32.gmra.mxu2 %v5812_v26  ;;  %v5442_v50 = vsub.f32 1.0, %v5441_v51  ;;  %v5451_v12 = vand.u32 2147483648, %v11597_v54  ;;  %v12231_v36 = vld [vmem:[#allocation29_spill] sm:$0xff] }
 0xcab   :  { %v5607_v8 = vmul.f32 %v5591_v43, %v11590_v28  ;;  %vm5446_vm9 = vweird.f32 %v6822_v44  ;;  %v11642_v7 = vand.u32 2147483647, %v11635_v22  ;;  %v4920_v39 = vmul.f32 %v4904_v60, %v12228_v2 }
 0xcac   :  { %6827 = vrcp.f32 %v11630_v23  ;;  %v5606_v27 = vmul.f32 %v5590_v4, %v11594_v49  ;;  %v5443_v52 = vmul.f32 %v6822_v44, %v5442_v50  ;;  %v6824_v20 = vpop.eup %6823  ;;  %v5189_v31 = vmul.f32 0.5, %v12229_v16 }
 0xcad   :  { %v5623_v25 = vadd.f32 0.2548296, %v5607_v8  ;;  %v5656_v1 = vmul.f32 %v11577_v53, %v11577_v53  ;;  %vm5445_vm10 = vweird.f32 %v11597_v54  ;;  %v5241_v29 = vmul.f32 0.3275911, %v11642_v7  ;;  %v6826_v42 = vpop.eup %6825 }
 0xcae   :  { %v5622_v18 = vadd.f32 0.2548296, %v5606_v27  ;;  %v5444_v63 = vadd.f32 %v6822_v44, %v5443_v52  ;;  %v5033_v5 = vmul.f32 %v5017_v11, %v12230_v55  ;;  %v5813_v58 = vmul.f32 %v5797_v45, %v5189_v31  ;;  %vm5447_vm12 = vmor %vm5445_vm10, %vm5446_vm9 }
 0xcaf   :  { %v5639_v32 = vmul.f32 %v5623_v25, %v11590_v28  ;;  %v5452_v35 = vor.u32 1.1754944e-38, %v5451_v12  ;;  %vm5450_vm13 = vcmp.eq.f32.partialorder %v5449_v61, 8.507059e+37  ;;  %v5257_v53 = vadd.f32 1.0, %v5241_v29 }
 0xcb0   :  { %v5638_v24 = vmul.f32 %v5622_v18, %v11594_v49  ;;  %v5448_v15 = vsel %vm5447_vm12, %v6822_v44, %v5444_v63  ;;  %v4936_v28 = vadd.f32 %v4920_v39, %v4823_v9  ;;  %v5130_v54 = vmul.f32 %v11281_v38, %v5112_v56 }
 0xcb1   :  { %v5719_v59 = vmul.f32 %v6824_v20, %v5639_v32  ;;  %v5453_v13 = vsel %vm5450_vm13, %v5452_v35, %v5448_v15  ;;  %6829 = vrcp.f32 %v5257_v53  ;;  %v5672_v44 = vsub.f32 0.0, %v5656_v1 }
 0xcb2   :  { %v11654_v3 = vpop.eup %6827  ;;  %v5718_v46 = vmul.f32 %v6826_v42, %v5638_v24  ;;  %5880 = vmatmul.f32.gmra.mxu2 %v5813_v58  ;;  %v5512_v47 = vmul.f32 1.0614054, %v5453_v13  ;;  %v5049_v40 = vadd.f32 %v5033_v5, %v4936_v28  ;;  %v5146_v60 = vmul.f32 %v5130_v54, %v12231_v36 }
 0xcb3   :  { %v5735_v57 = vsub.f32 1.0, %v5719_v59  ;;  %v5471_v37 = vmul.f32 %v11654_v3, %v11630_v23  ;;  %vm5750_vm15 = vcmp.lt.f32.partialorder %v11494_v14, 0.0  ;;  %v5190_v43 = vmul.f32 0.5, %v11477_v10 }
 0xcb4   :  { %v5734_v49 = vsub.f32 1.0, %v5718_v46  ;;  %v5528_v33 = vadd.f32 -1.4531521, %v5512_v47  ;;  %v5162_v9 = vadd.f32 %v5146_v60, %v5049_v40  ;;  %vm5751_vm1 = vcmp.lt.f32.partialorder %v11419_v0, 0.0 }
 0xcb5   :  { %v5767_v26 = vsub.f32 0.0, %v5735_v57  ;;  %v5472_v4 = vsub.f32 1.0, %v5471_v37  ;;  %v5700_v61 = vmul.f32 1.442695, %v5672_v44  ;;  %v5191_v25 = vmul.f32 0.5, %v11412_v48 }
 0xcb6   :  { %v5766_v30 = vsub.f32 0.0, %v5734_v49  ;;  %v5544_v38 = vmul.f32 %v5528_v33, %v5453_v13  ;;  %v5464_v14 = vand.u32 2147483647, %v5257_v53  ;;  %v5466_v2 = vand.u32 2147483648, %v5257_v53 }
 0xcb7   :  { %v6830_v45 = vpop.eup %6829  ;;  %v5783_v11 = vsel %vm5751_vm1, %v5767_v26, %v5735_v57  ;;  %v11665_v39 = vadd.f32 %v12175_v41, %v5162_v9  ;;  %v5473_v10 = vmul.f32 %v11654_v3, %v5472_v4  ;;  %6831 = vpow2.f32 %v5700_v61 }
 0xcb8   :  { %v5782_v51 = vsel %vm5750_vm15, %v5766_v30, %v5734_v49  ;;  %v5560_v50 = vadd.f32 1.4214138, %v5544_v38  ;;  %v5456_v27 = vmul.f32 %v6830_v45, %v5257_v53  ;;  %v5799_v0 = vadd.f32 1.0, %v5783_v11 }
 0xcb9   :  { %v5798_v8 = vadd.f32 1.0, %v5782_v51  ;;  %vm5461_vm14 = vweird.f32 %v6830_v45  ;;  %v5481_v18 = vand.u32 2147483648, %v11630_v23  ;;  %v11670_v1 = vmul.f32 0.70710677, %v11665_v39 }
 0xcba   :  { %v5576_v52 = vmul.f32 %v5560_v50, %v5453_v13  ;;  %v5457_v20 = vsub.f32 1.0, %v5456_v27  ;;  %vm5460_vm6 = vweird.f32 %v5257_v53  ;;  %v5657_v56 = vmul.f32 %v11642_v7, %v11642_v7 }
 0xcbb   :  { %v5814_v12 = vmul.f32 %v5798_v8, %v5190_v43  ;;  %v5479_v41 = vand.u32 2147483647, %v11630_v23  ;;  %vm5465_vm2 = vcmp.eq.f32.partialorder %v5464_v14, 8.507059e+37  ;;  %v5467_v63 = vor.u32 1.1754944e-38, %v5466_v2  ;;  %vm5462_vm3 = vmor %vm5460_vm6, %vm5461_vm14 }
 0xcbc   :  { %v5592_v16 = vadd.f32 -0.28449672, %v5576_v52  ;;  %v5458_v31 = vmul.f32 %v6830_v45, %v5457_v20  ;;  %v11676_v29 = vand.u32 2147483647, %v11670_v1  ;;  %v5474_v55 = vadd.f32 %v11654_v3, %v5473_v10 }
 0xcbd   :  { %5883 = vmatmul.f32.gmra.mxu2 %v5814_v12  ;;  %vm5475_vm4 = vweird.f32 %v11630_v23  ;;  %vm5476_vm5 = vweird.f32 %v11654_v3  ;;  %v5815_v5 = vmul.f32 %v5799_v0, %v5191_v25  ;;  %v5482_v7 = vor.u32 1.1754944e-38, %v5481_v18  ;;  %v6832_v35 = vpop.eup %6831 }
 0xcbe   :  { %v5608_v48 = vmul.f32 %v5592_v16, %v5453_v13  ;;  %v5459_v32 = vadd.f32 %v6830_v45, %v5458_v31  ;;  %vm5477_vm11 = vmor %vm5475_vm4, %vm5476_vm5  ;;  %v5243_v24 = vmul.f32 0.3275911, %v11676_v29  ;;  %vm5480_vm7 = vcmp.eq.f32.partialorder %v5479_v41, 8.507059e+37 }
 0xcbf   :  { %v5478_v53 = vsel %vm5477_vm11, %v11654_v3, %v5474_v55  ;;  %v5658_v28 = vmul.f32 %v11616_v17, %v11616_v17  ;;  %v5673_v37 = vsub.f32 0.0, %v5657_v56  ;;  %vm5752_vm8 = vcmp.lt.f32.partialorder %v11569_v21, 0.0 }
 0xcc0   :  { %v5624_v42 = vadd.f32 0.2548296, %v5608_v48  ;;  %v5463_v58 = vsel %vm5462_vm3, %v6830_v45, %v5459_v32  ;;  %v5483_v46 = vsel %vm5480_vm7, %v5482_v7, %v5478_v53  ;;  %v5259_v23 = vadd.f32 1.0, %v5243_v24 }
 0xcc1   :  { %v5468_v15 = vsel %vm5465_vm2, %v5467_v63, %v5463_v58  ;;  %v5514_v47 = vmul.f32 1.0614054, %v5483_v46  ;;  %v5674_v44 = vsub.f32 0.0, %v5658_v28  ;;  %v5702_v17 = vmul.f32 1.442695, %v5673_v37 }
 0xcc2   :  { %v5640_v59 = vmul.f32 %v5624_v42, %v5453_v13  ;;  %v5513_v54 = vmul.f32 1.0614054, %v5468_v15  ;;  %6833 = vrcp.f32 %v5259_v23  ;;  %v5192_v43 = vmul.f32 0.5, %v11551_v19 }
 0xcc3   :  { %v5530_v33 = vadd.f32 -1.4531521, %v5514_v47  ;;  %v5704_v9 = vmul.f32 1.442695, %v5674_v44  ;;  %6835 = vpow2.f32 %v5702_v17  ;;  %v5496_v12 = vand.u32 2147483648, %v5259_v23 }
 0xcc4   :  { %v5720_v57 = vmul.f32 %v6832_v35, %v5640_v59  ;;  %v5529_v40 = vadd.f32 -1.4531521, %v5513_v54  ;;  %v5494_v20 = vand.u32 2147483647, %v5259_v23  ;;  %vm5490_vm10 = vweird.f32 %v5259_v23 }
 0xcc5   :  { %5886 = vmatmul.f32.gmra.mxu2 %v5815_v5  ;;  %v5546_v60 = vmul.f32 %v5530_v33, %v5483_v46  ;;  %6837 = vpow2.f32 %v5704_v9  ;;  %v5497_v0 = vor.u32 1.1754944e-38, %v5496_v12  ;;  %v5659_v32 = vmul.f32 %v11676_v29, %v11676_v29  ;;  %v12232_v9 = vld [vmem:[#allocation15_spill] sm:$0xff]  ;;  %v12235_v12 = vld [vmem:[#allocation16_spill] sm:$0xff] }
 0xcc6   :  { %v5736_v49 = vsub.f32 1.0, %v5720_v57  ;;  %v5545_v13 = vmul.f32 %v5529_v40, %v5468_v15  ;;  %vm5495_vm13 = vcmp.eq.f32.partialorder %v5494_v20, 8.507059e+37  ;;  %vm5753_vm15 = vcmp.lt.f32.partialorder %v11635_v22, 0.0 }
 0xcc7   :  { %v5562_v26 = vadd.f32 1.4214138, %v5546_v60  ;;  %v5675_v24 = vsub.f32 0.0, %v5659_v32  ;;  %v5193_v53 = vmul.f32 0.5, %v11623_v34  ;;  %vm5754_vm1 = vcmp.lt.f32.partialorder %v11609_v6, 0.0 }
 0xcc8   :  { %v5768_v36 = vsub.f32 0.0, %v5736_v49  ;;  %v5561_v3 = vadd.f32 1.4214138, %v5545_v13  ;;  %v6834_v38 = vpop.eup %6833  ;;  %v6918_v6 = vld [vmem:[%s11798_s3] sm:$0x3f]  ;;  %vm5755_vm14 = vcmp.lt.f32.partialorder %v11670_v1, 0.0 }
 0xcc9   :  { %v5578_v4 = vmul.f32 %v5562_v26, %v5483_v46  ;;  %v5486_v8 = vmul.f32 %v6834_v38, %v5259_v23  ;;  %vm5491_vm9 = vweird.f32 %v6834_v38  ;;  %v6836_v16 = vpop.eup %6835  ;;  %v5706_v29 = vmul.f32 1.442695, %v5675_v24  ;;  %v12233_v1 = vld [vmem:[#allocation5_spill] sm:$0xff] }
 0xcca   :  { %v5784_v30 = vsel %vm5752_vm8, %v5768_v36, %v5736_v49  ;;  %v5577_v45 = vmul.f32 %v5561_v3, %v5468_v15  ;;  %vm5492_vm12 = vmor %vm5490_vm10, %vm5491_vm9  ;;  %v5194_v49 = vmul.f32 0.5, %v11605_v62  ;;  %v11696_v60 = vperm.slane %v6918_v6, 5 }
 0xccb   :  { %v5800_v51 = vadd.f32 1.0, %v5784_v30  ;;  %v5594_v11 = vadd.f32 -0.28449672, %v5578_v4  ;;  %v5487_v27 = vsub.f32 1.0, %v5486_v8  ;;  %v6838_v48 = vpop.eup %6837  ;;  %6839 = vpow2.f32 %v5706_v29 }
 0xccc   :  { %v5593_v61 = vadd.f32 -0.28449672, %v5577_v45  ;;  %v5195_v26 = vmul.f32 0.5, %v11665_v39 }
 0xccd   :  { %v5816_v50 = vmul.f32 %v5800_v51, %v5192_v43  ;;  %v5610_v25 = vmul.f32 %v5594_v11, %v5483_v46  ;;  %v5488_v52 = vmul.f32 %v6834_v38, %v5487_v27 }
 0xcce   :  { %v5609_v21 = vmul.f32 %v5593_v61, %v5468_v15  ;;  %v12234_v61 = vld [vmem:[#allocation18_spill] sm:$0xff] }
 0xccf   :  { %5889 = vmatmul.f32.gmra.mxu2 %v5816_v50  ;;  %v5626_v2 = vadd.f32 0.2548296, %v5610_v25  ;;  %v5489_v19 = vadd.f32 %v6834_v38, %v5488_v52 }
 0xcd0   :  { %v5625_v14 = vadd.f32 0.2548296, %v5609_v21 }
 0xcd1   :  { %v5642_v31 = vmul.f32 %v5626_v2, %v5483_v46  ;;  %v5493_v18 = vsel %vm5492_vm12, %v6834_v38, %v5489_v19  ;;  %v6840_v13 = vpop.eup %6839 }
 0xcd2   :  { %v5641_v10 = vmul.f32 %v5625_v14, %v5468_v15  ;;  %v5498_v41 = vsel %vm5495_vm13, %v5497_v0, %v5493_v18  ;;  %v12236_v14 = vld [vmem:[#allocation7_spill] sm:$0xff] }
 0xcd3   :  { %v5722_v63 = vmul.f32 %v6838_v48, %v5642_v31  ;;  %v5515_v42 = vmul.f32 1.0614054, %v5498_v41  ;;  %v12237_v0 = vld [vmem:[#allocation3_spill] sm:$0xff]  ;;  %v12238_v48 = vld [vmem:[#allocation17_spill] sm:$0xff] }
 0xcd4   :  { %v5721_v56 = vmul.f32 %v6836_v16, %v5641_v10 }
 0xcd5   :  { %v5738_v5 = vsub.f32 1.0, %v5722_v63  ;;  %v5531_v58 = vadd.f32 -1.4531521, %v5515_v42  ;;  %v12239_v63 = vld [vmem:[#allocation9_spill] sm:$0xff] }
 0xcd6   :  { %v5737_v55 = vsub.f32 1.0, %v5721_v56 }
 0xcd7   :  { %v5770_v35 = vsub.f32 0.0, %v5738_v5  ;;  %v5547_v59 = vmul.f32 %v5531_v58, %v5498_v41  ;;  %v12240_v58 = vld [vmem:[#allocation4_spill] sm:$0xff] }
 0xcd8   :  { %v5769_v7 = vsub.f32 0.0, %v5737_v55 }
 0xcd9   :  { %v5563_v54 = vadd.f32 1.4214138, %v5547_v59  ;;  %v5786_v46 = vsel %vm5754_vm1, %v5770_v35, %v5738_v5  ;;  %v12241_v59 = vld [vmem:[#allocation6_spill] sm:$0xff] }
 0xcda   :  { %v5785_v15 = vsel %vm5753_vm15, %v5769_v7, %v5737_v55  ;;  %v5802_v47 = vadd.f32 1.0, %v5786_v46 }
 0xcdb   :  { %v5801_v28 = vadd.f32 1.0, %v5785_v15  ;;  %v5579_v57 = vmul.f32 %v5563_v54, %v5498_v41  ;;  %v12242_v54 = vld [vmem:[#allocation8_spill] sm:$0xff] }
 0xcdc   :  { %v5818_v37 = vmul.f32 %v5802_v47, %v5194_v49 }
 0xcdd   :  { %v5817_v23 = vmul.f32 %v5801_v28, %v5193_v53  ;;  %v5595_v40 = vadd.f32 -0.28449672, %v5579_v57  ;;  %v12243_v57 = vld [vmem:[#allocation10_spill] sm:$0xff] }
 0xcdf   :  { %5892 = vmatmul.f32.gmra.mxu2 %v5817_v23  ;;  %v5611_v22 = vmul.f32 %v5595_v40, %v5498_v41 }
 0xce1   :  { %v5627_v33 = vadd.f32 0.2548296, %v5611_v22  ;;  %v12244_v22 = vld [vmem:[#allocation2_spill] sm:$0xff] }
 0xce3   :  { %v5643_v44 = vmul.f32 %v5627_v33, %v5498_v41 }
 0xce5   :  { %v5723_v34 = vmul.f32 %v6840_v13, %v5643_v44  ;;  %v12245_v13 = vld [vmem:[#allocation11_spill] sm:$0xff] }
 0xce7   :  { %5895 = vmatmul.f32.gmra.mxu2 %v5818_v37  ;;  %v5739_v36 = vsub.f32 1.0, %v5723_v34 }
 0xce9   :  { %v5771_v3 = vsub.f32 0.0, %v5739_v36 }
 0xceb   :  { %v5787_v17 = vsel %vm5755_vm14, %v5771_v3, %v5739_v36  ;;  %v12246_v3 = vld [vmem:[#allocation12_spill] sm:$0xff] }
 0xcec   :  { %v5803_v38 = vadd.f32 1.0, %v5787_v17 }
 0xced   :  { %v5854_v30 = vpop.f32.mrf.mxu2 }
 0xcee   :  { %v5855_v62 = vadd.f32 %v5854_v30, %v11696_v60  ;;  %v5819_v51 = vmul.f32 %v5803_v38, %v5195_v26  ;;  %v12247_v26 = vld [vmem:[#allocation13_spill] sm:$0xff] }
 0xcf0   :  { %v5902_v43 = vadd.f32 %v5855_v62, %v12232_v9  ;;  %5898 = vmatmul.f32.gmra.mxu2 %v5819_v51 }
 0xcf2   :  { %5918 = vst.msk [vmem:[%s11805_s9] sm:$0xff] %vm50_vm0, %v5902_v43 }
 0xcf5   :  { %v5857_v45 = vpop.f32.mrf.mxu2 }
 0xcf6   :  { %v5858_v4 = vadd.f32 %v5857_v45, %v11696_v60 }
 0xcf8   :  { %v5903_v8 = vadd.f32 %v5858_v4, %v12233_v1 }
 0xcfa   :  { %5919 = vst.msk [vmem:[%s11805_s9 + $0x8] sm:$0xff] %vm50_vm0, %v5903_v8 }
 0xcfd   :  { %v5860_v39 = vpop.f32.mrf.mxu2 }
 0xcfe   :  { %v5861_v50 = vadd.f32 %v5860_v39, %v11696_v60 }
 0xd00   :  { %v5904_v11 = vadd.f32 %v5861_v50, %v12234_v61 }
 0xd02   :  { %5920 = vst.msk [vmem:[%s11805_s9 + $0x10] sm:$0xff] %vm50_vm0, %v5904_v11 }
 0xd05   :  { %v5863_v27 = vpop.f32.mrf.mxu2 }
 0xd06   :  { %v5864_v21 = vadd.f32 %v5863_v27, %v11696_v60 }
 0xd08   :  { %v5905_v25 = vadd.f32 %v5864_v21, %v12235_v12 }
 0xd0a   :  { %5921 = vst.msk [vmem:[%s11805_s9 + $0x18] sm:$0xff] %vm50_vm0, %v5905_v25 }
 0xd0d   :  { %v5866_v52 = vpop.f32.mrf.mxu2 }
 0xd0e   :  { %v5867_v20 = vadd.f32 %v5866_v52, %v11696_v60 }
 0xd10   :  { %v5906_v2 = vadd.f32 %v5867_v20, %v12236_v14 }
 0xd12   :  { %5922 = vst.msk [vmem:[%s11805_s9 + $0x20] sm:$0xff] %vm50_vm0, %v5906_v2 }
 0xd15   :  { %v5869_v19 = vpop.f32.mrf.mxu2 }
 0xd16   :  { %v5870_v10 = vadd.f32 %v5869_v19, %v11696_v60 }
 0xd18   :  { %v5907_v16 = vadd.f32 %v5870_v10, %v12237_v0 }
 0xd1a   :  { %5923 = vst.msk [vmem:[%s11805_s9 + $0x28] sm:$0xff] %vm50_vm0, %v5907_v16 }
 0xd1d   :  { %v5872_v31 = vpop.f32.mrf.mxu2 }
 0xd1e   :  { %v5873_v18 = vadd.f32 %v5872_v31, %v11696_v60 }
 0xd20   :  { %v5908_v56 = vadd.f32 %v5873_v18, %v12238_v48 }
 0xd22   :  { %5924 = vst.msk [vmem:[%s11805_s9 + $0x30] sm:$0xff] %vm50_vm0, %v5908_v56 }
 0xd25   :  { %v5875_v41 = vpop.f32.mrf.mxu2 }
 0xd26   :  { %v5876_v32 = vadd.f32 %v5875_v41, %v11696_v60 }
 0xd28   :  { %v5909_v42 = vadd.f32 %v5876_v32, %v12239_v63 }
 0xd2a   :  { %5925 = vst.msk [vmem:[%s11805_s9 + $0x38] sm:$0xff] %vm50_vm0, %v5909_v42 }
 0xd2d   :  { %v5878_v55 = vpop.f32.mrf.mxu2 }
 0xd2e   :  { %v5879_v5 = vadd.f32 %v5878_v55, %v11696_v60 }
 0xd30   :  { %v5910_v7 = vadd.f32 %v5879_v5, %v12240_v58 }
 0xd32   :  { %5926 = vst.msk [vmem:[%s11805_s9 + $0x40] sm:$0xff] %vm50_vm0, %v5910_v7 }
 0xd35   :  { %v5881_v24 = vpop.f32.mrf.mxu2 }
 0xd36   :  { %v5882_v35 = vadd.f32 %v5881_v24, %v11696_v60 }
 0xd38   :  { %v5911_v15 = vadd.f32 %v5882_v35, %v12241_v59 }
 0xd3a   :  { %5927 = vst.msk [vmem:[%s11805_s9 + $0x48] sm:$0xff] %vm50_vm0, %v5911_v15 }
 0xd40   :  { %v5884_v53 = vpop.f32.mrf.mxu2 }
 0xd41   :  { %v5885_v28 = vadd.f32 %v5884_v53, %v11696_v60 }
 0xd43   :  { %v5912_v46 = vadd.f32 %v5885_v28, %v12242_v54 }
 0xd45   :  { %5928 = vst.msk [vmem:[%s11805_s9 + $0x50] sm:$0xff] %vm50_vm0, %v5912_v46 }
 0xd48   :  { %v5887_v29 = vpop.f32.mrf.mxu2 }
 0xd49   :  { %v5888_v23 = vadd.f32 %v5887_v29, %v11696_v60 }
 0xd4b   :  { %v5913_v47 = vadd.f32 %v5888_v23, %v12243_v57 }
 0xd4d   :  { %5929 = vst.msk [vmem:[%s11805_s9 + $0x58] sm:$0xff] %vm50_vm0, %v5913_v47 }
 0xd52   :  { %v5890_v40 = vpop.f32.mrf.mxu2 }
 0xd53   :  { %v5891_v49 = vadd.f32 %v5890_v40, %v11696_v60 }
 0xd55   :  { %v5914_v37 = vadd.f32 %v5891_v49, %v12244_v22 }
 0xd57   :  { %5930 = vst.msk [vmem:[%s11805_s9 + $0x60] sm:$0xff] %vm50_vm0, %v5914_v37 }
 0xd62   :  { %v5893_v33 = vpop.f32.mrf.mxu2 }
 0xd63   :  { %v5894_v44 = vadd.f32 %v5893_v33, %v11696_v60 }
 0xd65   :  { %v5915_v34 = vadd.f32 %v5894_v44, %v12245_v13 }
 0xd67   :  { %5931 = vst.msk [vmem:[%s11805_s9 + $0x68] sm:$0xff] %vm50_vm0, %v5915_v34 }
 0xd6a   :  { %v5896_v36 = vpop.f32.mrf.mxu2 }
 0xd6b   :  { %v5897_v6 = vadd.f32 %v5896_v36, %v11696_v60 }
 0xd6d   :  { %v5916_v30 = vadd.f32 %v5897_v6, %v12246_v3 }
 0xd6f   :  { %5932 = vst.msk [vmem:[%s11805_s9 + $0x70] sm:$0xff] %vm50_vm0, %v5916_v30 }
 0xd73   :  { %v5899_v17 = vpop.f32.mrf.mxu2 }
 0xd74   :  { %v5900_v62 = vadd.f32 %v5899_v17, %v11696_v60 }
 0xd76   :  { %v5917_v38 = vadd.f32 %v5900_v62, %v12247_v26 }
 0xd78   :  { %5933 = vst.msk [vmem:[%s11805_s9 + $0x78] sm:$0xff] %vm50_vm0, %v5917_v38 }

</bundles_post_ra>
